<compile_context>
chip_gen: v6e
topology: v6e:2x2x1
jax: 0.10.0
libtpu: 0.0.40
codegen_flags: <defaults>
</compile_context>

<pallas_src>
import functools

import jax
import jax.numpy as jnp
import numpy as np
from jax.experimental import pallas as pl
from jax.experimental.pallas import tpu as pltpu

H0 = 128    # lstm0 hidden size
H1 = 32     # lstm1 hidden size
H1P = 128   # lstm1 hidden size padded to a full 128-lane group (vreg-aligned gates)

# Kernel gate order is [i, f, o, g]; PyTorch LSTMCell order is [i, f, g, o].
# _GATE_PERM[p] = original gate index occupying kernel gate-slot p.
_GATE_PERM = (0, 1, 3, 2)


def dlstm_kernel(
    x_ref,      # (T*B, I)          time-major flattened input
    wih0_ref,   # (I, 4*H0)         gate cols in [i,f,o,g] order
    whh0_ref,   # (H0, 4*H0)        gate cols in [i,f,o,g] order
    b0_ref,     # (1, 4*H0)
    w1_ref,     # (H0+H1P, 4*H1P)   fused [W_ih1 ; W_hh1], gate-padded to 128 lanes
    b1_ref,     # (1, 4*H1P)        gate-padded
    wlin_ref,   # (H1P, OUT)        rows >= H1 are zero
    blin_ref,   # (1, OUT)
    out_ref,    # (B, OUT)
    *, T, B,
):
    # ---- Preamble: hoisted layer-0 input projection for ALL timesteps at once.
    gx0 = (
        jnp.dot(x_ref[...], wih0_ref[...], preferred_element_type=jnp.float32)
        + b0_ref[...]
    )  # (T*B, 4*H0)

    whh0 = whh0_ref[...]
    w1 = w1_ref[...]
    b1 = b1_ref[...]

    h0 = jnp.zeros((B, H0), jnp.float32)
    c0 = jnp.zeros((B, H0), jnp.float32)
    h1 = jnp.zeros((B, H1P), jnp.float32)   # padded; columns >= H1 remain exactly 0
    c1 = jnp.zeros((B, H1P), jnp.float32)

    # Static unroll over time: T is small; one big basic block lets the LLO
    # scheduler overlap MXU/EUP/VPU work across layers and timesteps.
    for t in range(T):
        # ---- layer 0 (only the recurrent half; input half hoisted above) ----
        g0 = gx0[t * B:(t + 1) * B, :] + jnp.dot(
            h0, whh0, preferred_element_type=jnp.float32
        )
        s0 = jax.nn.sigmoid(g0[:, 0:3 * H0])          # [i | f | o] contiguous
        i0 = s0[:, 0 * H0:1 * H0]
        f0 = s0[:, 1 * H0:2 * H0]
        o0 = s0[:, 2 * H0:3 * H0]
        gg0 = jnp.tanh(g0[:, 3 * H0:4 * H0])           # g
        c0 = f0 * c0 + i0 * gg0
        h0 = o0 * jnp.tanh(c0)
        # dropout(p=0.4) -> identity (eval mode)

        # ---- layer 1: one fused dot on concat([h0, h1]); lane-aligned gates ----
        z = jnp.concatenate([h0, h1], axis=1)                          # (B, H0+H1P)
        g1 = jnp.dot(z, w1, preferred_element_type=jnp.float32) + b1   # (B, 4*H1P)
        s1 = jax.nn.sigmoid(g1[:, 0:3 * H1P])          # [i | f | o] contiguous
        i1 = s1[:, 0 * H1P:1 * H1P]
        f1 = s1[:, 1 * H1P:2 * H1P]
        o1 = s1[:, 2 * H1P:3 * H1P]
        gg1 = jnp.tanh(g1[:, 3 * H1P:4 * H1P])          # g
        # Padded lanes: weights/bias are zero -> pre-activation 0 -> sigmoid 0.5,
        # tanh 0, so c1_pad = 0.5*0 + 0.5*0 = 0 and h1_pad = 0.5*tanh(0) = 0.
        c1 = f1 * c1 + i1 * gg1
        h1 = o1 * jnp.tanh(c1)
        # dropout(p=0.4) -> identity (eval mode)

    # Final linear head on the last hidden state (padded wlin rows are zero,
    # so the padded h1 columns contribute nothing).  Once-only store.
    out_ref[...] = (
        jnp.dot(h1, wlin_ref[...], preferred_element_type=jnp.float32)
        + blin_ref[...]
    )


@jax.jit
def dlstm_forward(x, kparams):
    """x: [B, T, I] float32 (PyTorch convention).  Returns pred: [B, OUT]."""
    B, T, I = x.shape
    wih0, whh0, b0, w1f, b1p, wlinp, blin = kparams
    OUT = wlinp.shape[1]

    # Time-major, flattened so the hoisted projection is one (T*B, I) matmul.
    x_tm = jnp.transpose(x, (1, 0, 2)).reshape(T * B, I)

    kernel = functools.partial(dlstm_kernel, T=T, B=B)
    full2d = lambda i: (0, 0)

    return pl.pallas_call(
        kernel,
        out_shape=jax.ShapeDtypeStruct((B, OUT), jnp.float32),
        grid=(1,),                              # single invocation; loop is in-kernel
        in_specs=[
            pl.BlockSpec((T * B, I), full2d),
            pl.BlockSpec(wih0.shape, full2d),
            pl.BlockSpec(whh0.shape, full2d),
            pl.BlockSpec(b0.shape, full2d),
            pl.BlockSpec(w1f.shape, full2d),
            pl.BlockSpec(b1p.shape, full2d),
            pl.BlockSpec(wlinp.shape, full2d),
            pl.BlockSpec(blin.shape, full2d),
        ],
        out_specs=pl.BlockSpec((B, OUT), full2d),
        compiler_params=pltpu.CompilerParams(
            dimension_semantics=("arbitrary",),
        ),
    )(x_tm, wih0, whh0, b0, w1f, b1p, wlinp, blin)


# ----------------------------- parameter handling -----------------------------

def make_torch_params(key, input_size, output_size):
    """PyTorch-style (un-transposed) parameter shapes with uniform init."""
    ks = jax.random.split(key, 10)
    u = lambda k, shape, s: jax.random.uniform(k, shape, jnp.float32, -s, s)
    s0 = 1.0 / np.sqrt(H0)
    s1 = 1.0 / np.sqrt(H1)
    return dict(
        w_ih0=u(ks[0], (4 * H0, input_size), s0),
        w_hh0=u(ks[1], (4 * H0, H0), s0),
        b_ih0=u(ks[2], (4 * H0,), s0),
        b_hh0=u(ks[3], (4 * H0,), s0),
        w_ih1=u(ks[4], (4 * H1, H0), s1),
        w_hh1=u(ks[5], (4 * H1, H1), s1),
        b_ih1=u(ks[6], (4 * H1,), s1),
        b_hh1=u(ks[7], (4 * H1,), s1),
        w_lin=u(ks[8], (output_size, H1), s1),
        b_lin=u(ks[9], (output_size,), s1),
    )


def _reorder_gate_cols(w_t, hidden):
    """Columns of (in, 4*hidden) from torch order [i,f,g,o] -> kernel [i,f,o,g]."""
    groups = [w_t[:, g * hidden:(g + 1) * hidden] for g in _GATE_PERM]
    return np.concatenate(groups, axis=1)


def pack_kernel_params(tp):
    """Re-layout PyTorch-style weights for the kernel (transposed, fused, gate-padded,
    gate columns reordered to [i, f, o, g])."""
    w_ih0 = np.asarray(tp["w_ih0"])
    w_hh0 = np.asarray(tp["w_hh0"])
    b0 = np.asarray(tp["b_ih0"]) + np.asarray(tp["b_hh0"])
    w_ih1 = np.asarray(tp["w_ih1"])
    w_hh1 = np.asarray(tp["w_hh1"])
    b1 = np.asarray(tp["b_ih1"]) + np.asarray(tp["b_hh1"])
    w_lin = np.asarray(tp["w_lin"])
    b_lin = np.asarray(tp["b_lin"])
    out_size = w_lin.shape[0]

    wih0_t = _reorder_gate_cols(np.ascontiguousarray(w_ih0.T), H0)   # (I, 4*H0)
    whh0_t = _reorder_gate_cols(np.ascontiguousarray(w_hh0.T), H0)   # (H0, 4*H0)
    b0_k = _reorder_gate_cols(b0.reshape(1, 4 * H0), H0)             # (1, 4*H0)

    # Fused + gate-padded layer-1 weight.  Rows = [h0 (H0) ; h1_padded (H1P)],
    # kernel gate-slot p occupies its own 128-lane group: columns
    # [p*H1P, p*H1P + H1), holding the original gate _GATE_PERM[p].
    w1f = np.zeros((H0 + H1P, 4 * H1P), np.float32)
    b1p = np.zeros((1, 4 * H1P), np.float32)
    for p, g in enumerate(_GATE_PERM):
        w1f[:H0, p * H1P:p * H1P + H1] = w_ih1[g * H1:(g + 1) * H1, :].T
        w1f[H0:H0 + H1, p * H1P:p * H1P + H1] = w_hh1[g * H1:(g + 1) * H1, :].T
        b1p[0, p * H1P:p * H1P + H1] = b1[g * H1:(g + 1) * H1]

    wlinp = np.zeros((H1P, out_size), np.float32)   # padded rows are zero
    wlinp[:H1, :] = w_lin.T
    blin = b_lin.reshape(1, out_size)

    to_j = lambda a: jnp.asarray(a, jnp.float32)
    return tuple(to_j(a) for a in (wih0_t, whh0_t, b0_k, w1f, b1p, wlinp, blin))


# ------------------------------- pure-JAX reference ----------------------------

def reference_forward(x, tp):
    """Pure-JAX reference with identical semantics (dropout = identity)."""
    B, T, _ = x.shape

    def cell(xt, h, c, w_ih, w_hh, b_ih, b_hh, hidden):
        gates = xt @ w_ih.T + b_ih + h @ w_hh.T + b_hh
        i = jax.nn.sigmoid(gates[:, 0 * hidden:1 * hidden])
        f = jax.nn.sigmoid(gates[:, 1 * hidden:2 * hidden])
        g = jnp.tanh(gates[:, 2 * hidden:3 * hidden])
        o = jax.nn.sigmoid(gates[:, 3 * hidden:4 * hidden])
        c_new = f * c + i * g
        return o * jnp.tanh(c_new), c_new

    h0 = jnp.zeros((B, H0), jnp.float32)
    c0 = jnp.zeros((B, H0), jnp.float32)
    h1 = jnp.zeros((B, H1), jnp.float32)
    c1 = jnp.zeros((B, H1), jnp.float32)
    for t in range(T):
        h0, c0 = cell(x[:, t, :], h0, c0,
                      tp["w_ih0"], tp["w_hh0"], tp["b_ih0"], tp["b_hh0"], H0)
        h1, c1 = cell(h0, h1, c1,
                      tp["w_ih1"], tp["w_hh1"], tp["b_ih1"], tp["b_hh1"], H1)
    return h1 @ tp["w_lin"].T + tp["b_lin"]


if __name__ == "__main__":
    B, T, I, OUT = 8, 8, 16, 8  # batch, seq_len, input_size, output_size

    key = jax.random.PRNGKey(0)
    k_x, k_p = jax.random.split(key)
    x = jax.random.normal(k_x, (B, T, I), jnp.float32)

    torch_params = make_torch_params(k_p, I, OUT)
    kparams = pack_kernel_params(torch_params)

    pred = dlstm_forward(x, kparams)
    pred = jax.block_until_ready(pred)

    ref = reference_forward(x, torch_params)
    np.testing.assert_allclose(np.asarray(pred), np.asarray(ref),
                               rtol=1e-4, atol=1e-4)
    print("KERNEL_OK")
</pallas_src>

<mosaic_0001>
module attributes {stable_mosaic.version = 11 : i64} {
  func.func @dlstm_kernel(%arg0: i32, %arg1: memref<64x16xf32, #tpu.memory_space<vmem>>, %arg2: memref<16x512xf32, #tpu.memory_space<vmem>>, %arg3: memref<128x512xf32, #tpu.memory_space<vmem>>, %arg4: memref<1x512xf32, #tpu.memory_space<vmem>>, %arg5: memref<256x512xf32, #tpu.memory_space<vmem>>, %arg6: memref<1x512xf32, #tpu.memory_space<vmem>>, %arg7: memref<128x8xf32, #tpu.memory_space<vmem>>, %arg8: memref<1x8xf32, #tpu.memory_space<vmem>>, %arg9: memref<8x8xf32, #tpu.memory_space<vmem>>) attributes {dimension_semantics = [#tpu.dimension_semantics<arbitrary>], iteration_bounds = array<i64: 1>, scalar_prefetch = 0 : i64, scratch_operands = 0 : i64, tpu.core_type = #tpu.core_type<tc>, window_params = [{pipeline_mode = #tpu.pipeline_mode<synchronous>, transform_indices = @transform_0, window_bounds = array<i64: 64, 16>}, {pipeline_mode = #tpu.pipeline_mode<synchronous>, transform_indices = @transform_1, window_bounds = array<i64: 16, 512>}, {pipeline_mode = #tpu.pipeline_mode<synchronous>, transform_indices = @transform_2, window_bounds = array<i64: 128, 512>}, {pipeline_mode = #tpu.pipeline_mode<synchronous>, transform_indices = @transform_3, window_bounds = array<i64: 1, 512>}, {pipeline_mode = #tpu.pipeline_mode<synchronous>, transform_indices = @transform_4, window_bounds = array<i64: 256, 512>}, {pipeline_mode = #tpu.pipeline_mode<synchronous>, transform_indices = @transform_5, window_bounds = array<i64: 1, 512>}, {pipeline_mode = #tpu.pipeline_mode<synchronous>, transform_indices = @transform_6, window_bounds = array<i64: 128, 8>}, {pipeline_mode = #tpu.pipeline_mode<synchronous>, transform_indices = @transform_7, window_bounds = array<i64: 1, 8>}, {pipeline_mode = #tpu.pipeline_mode<synchronous>, transform_indices = @transform_8, window_bounds = array<i64: 8, 8>}]} {
    %c0 = arith.constant 0 : index
    %c0_0 = arith.constant 0 : index
    %0 = vector.load %arg1[%c0, %c0_0] : memref<64x16xf32, #tpu.memory_space<vmem>>, vector<64x16xf32>
    %c0_1 = arith.constant 0 : index
    %c0_2 = arith.constant 0 : index
    %1 = vector.load %arg2[%c0_1, %c0_2] : memref<16x512xf32, #tpu.memory_space<vmem>>, vector<16x512xf32>
    %cst = arith.constant dense<0.000000e+00> : vector<64x512xf32>
    %2 = tpu.matmul %0, %1, %cst {dimension_numbers = #tpu.dot_dimension_numbers<[1], [0], [0], [1], [0, 0, 1, 1], [], []>} : vector<64x16xf32>, vector<16x512xf32>, vector<64x512xf32> -> vector<64x512xf32>
    %c0_3 = arith.constant 0 : index
    %c0_4 = arith.constant 0 : index
    %3 = vector.load %arg4[%c0_3, %c0_4] : memref<1x512xf32, #tpu.memory_space<vmem>>, vector<1x512xf32>
    %4 = vector.broadcast %3 : vector<1x512xf32> to vector<64x512xf32>
    %5 = arith.addf %2, %4 : vector<64x512xf32>
    %c0_5 = arith.constant 0 : index
    %c0_6 = arith.constant 0 : index
    %6 = vector.load %arg3[%c0_5, %c0_6] : memref<128x512xf32, #tpu.memory_space<vmem>>, vector<128x512xf32>
    %c0_7 = arith.constant 0 : index
    %c0_8 = arith.constant 0 : index
    %7 = vector.load %arg5[%c0_7, %c0_8] : memref<256x512xf32, #tpu.memory_space<vmem>>, vector<256x512xf32>
    %c0_9 = arith.constant 0 : index
    %c0_10 = arith.constant 0 : index
    %8 = vector.load %arg6[%c0_9, %c0_10] : memref<1x512xf32, #tpu.memory_space<vmem>>, vector<1x512xf32>
    %cst_11 = arith.constant 0.000000e+00 : f32
    %9 = vector.broadcast %cst_11 : f32 to vector<8x128xf32>
    %cst_12 = arith.constant 0.000000e+00 : f32
    %10 = vector.broadcast %cst_12 : f32 to vector<8x128xf32>
    %cst_13 = arith.constant 0.000000e+00 : f32
    %11 = vector.broadcast %cst_13 : f32 to vector<8x128xf32>
    %cst_14 = arith.constant 0.000000e+00 : f32
    %12 = vector.broadcast %cst_14 : f32 to vector<8x128xf32>
    %13 = vector.extract_strided_slice %5 {offsets = [0, 0], sizes = [8, 512], strides = [1, 1]} : vector<64x512xf32> to vector<8x512xf32>
    %cst_15 = arith.constant dense<0.000000e+00> : vector<8x512xf32>
    %14 = tpu.matmul %9, %6, %cst_15 {dimension_numbers = #tpu.dot_dimension_numbers<[1], [0], [0], [1], [0, 0, 1, 1], [], []>} : vector<8x128xf32>, vector<128x512xf32>, vector<8x512xf32> -> vector<8x512xf32>
    %15 = arith.addf %13, %14 : vector<8x512xf32>
    %16 = vector.extract_strided_slice %15 {offsets = [0, 0], sizes = [8, 384], strides = [1, 1]} : vector<8x512xf32> to vector<8x384xf32>
    %17 = arith.negf %16 : vector<8x384xf32>
    %18 = math.exp %17 : vector<8x384xf32>
    %cst_16 = arith.constant 1.000000e+00 : f32
    %19 = vector.broadcast %cst_16 : f32 to vector<8x384xf32>
    %20 = arith.addf %19, %18 : vector<8x384xf32>
    %21 = arith.divf %19, %20 : vector<8x384xf32>
    %22 = vector.extract_strided_slice %21 {offsets = [0, 0], sizes = [8, 128], strides = [1, 1]} : vector<8x384xf32> to vector<8x128xf32>
    %23 = vector.extract_strided_slice %21 {offsets = [0, 128], sizes = [8, 128], strides = [1, 1]} : vector<8x384xf32> to vector<8x128xf32>
    %24 = vector.extract_strided_slice %21 {offsets = [0, 256], sizes = [8, 128], strides = [1, 1]} : vector<8x384xf32> to vector<8x128xf32>
    %25 = vector.extract_strided_slice %15 {offsets = [0, 384], sizes = [8, 128], strides = [1, 1]} : vector<8x512xf32> to vector<8x128xf32>
    %26 = math.tanh %25 : vector<8x128xf32>
    %27 = arith.mulf %23, %10 : vector<8x128xf32>
    %28 = arith.mulf %22, %26 : vector<8x128xf32>
    %29 = arith.addf %27, %28 : vector<8x128xf32>
    %30 = math.tanh %29 : vector<8x128xf32>
    %31 = arith.mulf %24, %30 : vector<8x128xf32>
    %32 = tpu.concatenate %31, %11 in 1 : vector<8x128xf32>, vector<8x128xf32> -> vector<8x256xf32>
    %cst_17 = arith.constant dense<0.000000e+00> : vector<8x512xf32>
    %33 = tpu.matmul %32, %7, %cst_17 {dimension_numbers = #tpu.dot_dimension_numbers<[1], [0], [0], [1], [0, 0, 1, 1], [], []>} : vector<8x256xf32>, vector<256x512xf32>, vector<8x512xf32> -> vector<8x512xf32>
    %34 = vector.broadcast %8 : vector<1x512xf32> to vector<8x512xf32>
    %35 = arith.addf %33, %34 : vector<8x512xf32>
    %36 = vector.extract_strided_slice %35 {offsets = [0, 0], sizes = [8, 384], strides = [1, 1]} : vector<8x512xf32> to vector<8x384xf32>
    %37 = arith.negf %36 : vector<8x384xf32>
    %38 = math.exp %37 : vector<8x384xf32>
    %cst_18 = arith.constant 1.000000e+00 : f32
    %39 = vector.broadcast %cst_18 : f32 to vector<8x384xf32>
    %40 = arith.addf %39, %38 : vector<8x384xf32>
    %41 = arith.divf %39, %40 : vector<8x384xf32>
    %42 = vector.extract_strided_slice %41 {offsets = [0, 0], sizes = [8, 128], strides = [1, 1]} : vector<8x384xf32> to vector<8x128xf32>
    %43 = vector.extract_strided_slice %41 {offsets = [0, 128], sizes = [8, 128], strides = [1, 1]} : vector<8x384xf32> to vector<8x128xf32>
    %44 = vector.extract_strided_slice %41 {offsets = [0, 256], sizes = [8, 128], strides = [1, 1]} : vector<8x384xf32> to vector<8x128xf32>
    %45 = vector.extract_strided_slice %35 {offsets = [0, 384], sizes = [8, 128], strides = [1, 1]} : vector<8x512xf32> to vector<8x128xf32>
    %46 = math.tanh %45 : vector<8x128xf32>
    %47 = arith.mulf %43, %12 : vector<8x128xf32>
    %48 = arith.mulf %42, %46 : vector<8x128xf32>
    %49 = arith.addf %47, %48 : vector<8x128xf32>
    %50 = math.tanh %49 : vector<8x128xf32>
    %51 = arith.mulf %44, %50 : vector<8x128xf32>
    %52 = vector.extract_strided_slice %5 {offsets = [8, 0], sizes = [8, 512], strides = [1, 1]} : vector<64x512xf32> to vector<8x512xf32>
    %cst_19 = arith.constant dense<0.000000e+00> : vector<8x512xf32>
    %53 = tpu.matmul %31, %6, %cst_19 {dimension_numbers = #tpu.dot_dimension_numbers<[1], [0], [0], [1], [0, 0, 1, 1], [], []>} : vector<8x128xf32>, vector<128x512xf32>, vector<8x512xf32> -> vector<8x512xf32>
    %54 = arith.addf %52, %53 : vector<8x512xf32>
    %55 = vector.extract_strided_slice %54 {offsets = [0, 0], sizes = [8, 384], strides = [1, 1]} : vector<8x512xf32> to vector<8x384xf32>
    %56 = arith.negf %55 : vector<8x384xf32>
    %57 = math.exp %56 : vector<8x384xf32>
    %cst_20 = arith.constant 1.000000e+00 : f32
    %58 = vector.broadcast %cst_20 : f32 to vector<8x384xf32>
    %59 = arith.addf %58, %57 : vector<8x384xf32>
    %60 = arith.divf %58, %59 : vector<8x384xf32>
    %61 = vector.extract_strided_slice %60 {offsets = [0, 0], sizes = [8, 128], strides = [1, 1]} : vector<8x384xf32> to vector<8x128xf32>
    %62 = vector.extract_strided_slice %60 {offsets = [0, 128], sizes = [8, 128], strides = [1, 1]} : vector<8x384xf32> to vector<8x128xf32>
    %63 = vector.extract_strided_slice %60 {offsets = [0, 256], sizes = [8, 128], strides = [1, 1]} : vector<8x384xf32> to vector<8x128xf32>
    %64 = vector.extract_strided_slice %54 {offsets = [0, 384], sizes = [8, 128], strides = [1, 1]} : vector<8x512xf32> to vector<8x128xf32>
    %65 = math.tanh %64 : vector<8x128xf32>
    %66 = arith.mulf %62, %29 : vector<8x128xf32>
    %67 = arith.mulf %61, %65 : vector<8x128xf32>
    %68 = arith.addf %66, %67 : vector<8x128xf32>
    %69 = math.tanh %68 : vector<8x128xf32>
    %70 = arith.mulf %63, %69 : vector<8x128xf32>
    %71 = tpu.concatenate %70, %51 in 1 : vector<8x128xf32>, vector<8x128xf32> -> vector<8x256xf32>
    %cst_21 = arith.constant dense<0.000000e+00> : vector<8x512xf32>
    %72 = tpu.matmul %71, %7, %cst_21 {dimension_numbers = #tpu.dot_dimension_numbers<[1], [0], [0], [1], [0, 0, 1, 1], [], []>} : vector<8x256xf32>, vector<256x512xf32>, vector<8x512xf32> -> vector<8x512xf32>
    %73 = vector.broadcast %8 : vector<1x512xf32> to vector<8x512xf32>
    %74 = arith.addf %72, %73 : vector<8x512xf32>
    %75 = vector.extract_strided_slice %74 {offsets = [0, 0], sizes = [8, 384], strides = [1, 1]} : vector<8x512xf32> to vector<8x384xf32>
    %76 = arith.negf %75 : vector<8x384xf32>
    %77 = math.exp %76 : vector<8x384xf32>
    %cst_22 = arith.constant 1.000000e+00 : f32
    %78 = vector.broadcast %cst_22 : f32 to vector<8x384xf32>
    %79 = arith.addf %78, %77 : vector<8x384xf32>
    %80 = arith.divf %78, %79 : vector<8x384xf32>
    %81 = vector.extract_strided_slice %80 {offsets = [0, 0], sizes = [8, 128], strides = [1, 1]} : vector<8x384xf32> to vector<8x128xf32>
    %82 = vector.extract_strided_slice %80 {offsets = [0, 128], sizes = [8, 128], strides = [1, 1]} : vector<8x384xf32> to vector<8x128xf32>
    %83 = vector.extract_strided_slice %80 {offsets = [0, 256], sizes = [8, 128], strides = [1, 1]} : vector<8x384xf32> to vector<8x128xf32>
    %84 = vector.extract_strided_slice %74 {offsets = [0, 384], sizes = [8, 128], strides = [1, 1]} : vector<8x512xf32> to vector<8x128xf32>
    %85 = math.tanh %84 : vector<8x128xf32>
    %86 = arith.mulf %82, %49 : vector<8x128xf32>
    %87 = arith.mulf %81, %85 : vector<8x128xf32>
    %88 = arith.addf %86, %87 : vector<8x128xf32>
    %89 = math.tanh %88 : vector<8x128xf32>
    %90 = arith.mulf %83, %89 : vector<8x128xf32>
    %91 = vector.extract_strided_slice %5 {offsets = [16, 0], sizes = [8, 512], strides = [1, 1]} : vector<64x512xf32> to vector<8x512xf32>
    %cst_23 = arith.constant dense<0.000000e+00> : vector<8x512xf32>
    %92 = tpu.matmul %70, %6, %cst_23 {dimension_numbers = #tpu.dot_dimension_numbers<[1], [0], [0], [1], [0, 0, 1, 1], [], []>} : vector<8x128xf32>, vector<128x512xf32>, vector<8x512xf32> -> vector<8x512xf32>
    %93 = arith.addf %91, %92 : vector<8x512xf32>
    %94 = vector.extract_strided_slice %93 {offsets = [0, 0], sizes = [8, 384], strides = [1, 1]} : vector<8x512xf32> to vector<8x384xf32>
    %95 = arith.negf %94 : vector<8x384xf32>
    %96 = math.exp %95 : vector<8x384xf32>
    %cst_24 = arith.constant 1.000000e+00 : f32
    %97 = vector.broadcast %cst_24 : f32 to vector<8x384xf32>
    %98 = arith.addf %97, %96 : vector<8x384xf32>
    %99 = arith.divf %97, %98 : vector<8x384xf32>
    %100 = vector.extract_strided_slice %99 {offsets = [0, 0], sizes = [8, 128], strides = [1, 1]} : vector<8x384xf32> to vector<8x128xf32>
    %101 = vector.extract_strided_slice %99 {offsets = [0, 128], sizes = [8, 128], strides = [1, 1]} : vector<8x384xf32> to vector<8x128xf32>
    %102 = vector.extract_strided_slice %99 {offsets = [0, 256], sizes = [8, 128], strides = [1, 1]} : vector<8x384xf32> to vector<8x128xf32>
    %103 = vector.extract_strided_slice %93 {offsets = [0, 384], sizes = [8, 128], strides = [1, 1]} : vector<8x512xf32> to vector<8x128xf32>
    %104 = math.tanh %103 : vector<8x128xf32>
    %105 = arith.mulf %101, %68 : vector<8x128xf32>
    %106 = arith.mulf %100, %104 : vector<8x128xf32>
    %107 = arith.addf %105, %106 : vector<8x128xf32>
    %108 = math.tanh %107 : vector<8x128xf32>
    %109 = arith.mulf %102, %108 : vector<8x128xf32>
    %110 = tpu.concatenate %109, %90 in 1 : vector<8x128xf32>, vector<8x128xf32> -> vector<8x256xf32>
    %cst_25 = arith.constant dense<0.000000e+00> : vector<8x512xf32>
    %111 = tpu.matmul %110, %7, %cst_25 {dimension_numbers = #tpu.dot_dimension_numbers<[1], [0], [0], [1], [0, 0, 1, 1], [], []>} : vector<8x256xf32>, vector<256x512xf32>, vector<8x512xf32> -> vector<8x512xf32>
    %112 = vector.broadcast %8 : vector<1x512xf32> to vector<8x512xf32>
    %113 = arith.addf %111, %112 : vector<8x512xf32>
    %114 = vector.extract_strided_slice %113 {offsets = [0, 0], sizes = [8, 384], strides = [1, 1]} : vector<8x512xf32> to vector<8x384xf32>
    %115 = arith.negf %114 : vector<8x384xf32>
    %116 = math.exp %115 : vector<8x384xf32>
    %cst_26 = arith.constant 1.000000e+00 : f32
    %117 = vector.broadcast %cst_26 : f32 to vector<8x384xf32>
    %118 = arith.addf %117, %116 : vector<8x384xf32>
    %119 = arith.divf %117, %118 : vector<8x384xf32>
    %120 = vector.extract_strided_slice %119 {offsets = [0, 0], sizes = [8, 128], strides = [1, 1]} : vector<8x384xf32> to vector<8x128xf32>
    %121 = vector.extract_strided_slice %119 {offsets = [0, 128], sizes = [8, 128], strides = [1, 1]} : vector<8x384xf32> to vector<8x128xf32>
    %122 = vector.extract_strided_slice %119 {offsets = [0, 256], sizes = [8, 128], strides = [1, 1]} : vector<8x384xf32> to vector<8x128xf32>
    %123 = vector.extract_strided_slice %113 {offsets = [0, 384], sizes = [8, 128], strides = [1, 1]} : vector<8x512xf32> to vector<8x128xf32>
    %124 = math.tanh %123 : vector<8x128xf32>
    %125 = arith.mulf %121, %88 : vector<8x128xf32>
    %126 = arith.mulf %120, %124 : vector<8x128xf32>
    %127 = arith.addf %125, %126 : vector<8x128xf32>
    %128 = math.tanh %127 : vector<8x128xf32>
    %129 = arith.mulf %122, %128 : vector<8x128xf32>
    %130 = vector.extract_strided_slice %5 {offsets = [24, 0], sizes = [8, 512], strides = [1, 1]} : vector<64x512xf32> to vector<8x512xf32>
    %cst_27 = arith.constant dense<0.000000e+00> : vector<8x512xf32>
    %131 = tpu.matmul %109, %6, %cst_27 {dimension_numbers = #tpu.dot_dimension_numbers<[1], [0], [0], [1], [0, 0, 1, 1], [], []>} : vector<8x128xf32>, vector<128x512xf32>, vector<8x512xf32> -> vector<8x512xf32>
    %132 = arith.addf %130, %131 : vector<8x512xf32>
    %133 = vector.extract_strided_slice %132 {offsets = [0, 0], sizes = [8, 384], strides = [1, 1]} : vector<8x512xf32> to vector<8x384xf32>
    %134 = arith.negf %133 : vector<8x384xf32>
    %135 = math.exp %134 : vector<8x384xf32>
    %cst_28 = arith.constant 1.000000e+00 : f32
    %136 = vector.broadcast %cst_28 : f32 to vector<8x384xf32>
    %137 = arith.addf %136, %135 : vector<8x384xf32>
    %138 = arith.divf %136, %137 : vector<8x384xf32>
    %139 = vector.extract_strided_slice %138 {offsets = [0, 0], sizes = [8, 128], strides = [1, 1]} : vector<8x384xf32> to vector<8x128xf32>
    %140 = vector.extract_strided_slice %138 {offsets = [0, 128], sizes = [8, 128], strides = [1, 1]} : vector<8x384xf32> to vector<8x128xf32>
    %141 = vector.extract_strided_slice %138 {offsets = [0, 256], sizes = [8, 128], strides = [1, 1]} : vector<8x384xf32> to vector<8x128xf32>
    %142 = vector.extract_strided_slice %132 {offsets = [0, 384], sizes = [8, 128], strides = [1, 1]} : vector<8x512xf32> to vector<8x128xf32>
    %143 = math.tanh %142 : vector<8x128xf32>
    %144 = arith.mulf %140, %107 : vector<8x128xf32>
    %145 = arith.mulf %139, %143 : vector<8x128xf32>
    %146 = arith.addf %144, %145 : vector<8x128xf32>
    %147 = math.tanh %146 : vector<8x128xf32>
    %148 = arith.mulf %141, %147 : vector<8x128xf32>
    %149 = tpu.concatenate %148, %129 in 1 : vector<8x128xf32>, vector<8x128xf32> -> vector<8x256xf32>
    %cst_29 = arith.constant dense<0.000000e+00> : vector<8x512xf32>
    %150 = tpu.matmul %149, %7, %cst_29 {dimension_numbers = #tpu.dot_dimension_numbers<[1], [0], [0], [1], [0, 0, 1, 1], [], []>} : vector<8x256xf32>, vector<256x512xf32>, vector<8x512xf32> -> vector<8x512xf32>
    %151 = vector.broadcast %8 : vector<1x512xf32> to vector<8x512xf32>
    %152 = arith.addf %150, %151 : vector<8x512xf32>
    %153 = vector.extract_strided_slice %152 {offsets = [0, 0], sizes = [8, 384], strides = [1, 1]} : vector<8x512xf32> to vector<8x384xf32>
    %154 = arith.negf %153 : vector<8x384xf32>
    %155 = math.exp %154 : vector<8x384xf32>
    %cst_30 = arith.constant 1.000000e+00 : f32
    %156 = vector.broadcast %cst_30 : f32 to vector<8x384xf32>
    %157 = arith.addf %156, %155 : vector<8x384xf32>
    %158 = arith.divf %156, %157 : vector<8x384xf32>
    %159 = vector.extract_strided_slice %158 {offsets = [0, 0], sizes = [8, 128], strides = [1, 1]} : vector<8x384xf32> to vector<8x128xf32>
    %160 = vector.extract_strided_slice %158 {offsets = [0, 128], sizes = [8, 128], strides = [1, 1]} : vector<8x384xf32> to vector<8x128xf32>
    %161 = vector.extract_strided_slice %158 {offsets = [0, 256], sizes = [8, 128], strides = [1, 1]} : vector<8x384xf32> to vector<8x128xf32>
    %162 = vector.extract_strided_slice %152 {offsets = [0, 384], sizes = [8, 128], strides = [1, 1]} : vector<8x512xf32> to vector<8x128xf32>
    %163 = math.tanh %162 : vector<8x128xf32>
    %164 = arith.mulf %160, %127 : vector<8x128xf32>
    %165 = arith.mulf %159, %163 : vector<8x128xf32>
    %166 = arith.addf %164, %165 : vector<8x128xf32>
    %167 = math.tanh %166 : vector<8x128xf32>
    %168 = arith.mulf %161, %167 : vector<8x128xf32>
    %169 = vector.extract_strided_slice %5 {offsets = [32, 0], sizes = [8, 512], strides = [1, 1]} : vector<64x512xf32> to vector<8x512xf32>
    %cst_31 = arith.constant dense<0.000000e+00> : vector<8x512xf32>
    %170 = tpu.matmul %148, %6, %cst_31 {dimension_numbers = #tpu.dot_dimension_numbers<[1], [0], [0], [1], [0, 0, 1, 1], [], []>} : vector<8x128xf32>, vector<128x512xf32>, vector<8x512xf32> -> vector<8x512xf32>
    %171 = arith.addf %169, %170 : vector<8x512xf32>
    %172 = vector.extract_strided_slice %171 {offsets = [0, 0], sizes = [8, 384], strides = [1, 1]} : vector<8x512xf32> to vector<8x384xf32>
    %173 = arith.negf %172 : vector<8x384xf32>
    %174 = math.exp %173 : vector<8x384xf32>
    %cst_32 = arith.constant 1.000000e+00 : f32
    %175 = vector.broadcast %cst_32 : f32 to vector<8x384xf32>
    %176 = arith.addf %175, %174 : vector<8x384xf32>
    %177 = arith.divf %175, %176 : vector<8x384xf32>
    %178 = vector.extract_strided_slice %177 {offsets = [0, 0], sizes = [8, 128], strides = [1, 1]} : vector<8x384xf32> to vector<8x128xf32>
    %179 = vector.extract_strided_slice %177 {offsets = [0, 128], sizes = [8, 128], strides = [1, 1]} : vector<8x384xf32> to vector<8x128xf32>
    %180 = vector.extract_strided_slice %177 {offsets = [0, 256], sizes = [8, 128], strides = [1, 1]} : vector<8x384xf32> to vector<8x128xf32>
    %181 = vector.extract_strided_slice %171 {offsets = [0, 384], sizes = [8, 128], strides = [1, 1]} : vector<8x512xf32> to vector<8x128xf32>
    %182 = math.tanh %181 : vector<8x128xf32>
    %183 = arith.mulf %179, %146 : vector<8x128xf32>
    %184 = arith.mulf %178, %182 : vector<8x128xf32>
    %185 = arith.addf %183, %184 : vector<8x128xf32>
    %186 = math.tanh %185 : vector<8x128xf32>
    %187 = arith.mulf %180, %186 : vector<8x128xf32>
    %188 = tpu.concatenate %187, %168 in 1 : vector<8x128xf32>, vector<8x128xf32> -> vector<8x256xf32>
    %cst_33 = arith.constant dense<0.000000e+00> : vector<8x512xf32>
    %189 = tpu.matmul %188, %7, %cst_33 {dimension_numbers = #tpu.dot_dimension_numbers<[1], [0], [0], [1], [0, 0, 1, 1], [], []>} : vector<8x256xf32>, vector<256x512xf32>, vector<8x512xf32> -> vector<8x512xf32>
    %190 = vector.broadcast %8 : vector<1x512xf32> to vector<8x512xf32>
    %191 = arith.addf %189, %190 : vector<8x512xf32>
    %192 = vector.extract_strided_slice %191 {offsets = [0, 0], sizes = [8, 384], strides = [1, 1]} : vector<8x512xf32> to vector<8x384xf32>
    %193 = arith.negf %192 : vector<8x384xf32>
    %194 = math.exp %193 : vector<8x384xf32>
    %cst_34 = arith.constant 1.000000e+00 : f32
    %195 = vector.broadcast %cst_34 : f32 to vector<8x384xf32>
    %196 = arith.addf %195, %194 : vector<8x384xf32>
    %197 = arith.divf %195, %196 : vector<8x384xf32>
    %198 = vector.extract_strided_slice %197 {offsets = [0, 0], sizes = [8, 128], strides = [1, 1]} : vector<8x384xf32> to vector<8x128xf32>
    %199 = vector.extract_strided_slice %197 {offsets = [0, 128], sizes = [8, 128], strides = [1, 1]} : vector<8x384xf32> to vector<8x128xf32>
    %200 = vector.extract_strided_slice %197 {offsets = [0, 256], sizes = [8, 128], strides = [1, 1]} : vector<8x384xf32> to vector<8x128xf32>
    %201 = vector.extract_strided_slice %191 {offsets = [0, 384], sizes = [8, 128], strides = [1, 1]} : vector<8x512xf32> to vector<8x128xf32>
    %202 = math.tanh %201 : vector<8x128xf32>
    %203 = arith.mulf %199, %166 : vector<8x128xf32>
    %204 = arith.mulf %198, %202 : vector<8x128xf32>
    %205 = arith.addf %203, %204 : vector<8x128xf32>
    %206 = math.tanh %205 : vector<8x128xf32>
    %207 = arith.mulf %200, %206 : vector<8x128xf32>
    %208 = vector.extract_strided_slice %5 {offsets = [40, 0], sizes = [8, 512], strides = [1, 1]} : vector<64x512xf32> to vector<8x512xf32>
    %cst_35 = arith.constant dense<0.000000e+00> : vector<8x512xf32>
    %209 = tpu.matmul %187, %6, %cst_35 {dimension_numbers = #tpu.dot_dimension_numbers<[1], [0], [0], [1], [0, 0, 1, 1], [], []>} : vector<8x128xf32>, vector<128x512xf32>, vector<8x512xf32> -> vector<8x512xf32>
    %210 = arith.addf %208, %209 : vector<8x512xf32>
    %211 = vector.extract_strided_slice %210 {offsets = [0, 0], sizes = [8, 384], strides = [1, 1]} : vector<8x512xf32> to vector<8x384xf32>
    %212 = arith.negf %211 : vector<8x384xf32>
    %213 = math.exp %212 : vector<8x384xf32>
    %cst_36 = arith.constant 1.000000e+00 : f32
    %214 = vector.broadcast %cst_36 : f32 to vector<8x384xf32>
    %215 = arith.addf %214, %213 : vector<8x384xf32>
    %216 = arith.divf %214, %215 : vector<8x384xf32>
    %217 = vector.extract_strided_slice %216 {offsets = [0, 0], sizes = [8, 128], strides = [1, 1]} : vector<8x384xf32> to vector<8x128xf32>
    %218 = vector.extract_strided_slice %216 {offsets = [0, 128], sizes = [8, 128], strides = [1, 1]} : vector<8x384xf32> to vector<8x128xf32>
    %219 = vector.extract_strided_slice %216 {offsets = [0, 256], sizes = [8, 128], strides = [1, 1]} : vector<8x384xf32> to vector<8x128xf32>
    %220 = vector.extract_strided_slice %210 {offsets = [0, 384], sizes = [8, 128], strides = [1, 1]} : vector<8x512xf32> to vector<8x128xf32>
    %221 = math.tanh %220 : vector<8x128xf32>
    %222 = arith.mulf %218, %185 : vector<8x128xf32>
    %223 = arith.mulf %217, %221 : vector<8x128xf32>
    %224 = arith.addf %222, %223 : vector<8x128xf32>
    %225 = math.tanh %224 : vector<8x128xf32>
    %226 = arith.mulf %219, %225 : vector<8x128xf32>
    %227 = tpu.concatenate %226, %207 in 1 : vector<8x128xf32>, vector<8x128xf32> -> vector<8x256xf32>
    %cst_37 = arith.constant dense<0.000000e+00> : vector<8x512xf32>
    %228 = tpu.matmul %227, %7, %cst_37 {dimension_numbers = #tpu.dot_dimension_numbers<[1], [0], [0], [1], [0, 0, 1, 1], [], []>} : vector<8x256xf32>, vector<256x512xf32>, vector<8x512xf32> -> vector<8x512xf32>
    %229 = vector.broadcast %8 : vector<1x512xf32> to vector<8x512xf32>
    %230 = arith.addf %228, %229 : vector<8x512xf32>
    %231 = vector.extract_strided_slice %230 {offsets = [0, 0], sizes = [8, 384], strides = [1, 1]} : vector<8x512xf32> to vector<8x384xf32>
    %232 = arith.negf %231 : vector<8x384xf32>
    %233 = math.exp %232 : vector<8x384xf32>
    %cst_38 = arith.constant 1.000000e+00 : f32
    %234 = vector.broadcast %cst_38 : f32 to vector<8x384xf32>
    %235 = arith.addf %234, %233 : vector<8x384xf32>
    %236 = arith.divf %234, %235 : vector<8x384xf32>
    %237 = vector.extract_strided_slice %236 {offsets = [0, 0], sizes = [8, 128], strides = [1, 1]} : vector<8x384xf32> to vector<8x128xf32>
    %238 = vector.extract_strided_slice %236 {offsets = [0, 128], sizes = [8, 128], strides = [1, 1]} : vector<8x384xf32> to vector<8x128xf32>
    %239 = vector.extract_strided_slice %236 {offsets = [0, 256], sizes = [8, 128], strides = [1, 1]} : vector<8x384xf32> to vector<8x128xf32>
    %240 = vector.extract_strided_slice %230 {offsets = [0, 384], sizes = [8, 128], strides = [1, 1]} : vector<8x512xf32> to vector<8x128xf32>
    %241 = math.tanh %240 : vector<8x128xf32>
    %242 = arith.mulf %238, %205 : vector<8x128xf32>
    %243 = arith.mulf %237, %241 : vector<8x128xf32>
    %244 = arith.addf %242, %243 : vector<8x128xf32>
    %245 = math.tanh %244 : vector<8x128xf32>
    %246 = arith.mulf %239, %245 : vector<8x128xf32>
    %247 = vector.extract_strided_slice %5 {offsets = [48, 0], sizes = [8, 512], strides = [1, 1]} : vector<64x512xf32> to vector<8x512xf32>
    %cst_39 = arith.constant dense<0.000000e+00> : vector<8x512xf32>
    %248 = tpu.matmul %226, %6, %cst_39 {dimension_numbers = #tpu.dot_dimension_numbers<[1], [0], [0], [1], [0, 0, 1, 1], [], []>} : vector<8x128xf32>, vector<128x512xf32>, vector<8x512xf32> -> vector<8x512xf32>
    %249 = arith.addf %247, %248 : vector<8x512xf32>
    %250 = vector.extract_strided_slice %249 {offsets = [0, 0], sizes = [8, 384], strides = [1, 1]} : vector<8x512xf32> to vector<8x384xf32>
    %251 = arith.negf %250 : vector<8x384xf32>
    %252 = math.exp %251 : vector<8x384xf32>
    %cst_40 = arith.constant 1.000000e+00 : f32
    %253 = vector.broadcast %cst_40 : f32 to vector<8x384xf32>
    %254 = arith.addf %253, %252 : vector<8x384xf32>
    %255 = arith.divf %253, %254 : vector<8x384xf32>
    %256 = vector.extract_strided_slice %255 {offsets = [0, 0], sizes = [8, 128], strides = [1, 1]} : vector<8x384xf32> to vector<8x128xf32>
    %257 = vector.extract_strided_slice %255 {offsets = [0, 128], sizes = [8, 128], strides = [1, 1]} : vector<8x384xf32> to vector<8x128xf32>
    %258 = vector.extract_strided_slice %255 {offsets = [0, 256], sizes = [8, 128], strides = [1, 1]} : vector<8x384xf32> to vector<8x128xf32>
    %259 = vector.extract_strided_slice %249 {offsets = [0, 384], sizes = [8, 128], strides = [1, 1]} : vector<8x512xf32> to vector<8x128xf32>
    %260 = math.tanh %259 : vector<8x128xf32>
    %261 = arith.mulf %257, %224 : vector<8x128xf32>
    %262 = arith.mulf %256, %260 : vector<8x128xf32>
    %263 = arith.addf %261, %262 : vector<8x128xf32>
    %264 = math.tanh %263 : vector<8x128xf32>
    %265 = arith.mulf %258, %264 : vector<8x128xf32>
    %266 = tpu.concatenate %265, %246 in 1 : vector<8x128xf32>, vector<8x128xf32> -> vector<8x256xf32>
    %cst_41 = arith.constant dense<0.000000e+00> : vector<8x512xf32>
    %267 = tpu.matmul %266, %7, %cst_41 {dimension_numbers = #tpu.dot_dimension_numbers<[1], [0], [0], [1], [0, 0, 1, 1], [], []>} : vector<8x256xf32>, vector<256x512xf32>, vector<8x512xf32> -> vector<8x512xf32>
    %268 = vector.broadcast %8 : vector<1x512xf32> to vector<8x512xf32>
    %269 = arith.addf %267, %268 : vector<8x512xf32>
    %270 = vector.extract_strided_slice %269 {offsets = [0, 0], sizes = [8, 384], strides = [1, 1]} : vector<8x512xf32> to vector<8x384xf32>
    %271 = arith.negf %270 : vector<8x384xf32>
    %272 = math.exp %271 : vector<8x384xf32>
    %cst_42 = arith.constant 1.000000e+00 : f32
    %273 = vector.broadcast %cst_42 : f32 to vector<8x384xf32>
    %274 = arith.addf %273, %272 : vector<8x384xf32>
    %275 = arith.divf %273, %274 : vector<8x384xf32>
    %276 = vector.extract_strided_slice %275 {offsets = [0, 0], sizes = [8, 128], strides = [1, 1]} : vector<8x384xf32> to vector<8x128xf32>
    %277 = vector.extract_strided_slice %275 {offsets = [0, 128], sizes = [8, 128], strides = [1, 1]} : vector<8x384xf32> to vector<8x128xf32>
    %278 = vector.extract_strided_slice %275 {offsets = [0, 256], sizes = [8, 128], strides = [1, 1]} : vector<8x384xf32> to vector<8x128xf32>
    %279 = vector.extract_strided_slice %269 {offsets = [0, 384], sizes = [8, 128], strides = [1, 1]} : vector<8x512xf32> to vector<8x128xf32>
    %280 = math.tanh %279 : vector<8x128xf32>
    %281 = arith.mulf %277, %244 : vector<8x128xf32>
    %282 = arith.mulf %276, %280 : vector<8x128xf32>
    %283 = arith.addf %281, %282 : vector<8x128xf32>
    %284 = math.tanh %283 : vector<8x128xf32>
    %285 = arith.mulf %278, %284 : vector<8x128xf32>
    %286 = vector.extract_strided_slice %5 {offsets = [56, 0], sizes = [8, 512], strides = [1, 1]} : vector<64x512xf32> to vector<8x512xf32>
    %cst_43 = arith.constant dense<0.000000e+00> : vector<8x512xf32>
    %287 = tpu.matmul %265, %6, %cst_43 {dimension_numbers = #tpu.dot_dimension_numbers<[1], [0], [0], [1], [0, 0, 1, 1], [], []>} : vector<8x128xf32>, vector<128x512xf32>, vector<8x512xf32> -> vector<8x512xf32>
    %288 = arith.addf %286, %287 : vector<8x512xf32>
    %289 = vector.extract_strided_slice %288 {offsets = [0, 0], sizes = [8, 384], strides = [1, 1]} : vector<8x512xf32> to vector<8x384xf32>
    %290 = arith.negf %289 : vector<8x384xf32>
    %291 = math.exp %290 : vector<8x384xf32>
    %cst_44 = arith.constant 1.000000e+00 : f32
    %292 = vector.broadcast %cst_44 : f32 to vector<8x384xf32>
    %293 = arith.addf %292, %291 : vector<8x384xf32>
    %294 = arith.divf %292, %293 : vector<8x384xf32>
    %295 = vector.extract_strided_slice %294 {offsets = [0, 0], sizes = [8, 128], strides = [1, 1]} : vector<8x384xf32> to vector<8x128xf32>
    %296 = vector.extract_strided_slice %294 {offsets = [0, 128], sizes = [8, 128], strides = [1, 1]} : vector<8x384xf32> to vector<8x128xf32>
    %297 = vector.extract_strided_slice %294 {offsets = [0, 256], sizes = [8, 128], strides = [1, 1]} : vector<8x384xf32> to vector<8x128xf32>
    %298 = vector.extract_strided_slice %288 {offsets = [0, 384], sizes = [8, 128], strides = [1, 1]} : vector<8x512xf32> to vector<8x128xf32>
    %299 = math.tanh %298 : vector<8x128xf32>
    %300 = arith.mulf %296, %263 : vector<8x128xf32>
    %301 = arith.mulf %295, %299 : vector<8x128xf32>
    %302 = arith.addf %300, %301 : vector<8x128xf32>
    %303 = math.tanh %302 : vector<8x128xf32>
    %304 = arith.mulf %297, %303 : vector<8x128xf32>
    %305 = tpu.concatenate %304, %285 in 1 : vector<8x128xf32>, vector<8x128xf32> -> vector<8x256xf32>
    %cst_45 = arith.constant dense<0.000000e+00> : vector<8x512xf32>
    %306 = tpu.matmul %305, %7, %cst_45 {dimension_numbers = #tpu.dot_dimension_numbers<[1], [0], [0], [1], [0, 0, 1, 1], [], []>} : vector<8x256xf32>, vector<256x512xf32>, vector<8x512xf32> -> vector<8x512xf32>
    %307 = vector.broadcast %8 : vector<1x512xf32> to vector<8x512xf32>
    %308 = arith.addf %306, %307 : vector<8x512xf32>
    %309 = vector.extract_strided_slice %308 {offsets = [0, 0], sizes = [8, 384], strides = [1, 1]} : vector<8x512xf32> to vector<8x384xf32>
    %310 = arith.negf %309 : vector<8x384xf32>
    %311 = math.exp %310 : vector<8x384xf32>
    %cst_46 = arith.constant 1.000000e+00 : f32
    %312 = vector.broadcast %cst_46 : f32 to vector<8x384xf32>
    %313 = arith.addf %312, %311 : vector<8x384xf32>
    %314 = arith.divf %312, %313 : vector<8x384xf32>
    %315 = vector.extract_strided_slice %314 {offsets = [0, 0], sizes = [8, 128], strides = [1, 1]} : vector<8x384xf32> to vector<8x128xf32>
    %316 = vector.extract_strided_slice %314 {offsets = [0, 128], sizes = [8, 128], strides = [1, 1]} : vector<8x384xf32> to vector<8x128xf32>
    %317 = vector.extract_strided_slice %314 {offsets = [0, 256], sizes = [8, 128], strides = [1, 1]} : vector<8x384xf32> to vector<8x128xf32>
    %318 = vector.extract_strided_slice %308 {offsets = [0, 384], sizes = [8, 128], strides = [1, 1]} : vector<8x512xf32> to vector<8x128xf32>
    %319 = math.tanh %318 : vector<8x128xf32>
    %320 = arith.mulf %316, %283 : vector<8x128xf32>
    %321 = arith.mulf %315, %319 : vector<8x128xf32>
    %322 = arith.addf %320, %321 : vector<8x128xf32>
    %323 = math.tanh %322 : vector<8x128xf32>
    %324 = arith.mulf %317, %323 : vector<8x128xf32>
    %c0_47 = arith.constant 0 : index
    %c0_48 = arith.constant 0 : index
    %325 = vector.load %arg7[%c0_47, %c0_48] : memref<128x8xf32, #tpu.memory_space<vmem>>, vector<128x8xf32>
    %cst_49 = arith.constant dense<0.000000e+00> : vector<8x8xf32>
    %326 = tpu.matmul %324, %325, %cst_49 {dimension_numbers = #tpu.dot_dimension_numbers<[1], [0], [0], [1], [0, 0, 1, 1], [], []>} : vector<8x128xf32>, vector<128x8xf32>, vector<8x8xf32> -> vector<8x8xf32>
    %c0_50 = arith.constant 0 : index
    %c0_51 = arith.constant 0 : index
    %327 = vector.load %arg8[%c0_50, %c0_51] : memref<1x8xf32, #tpu.memory_space<vmem>>, vector<1x8xf32>
    %328 = vector.broadcast %327 : vector<1x8xf32> to vector<8x8xf32>
    %329 = arith.addf %326, %328 : vector<8x8xf32>
    %c0_52 = arith.constant 0 : index
    %c0_53 = arith.constant 0 : index
    %330 = vector.load %arg9[%c0_52, %c0_53] : memref<8x8xf32, #tpu.memory_space<vmem>>, vector<8x8xf32>
    tpu.vector_store %arg9[%c0_52, %c0_53], %329 {strides = array<i32>} : memref<8x8xf32, #tpu.memory_space<vmem>>, vector<8x8xf32>,
    return
  }
  func.func @transform_0(%arg0: i32) -> (i32, i32) {
    %c0_i32 = arith.constant 0 : i32
    %c0_i32_0 = arith.constant 0 : i32
    %c0_i32_1 = arith.constant 0 : i32
    return %c0_i32, %c0_i32_0 : i32, i32
  }
  func.func @transform_1(%arg0: i32) -> (i32, i32) {
    %c0_i32 = arith.constant 0 : i32
    %c0_i32_0 = arith.constant 0 : i32
    %c0_i32_1 = arith.constant 0 : i32
    return %c0_i32, %c0_i32_0 : i32, i32
  }
  func.func @transform_2(%arg0: i32) -> (i32, i32) {
    %c0_i32 = arith.constant 0 : i32
    %c0_i32_0 = arith.constant 0 : i32
    %c0_i32_1 = arith.constant 0 : i32
    return %c0_i32, %c0_i32_0 : i32, i32
  }
  func.func @transform_3(%arg0: i32) -> (i32, i32) {
    %c0_i32 = arith.constant 0 : i32
    %c0_i32_0 = arith.constant 0 : i32
    %c0_i32_1 = arith.constant 0 : i32
    return %c0_i32, %c0_i32_0 : i32, i32
  }
  func.func @transform_4(%arg0: i32) -> (i32, i32) {
    %c0_i32 = arith.constant 0 : i32
    %c0_i32_0 = arith.constant 0 : i32
    %c0_i32_1 = arith.constant 0 : i32
    return %c0_i32, %c0_i32_0 : i32, i32
  }
  func.func @transform_5(%arg0: i32) -> (i32, i32) {
    %c0_i32 = arith.constant 0 : i32
    %c0_i32_0 = arith.constant 0 : i32
    %c0_i32_1 = arith.constant 0 : i32
    return %c0_i32, %c0_i32_0 : i32, i32
  }
  func.func @transform_6(%arg0: i32) -> (i32, i32) {
    %c0_i32 = arith.constant 0 : i32
    %c0_i32_0 = arith.constant 0 : i32
    %c0_i32_1 = arith.constant 0 : i32
    return %c0_i32, %c0_i32_0 : i32, i32
  }
  func.func @transform_7(%arg0: i32) -> (i32, i32) {
    %c0_i32 = arith.constant 0 : i32
    %c0_i32_0 = arith.constant 0 : i32
    %c0_i32_1 = arith.constant 0 : i32
    return %c0_i32, %c0_i32_0 : i32, i32
  }
  func.func @transform_8(%arg0: i32) -> (i32, i32) {
    %c0_i32 = arith.constant 0 : i32
    %c0_i32_0 = arith.constant 0 : i32
    %c0_i32_1 = arith.constant 0 : i32
    return %c0_i32, %c0_i32_0 : i32, i32
  }
}

</mosaic_0001>

<bundles_post_ra>
// kernel: dlstm_forward.1
= control target key start
LH: loop header
LB: loop body
LE: loop exit
PB: predicated region body
PF: predicated region fallthrough
CT: control target
= control target key end

     0   :  { %13 = vsyncpa [#allocation3], 0  ;;  %s7911_s0 = inlined_call_operand.vmem [shape: f32[64,16], index: 0, kind: input, shape index: {}]   ;;  %s7912_s1 = inlined_call_operand.vmem [shape: f32[16,512], index: 1, kind: input, shape index: {}]   ;;  %s7913_s2 = inlined_call_operand.hbm [shape: f32[128,512], index: 2, kind: input, shape index: {}]   ;;  %s7914_s3 = inlined_call_operand.vmem [shape: f32[1,512], index: 3, kind: input, shape index: {}]   ;;  %s7915_s4 = inlined_call_operand.hbm [shape: f32[256,512], index: 4, kind: input, shape index: {}]   ;;  %s7916_s5 = inlined_call_operand.vmem [shape: f32[1,512], index: 5, kind: input, shape index: {}]   ;;  %s7917_s6 = inlined_call_operand.vmem [shape: f32[128,8], index: 6, kind: input, shape index: {}]   ;;  %s7918_s7 = inlined_call_operand.vmem [shape: f32[1,8], index: 7, kind: input, shape index: {}]   ;;  %s7919_s8 = inlined_call_operand.hbm [shape: f32[8,8], index: 8, kind: output, shape index: {}]  }
   0x1   :  { %14 = vsyncpa [#allocation6], 0 }
   0x2   :  { %15 = vsyncpa [#allocation4], 0  ;;  %s4400_s27 = smov [#allocation2]  }
   0x3   :  { %s25_s28 = sshll.u32 %s4400_s27, 4  ;;  %s26_s28 = int_to_ptr.vmem [resolvable:$true] %s25_s28 }
   0x4   :  { %s4342_s29 = scalar_lea.vmem %s26_s28, 8192  ;;  %p4347_p1 = scmp.lt.s32.totalorder %s26_s28, %s26_s28 }
   0x5   :  { %p4343_p0 = scmp.ne.s32.totalorder %s26_s28, %s4342_s29  ;;  %p4348_p2 = scmp.lt.s32.totalorder %s4342_s29, %s4342_s29 }
   0x7   :  { %p4349_p3 = por %p4348_p2, %p4347_p1 }
   0x9   :  { %p4350_p4 = pnand %p4349_p3, %p4343_p0 }
   0xb   :  { %4353 = shalt.err (!%p4350_p4)
}
   0xc   :  { %s4401_s30 = smov 512   ;;  %s4402_s9 = smov 32  }
   0xd   :  { %31 = dma.hbm_to_vmem [thread:$0]  %s7913_s2, 8192, %s26_s28, [#allocation3], %s4401_s30, %s4401_s30, %s4402_s9  }
   0xe   :  { %s4403_s12 = smov [#allocation5]  }
   0xf   :  { %s39_s13 = sshll.u32 %s4403_s12, 4  ;;  %s40_s13 = int_to_ptr.vmem [resolvable:$true] %s39_s13 }
  0x10   :  { %s4362_s14 = scalar_lea.vmem %s40_s13, 16384  ;;  %p4367_p6 = scmp.lt.s32.totalorder %s40_s13, %s40_s13 }
  0x11   :  { %p4363_p5 = scmp.ne.s32.totalorder %s40_s13, %s4362_s14  ;;  %p4368_p7 = scmp.lt.s32.totalorder %s4362_s14, %s4362_s14 }
  0x13   :  { %p4369_p8 = por %p4368_p7, %p4367_p6 }
  0x15   :  { %p4370_p9 = pnand %p4369_p8, %p4363_p5 }
  0x17   :  { %4373 = shalt.err (!%p4370_p9)
}
  0x18   :  { %45 = dma.hbm_to_vmem [thread:$0]  %s7915_s4, 16384, %s40_s13, [#allocation6], %s4401_s30, %s4401_s30, %s4402_s9  }
  0x19   :  { %4394 = dma.done.wait [#allocation3], 8192  }
  0x1a   :  { %4395 = vsyncadd [#allocation3], 4294959104 }
  0x1b   :  { %4396 = dma.done.wait [#allocation6], 16384  }
  0x1c   :  { %4397 = vsyncadd [#allocation6], 4294950912  ;;  %v7920_v0 = vmov 0.0   ;;  %v71_v1 = vld [vmem:[%s7912_s1 + $0x28] sm:$0xff]  ;;  %v73_v2 = vld [vmem:[%s7912_s1 + $0x38] sm:$0xff]  ;;  %vm96_vm0 = vcmask 130048  }
  0x1d   :  { %185 = vmatprep.mubr.f32.mxu0 %v7920_v0  ;;  %298 = vmatprep.mubr.f32.mxu1 %v7920_v0  ;;  %v70_v3 = vld [vmem:[%s7912_s1 + $0x20] sm:$0xff]  ;;  %v72_v4 = vld [vmem:[%s7912_s1 + $0x30] sm:$0xff]  ;;  %v67_v5 = vld [vmem:[%s7912_s1 + $0x8] sm:$0xff]  ;;  %vm4405_vm1 = vmmov 0   ;;  %s4406_s28 = smov [#allocation7]   ;;  %vm3342_vm2 = vcmask 64512  }
  0x1e   :  { %149 = vmatprep.subr.mxu0 %v71_v1  ;;  %262 = vmatprep.subr.mxu1 %v73_v2  ;;  %v69_v6 = vld [vmem:[%s7912_s1 + $0x18] sm:$0xff]  ;;  %v66_v7 = vld [vmem:[%s7912_s1] sm:$0xff]  ;;  %v68_v8 = vld [vmem:[%s7912_s1 + $0x10] sm:$0xff]  ;;  %s3350_s29 = sshll.u32 %s4406_s28, 4  ;;  %s3351_s29 = int_to_ptr.vmem [resolvable:$true] %s3350_s29 }
  0x1f   :  { %150 = vmatpush1.msra.mxu0 %v70_v3  ;;  %263 = vmatpush1.msra.mxu1 %v72_v4  ;;  %v58_v9 = vld [vmem:[%s7911_s0] sm:$0xff]  ;;  %v4487_v10 = vld [vmem:[#allocation2 + $0x1e8] sm:$0xff]  ;;  %v4489_v11 = vld [vmem:[#allocation2 + $0x1f8] sm:$0xff]  ;;  %s4374_s30 = scalar_lea.vmem %s3351_s29, 128  ;;  %p4379_p11 = scmp.lt.s32.totalorder %s3351_s29, %s3351_s29 }
  0x20   :  { %151 = vmatprep.subr.mxu0 %v67_v5  ;;  %264 = vmatprep.subr.mxu1 %v69_v6  ;;  %v407_v12 = vld [vmem:[#allocation2 + $0x1e0] sm:$0xff]  ;;  %v409_v13 = vld [vmem:[#allocation2 + $0x1f0] sm:$0xff]  ;;  %v404_v14 = vld [vmem:[#allocation2 + $0x1c8] sm:$0xff]  ;;  %p4375_p10 = scmp.ne.s32.totalorder %s3351_s29, %s4374_s30  ;;  %p4380_p12 = scmp.lt.s32.totalorder %s4374_s30, %s4374_s30 }
  0x21   :  { %152 = vmatpush1.msra.mxu0 %v66_v7  ;;  %265 = vmatpush1.msra.mxu1 %v68_v8  ;;  %v406_v15 = vld [vmem:[#allocation2 + $0x1d8] sm:$0xff]  ;;  %v403_v16 = vld [vmem:[#allocation2 + $0x1c0] sm:$0xff]  ;;  %v405_v17 = vld [vmem:[#allocation2 + $0x1d0] sm:$0xff] }
  0x22   :  { %3360 = vmatmul.mubr.msk.f32.vlgmr.msra.gmra.mxu0 %vm96_vm0, %v58_v9  ;;  %3368 = vmatmul.mubr.msk.f32.vlgmr.msra.gmra.mxu1 %vm96_vm0, %v58_v9  ;;  %v59_v18 = vld [vmem:[%s7911_s0 + $0x8] sm:$0xff]  ;;  %v402_v20 = vld [vmem:[#allocation2 + $0x1b8] sm:$0xff]  ;;  %v399_v21 = vld [vmem:[#allocation2 + $0x1a0] sm:$0xff]  ;;  %p4381_p13 = por %p4380_p12, %p4379_p11 }
  0x23   :  { %540 = vmatprep.subr.mxu0 %v4487_v10  ;;  %611 = vmatprep.subr.mxu1 %v4489_v11  ;;  %v400_v19 = vld [vmem:[#allocation2 + $0x1a8] sm:$0xff]  ;;  %v401_v22 = vld [vmem:[#allocation2 + $0x1b0] sm:$0xff]  ;;  %v398_v24 = vld [vmem:[#allocation2 + $0x198] sm:$0xff] }
  0x24   :  { %541 = vmatpush1.msra.mxu0 %v407_v12  ;;  %612 = vmatpush1.msra.mxu1 %v409_v13  ;;  %v396_v23 = vld [vmem:[#allocation2 + $0x188] sm:$0xff]  ;;  %v395_v25 = vld [vmem:[#allocation2 + $0x180] sm:$0xff]  ;;  %v397_v26 = vld [vmem:[#allocation2 + $0x190] sm:$0xff]  ;;  %p4382_p0 = pnand %p4381_p13, %p4375_p10 }
  0x25   :  { %542 = vmatprep.subr.mxu0 %v404_v14  ;;  %613 = vmatprep.subr.mxu1 %v406_v15  ;;  %v60_v27 = vld [vmem:[%s7911_s0 + $0x10] sm:$0xff]  ;;  %v392_v28 = vld [vmem:[#allocation2 + $0x168] sm:$0xff]  ;;  %v394_v29 = vld [vmem:[#allocation2 + $0x178] sm:$0xff] }
  0x26   :  { %191 = vmatprep.mubr.f32.mxu0 %v7920_v0  ;;  %304 = vmatprep.mubr.f32.mxu1 %v7920_v0  ;;  %v391_v30 = vld [vmem:[#allocation2 + $0x160] sm:$0xff]  ;;  %v393_v31 = vld [vmem:[#allocation2 + $0x170] sm:$0xff]  ;;  %v4509_v32 = vld [vmem:[#allocation2 + $0x148] sm:$0xff] }
  0x27   :  { %543 = vmatpush1.msra.mxu0 %v403_v16  ;;  %614 = vmatpush1.msra.mxu1 %v405_v17  ;;  %v4511_v33 = vld [vmem:[#allocation2 + $0x158] sm:$0xff]  ;;  %v4513_v34 = vld [vmem:[#allocation2 + $0x140] sm:$0xff]  ;;  %v4515_v35 = vld [vmem:[#allocation2 + $0x150] sm:$0xff] }
  0x28   :  { %3361 = vmatmul.mubr.msk.f32.gmra.mxu0 %vm96_vm0, %v59_v18  ;;  %3369 = vmatmul.mubr.msk.f32.gmra.mxu1 %vm96_vm0, %v59_v18  ;;  %v61_v36 = vld [vmem:[%s7911_s0 + $0x18] sm:$0xff]  ;;  %v4524_v37 = vld [vmem:[#allocation2 + $0x128] sm:$0xff]  ;;  %v4530_v39 = vld [vmem:[#allocation2 + $0x120] sm:$0xff] }
  0x29   :  { %544 = vmatprep.subr.mxu0 %v400_v19  ;;  %615 = vmatprep.subr.mxu1 %v402_v20  ;;  %v4526_v38 = vld [vmem:[#allocation2 + $0x138] sm:$0xff]  ;;  %v4532_v40 = vld [vmem:[#allocation2 + $0x130] sm:$0xff]  ;;  %v4536_v41 = vld [vmem:[#allocation2 + $0x108] sm:$0xff] }
  0x2a   :  { %545 = vmatpush1.msra.mxu0 %v399_v21  ;;  %616 = vmatpush1.msra.mxu1 %v401_v22  ;;  %v4538_v42 = vld [vmem:[#allocation2 + $0x118] sm:$0xff]  ;;  %v4544_v43 = vld [vmem:[#allocation2 + $0x100] sm:$0xff]  ;;  %v4546_v44 = vld [vmem:[#allocation2 + $0x110] sm:$0xff] }
  0x2b   :  { %546 = vmatprep.subr.mxu0 %v396_v23  ;;  %617 = vmatprep.subr.mxu1 %v398_v24  ;;  %v62_v45 = vld [vmem:[%s7911_s0 + $0x20] sm:$0xff]  ;;  %v4555_v46 = vld [vmem:[#allocation2 + $0xe8] sm:$0xff]  ;;  %v4557_v47 = vld [vmem:[#allocation2 + $0xf8] sm:$0xff] }
  0x2c   :  { %197 = vmatprep.mubr.f32.mxu0 %v7920_v0  ;;  %310 = vmatprep.mubr.f32.mxu1 %v7920_v0  ;;  %v4561_v48 = vld [vmem:[#allocation2 + $0xe0] sm:$0xff]  ;;  %v4563_v49 = vld [vmem:[#allocation2 + $0xf0] sm:$0xff]  ;;  %v4567_v50 = vld [vmem:[#allocation2 + $0xc8] sm:$0xff] }
  0x2d   :  { %547 = vmatpush1.msra.mxu0 %v395_v25  ;;  %618 = vmatpush1.msra.mxu1 %v397_v26  ;;  %v4569_v51 = vld [vmem:[#allocation2 + $0xd8] sm:$0xff]  ;;  %v4575_v52 = vld [vmem:[#allocation2 + $0xc0] sm:$0xff]  ;;  %v4577_v53 = vld [vmem:[#allocation2 + $0xd0] sm:$0xff] }
  0x2e   :  { %3362 = vmatmul.mubr.msk.f32.gmra.mxu0 %vm96_vm0, %v60_v27  ;;  %3370 = vmatmul.mubr.msk.f32.gmra.mxu1 %vm96_vm0, %v60_v27  ;;  %v63_v54 = vld [vmem:[%s7911_s0 + $0x28] sm:$0xff]  ;;  %v4588_v56 = vld [vmem:[#allocation2 + $0xb8] sm:$0xff]  ;;  %v4592_v57 = vld [vmem:[#allocation2 + $0xa0] sm:$0xff] }
  0x2f   :  { %548 = vmatprep.subr.mxu0 %v392_v28  ;;  %619 = vmatprep.subr.mxu1 %v394_v29  ;;  %v4586_v55 = vld [vmem:[#allocation2 + $0xa8] sm:$0xff]  ;;  %v4594_v58 = vld [vmem:[#allocation2 + $0xb0] sm:$0xff]  ;;  %v4600_v60 = vld [vmem:[#allocation2 + $0x98] sm:$0xff] }
  0x30   :  { %549 = vmatpush1.msra.mxu0 %v391_v30  ;;  %620 = vmatpush1.msra.mxu1 %v393_v31  ;;  %v4598_v59 = vld [vmem:[#allocation2 + $0x88] sm:$0xff]  ;;  %v4606_v61 = vld [vmem:[#allocation2 + $0x80] sm:$0xff]  ;;  %v4608_v62 = vld [vmem:[#allocation2 + $0x90] sm:$0xff] }
  0x31   :  { %550 = vmatprep.subr.mxu0 %v4509_v32  ;;  %621 = vmatprep.subr.mxu1 %v4511_v33  ;;  %v64_v63 = vld [vmem:[%s7911_s0 + $0x30] sm:$0xff]  ;;  %v4617_v1 = vld [vmem:[#allocation2 + $0x68] sm:$0xff]  ;;  %v4619_v2 = vld [vmem:[#allocation2 + $0x78] sm:$0xff] }
  0x32   :  { %203 = vmatprep.mubr.f32.mxu0 %v7920_v0  ;;  %316 = vmatprep.mubr.f32.mxu1 %v7920_v0  ;;  %v4623_v3 = vld [vmem:[#allocation2 + $0x60] sm:$0xff]  ;;  %v4625_v4 = vld [vmem:[#allocation2 + $0x70] sm:$0xff]  ;;  %v4629_v5 = vld [vmem:[#allocation2 + $0x48] sm:$0xff] }
  0x33   :  { %551 = vmatpush1.msra.mxu0 %v4513_v34  ;;  %622 = vmatpush1.msra.mxu1 %v4515_v35  ;;  %v4631_v6 = vld [vmem:[#allocation2 + $0x58] sm:$0xff]  ;;  %v4637_v7 = vld [vmem:[#allocation2 + $0x40] sm:$0xff]  ;;  %v4639_v8 = vld [vmem:[#allocation2 + $0x50] sm:$0xff] }
  0x34   :  { %3363 = vmatmul.mubr.msk.f32.gmra.mxu0 %vm96_vm0, %v61_v36  ;;  %3371 = vmatmul.mubr.msk.f32.gmra.mxu1 %vm96_vm0, %v61_v36  ;;  %v65_v9 = vld [vmem:[%s7911_s0 + $0x38] sm:$0xff]  ;;  %v4648_v12 = vld [vmem:[#allocation2 + $0x28] sm:$0xff]  ;;  %v4654_v14 = vld [vmem:[#allocation2 + $0x20] sm:$0xff] }
  0x35   :  { %552 = vmatprep.subr.mxu0 %v4524_v37  ;;  %623 = vmatprep.subr.mxu1 %v4526_v38  ;;  %v4650_v13 = vld [vmem:[#allocation2 + $0x38] sm:$0xff]  ;;  %v4656_v15 = vld [vmem:[#allocation2 + $0x30] sm:$0xff]  ;;  %v4660_v16 = vld [vmem:[#allocation2 + $0x8] sm:$0xff] }
  0x36   :  { %553 = vmatpush1.msra.mxu0 %v4530_v39  ;;  %624 = vmatpush1.msra.mxu1 %v4532_v40  ;;  %v4662_v17 = vld [vmem:[#allocation2 + $0x18] sm:$0xff]  ;;  %v4666_v18 = vld [vmem:[#allocation2] sm:$0xff]  ;;  %v4670_v19 = vld [vmem:[#allocation2 + $0x10] sm:$0xff] }
  0x37   :  { %554 = vmatprep.subr.mxu0 %v4536_v41  ;;  %625 = vmatprep.subr.mxu1 %v4538_v42  ;;  %8466 = vst [vmem:[#allocation11_spill] sm:$0xff] %v4662_v17  ;;  %8467 = vst [vmem:[#allocation12_spill] sm:$0xff] %v4666_v18  ;;  %v4682_v20 = vld [vmem:[#allocation5 + $0x1e8] sm:$0xff]  ;;  %v4684_v21 = vld [vmem:[#allocation5 + $0x1f8] sm:$0xff] }
  0x38   :  { %209 = vmatprep.mubr.f32.mxu0 %v7920_v0  ;;  %322 = vmatprep.mubr.f32.mxu1 %v7920_v0  ;;  %8468 = vst [vmem:[#allocation13_spill] sm:$0xff] %v4670_v19  ;;  %8469 = vst [vmem:[#allocation14_spill] sm:$0xff] %v4682_v20  ;;  %v4686_v22 = vld [vmem:[#allocation5 + $0x1e0] sm:$0xff]  ;;  %v4690_v23 = vld [vmem:[#allocation5 + $0x1f0] sm:$0xff] }
  0x39   :  { %555 = vmatpush1.msra.mxu0 %v4544_v43  ;;  %626 = vmatpush1.msra.mxu1 %v4546_v44  ;;  %8470 = vst [vmem:[#allocation15_spill] sm:$0xff] %v4684_v21  ;;  %8471 = vst [vmem:[#allocation16_spill] sm:$0xff] %v4686_v22  ;;  %v4694_v24 = vld [vmem:[#allocation5 + $0x1c8] sm:$0xff]  ;;  %v4696_v25 = vld [vmem:[#allocation5 + $0x1d8] sm:$0xff] }
  0x3a   :  { %3364 = vmatmul.mubr.msk.f32.gmra.mxu0 %vm96_vm0, %v62_v45  ;;  %3372 = vmatmul.mubr.msk.f32.gmra.mxu1 %vm96_vm0, %v62_v45  ;;  %8472 = vst [vmem:[#allocation17_spill] sm:$0xff] %v4690_v23  ;;  %8473 = vst [vmem:[#allocation18_spill] sm:$0xff] %v4694_v24  ;;  %v4698_v26 = vld [vmem:[#allocation5 + $0x1c0] sm:$0xff]  ;;  %v4702_v27 = vld [vmem:[#allocation5 + $0x1d0] sm:$0xff] }
  0x3b   :  { %556 = vmatprep.subr.mxu0 %v4555_v46  ;;  %627 = vmatprep.subr.mxu1 %v4557_v47  ;;  %8474 = vst [vmem:[#allocation19_spill] sm:$0xff] %v4696_v25  ;;  %8475 = vst [vmem:[#allocation20_spill] sm:$0xff] %v4698_v26  ;;  %v4706_v28 = vld [vmem:[#allocation5 + $0x1a8] sm:$0xff]  ;;  %v4708_v29 = vld [vmem:[#allocation5 + $0x1b8] sm:$0xff] }
  0x3c   :  { %557 = vmatpush1.msra.mxu0 %v4561_v48  ;;  %628 = vmatpush1.msra.mxu1 %v4563_v49  ;;  %8476 = vst [vmem:[#allocation21_spill] sm:$0xff] %v4702_v27  ;;  %8477 = vst [vmem:[#allocation22_spill] sm:$0xff] %v4706_v28  ;;  %v4710_v30 = vld [vmem:[#allocation5 + $0x1a0] sm:$0xff]  ;;  %v4714_v31 = vld [vmem:[#allocation5 + $0x1b0] sm:$0xff] }
  0x3d   :  { %558 = vmatprep.subr.mxu0 %v4567_v50  ;;  %629 = vmatprep.subr.mxu1 %v4569_v51  ;;  %8478 = vst [vmem:[#allocation23_spill] sm:$0xff] %v4708_v29  ;;  %8479 = vst [vmem:[#allocation24_spill] sm:$0xff] %v4710_v30  ;;  %v4718_v36 = vld [vmem:[#allocation5 + $0x188] sm:$0xff]  ;;  %v4720_v45 = vld [vmem:[#allocation5 + $0x198] sm:$0xff] }
  0x3e   :  { %215 = vmatprep.mubr.f32.mxu0 %v7920_v0  ;;  %328 = vmatprep.mubr.f32.mxu1 %v7920_v0  ;;  %8480 = vst [vmem:[#allocation25_spill] sm:$0xff] %v4714_v31  ;;  %8481 = vst [vmem:[#allocation26_spill] sm:$0xff] %v4718_v36 }
  0x3f   :  { %559 = vmatpush1.msra.mxu0 %v4575_v52  ;;  %630 = vmatpush1.msra.mxu1 %v4577_v53  ;;  %8482 = vst [vmem:[#allocation27_spill] sm:$0xff] %v4720_v45 }
  0x40   :  { %3365 = vmatmul.mubr.msk.f32.gmra.mxu0 %vm96_vm0, %v63_v54  ;;  %3373 = vmatmul.mubr.msk.f32.gmra.mxu1 %vm96_vm0, %v63_v54  ;;  %v4722_v54 = vld [vmem:[#allocation5 + $0x180] sm:$0xff] }
  0x41   :  { %560 = vmatprep.subr.mxu0 %v4586_v55  ;;  %631 = vmatprep.subr.mxu1 %v4588_v56  ;;  %8483 = vst [vmem:[#allocation28_spill] sm:$0xff] %v4722_v54 }
  0x42   :  { %561 = vmatpush1.msra.mxu0 %v4592_v57  ;;  %632 = vmatpush1.msra.mxu1 %v4594_v58 }
  0x43   :  { %562 = vmatprep.subr.mxu0 %v4598_v59  ;;  %633 = vmatprep.subr.mxu1 %v4600_v60 }
  0x44   :  { %221 = vmatprep.mubr.f32.mxu0 %v7920_v0  ;;  %334 = vmatprep.mubr.f32.mxu1 %v7920_v0 }
  0x45   :  { %563 = vmatpush1.msra.mxu0 %v4606_v61  ;;  %634 = vmatpush1.msra.mxu1 %v4608_v62 }
  0x46   :  { %3366 = vmatmul.mubr.msk.f32.gmra.mxu0 %vm96_vm0, %v64_v63  ;;  %3374 = vmatmul.mubr.msk.f32.gmra.mxu1 %vm96_vm0, %v64_v63  ;;  %v4726_v63 = vld [vmem:[#allocation5 + $0x190] sm:$0xff] }
  0x47   :  { %564 = vmatprep.subr.mxu0 %v4617_v1  ;;  %635 = vmatprep.subr.mxu1 %v4619_v2  ;;  %8484 = vst [vmem:[#allocation29_spill] sm:$0xff] %v4726_v63 }
  0x48   :  { %565 = vmatpush1.msra.mxu0 %v4623_v3  ;;  %636 = vmatpush1.msra.mxu1 %v4625_v4 }
  0x49   :  { %566 = vmatprep.subr.mxu0 %v4629_v5  ;;  %637 = vmatprep.subr.mxu1 %v4631_v6 }
  0x4a   :  { %227 = vmatprep.mubr.f32.mxu0 %v7920_v0  ;;  %340 = vmatprep.mubr.f32.mxu1 %v7920_v0 }
  0x4b   :  { %567 = vmatpush1.msra.mxu0 %v4637_v7  ;;  %638 = vmatpush1.msra.mxu1 %v4639_v8 }
  0x4c   :  { %3367 = vmatmul.mubr.msk.f32.gmra.mxu0 %vm96_vm0, %v65_v9  ;;  %3375 = vmatmul.mubr.msk.f32.gmra.mxu1 %vm96_vm0, %v65_v9  ;;  %v4730_v9 = vld [vmem:[#allocation5 + $0x168] sm:$0xff] }
  0x4d   :  { %568 = vmatprep.subr.mxu0 %v4648_v12  ;;  %639 = vmatprep.subr.mxu1 %v4650_v13  ;;  %8485 = vst [vmem:[#allocation30_spill] sm:$0xff] %v4730_v9 }
  0x4e   :  { %569 = vmatpush1.msra.mxu0 %v4654_v14  ;;  %640 = vmatpush1.msra.mxu1 %v4656_v15 }
  0x4f   :  { %570 = vmatprep.subr.mxu0 %v4660_v16  ;;  %641 = vmatprep.subr.mxu1 %v4662_v17 }
  0x50   :  { %571 = vmatpush1.msra.mxu0 %v4666_v18  ;;  %604 = vmatprep.mubr.f32.mxu0 %v7920_v0 }
  0x51   :  { %642 = vmatpush1.msra.mxu1 %v4670_v19  ;;  %675 = vmatprep.mubr.f32.mxu1 %v7920_v0 }
  0x52   :  { %605 = vmatmul.mubr.f32.vlgmr.msra.gmra.mxu0 %v7920_v0  ;;  %676 = vmatmul.mubr.f32.vlgmr.msra.gmra.mxu1 %v7920_v0 }
  0x53   :  { %795 = vmatprep.mubr.f32.mxu0 %v7920_v0  ;;  %866 = vmatprep.mubr.f32.mxu1 %v7920_v0  ;;  %v4732_v0 = vld [vmem:[#allocation5 + $0x178] sm:$0xff] }
  0x54   :  { %731 = vmatprep.subr.mxu0 %v4682_v20  ;;  %802 = vmatprep.subr.mxu1 %v4684_v21  ;;  %8486 = vst [vmem:[#allocation31_spill] sm:$0xff] %v4732_v0 }
  0x55   :  { %732 = vmatpush1.msra.mxu0 %v4686_v22  ;;  %803 = vmatpush1.msra.mxu1 %v4690_v23 }
  0x56   :  { %733 = vmatprep.subr.mxu0 %v4694_v24  ;;  %804 = vmatprep.subr.mxu1 %v4696_v25 }
  0x57   :  { %734 = vmatpush1.msra.mxu0 %v4698_v26  ;;  %805 = vmatpush1.msra.mxu1 %v4702_v27  ;;  %v5008_v27 = vld [vmem:[#allocation5 + $0x280] sm:$0xff] }
  0x58   :  { %735 = vmatprep.subr.mxu0 %v4706_v28  ;;  %806 = vmatprep.subr.mxu1 %v4708_v29  ;;  %v4984_v29 = vld [vmem:[#allocation5 + $0x2c0] sm:$0xff]  ;;  %v4992_v28 = vld [vmem:[#allocation5 + $0x2b8] sm:$0xff]  ;;  %8579 = vst [vmem:[#allocation124_spill] sm:$0xff] %v5008_v27 }
  0x59   :  { %736 = vmatpush1.msra.mxu0 %v4710_v30  ;;  %807 = vmatpush1.msra.mxu1 %v4714_v31  ;;  %v4736_v31 = vld [vmem:[#allocation5 + $0x160] sm:$0xff]  ;;  %v4738_v30 = vld [vmem:[#allocation5 + $0x170] sm:$0xff]  ;;  %8571 = vst [vmem:[#allocation116_spill] sm:$0xff] %v4984_v29  ;;  %8574 = vst [vmem:[#allocation119_spill] sm:$0xff] %v4992_v28 }
  0x5a   :  { %737 = vmatprep.subr.mxu0 %v4718_v36  ;;  %808 = vmatprep.subr.mxu1 %v4720_v45  ;;  %8487 = vst [vmem:[#allocation32_spill] sm:$0xff] %v4736_v31  ;;  %8488 = vst [vmem:[#allocation33_spill] sm:$0xff] %v4738_v30  ;;  %v4742_v45 = vld [vmem:[#allocation5 + $0x148] sm:$0xff]  ;;  %v4976_v36 = vld [vmem:[#allocation5 + $0x2f0] sm:$0xff] }
  0x5b   :  { %738 = vmatpush1.msra.mxu0 %v4722_v54  ;;  %809 = vmatpush1.msra.mxu1 %v4726_v63  ;;  %8489 = vst [vmem:[#allocation34_spill] sm:$0xff] %v4742_v45  ;;  %v4744_v54 = vld [vmem:[#allocation5 + $0x158] sm:$0xff]  ;;  %v4748_v63 = vld [vmem:[#allocation5 + $0x140] sm:$0xff]  ;;  %8568 = vst [vmem:[#allocation113_spill] sm:$0xff] %v4976_v36 }
  0x5c   :  { %739 = vmatprep.subr.mxu0 %v4730_v9  ;;  %810 = vmatprep.subr.mxu1 %v4732_v0  ;;  %8490 = vst [vmem:[#allocation35_spill] sm:$0xff] %v4744_v54  ;;  %8491 = vst [vmem:[#allocation36_spill] sm:$0xff] %v4748_v63  ;;  %v4750_v9 = vld [vmem:[#allocation5 + $0x150] sm:$0xff]  ;;  %v4754_v0 = vld [vmem:[#allocation5 + $0x128] sm:$0xff] }
  0x5d   :  { %740 = vmatpush1.msra.mxu0 %v4736_v31  ;;  %811 = vmatpush1.msra.mxu1 %v4738_v30  ;;  %8492 = vst [vmem:[#allocation37_spill] sm:$0xff] %v4750_v9  ;;  %8493 = vst [vmem:[#allocation38_spill] sm:$0xff] %v4754_v0  ;;  %v4756_v31 = vld [vmem:[#allocation5 + $0x138] sm:$0xff]  ;;  %v4760_v30 = vld [vmem:[#allocation5 + $0x120] sm:$0xff] }
  0x5e   :  { %741 = vmatprep.subr.mxu0 %v4742_v45  ;;  %812 = vmatprep.subr.mxu1 %v4744_v54  ;;  %8494 = vst [vmem:[#allocation39_spill] sm:$0xff] %v4756_v31  ;;  %8495 = vst [vmem:[#allocation40_spill] sm:$0xff] %v4760_v30  ;;  %v4762_v45 = vld [vmem:[#allocation5 + $0x130] sm:$0xff]  ;;  %v4766_v54 = vld [vmem:[#allocation5 + $0x108] sm:$0xff] }
  0x5f   :  { %742 = vmatpush1.msra.mxu0 %v4748_v63  ;;  %813 = vmatpush1.msra.mxu1 %v4750_v9  ;;  %8496 = vst [vmem:[#allocation41_spill] sm:$0xff] %v4762_v45  ;;  %8497 = vst [vmem:[#allocation42_spill] sm:$0xff] %v4766_v54  ;;  %v4768_v63 = vld [vmem:[#allocation5 + $0x118] sm:$0xff]  ;;  %v4772_v9 = vld [vmem:[#allocation5 + $0x100] sm:$0xff] }
  0x60   :  { %743 = vmatprep.subr.mxu0 %v4754_v0  ;;  %814 = vmatprep.subr.mxu1 %v4756_v31  ;;  %8498 = vst [vmem:[#allocation43_spill] sm:$0xff] %v4768_v63  ;;  %8499 = vst [vmem:[#allocation44_spill] sm:$0xff] %v4772_v9  ;;  %v4774_v0 = vld [vmem:[#allocation5 + $0x110] sm:$0xff]  ;;  %v4778_v31 = vld [vmem:[#allocation5 + $0xe8] sm:$0xff] }
  0x61   :  { %744 = vmatpush1.msra.mxu0 %v4760_v30  ;;  %815 = vmatpush1.msra.mxu1 %v4762_v45  ;;  %8500 = vst [vmem:[#allocation45_spill] sm:$0xff] %v4774_v0  ;;  %8501 = vst [vmem:[#allocation46_spill] sm:$0xff] %v4778_v31  ;;  %v4780_v30 = vld [vmem:[#allocation5 + $0xf8] sm:$0xff]  ;;  %v4784_v45 = vld [vmem:[#allocation5 + $0xe0] sm:$0xff] }
  0x62   :  { %745 = vmatprep.subr.mxu0 %v4766_v54  ;;  %816 = vmatprep.subr.mxu1 %v4768_v63  ;;  %8502 = vst [vmem:[#allocation47_spill] sm:$0xff] %v4780_v30  ;;  %8503 = vst [vmem:[#allocation48_spill] sm:$0xff] %v4784_v45  ;;  %v4786_v54 = vld [vmem:[#allocation5 + $0xf0] sm:$0xff]  ;;  %v4790_v63 = vld [vmem:[#allocation5 + $0xc8] sm:$0xff] }
  0x63   :  { %746 = vmatpush1.msra.mxu0 %v4772_v9  ;;  %817 = vmatpush1.msra.mxu1 %v4774_v0  ;;  %8504 = vst [vmem:[#allocation49_spill] sm:$0xff] %v4786_v54  ;;  %8505 = vst [vmem:[#allocation50_spill] sm:$0xff] %v4790_v63  ;;  %v4792_v9 = vld [vmem:[#allocation5 + $0xd8] sm:$0xff]  ;;  %v4796_v0 = vld [vmem:[#allocation5 + $0xc0] sm:$0xff] }
  0x64   :  { %747 = vmatprep.subr.mxu0 %v4778_v31  ;;  %818 = vmatprep.subr.mxu1 %v4780_v30  ;;  %8506 = vst [vmem:[#allocation51_spill] sm:$0xff] %v4792_v9  ;;  %8507 = vst [vmem:[#allocation52_spill] sm:$0xff] %v4796_v0  ;;  %v4798_v31 = vld [vmem:[#allocation5 + $0xd0] sm:$0xff]  ;;  %v4802_v30 = vld [vmem:[#allocation5 + $0xa8] sm:$0xff] }
  0x65   :  { %748 = vmatpush1.msra.mxu0 %v4784_v45  ;;  %819 = vmatpush1.msra.mxu1 %v4786_v54  ;;  %8508 = vst [vmem:[#allocation53_spill] sm:$0xff] %v4798_v31  ;;  %8509 = vst [vmem:[#allocation54_spill] sm:$0xff] %v4802_v30  ;;  %v4804_v45 = vld [vmem:[#allocation5 + $0xb8] sm:$0xff]  ;;  %v4808_v54 = vld [vmem:[#allocation5 + $0xa0] sm:$0xff] }
  0x66   :  { %749 = vmatprep.subr.mxu0 %v4790_v63  ;;  %820 = vmatprep.subr.mxu1 %v4792_v9  ;;  %8510 = vst [vmem:[#allocation55_spill] sm:$0xff] %v4804_v45  ;;  %8511 = vst [vmem:[#allocation56_spill] sm:$0xff] %v4808_v54  ;;  %v4810_v63 = vld [vmem:[#allocation5 + $0xb0] sm:$0xff]  ;;  %v4814_v9 = vld [vmem:[#allocation5 + $0x88] sm:$0xff] }
  0x67   :  { %750 = vmatpush1.msra.mxu0 %v4796_v0  ;;  %821 = vmatpush1.msra.mxu1 %v4798_v31  ;;  %8512 = vst [vmem:[#allocation57_spill] sm:$0xff] %v4810_v63  ;;  %8513 = vst [vmem:[#allocation58_spill] sm:$0xff] %v4814_v9  ;;  %v4816_v0 = vld [vmem:[#allocation5 + $0x98] sm:$0xff]  ;;  %v4820_v31 = vld [vmem:[#allocation5 + $0x80] sm:$0xff] }
  0x68   :  { %751 = vmatprep.subr.mxu0 %v4802_v30  ;;  %822 = vmatprep.subr.mxu1 %v4804_v45  ;;  %8514 = vst [vmem:[#allocation59_spill] sm:$0xff] %v4816_v0  ;;  %8515 = vst [vmem:[#allocation60_spill] sm:$0xff] %v4820_v31  ;;  %v4822_v30 = vld [vmem:[#allocation5 + $0x90] sm:$0xff]  ;;  %v4826_v45 = vld [vmem:[#allocation5 + $0x68] sm:$0xff] }
  0x69   :  { %752 = vmatpush1.msra.mxu0 %v4808_v54  ;;  %823 = vmatpush1.msra.mxu1 %v4810_v63  ;;  %8516 = vst [vmem:[#allocation61_spill] sm:$0xff] %v4822_v30  ;;  %8517 = vst [vmem:[#allocation62_spill] sm:$0xff] %v4826_v45  ;;  %v4828_v54 = vld [vmem:[#allocation5 + $0x78] sm:$0xff]  ;;  %v4832_v63 = vld [vmem:[#allocation5 + $0x60] sm:$0xff] }
  0x6a   :  { %753 = vmatprep.subr.mxu0 %v4814_v9  ;;  %824 = vmatprep.subr.mxu1 %v4816_v0  ;;  %8518 = vst [vmem:[#allocation63_spill] sm:$0xff] %v4828_v54  ;;  %8519 = vst [vmem:[#allocation64_spill] sm:$0xff] %v4832_v63  ;;  %v4834_v9 = vld [vmem:[#allocation5 + $0x70] sm:$0xff]  ;;  %v4838_v0 = vld [vmem:[#allocation5 + $0x48] sm:$0xff] }
  0x6b   :  { %754 = vmatpush1.msra.mxu0 %v4820_v31  ;;  %825 = vmatpush1.msra.mxu1 %v4822_v30  ;;  %8520 = vst [vmem:[#allocation65_spill] sm:$0xff] %v4834_v9  ;;  %8521 = vst [vmem:[#allocation66_spill] sm:$0xff] %v4838_v0  ;;  %v4840_v31 = vld [vmem:[#allocation5 + $0x58] sm:$0xff]  ;;  %v4844_v30 = vld [vmem:[#allocation5 + $0x40] sm:$0xff] }
  0x6c   :  { %755 = vmatprep.subr.mxu0 %v4826_v45  ;;  %826 = vmatprep.subr.mxu1 %v4828_v54  ;;  %8522 = vst [vmem:[#allocation67_spill] sm:$0xff] %v4840_v31  ;;  %8523 = vst [vmem:[#allocation68_spill] sm:$0xff] %v4844_v30  ;;  %v4846_v45 = vld [vmem:[#allocation5 + $0x50] sm:$0xff]  ;;  %v4850_v54 = vld [vmem:[#allocation5 + $0x28] sm:$0xff] }
  0x6d   :  { %756 = vmatpush1.msra.mxu0 %v4832_v63  ;;  %827 = vmatpush1.msra.mxu1 %v4834_v9  ;;  %8524 = vst [vmem:[#allocation69_spill] sm:$0xff] %v4846_v45  ;;  %8525 = vst [vmem:[#allocation70_spill] sm:$0xff] %v4850_v54  ;;  %v4852_v63 = vld [vmem:[#allocation5 + $0x38] sm:$0xff]  ;;  %v4856_v9 = vld [vmem:[#allocation5 + $0x20] sm:$0xff] }
  0x6e   :  { %757 = vmatprep.subr.mxu0 %v4838_v0  ;;  %828 = vmatprep.subr.mxu1 %v4840_v31  ;;  %8526 = vst [vmem:[#allocation71_spill] sm:$0xff] %v4852_v63  ;;  %8527 = vst [vmem:[#allocation72_spill] sm:$0xff] %v4856_v9  ;;  %v4858_v0 = vld [vmem:[#allocation5 + $0x30] sm:$0xff]  ;;  %v4862_v31 = vld [vmem:[#allocation5 + $0x8] sm:$0xff] }
  0x6f   :  { %758 = vmatpush1.msra.mxu0 %v4844_v30  ;;  %829 = vmatpush1.msra.mxu1 %v4846_v45  ;;  %8528 = vst [vmem:[#allocation73_spill] sm:$0xff] %v4858_v0  ;;  %8529 = vst [vmem:[#allocation74_spill] sm:$0xff] %v4862_v31  ;;  %v4864_v30 = vld [vmem:[#allocation5 + $0x18] sm:$0xff]  ;;  %v4868_v45 = vld [vmem:[#allocation5] sm:$0xff] }
  0x70   :  { %759 = vmatprep.subr.mxu0 %v4850_v54  ;;  %830 = vmatprep.subr.mxu1 %v4852_v63  ;;  %8530 = vst [vmem:[#allocation75_spill] sm:$0xff] %v4864_v30  ;;  %8531 = vst [vmem:[#allocation76_spill] sm:$0xff] %v4868_v45  ;;  %v4870_v54 = vld [vmem:[#allocation5 + $0x10] sm:$0xff]  ;;  %v4874_v63 = vld [vmem:[#allocation5 + $0x3e8] sm:$0xff] }
  0x71   :  { %760 = vmatpush1.msra.mxu0 %v4856_v9  ;;  %831 = vmatpush1.msra.mxu1 %v4858_v0  ;;  %8532 = vst [vmem:[#allocation77_spill] sm:$0xff] %v4870_v54  ;;  %8533 = vst [vmem:[#allocation78_spill] sm:$0xff] %v4874_v63  ;;  %v4876_v9 = vld [vmem:[#allocation5 + $0x3f8] sm:$0xff]  ;;  %v4880_v0 = vld [vmem:[#allocation5 + $0x3e0] sm:$0xff] }
  0x72   :  { %761 = vmatprep.subr.mxu0 %v4862_v31  ;;  %832 = vmatprep.subr.mxu1 %v4864_v30  ;;  %8534 = vst [vmem:[#allocation79_spill] sm:$0xff] %v4876_v9  ;;  %8535 = vst [vmem:[#allocation80_spill] sm:$0xff] %v4880_v0  ;;  %v4882_v31 = vld [vmem:[#allocation5 + $0x3f0] sm:$0xff]  ;;  %v4886_v30 = vld [vmem:[#allocation5 + $0x3c8] sm:$0xff] }
  0x73   :  { %762 = vmatpush1.msra.mxu0 %v4868_v45  ;;  %833 = vmatpush1.msra.mxu1 %v4870_v54  ;;  %8536 = vst [vmem:[#allocation81_spill] sm:$0xff] %v4882_v31  ;;  %8537 = vst [vmem:[#allocation82_spill] sm:$0xff] %v4886_v30  ;;  %v4888_v45 = vld [vmem:[#allocation5 + $0x3d8] sm:$0xff]  ;;  %v4892_v54 = vld [vmem:[#allocation5 + $0x3c0] sm:$0xff] }
  0x74   :  { %763 = vmatprep.subr.mxu0 %v4874_v63  ;;  %834 = vmatprep.subr.mxu1 %v4876_v9  ;;  %8538 = vst [vmem:[#allocation83_spill] sm:$0xff] %v4888_v45  ;;  %8539 = vst [vmem:[#allocation84_spill] sm:$0xff] %v4892_v54  ;;  %v4894_v63 = vld [vmem:[#allocation5 + $0x3d0] sm:$0xff]  ;;  %v4898_v9 = vld [vmem:[#allocation5 + $0x3a8] sm:$0xff] }
  0x75   :  { %764 = vmatpush2.msra.mxu0 %v4880_v0  ;;  %835 = vmatpush2.msra.mxu1 %v4882_v31  ;;  %8540 = vst [vmem:[#allocation85_spill] sm:$0xff] %v4894_v63  ;;  %8541 = vst [vmem:[#allocation86_spill] sm:$0xff] %v4898_v9  ;;  %v4900_v0 = vld [vmem:[#allocation5 + $0x3b8] sm:$0xff]  ;;  %v4904_v31 = vld [vmem:[#allocation5 + $0x3a0] sm:$0xff] }
  0x76   :  { %765 = vmatprep.subr.mxu0 %v4886_v30  ;;  %836 = vmatprep.subr.mxu1 %v4888_v45  ;;  %8542 = vst [vmem:[#allocation87_spill] sm:$0xff] %v4900_v0  ;;  %8543 = vst [vmem:[#allocation88_spill] sm:$0xff] %v4904_v31  ;;  %v4906_v30 = vld [vmem:[#allocation5 + $0x3b0] sm:$0xff]  ;;  %v4910_v45 = vld [vmem:[#allocation5 + $0x388] sm:$0xff] }
  0x77   :  { %766 = vmatpush2.msra.mxu0 %v4892_v54  ;;  %837 = vmatpush2.msra.mxu1 %v4894_v63  ;;  %8544 = vst [vmem:[#allocation89_spill] sm:$0xff] %v4906_v30  ;;  %8545 = vst [vmem:[#allocation90_spill] sm:$0xff] %v4910_v45  ;;  %v4912_v54 = vld [vmem:[#allocation5 + $0x398] sm:$0xff]  ;;  %v4916_v63 = vld [vmem:[#allocation5 + $0x380] sm:$0xff] }
  0x78   :  { %767 = vmatprep.subr.mxu0 %v4898_v9  ;;  %838 = vmatprep.subr.mxu1 %v4900_v0  ;;  %8546 = vst [vmem:[#allocation91_spill] sm:$0xff] %v4912_v54  ;;  %8547 = vst [vmem:[#allocation92_spill] sm:$0xff] %v4916_v63  ;;  %v4918_v9 = vld [vmem:[#allocation5 + $0x390] sm:$0xff]  ;;  %v4922_v0 = vld [vmem:[#allocation5 + $0x368] sm:$0xff] }
  0x79   :  { %768 = vmatpush2.msra.mxu0 %v4904_v31  ;;  %839 = vmatpush2.msra.mxu1 %v4906_v30  ;;  %8548 = vst [vmem:[#allocation93_spill] sm:$0xff] %v4918_v9  ;;  %8549 = vst [vmem:[#allocation94_spill] sm:$0xff] %v4922_v0  ;;  %v4924_v31 = vld [vmem:[#allocation5 + $0x378] sm:$0xff]  ;;  %v4928_v30 = vld [vmem:[#allocation5 + $0x360] sm:$0xff] }
  0x7a   :  { %769 = vmatprep.subr.mxu0 %v4910_v45  ;;  %840 = vmatprep.subr.mxu1 %v4912_v54  ;;  %8550 = vst [vmem:[#allocation95_spill] sm:$0xff] %v4924_v31  ;;  %8551 = vst [vmem:[#allocation96_spill] sm:$0xff] %v4928_v30  ;;  %v4930_v45 = vld [vmem:[#allocation5 + $0x370] sm:$0xff]  ;;  %v4934_v54 = vld [vmem:[#allocation5 + $0x348] sm:$0xff] }
  0x7b   :  { %770 = vmatpush2.msra.mxu0 %v4916_v63  ;;  %841 = vmatpush2.msra.mxu1 %v4918_v9  ;;  %8552 = vst [vmem:[#allocation97_spill] sm:$0xff] %v4930_v45  ;;  %8553 = vst [vmem:[#allocation98_spill] sm:$0xff] %v4934_v54  ;;  %v4936_v63 = vld [vmem:[#allocation5 + $0x358] sm:$0xff]  ;;  %v4940_v9 = vld [vmem:[#allocation5 + $0x340] sm:$0xff] }
  0x7c   :  { %771 = vmatprep.subr.mxu0 %v4922_v0  ;;  %842 = vmatprep.subr.mxu1 %v4924_v31  ;;  %8554 = vst [vmem:[#allocation99_spill] sm:$0xff] %v4936_v63  ;;  %8555 = vst [vmem:[#allocation100_spill] sm:$0xff] %v4940_v9  ;;  %v4942_v0 = vld [vmem:[#allocation5 + $0x350] sm:$0xff]  ;;  %v4946_v31 = vld [vmem:[#allocation5 + $0x328] sm:$0xff] }
  0x7d   :  { %772 = vmatpush2.msra.mxu0 %v4928_v30  ;;  %843 = vmatpush2.msra.mxu1 %v4930_v45  ;;  %8556 = vst [vmem:[#allocation101_spill] sm:$0xff] %v4942_v0  ;;  %8557 = vst [vmem:[#allocation102_spill] sm:$0xff] %v4946_v31  ;;  %v4948_v30 = vld [vmem:[#allocation5 + $0x338] sm:$0xff]  ;;  %v4952_v45 = vld [vmem:[#allocation5 + $0x320] sm:$0xff] }
  0x7e   :  { %773 = vmatprep.subr.mxu0 %v4934_v54  ;;  %844 = vmatprep.subr.mxu1 %v4936_v63  ;;  %8558 = vst [vmem:[#allocation103_spill] sm:$0xff] %v4948_v30  ;;  %8559 = vst [vmem:[#allocation104_spill] sm:$0xff] %v4952_v45  ;;  %v4954_v54 = vld [vmem:[#allocation5 + $0x330] sm:$0xff]  ;;  %v4958_v63 = vld [vmem:[#allocation5 + $0x308] sm:$0xff] }
  0x7f   :  { %774 = vmatpush2.msra.mxu0 %v4940_v9  ;;  %845 = vmatpush2.msra.mxu1 %v4942_v0  ;;  %8560 = vst [vmem:[#allocation105_spill] sm:$0xff] %v4954_v54  ;;  %8561 = vst [vmem:[#allocation106_spill] sm:$0xff] %v4958_v63  ;;  %v4960_v9 = vld [vmem:[#allocation5 + $0x318] sm:$0xff]  ;;  %v4964_v0 = vld [vmem:[#allocation5 + $0x300] sm:$0xff] }
  0x80   :  { %775 = vmatprep.subr.mxu0 %v4946_v31  ;;  %846 = vmatprep.subr.mxu1 %v4948_v30  ;;  %8562 = vst [vmem:[#allocation107_spill] sm:$0xff] %v4960_v9  ;;  %8563 = vst [vmem:[#allocation108_spill] sm:$0xff] %v4964_v0  ;;  %v4966_v31 = vld [vmem:[#allocation5 + $0x310] sm:$0xff]  ;;  %v4968_v30 = vld [vmem:[#allocation5 + $0x2e8] sm:$0xff] }
  0x81   :  { %776 = vmatpush2.msra.mxu0 %v4952_v45  ;;  %847 = vmatpush2.msra.mxu1 %v4954_v54  ;;  %8564 = vst [vmem:[#allocation109_spill] sm:$0xff] %v4966_v31  ;;  %8565 = vst [vmem:[#allocation110_spill] sm:$0xff] %v4968_v30  ;;  %v4972_v45 = vld [vmem:[#allocation5 + $0x2f8] sm:$0xff]  ;;  %v4974_v54 = vld [vmem:[#allocation5 + $0x2e0] sm:$0xff] }
  0x82   :  { %777 = vmatprep.subr.mxu0 %v4958_v63  ;;  %848 = vmatprep.subr.mxu1 %v4960_v9  ;;  %8566 = vst [vmem:[#allocation111_spill] sm:$0xff] %v4972_v45  ;;  %8567 = vst [vmem:[#allocation112_spill] sm:$0xff] %v4974_v54  ;;  %v4980_v9 = vld [vmem:[#allocation5 + $0x2c8] sm:$0xff]  ;;  %v4982_v63 = vld [vmem:[#allocation5 + $0x2d8] sm:$0xff] }
  0x83   :  { %778 = vmatpush2.msra.mxu0 %v4964_v0  ;;  %849 = vmatpush2.msra.mxu1 %v4966_v31  ;;  %8569 = vst [vmem:[#allocation114_spill] sm:$0xff] %v4980_v9  ;;  %8570 = vst [vmem:[#allocation115_spill] sm:$0xff] %v4982_v63  ;;  %v4988_v31 = vld [vmem:[#allocation5 + $0x2d0] sm:$0xff]  ;;  %v4990_v0 = vld [vmem:[#allocation5 + $0x2a8] sm:$0xff] }
  0x84   :  { %779 = vmatprep.subr.mxu0 %v4968_v30  ;;  %850 = vmatprep.subr.mxu1 %v4972_v45  ;;  %8572 = vst [vmem:[#allocation117_spill] sm:$0xff] %v4988_v31  ;;  %8573 = vst [vmem:[#allocation118_spill] sm:$0xff] %v4990_v0  ;;  %v4996_v45 = vld [vmem:[#allocation5 + $0x2a0] sm:$0xff]  ;;  %v4998_v30 = vld [vmem:[#allocation5 + $0x2b0] sm:$0xff] }
  0x85   :  { %780 = vmatpush2.msra.mxu0 %v4974_v54  ;;  %851 = vmatpush2.msra.mxu1 %v4976_v36  ;;  %8575 = vst [vmem:[#allocation120_spill] sm:$0xff] %v4996_v45  ;;  %8576 = vst [vmem:[#allocation121_spill] sm:$0xff] %v4998_v30  ;;  %v5002_v54 = vld [vmem:[#allocation5 + $0x288] sm:$0xff]  ;;  %v5004_v36 = vld [vmem:[#allocation5 + $0x298] sm:$0xff] }
  0x86   :  { %781 = vmatprep.subr.mxu0 %v4980_v9  ;;  %852 = vmatprep.subr.mxu1 %v4982_v63  ;;  %8577 = vst [vmem:[#allocation122_spill] sm:$0xff] %v5002_v54  ;;  %8578 = vst [vmem:[#allocation123_spill] sm:$0xff] %v5004_v36  ;;  %v5010_v9 = vld [vmem:[#allocation5 + $0x290] sm:$0xff]  ;;  %v5014_v63 = vld [vmem:[#allocation5 + $0x268] sm:$0xff] }
  0x87   :  { %782 = vmatpush2.msra.mxu0 %v4984_v29  ;;  %853 = vmatpush2.msra.mxu1 %v4988_v31  ;;  %8580 = vst [vmem:[#allocation125_spill] sm:$0xff] %v5010_v9  ;;  %8581 = vst [vmem:[#allocation126_spill] sm:$0xff] %v5014_v63  ;;  %v5016_v29 = vld [vmem:[#allocation5 + $0x278] sm:$0xff]  ;;  %v5020_v31 = vld [vmem:[#allocation5 + $0x260] sm:$0xff] }
  0x88   :  { %783 = vmatprep.subr.mxu0 %v4990_v0  ;;  %854 = vmatprep.subr.mxu1 %v4992_v28  ;;  %8582 = vst [vmem:[#allocation127_spill] sm:$0xff] %v5016_v29  ;;  %8583 = vst [vmem:[#allocation128_spill] sm:$0xff] %v5020_v31  ;;  %v5022_v0 = vld [vmem:[#allocation5 + $0x270] sm:$0xff]  ;;  %v5026_v28 = vld [vmem:[#allocation5 + $0x248] sm:$0xff] }
  0x89   :  { %784 = vmatpush2.msra.mxu0 %v4996_v45  ;;  %855 = vmatpush2.msra.mxu1 %v4998_v30  ;;  %8584 = vst [vmem:[#allocation129_spill] sm:$0xff] %v5022_v0  ;;  %8585 = vst [vmem:[#allocation130_spill] sm:$0xff] %v5026_v28  ;;  %v5028_v45 = vld [vmem:[#allocation5 + $0x258] sm:$0xff]  ;;  %v5032_v30 = vld [vmem:[#allocation5 + $0x240] sm:$0xff] }
  0x8a   :  { %785 = vmatprep.subr.mxu0 %v5002_v54  ;;  %856 = vmatprep.subr.mxu1 %v5004_v36  ;;  %8586 = vst [vmem:[#allocation131_spill] sm:$0xff] %v5028_v45  ;;  %8587 = vst [vmem:[#allocation132_spill] sm:$0xff] %v5032_v30  ;;  %v5034_v54 = vld [vmem:[#allocation5 + $0x250] sm:$0xff]  ;;  %v5038_v36 = vld [vmem:[#allocation5 + $0x228] sm:$0xff] }
  0x8b   :  { %786 = vmatpush2.msra.mxu0 %v5008_v27  ;;  %857 = vmatpush2.msra.mxu1 %v5010_v9  ;;  %8588 = vst [vmem:[#allocation133_spill] sm:$0xff] %v5034_v54  ;;  %8589 = vst [vmem:[#allocation134_spill] sm:$0xff] %v5038_v36  ;;  %v5040_v27 = vld [vmem:[#allocation5 + $0x238] sm:$0xff]  ;;  %v5044_v9 = vld [vmem:[#allocation5 + $0x220] sm:$0xff] }
  0x8c   :  { %787 = vmatprep.subr.mxu0 %v5014_v63  ;;  %858 = vmatprep.subr.mxu1 %v5016_v29  ;;  %8590 = vst [vmem:[#allocation135_spill] sm:$0xff] %v5040_v27  ;;  %8591 = vst [vmem:[#allocation136_spill] sm:$0xff] %v5044_v9  ;;  %v5046_v63 = vld [vmem:[#allocation5 + $0x230] sm:$0xff]  ;;  %v5050_v29 = vld [vmem:[#allocation5 + $0x208] sm:$0xff] }
  0x8d   :  { %788 = vmatpush2.msra.mxu0 %v5020_v31  ;;  %859 = vmatpush2.msra.mxu1 %v5022_v0  ;;  %8592 = vst [vmem:[#allocation137_spill] sm:$0xff] %v5046_v63  ;;  %8593 = vst [vmem:[#allocation138_spill] sm:$0xff] %v5050_v29  ;;  %v5052_v31 = vld [vmem:[#allocation5 + $0x218] sm:$0xff]  ;;  %v5056_v0 = vld [vmem:[#allocation5 + $0x200] sm:$0xff] }
  0x8e   :  { %789 = vmatprep.subr.mxu0 %v5026_v28  ;;  %860 = vmatprep.subr.mxu1 %v5028_v45  ;;  %8594 = vst [vmem:[#allocation139_spill] sm:$0xff] %v5052_v31  ;;  %8595 = vst [vmem:[#allocation140_spill] sm:$0xff] %v5056_v0  ;;  %v5058_v28 = vld [vmem:[#allocation5 + $0x210] sm:$0xff] }
  0x8f   :  { %790 = vmatpush2.msra.mxu0 %v5032_v30  ;;  %861 = vmatpush2.msra.mxu1 %v5034_v54  ;;  %8596 = vst [vmem:[#allocation141_spill] sm:$0xff] %v5058_v28 }
  0x90   :  { %791 = vmatprep.subr.mxu0 %v5038_v36  ;;  %862 = vmatprep.subr.mxu1 %v5040_v27  ;;  %v76_v27 = vlaneseq }
  0x91   :  { %792 = vmatpush2.msra.mxu0 %v5044_v9  ;;  %863 = vmatpush2.msra.mxu1 %v5046_v63 }
  0x92   :  { %793 = vmatprep.subr.mxu0 %v5050_v29  ;;  %864 = vmatprep.subr.mxu1 %v5052_v31  ;;  %v5068_v36 = vshrl.u32 %v76_v27, 7 }
  0x93   :  { %794 = vmatpush2.msra.mxu0 %v5056_v0  ;;  %865 = vmatpush2.msra.mxu1 %v5058_v28  ;;  %v74_v0 = vld [vmem:[%s7914_s3] sm:$0xf] }
  0x94   :  { %897 = vmatprep.subr.mxu0 %v4487_v10  ;;  %968 = vmatprep.subr.mxu1 %v4489_v11  ;;  %v8049_v63 = vsub.s32 0, %v5068_v36  ;;  %v8051_v29 = vsub.s32 2, %v5068_v36  ;;  %v8055_v11 = vsub.s32 1, %v5068_v36  ;;  %v8056_v27 = vsub.s32 3, %v5068_v36 }
  0x96   :  { %v79_v31 = vrot.slane %v74_v0, %v8049_v63  ;;  %v5089_v30 = vrot.slane %v74_v0, %v8051_v29  ;;  %v83_v25 = vrot.slane %v74_v0, %v8055_v11  ;;  %v5095_v24 = vrot.slane %v74_v0, %v8056_v27 }
  0xe2   :  { %v5070_v54 = vpop.f32.mrf.mxu0  ;;  %v5072_v9 = vpop.f32.mrf.mxu1 }
  0xe4   :  { %v5079_v28 = vpop.f32.mrf.mxu0  ;;  %v5081_v10 = vpop.f32.mrf.mxu1 }
  0xe8   :  { %v193_v45 = vpop.f32.mrf.mxu0  ;;  %v306_v26 = vpop.f32.mrf.mxu1 }
  0xe9   :  { %v5097_v23 = vadd.f32 %v193_v45, %v79_v31  ;;  %v5100_v22 = vadd.f32 %v306_v26, %v5089_v30 }
  0xea   :  { %v195_v21 = vpop.f32.mrf.mxu0  ;;  %v308_v63 = vpop.f32.mrf.mxu1 }
  0xeb   :  { %8597 = vst [vmem:[#allocation142_spill] sm:$0xff] %v5097_v23  ;;  %8598 = vst [vmem:[#allocation143_spill] sm:$0xff] %v5100_v22  ;;  %v5102_v20 = vadd.f32 %v195_v21, %v83_v25  ;;  %v5105_v29 = vadd.f32 %v308_v63, %v5095_v24 }
  0xed   :  { %8599 = vst [vmem:[#allocation144_spill] sm:$0xff] %v5102_v20  ;;  %8600 = vst [vmem:[#allocation145_spill] sm:$0xff] %v5105_v29 }
  0xee   :  { %v199_v19 = vpop.f32.mrf.mxu0  ;;  %v312_v18 = vpop.f32.mrf.mxu1 }
  0xef   :  { %v5107_v17 = vadd.f32 %v199_v19, %v79_v31  ;;  %v5110_v11 = vadd.f32 %v312_v18, %v5089_v30 }
  0xf0   :  { %v201_v0 = vpop.f32.mrf.mxu0  ;;  %v314_v45 = vpop.f32.mrf.mxu1 }
  0xf1   :  { %8601 = vst [vmem:[#allocation146_spill] sm:$0xff] %v5107_v17  ;;  %8602 = vst [vmem:[#allocation147_spill] sm:$0xff] %v5110_v11  ;;  %v5112_v27 = vadd.f32 %v201_v0, %v83_v25  ;;  %v5115_v26 = vadd.f32 %v314_v45, %v5095_v24 }
  0xf3   :  { %8603 = vst [vmem:[#allocation148_spill] sm:$0xff] %v5112_v27  ;;  %8604 = vst [vmem:[#allocation149_spill] sm:$0xff] %v5115_v26 }
  0xf4   :  { %v205_v22 = vpop.f32.mrf.mxu0  ;;  %v318_v21 = vpop.f32.mrf.mxu1 }
  0xf5   :  { %v5117_v20 = vadd.f32 %v205_v22, %v79_v31  ;;  %v5120_v63 = vadd.f32 %v318_v21, %v5089_v30 }
  0xf6   :  { %v207_v29 = vpop.f32.mrf.mxu0  ;;  %v320_v19 = vpop.f32.mrf.mxu1 }
  0xf7   :  { %8605 = vst [vmem:[#allocation150_spill] sm:$0xff] %v5117_v20  ;;  %8606 = vst [vmem:[#allocation151_spill] sm:$0xff] %v5120_v63  ;;  %v5122_v17 = vadd.f32 %v207_v29, %v83_v25  ;;  %v5125_v18 = vadd.f32 %v320_v19, %v5095_v24 }
  0xf9   :  { %8607 = vst [vmem:[#allocation152_spill] sm:$0xff] %v5122_v17  ;;  %8608 = vst [vmem:[#allocation153_spill] sm:$0xff] %v5125_v18 }
  0xfa   :  { %v211_v11 = vpop.f32.mrf.mxu0  ;;  %v324_v0 = vpop.f32.mrf.mxu1 }
  0xfb   :  { %v5127_v27 = vadd.f32 %v211_v11, %v79_v31  ;;  %v5130_v45 = vadd.f32 %v324_v0, %v5089_v30 }
  0xfc   :  { %v213_v26 = vpop.f32.mrf.mxu0  ;;  %v326_v22 = vpop.f32.mrf.mxu1 }
  0xfd   :  { %8609 = vst [vmem:[#allocation154_spill] sm:$0xff] %v5127_v27  ;;  %8610 = vst [vmem:[#allocation155_spill] sm:$0xff] %v5130_v45  ;;  %v5132_v20 = vadd.f32 %v213_v26, %v83_v25  ;;  %v5135_v21 = vadd.f32 %v326_v22, %v5095_v24 }
  0xff   :  { %8611 = vst [vmem:[#allocation156_spill] sm:$0xff] %v5132_v20  ;;  %8612 = vst [vmem:[#allocation157_spill] sm:$0xff] %v5135_v21 }
 0x100   :  { %v217_v63 = vpop.f32.mrf.mxu0  ;;  %v330_v29 = vpop.f32.mrf.mxu1 }
 0x101   :  { %v5137_v17 = vadd.f32 %v217_v63, %v79_v31  ;;  %v5140_v19 = vadd.f32 %v330_v29, %v5089_v30 }
 0x102   :  { %v219_v18 = vpop.f32.mrf.mxu0  ;;  %v332_v11 = vpop.f32.mrf.mxu1 }
 0x103   :  { %8613 = vst [vmem:[#allocation158_spill] sm:$0xff] %v5137_v17  ;;  %8614 = vst [vmem:[#allocation159_spill] sm:$0xff] %v5140_v19  ;;  %v5142_v27 = vadd.f32 %v219_v18, %v83_v25  ;;  %v5145_v0 = vadd.f32 %v332_v11, %v5095_v24 }
 0x105   :  { %8615 = vst [vmem:[#allocation160_spill] sm:$0xff] %v5142_v27  ;;  %8616 = vst [vmem:[#allocation161_spill] sm:$0xff] %v5145_v0 }
 0x106   :  { %v223_v45 = vpop.f32.mrf.mxu0  ;;  %v336_v26 = vpop.f32.mrf.mxu1 }
 0x107   :  { %v5147_v20 = vadd.f32 %v223_v45, %v79_v31  ;;  %v5150_v22 = vadd.f32 %v336_v26, %v5089_v30 }
 0x108   :  { %v225_v21 = vpop.f32.mrf.mxu0  ;;  %v338_v63 = vpop.f32.mrf.mxu1 }
 0x109   :  { %8617 = vst [vmem:[#allocation162_spill] sm:$0xff] %v5147_v20  ;;  %8618 = vst [vmem:[#allocation163_spill] sm:$0xff] %v5150_v22  ;;  %v5152_v17 = vadd.f32 %v225_v21, %v83_v25  ;;  %v5155_v29 = vadd.f32 %v338_v63, %v5095_v24  ;;  %v188_v21 = vadd.f32 %v5070_v54, %v79_v31 }
 0x10a   :  { %v190_v63 = vadd.f32 %v5079_v28, %v83_v25 }
 0x10b   :  { %8619 = vst [vmem:[#allocation164_spill] sm:$0xff] %v5152_v17  ;;  %8620 = vst [vmem:[#allocation165_spill] sm:$0xff] %v5155_v29 }
 0x10c   :  { %v229_v19 = vpop.f32.mrf.mxu0  ;;  %v342_v18 = vpop.f32.mrf.mxu1 }
 0x10d   :  { %v5157_v27 = vadd.f32 %v229_v19, %v79_v31  ;;  %v5160_v11 = vadd.f32 %v342_v18, %v5089_v30 }
 0x10e   :  { %v231_v0 = vpop.f32.mrf.mxu0  ;;  %v344_v45 = vpop.f32.mrf.mxu1 }
 0x10f   :  { %8621 = vst [vmem:[#allocation166_spill] sm:$0xff] %v5157_v27  ;;  %8622 = vst [vmem:[#allocation167_spill] sm:$0xff] %v5160_v11  ;;  %v5162_v20 = vadd.f32 %v231_v0, %v83_v25  ;;  %v5165_v26 = vadd.f32 %v344_v45, %v5095_v24  ;;  %v301_v0 = vadd.f32 %v5072_v9, %v5089_v30 }
 0x110   :  { %v303_v45 = vadd.f32 %v5081_v10, %v5095_v24 }
 0x111   :  { %8623 = vst [vmem:[#allocation168_spill] sm:$0xff] %v5162_v20  ;;  %8624 = vst [vmem:[#allocation169_spill] sm:$0xff] %v5165_v26 }
 0x112   :  { %v606_v22 = vpop.f32.mrf.mxu0  ;;  %v677_v18 = vpop.f32.mrf.mxu1 }
 0x113   :  { %v682_v29 = vadd.f32 %v606_v22, %v188_v21  ;;  %v684_v11 = vadd.f32 %v677_v18, %v301_v0  ;;  %v5189_v18 = vld [vmem:[#allocation2 + $0x1d8] sm:$0xff]  ;;  %v5192_v0 = vld [vmem:[#allocation2 + $0x1c0] sm:$0xff] }
 0x114   :  { %v608_v17 = vpop.f32.mrf.mxu0  ;;  %v679_v20 = vpop.f32.mrf.mxu1 }
 0x115   :  { %v3376_v23 = vmul.f32 -1.442695, %v682_v29  ;;  %v683_v19 = vadd.f32 %v608_v17, %v190_v63  ;;  %v3378_v31 = vmul.f32 -1.442695, %v684_v11  ;;  %v685_v26 = vadd.f32 %v679_v20, %v303_v45  ;;  %v5180_v11 = vld [vmem:[#allocation2 + $0x1e0] sm:$0xff]  ;;  %v5195_v45 = vld [vmem:[#allocation2 + $0x1d0] sm:$0xff] }
 0x117   :  { %3484 = vpow2.f32 %v3376_v23  ;;  %v3377_v27 = vmul.f32 -1.442695, %v683_v19  ;;  %v5186_v19 = vld [vmem:[#allocation2 + $0x1c8] sm:$0xff] }
 0x119   :  { %3486 = vpow2.f32 %v3377_v27 }
 0x11a   :  { %3488 = vpow2.f32 %v3378_v31  ;;  %v5198_v31 = vld [vmem:[#allocation2 + $0x1a8] sm:$0xff] }
 0x124   :  { %v3485_v54 = vpop.eup %3484 }
 0x125   :  { %v695_v25 = vadd.f32 1.0, %v3485_v54  ;;  %v5201_v54 = vld [vmem:[#allocation2 + $0x1b8] sm:$0xff] }
 0x126   :  { %v3487_v28 = vpop.eup %3486 }
 0x127   :  { %3490 = vrcp.f32 %v695_v25  ;;  %v696_v17 = vadd.f32 1.0, %v3487_v28  ;;  %v3489_v23 = vpop.eup %3488  ;;  %v5204_v25 = vld [vmem:[#allocation2 + $0x1a0] sm:$0xff]  ;;  %v5207_v28 = vld [vmem:[#allocation2 + $0x1b0] sm:$0xff] }
 0x128   :  { %3492 = vtanh.f32 %v685_v26  ;;  %v697_v30 = vadd.f32 1.0, %v3489_v23  ;;  %v5183_v26 = vld [vmem:[#allocation2 + $0x1f0] sm:$0xff]  ;;  %v5213_v23 = vld [vmem:[#allocation2 + $0x198] sm:$0xff] }
 0x129   :  { %3494 = vrcp.f32 %v696_v17  ;;  %v5210_v17 = vld [vmem:[#allocation2 + $0x188] sm:$0xff] }
 0x12a   :  { %3496 = vrcp.f32 %v697_v30  ;;  %v5225_v30 = vld [vmem:[#allocation2 + $0x178] sm:$0xff] }
 0x134   :  { %v3491_v27 = vpop.eup %3490 }
 0x135   :  { %v3493_v22 = vpop.eup %3492 }
 0x136   :  { %v3495_v29 = vpop.eup %3494  ;;  %v706_v21 = vmul.f32 %v3493_v22, %v3491_v27  ;;  %v5216_v27 = vld [vmem:[#allocation2 + $0x180] sm:$0xff]  ;;  %v5219_v22 = vld [vmem:[#allocation2 + $0x190] sm:$0xff] }
 0x137   :  { %v705_v9 = vmul.f32 0.0, %v3495_v29  ;;  %v3497_v20 = vpop.eup %3496  ;;  %v5222_v29 = vld [vmem:[#allocation2 + $0x168] sm:$0xff] }
 0x139   :  { %v5173_v63 = vadd.f32 %v706_v21, %v705_v9  ;;  %v5228_v9 = vld [vmem:[#allocation2 + $0x160] sm:$0xff]  ;;  %v5231_v21 = vld [vmem:[#allocation2 + $0x170] sm:$0xff] }
 0x13b   :  { %3498 = vtanh.f32 %v5173_v63 }
 0x148   :  { %v3499_v24 = vpop.eup %3498 }
 0x149   :  { %v5176_v10 = vmul.f32 %v3499_v24, %v3497_v20  ;;  %v8666_v20 = vld [vmem:[#allocation51_spill] sm:$0xff]  ;;  %v8667_v24 = vld [vmem:[#allocation52_spill] sm:$0xff] }
 0x14b   :  { %796 = vmatmul.mubr.f32.vlgmr.msra.gmra.mxu0 %v5176_v10  ;;  %867 = vmatmul.mubr.f32.vlgmr.msra.gmra.mxu1 %v5176_v10 }
 0x14c   :  { %898 = vmatpush1.msra.mxu0 %v5180_v11  ;;  %969 = vmatpush1.msra.mxu1 %v5183_v26 }
 0x14d   :  { %899 = vmatprep.subr.mxu0 %v5186_v19  ;;  %970 = vmatprep.subr.mxu1 %v5189_v18 }
 0x14e   :  { %900 = vmatpush1.msra.mxu0 %v5192_v0  ;;  %971 = vmatpush1.msra.mxu1 %v5195_v45 }
 0x14f   :  { %901 = vmatprep.subr.mxu0 %v5198_v31  ;;  %972 = vmatprep.subr.mxu1 %v5201_v54 }
 0x150   :  { %902 = vmatpush1.msra.mxu0 %v5204_v25  ;;  %973 = vmatpush1.msra.mxu1 %v5207_v28 }
 0x151   :  { %903 = vmatprep.subr.mxu0 %v5210_v17  ;;  %974 = vmatprep.subr.mxu1 %v5213_v23 }
 0x152   :  { %904 = vmatpush1.msra.mxu0 %v5216_v27  ;;  %975 = vmatpush1.msra.mxu1 %v5219_v22 }
 0x153   :  { %905 = vmatprep.subr.mxu0 %v5222_v29  ;;  %976 = vmatprep.subr.mxu1 %v5225_v30 }
 0x154   :  { %906 = vmatpush1.msra.mxu0 %v5228_v9  ;;  %977 = vmatpush1.msra.mxu1 %v5231_v21 }
 0x155   :  { %907 = vmatprep.subr.mxu0 %v4509_v32  ;;  %978 = vmatprep.subr.mxu1 %v4511_v33  ;;  %v8625_v32 = vld [vmem:[#allocation11_spill] sm:$0xff]  ;;  %v8626_v33 = vld [vmem:[#allocation12_spill] sm:$0xff] }
 0x156   :  { %908 = vmatpush1.msra.mxu0 %v4513_v34  ;;  %979 = vmatpush1.msra.mxu1 %v4515_v35  ;;  %v8627_v34 = vmov 0.0   ;;  %v8628_v35 = vld [vmem:[#allocation13_spill] sm:$0xff] }
 0x157   :  { %909 = vmatprep.subr.mxu0 %v4524_v37  ;;  %980 = vmatprep.subr.mxu1 %v4526_v38  ;;  %v8629_v37 = vld [vmem:[#allocation14_spill] sm:$0xff]  ;;  %v8630_v38 = vld [vmem:[#allocation15_spill] sm:$0xff] }
 0x158   :  { %910 = vmatpush1.msra.mxu0 %v4530_v39  ;;  %981 = vmatpush1.msra.mxu1 %v4532_v40  ;;  %v8631_v39 = vld [vmem:[#allocation16_spill] sm:$0xff]  ;;  %v8632_v40 = vld [vmem:[#allocation17_spill] sm:$0xff] }
 0x159   :  { %911 = vmatprep.subr.mxu0 %v4536_v41  ;;  %982 = vmatprep.subr.mxu1 %v4538_v42  ;;  %v8633_v41 = vld [vmem:[#allocation18_spill] sm:$0xff]  ;;  %v8634_v42 = vld [vmem:[#allocation19_spill] sm:$0xff] }
 0x15a   :  { %912 = vmatpush1.msra.mxu0 %v4544_v43  ;;  %983 = vmatpush1.msra.mxu1 %v4546_v44  ;;  %v8635_v43 = vld [vmem:[#allocation20_spill] sm:$0xff]  ;;  %v8636_v44 = vld [vmem:[#allocation21_spill] sm:$0xff] }
 0x15b   :  { %913 = vmatprep.subr.mxu0 %v4555_v46  ;;  %984 = vmatprep.subr.mxu1 %v4557_v47  ;;  %v8637_v46 = vld [vmem:[#allocation22_spill] sm:$0xff]  ;;  %v8638_v47 = vld [vmem:[#allocation23_spill] sm:$0xff] }
 0x15c   :  { %914 = vmatpush1.msra.mxu0 %v4561_v48  ;;  %985 = vmatpush1.msra.mxu1 %v4563_v49  ;;  %v8639_v48 = vld [vmem:[#allocation24_spill] sm:$0xff]  ;;  %v8640_v49 = vld [vmem:[#allocation25_spill] sm:$0xff] }
 0x15d   :  { %915 = vmatprep.subr.mxu0 %v4567_v50  ;;  %986 = vmatprep.subr.mxu1 %v4569_v51  ;;  %v8641_v50 = vld [vmem:[#allocation26_spill] sm:$0xff]  ;;  %v8642_v51 = vld [vmem:[#allocation27_spill] sm:$0xff] }
 0x15e   :  { %916 = vmatpush1.msra.mxu0 %v4575_v52  ;;  %987 = vmatpush1.msra.mxu1 %v4577_v53  ;;  %v8643_v52 = vld [vmem:[#allocation28_spill] sm:$0xff]  ;;  %v8644_v53 = vld [vmem:[#allocation29_spill] sm:$0xff] }
 0x15f   :  { %917 = vmatprep.subr.mxu0 %v4586_v55  ;;  %988 = vmatprep.subr.mxu1 %v4588_v56  ;;  %v8645_v55 = vld [vmem:[#allocation30_spill] sm:$0xff]  ;;  %v8646_v56 = vld [vmem:[#allocation31_spill] sm:$0xff] }
 0x160   :  { %918 = vmatpush1.msra.mxu0 %v4592_v57  ;;  %989 = vmatpush1.msra.mxu1 %v4594_v58  ;;  %v8647_v57 = vld [vmem:[#allocation32_spill] sm:$0xff]  ;;  %v8648_v58 = vld [vmem:[#allocation33_spill] sm:$0xff] }
 0x161   :  { %919 = vmatprep.subr.mxu0 %v4598_v59  ;;  %990 = vmatprep.subr.mxu1 %v4600_v60  ;;  %v8649_v59 = vld [vmem:[#allocation34_spill] sm:$0xff]  ;;  %v8650_v60 = vld [vmem:[#allocation35_spill] sm:$0xff] }
 0x162   :  { %920 = vmatpush1.msra.mxu0 %v4606_v61  ;;  %991 = vmatpush1.msra.mxu1 %v4608_v62  ;;  %v8651_v61 = vld [vmem:[#allocation36_spill] sm:$0xff]  ;;  %v8652_v62 = vld [vmem:[#allocation37_spill] sm:$0xff] }
 0x163   :  { %921 = vmatprep.subr.mxu0 %v4617_v1  ;;  %992 = vmatprep.subr.mxu1 %v4619_v2  ;;  %v8653_v1 = vld [vmem:[#allocation38_spill] sm:$0xff]  ;;  %v8654_v2 = vld [vmem:[#allocation39_spill] sm:$0xff] }
 0x164   :  { %922 = vmatpush1.msra.mxu0 %v4623_v3  ;;  %993 = vmatpush1.msra.mxu1 %v4625_v4  ;;  %v8655_v3 = vld [vmem:[#allocation40_spill] sm:$0xff]  ;;  %v8656_v4 = vld [vmem:[#allocation41_spill] sm:$0xff] }
 0x165   :  { %923 = vmatprep.subr.mxu0 %v4629_v5  ;;  %994 = vmatprep.subr.mxu1 %v4631_v6  ;;  %v8657_v5 = vld [vmem:[#allocation42_spill] sm:$0xff]  ;;  %v8658_v6 = vld [vmem:[#allocation43_spill] sm:$0xff] }
 0x166   :  { %924 = vmatpush1.msra.mxu0 %v4637_v7  ;;  %995 = vmatpush1.msra.mxu1 %v4639_v8  ;;  %v8659_v7 = vld [vmem:[#allocation44_spill] sm:$0xff]  ;;  %v8660_v8 = vld [vmem:[#allocation45_spill] sm:$0xff] }
 0x167   :  { %925 = vmatprep.subr.mxu0 %v4648_v12  ;;  %996 = vmatprep.subr.mxu1 %v4650_v13  ;;  %v8661_v12 = vld [vmem:[#allocation46_spill] sm:$0xff]  ;;  %v8662_v13 = vld [vmem:[#allocation47_spill] sm:$0xff] }
 0x168   :  { %926 = vmatpush1.msra.mxu0 %v4654_v14  ;;  %997 = vmatpush1.msra.mxu1 %v4656_v15  ;;  %v8663_v14 = vld [vmem:[#allocation48_spill] sm:$0xff]  ;;  %v8664_v15 = vld [vmem:[#allocation49_spill] sm:$0xff] }
 0x169   :  { %927 = vmatprep.subr.mxu0 %v4660_v16  ;;  %998 = vmatprep.subr.mxu1 %v8625_v32  ;;  %v8665_v16 = vld [vmem:[#allocation50_spill] sm:$0xff] }
 0x16a   :  { %928 = vmatpush1.msra.mxu0 %v8626_v33  ;;  %961 = vmatprep.mubr.f32.mxu0 %v8627_v34  ;;  %v8669_v32 = vld [vmem:[#allocation54_spill] sm:$0xff]  ;;  %v8670_v33 = vld [vmem:[#allocation55_spill] sm:$0xff] }
 0x16b   :  { %999 = vmatpush1.msra.mxu1 %v8628_v35  ;;  %1032 = vmatprep.mubr.f32.mxu1 %v8627_v34  ;;  %v8671_v35 = vld [vmem:[#allocation56_spill] sm:$0xff] }
 0x16c   :  { %962 = vmatmul.mubr.f32.vlgmr.msra.gmra.mxu0 %v5176_v10  ;;  %1033 = vmatmul.mubr.f32.vlgmr.msra.gmra.mxu1 %v5176_v10  ;;  %v8668_v10 = vld [vmem:[#allocation53_spill] sm:$0xff] }
 0x16d   :  { %1067 = vmatprep.subr.mxu0 %v8629_v37  ;;  %1138 = vmatprep.subr.mxu1 %v8630_v38  ;;  %v8672_v37 = vld [vmem:[#allocation57_spill] sm:$0xff]  ;;  %v8673_v38 = vld [vmem:[#allocation58_spill] sm:$0xff] }
 0x16e   :  { %1068 = vmatpush1.msra.mxu0 %v8631_v39  ;;  %1139 = vmatpush1.msra.mxu1 %v8632_v40  ;;  %v8674_v39 = vld [vmem:[#allocation59_spill] sm:$0xff]  ;;  %v8675_v40 = vld [vmem:[#allocation60_spill] sm:$0xff] }
 0x16f   :  { %1069 = vmatprep.subr.mxu0 %v8633_v41  ;;  %1140 = vmatprep.subr.mxu1 %v8634_v42  ;;  %v8676_v41 = vld [vmem:[#allocation61_spill] sm:$0xff]  ;;  %v8677_v42 = vld [vmem:[#allocation62_spill] sm:$0xff] }
 0x170   :  { %1070 = vmatpush1.msra.mxu0 %v8635_v43  ;;  %1141 = vmatpush1.msra.mxu1 %v8636_v44  ;;  %v8678_v43 = vld [vmem:[#allocation63_spill] sm:$0xff]  ;;  %v8679_v44 = vld [vmem:[#allocation64_spill] sm:$0xff] }
 0x171   :  { %1071 = vmatprep.subr.mxu0 %v8637_v46  ;;  %1142 = vmatprep.subr.mxu1 %v8638_v47  ;;  %v8680_v46 = vld [vmem:[#allocation65_spill] sm:$0xff]  ;;  %v8681_v47 = vld [vmem:[#allocation66_spill] sm:$0xff] }
 0x172   :  { %1072 = vmatpush1.msra.mxu0 %v8639_v48  ;;  %1143 = vmatpush1.msra.mxu1 %v8640_v49  ;;  %v8682_v48 = vld [vmem:[#allocation67_spill] sm:$0xff]  ;;  %v8683_v49 = vld [vmem:[#allocation68_spill] sm:$0xff] }
 0x173   :  { %1073 = vmatprep.subr.mxu0 %v8641_v50  ;;  %1144 = vmatprep.subr.mxu1 %v8642_v51  ;;  %v8684_v50 = vld [vmem:[#allocation69_spill] sm:$0xff]  ;;  %v8685_v51 = vld [vmem:[#allocation70_spill] sm:$0xff] }
 0x174   :  { %1074 = vmatpush1.msra.mxu0 %v8643_v52  ;;  %1145 = vmatpush1.msra.mxu1 %v8644_v53  ;;  %v8686_v52 = vld [vmem:[#allocation71_spill] sm:$0xff]  ;;  %v8687_v53 = vld [vmem:[#allocation72_spill] sm:$0xff] }
 0x175   :  { %1075 = vmatprep.subr.mxu0 %v8645_v55  ;;  %1146 = vmatprep.subr.mxu1 %v8646_v56  ;;  %v8688_v55 = vld [vmem:[#allocation73_spill] sm:$0xff]  ;;  %v8689_v56 = vld [vmem:[#allocation74_spill] sm:$0xff] }
 0x176   :  { %1076 = vmatpush1.msra.mxu0 %v8647_v57  ;;  %1147 = vmatpush1.msra.mxu1 %v8648_v58  ;;  %v8690_v57 = vld [vmem:[#allocation75_spill] sm:$0xff]  ;;  %v8691_v58 = vld [vmem:[#allocation76_spill] sm:$0xff] }
 0x177   :  { %1077 = vmatprep.subr.mxu0 %v8649_v59  ;;  %1148 = vmatprep.subr.mxu1 %v8650_v60  ;;  %v8692_v59 = vld [vmem:[#allocation77_spill] sm:$0xff]  ;;  %v8693_v60 = vld [vmem:[#allocation78_spill] sm:$0xff] }
 0x178   :  { %1078 = vmatpush1.msra.mxu0 %v8651_v61  ;;  %1149 = vmatpush1.msra.mxu1 %v8652_v62  ;;  %v8694_v61 = vld [vmem:[#allocation79_spill] sm:$0xff]  ;;  %v8695_v62 = vld [vmem:[#allocation80_spill] sm:$0xff] }
 0x179   :  { %1079 = vmatprep.subr.mxu0 %v8653_v1  ;;  %1150 = vmatprep.subr.mxu1 %v8654_v2  ;;  %v8696_v1 = vld [vmem:[#allocation81_spill] sm:$0xff]  ;;  %v8697_v2 = vld [vmem:[#allocation82_spill] sm:$0xff] }
 0x17a   :  { %1080 = vmatpush1.msra.mxu0 %v8655_v3  ;;  %1151 = vmatpush1.msra.mxu1 %v8656_v4  ;;  %v8698_v3 = vld [vmem:[#allocation83_spill] sm:$0xff]  ;;  %v8699_v4 = vld [vmem:[#allocation84_spill] sm:$0xff] }
 0x17b   :  { %1081 = vmatprep.subr.mxu0 %v8657_v5  ;;  %1152 = vmatprep.subr.mxu1 %v8658_v6  ;;  %v8700_v5 = vld [vmem:[#allocation85_spill] sm:$0xff]  ;;  %v8701_v6 = vld [vmem:[#allocation86_spill] sm:$0xff] }
 0x17c   :  { %1082 = vmatpush1.msra.mxu0 %v8659_v7  ;;  %1153 = vmatpush1.msra.mxu1 %v8660_v8  ;;  %v8702_v7 = vld [vmem:[#allocation87_spill] sm:$0xff]  ;;  %v8703_v8 = vld [vmem:[#allocation88_spill] sm:$0xff] }
 0x17d   :  { %1083 = vmatprep.subr.mxu0 %v8661_v12  ;;  %1154 = vmatprep.subr.mxu1 %v8662_v13  ;;  %v8704_v12 = vld [vmem:[#allocation89_spill] sm:$0xff]  ;;  %v8705_v13 = vld [vmem:[#allocation90_spill] sm:$0xff] }
 0x17e   :  { %1084 = vmatpush1.msra.mxu0 %v8663_v14  ;;  %1155 = vmatpush1.msra.mxu1 %v8664_v15  ;;  %v8706_v14 = vld [vmem:[#allocation91_spill] sm:$0xff]  ;;  %v8707_v15 = vld [vmem:[#allocation92_spill] sm:$0xff] }
 0x17f   :  { %1085 = vmatprep.subr.mxu0 %v8665_v16  ;;  %1156 = vmatprep.subr.mxu1 %v8666_v20  ;;  %v8708_v16 = vld [vmem:[#allocation93_spill] sm:$0xff]  ;;  %v8709_v20 = vld [vmem:[#allocation94_spill] sm:$0xff] }
 0x180   :  { %1086 = vmatpush1.msra.mxu0 %v8667_v24  ;;  %1157 = vmatpush1.msra.mxu1 %v8668_v10  ;;  %v8710_v24 = vld [vmem:[#allocation95_spill] sm:$0xff]  ;;  %v8711_v10 = vld [vmem:[#allocation96_spill] sm:$0xff] }
 0x181   :  { %1087 = vmatprep.subr.mxu0 %v8669_v32  ;;  %1158 = vmatprep.subr.mxu1 %v8670_v33  ;;  %v8712_v32 = vld [vmem:[#allocation97_spill] sm:$0xff]  ;;  %v8713_v33 = vld [vmem:[#allocation98_spill] sm:$0xff] }
 0x182   :  { %1088 = vmatpush1.msra.mxu0 %v8671_v35  ;;  %1159 = vmatpush1.msra.mxu1 %v8672_v37  ;;  %v8714_v35 = vld [vmem:[#allocation99_spill] sm:$0xff]  ;;  %v8715_v37 = vld [vmem:[#allocation100_spill] sm:$0xff] }
 0x183   :  { %1089 = vmatprep.subr.mxu0 %v8673_v38  ;;  %1160 = vmatprep.subr.mxu1 %v8674_v39  ;;  %v8716_v38 = vld [vmem:[#allocation101_spill] sm:$0xff]  ;;  %v8717_v39 = vld [vmem:[#allocation102_spill] sm:$0xff] }
 0x184   :  { %1090 = vmatpush1.msra.mxu0 %v8675_v40  ;;  %1161 = vmatpush1.msra.mxu1 %v8676_v41  ;;  %v8718_v40 = vld [vmem:[#allocation103_spill] sm:$0xff]  ;;  %v8719_v41 = vld [vmem:[#allocation104_spill] sm:$0xff] }
 0x185   :  { %1091 = vmatprep.subr.mxu0 %v8677_v42  ;;  %1162 = vmatprep.subr.mxu1 %v8678_v43  ;;  %v8720_v42 = vld [vmem:[#allocation105_spill] sm:$0xff]  ;;  %v8721_v43 = vld [vmem:[#allocation106_spill] sm:$0xff] }
 0x186   :  { %1092 = vmatpush1.msra.mxu0 %v8679_v44  ;;  %1163 = vmatpush1.msra.mxu1 %v8680_v46  ;;  %v8722_v44 = vld [vmem:[#allocation107_spill] sm:$0xff]  ;;  %v8723_v46 = vld [vmem:[#allocation108_spill] sm:$0xff] }
 0x187   :  { %1093 = vmatprep.subr.mxu0 %v8681_v47  ;;  %1164 = vmatprep.subr.mxu1 %v8682_v48  ;;  %v8724_v47 = vld [vmem:[#allocation109_spill] sm:$0xff]  ;;  %v8725_v48 = vld [vmem:[#allocation110_spill] sm:$0xff] }
 0x188   :  { %1094 = vmatpush1.msra.mxu0 %v8683_v49  ;;  %1165 = vmatpush1.msra.mxu1 %v8684_v50  ;;  %v8726_v49 = vld [vmem:[#allocation111_spill] sm:$0xff]  ;;  %v8727_v50 = vld [vmem:[#allocation112_spill] sm:$0xff] }
 0x189   :  { %1095 = vmatprep.subr.mxu0 %v8685_v51  ;;  %1166 = vmatprep.subr.mxu1 %v8686_v52  ;;  %v8728_v51 = vld [vmem:[#allocation113_spill] sm:$0xff]  ;;  %v8729_v52 = vld [vmem:[#allocation114_spill] sm:$0xff] }
 0x18a   :  { %1096 = vmatpush1.msra.mxu0 %v8687_v53  ;;  %1167 = vmatpush1.msra.mxu1 %v8688_v55  ;;  %v8730_v53 = vld [vmem:[#allocation115_spill] sm:$0xff]  ;;  %v8731_v55 = vld [vmem:[#allocation116_spill] sm:$0xff] }
 0x18b   :  { %1097 = vmatprep.subr.mxu0 %v8689_v56  ;;  %1168 = vmatprep.subr.mxu1 %v8690_v57  ;;  %v8732_v56 = vld [vmem:[#allocation117_spill] sm:$0xff]  ;;  %v8733_v57 = vld [vmem:[#allocation118_spill] sm:$0xff] }
 0x18c   :  { %1098 = vmatpush1.msra.mxu0 %v8691_v58  ;;  %1169 = vmatpush1.msra.mxu1 %v8692_v59  ;;  %v8734_v58 = vld [vmem:[#allocation119_spill] sm:$0xff]  ;;  %v8735_v59 = vld [vmem:[#allocation120_spill] sm:$0xff] }
 0x18d   :  { %1099 = vmatprep.subr.mxu0 %v8693_v60  ;;  %1170 = vmatprep.subr.mxu1 %v8694_v61  ;;  %v8736_v60 = vld [vmem:[#allocation121_spill] sm:$0xff]  ;;  %v8737_v61 = vld [vmem:[#allocation122_spill] sm:$0xff] }
 0x18e   :  { %1100 = vmatpush2.msra.mxu0 %v8695_v62  ;;  %1171 = vmatpush2.msra.mxu1 %v8696_v1  ;;  %v8738_v62 = vld [vmem:[#allocation123_spill] sm:$0xff]  ;;  %v8739_v1 = vld [vmem:[#allocation124_spill] sm:$0xff] }
 0x18f   :  { %1101 = vmatprep.subr.mxu0 %v8697_v2  ;;  %1172 = vmatprep.subr.mxu1 %v8698_v3  ;;  %v8740_v2 = vld [vmem:[#allocation125_spill] sm:$0xff]  ;;  %v8741_v3 = vld [vmem:[#allocation126_spill] sm:$0xff] }
 0x190   :  { %1102 = vmatpush2.msra.mxu0 %v8699_v4  ;;  %1173 = vmatpush2.msra.mxu1 %v8700_v5  ;;  %v8742_v4 = vld [vmem:[#allocation127_spill] sm:$0xff]  ;;  %v8743_v5 = vld [vmem:[#allocation128_spill] sm:$0xff] }
 0x191   :  { %1103 = vmatprep.subr.mxu0 %v8701_v6  ;;  %1174 = vmatprep.subr.mxu1 %v8702_v7  ;;  %v8744_v6 = vld [vmem:[#allocation129_spill] sm:$0xff]  ;;  %v8745_v7 = vld [vmem:[#allocation130_spill] sm:$0xff] }
 0x192   :  { %1104 = vmatpush2.msra.mxu0 %v8703_v8  ;;  %1175 = vmatpush2.msra.mxu1 %v8704_v12  ;;  %v8746_v8 = vld [vmem:[#allocation131_spill] sm:$0xff]  ;;  %v8747_v12 = vld [vmem:[#allocation132_spill] sm:$0xff] }
 0x193   :  { %1105 = vmatprep.subr.mxu0 %v8705_v13  ;;  %1176 = vmatprep.subr.mxu1 %v8706_v14  ;;  %v8748_v13 = vld [vmem:[#allocation133_spill] sm:$0xff]  ;;  %v8749_v14 = vld [vmem:[#allocation134_spill] sm:$0xff] }
 0x194   :  { %1106 = vmatpush2.msra.mxu0 %v8707_v15  ;;  %1177 = vmatpush2.msra.mxu1 %v8708_v16  ;;  %v8750_v15 = vld [vmem:[#allocation135_spill] sm:$0xff]  ;;  %v8751_v16 = vld [vmem:[#allocation136_spill] sm:$0xff] }
 0x195   :  { %1107 = vmatprep.subr.mxu0 %v8709_v20  ;;  %1178 = vmatprep.subr.mxu1 %v8710_v24  ;;  %v8752_v20 = vld [vmem:[#allocation137_spill] sm:$0xff]  ;;  %v8753_v24 = vld [vmem:[#allocation138_spill] sm:$0xff] }
 0x196   :  { %1108 = vmatpush2.msra.mxu0 %v8711_v10  ;;  %1179 = vmatpush2.msra.mxu1 %v8712_v32  ;;  %v8754_v10 = vld [vmem:[#allocation139_spill] sm:$0xff]  ;;  %v8755_v32 = vld [vmem:[#allocation140_spill] sm:$0xff] }
 0x197   :  { %1109 = vmatprep.subr.mxu0 %v8713_v33  ;;  %1180 = vmatprep.subr.mxu1 %v8714_v35  ;;  %v8756_v33 = vld [vmem:[#allocation141_spill] sm:$0xff]  ;;  %v5410_v35 = vld [vmem:[#allocation2 + $0x1e8] sm:$0xff] }
 0x198   :  { %1110 = vmatpush2.msra.mxu0 %v8715_v37  ;;  %1181 = vmatpush2.msra.mxu1 %v8716_v38  ;;  %v5413_v37 = vld [vmem:[#allocation2 + $0x1f8] sm:$0xff]  ;;  %v539_v38 = vld [vmem:[%s7916_s5] sm:$0xf] }
 0x199   :  { %1111 = vmatprep.subr.mxu0 %v8717_v39  ;;  %1182 = vmatprep.subr.mxu1 %v8718_v40  ;;  %v8757_v39 = vsub.s32 0, %v5068_v36 }
 0x19a   :  { %1112 = vmatpush2.msra.mxu0 %v8719_v41  ;;  %1183 = vmatpush2.msra.mxu1 %v8720_v42  ;;  %v8759_v41 = vsub.s32 1, %v5068_v36 }
 0x19b   :  { %1113 = vmatprep.subr.mxu0 %v8721_v43  ;;  %1184 = vmatprep.subr.mxu1 %v8722_v44  ;;  %v5421_v40 = vrot.slane %v539_v38, %v8757_v39 }
 0x19c   :  { %1114 = vmatpush2.msra.mxu0 %v8723_v46  ;;  %1185 = vmatpush2.msra.mxu1 %v8724_v47  ;;  %v5425_v42 = vrot.slane %v539_v38, %v8759_v41 }
 0x19d   :  { %1115 = vmatprep.subr.mxu0 %v8725_v48  ;;  %1186 = vmatprep.subr.mxu1 %v8726_v49  ;;  %8758 = vst [vmem:[#allocation11_spill] sm:$0xff] %v5421_v40 }
 0x19e   :  { %1116 = vmatpush2.msra.mxu0 %v8727_v50  ;;  %1187 = vmatpush2.msra.mxu1 %v8728_v51  ;;  %8760 = vst [vmem:[#allocation12_spill] sm:$0xff] %v5425_v42  ;;  %v8761_v50 = vsub.s32 2, %v5068_v36 }
 0x19f   :  { %1117 = vmatprep.subr.mxu0 %v8729_v52  ;;  %1188 = vmatprep.subr.mxu1 %v8730_v53 }
 0x1a0   :  { %1118 = vmatpush2.msra.mxu0 %v8731_v55  ;;  %1189 = vmatpush2.msra.mxu1 %v8732_v56  ;;  %v5431_v51 = vrot.slane %v539_v38, %v8761_v50  ;;  %v8763_v55 = vsub.s32 3, %v5068_v36 }
 0x1a1   :  { %1119 = vmatprep.subr.mxu0 %v8733_v57  ;;  %1190 = vmatprep.subr.mxu1 %v8734_v58 }
 0x1a2   :  { %1120 = vmatpush2.msra.mxu0 %v8735_v59  ;;  %1191 = vmatpush2.msra.mxu1 %v8736_v60  ;;  %8762 = vst [vmem:[#allocation13_spill] sm:$0xff] %v5431_v51  ;;  %v5436_v56 = vrot.slane %v539_v38, %v8763_v55 }
 0x1a3   :  { %1121 = vmatprep.subr.mxu0 %v8737_v61  ;;  %1192 = vmatprep.subr.mxu1 %v8738_v62 }
 0x1a4   :  { %1122 = vmatpush2.msra.mxu0 %v8739_v1  ;;  %1193 = vmatpush2.msra.mxu1 %v8740_v2  ;;  %8764 = vst [vmem:[#allocation14_spill] sm:$0xff] %v5436_v56 }
 0x1a5   :  { %1123 = vmatprep.subr.mxu0 %v8741_v3  ;;  %1194 = vmatprep.subr.mxu1 %v8742_v4 }
 0x1a6   :  { %1124 = vmatpush2.msra.mxu0 %v8743_v5  ;;  %1195 = vmatpush2.msra.mxu1 %v8744_v6  ;;  %v8765_v5 = vld [vmem:[#allocation142_spill] sm:$0xff] }
 0x1a7   :  { %1125 = vmatprep.subr.mxu0 %v8745_v7  ;;  %1196 = vmatprep.subr.mxu1 %v8746_v8 }
 0x1a8   :  { %1126 = vmatpush2.msra.mxu0 %v8747_v12  ;;  %1197 = vmatpush2.msra.mxu1 %v8748_v13  ;;  %v8766_v13 = vld [vmem:[#allocation144_spill] sm:$0xff] }
 0x1a9   :  { %1127 = vmatprep.subr.mxu0 %v8749_v14  ;;  %1198 = vmatprep.subr.mxu1 %v8750_v15 }
 0x1aa   :  { %1128 = vmatpush2.msra.mxu0 %v8751_v16  ;;  %1199 = vmatpush2.msra.mxu1 %v8752_v20 }
 0x1ab   :  { %1129 = vmatprep.subr.mxu0 %v8753_v24  ;;  %1200 = vmatprep.subr.mxu1 %v8754_v10 }
 0x1ac   :  { %1130 = vmatpush2.msra.mxu0 %v8755_v32  ;;  %1201 = vmatpush2.msra.mxu1 %v8756_v33  ;;  %v8767_v33 = vld [vmem:[#allocation143_spill] sm:$0xff] }
 0x1ad   :  { %1233 = vmatprep.subr.mxu0 %v5410_v35  ;;  %1304 = vmatprep.subr.mxu1 %v5413_v37 }
 0x20b   :  { %v797_v43 = vpop.f32.mrf.mxu0  ;;  %v868_v52 = vpop.f32.mrf.mxu1 }
 0x20c   :  { %v798_v44 = vadd.f32 %v797_v43, %v5421_v40  ;;  %v869_v53 = vadd.f32 %v868_v52, %v5431_v51  ;;  %v8768_v43 = vld [vmem:[#allocation145_spill] sm:$0xff] }
 0x20d   :  { %v799_v46 = vpop.f32.mrf.mxu0  ;;  %v870_v57 = vpop.f32.mrf.mxu1 }
 0x20e   :  { %v3379_v47 = vmul.f32 -1.442695, %v798_v44  ;;  %v800_v48 = vadd.f32 %v799_v46, %v5425_v42  ;;  %v3381_v58 = vmul.f32 -1.442695, %v869_v53  ;;  %v871_v60 = vadd.f32 %v870_v57, %v5436_v56 }
 0x210   :  { %3500 = vpow2.f32 %v3379_v47  ;;  %v3380_v49 = vmul.f32 -1.442695, %v800_v48 }
 0x212   :  { %3502 = vpow2.f32 %v3380_v49 }
 0x213   :  { %3504 = vpow2.f32 %v3381_v58 }
 0x21d   :  { %v3501_v59 = vpop.eup %3500 }
 0x21e   :  { %v882_v61 = vadd.f32 1.0, %v3501_v59 }
 0x21f   :  { %v3503_v62 = vpop.eup %3502 }
 0x220   :  { %3506 = vrcp.f32 %v882_v61  ;;  %v883_v1 = vadd.f32 1.0, %v3503_v62  ;;  %v3505_v2 = vpop.eup %3504 }
 0x221   :  { %3508 = vtanh.f32 %v871_v60  ;;  %v884_v15 = vadd.f32 1.0, %v3505_v2 }
 0x222   :  { %3510 = vrcp.f32 %v883_v1 }
 0x22c   :  { %v963_v3 = vpop.f32.mrf.mxu0  ;;  %v1034_v32 = vpop.f32.mrf.mxu1 }
 0x22d   :  { %v3507_v4 = vpop.eup %3506  ;;  %v1039_v6 = vadd.f32 %v963_v3, %v8765_v5  ;;  %v1041_v38 = vadd.f32 %v1034_v32, %v8767_v33  ;;  %v5529_v5 = vld [vmem:[#allocation2 + $0xd0] sm:$0xff]  ;;  %v5568_v33 = vld [vmem:[#allocation2 + $0x48] sm:$0xff] }
 0x22e   :  { %v3509_v36 = vpop.eup %3508  ;;  %v965_v7 = vpop.f32.mrf.mxu0  ;;  %v5565_v32 = vld [vmem:[#allocation2 + $0x70] sm:$0xff] }
 0x22f   :  { %v3511_v8 = vpop.eup %3510  ;;  %v3382_v12 = vmul.f32 -1.442695, %v1039_v6  ;;  %v1040_v14 = vadd.f32 %v965_v7, %v8766_v13  ;;  %v893_v20 = vmul.f32 %v3509_v36, %v3507_v4  ;;  %v1036_v39 = vpop.f32.mrf.mxu1  ;;  %v3384_v41 = vmul.f32 -1.442695, %v1041_v38  ;;  %v5532_v6 = vld [vmem:[#allocation2 + $0xa8] sm:$0xff]  ;;  %v5535_v36 = vld [vmem:[#allocation2 + $0xb8] sm:$0xff] }
 0x230   :  { %v892_v16 = vmul.f32 0.0, %v3511_v8  ;;  %v1042_v44 = vadd.f32 %v1036_v39, %v8768_v43  ;;  %v5538_v7 = vld [vmem:[#allocation2 + $0xa0] sm:$0xff]  ;;  %v5541_v8 = vld [vmem:[#allocation2 + $0xb0] sm:$0xff]  ;;  %v5547_v13 = vld [vmem:[#allocation2 + $0x98] sm:$0xff] }
 0x231   :  { %3512 = vpow2.f32 %v3382_v12  ;;  %v3383_v24 = vmul.f32 -1.442695, %v1040_v14  ;;  %v5544_v12 = vld [vmem:[#allocation2 + $0x88] sm:$0xff]  ;;  %v5550_v14 = vld [vmem:[#allocation2 + $0x80] sm:$0xff]  ;;  %v5571_v38 = vld [vmem:[#allocation2 + $0x58] sm:$0xff] }
 0x232   :  { %v5441_v10 = vadd.f32 %v893_v20, %v892_v16  ;;  %v5556_v16 = vld [vmem:[#allocation2 + $0x68] sm:$0xff]  ;;  %v5559_v20 = vld [vmem:[#allocation2 + $0x78] sm:$0xff]  ;;  %v5574_v39 = vld [vmem:[#allocation2 + $0x40] sm:$0xff] }
 0x233   :  { %3514 = vpow2.f32 %v3383_v24  ;;  %v5562_v24 = vld [vmem:[#allocation2 + $0x60] sm:$0xff]  ;;  %v5580_v43 = vld [vmem:[#allocation2 + $0x28] sm:$0xff] }
 0x234   :  { %3516 = vrcp.f32 %v884_v15  ;;  %v5553_v15 = vld [vmem:[#allocation2 + $0x90] sm:$0xff] }
 0x235   :  { %3518 = vtanh.f32 %v5441_v10 }
 0x236   :  { %3520 = vpow2.f32 %v3384_v41  ;;  %v5577_v41 = vld [vmem:[#allocation2 + $0x50] sm:$0xff] }
 0x237   :  { %3522 = vtanh.f32 %v1042_v44  ;;  %v5583_v44 = vld [vmem:[#allocation2 + $0x38] sm:$0xff] }
 0x23e   :  { %v3513_v46 = vpop.eup %3512 }
 0x23f   :  { %v1052_v47 = vadd.f32 1.0, %v3513_v46  ;;  %v5586_v46 = vld [vmem:[#allocation2 + $0x20] sm:$0xff] }
 0x240   :  { %v3515_v48 = vpop.eup %3514 }
 0x241   :  { %v3517_v49 = vpop.eup %3516  ;;  %3524 = vrcp.f32 %v1052_v47  ;;  %v1053_v50 = vadd.f32 1.0, %v3515_v48  ;;  %v5589_v47 = vld [vmem:[#allocation2 + $0x30] sm:$0xff]  ;;  %v5592_v48 = vld [vmem:[#allocation2 + $0x8] sm:$0xff] }
 0x242   :  { %v3519_v52 = vpop.eup %3518 }
 0x243   :  { %3526 = vrcp.f32 %v1053_v50  ;;  %v896_v53 = vmul.f32 %v3519_v52, %v3517_v49  ;;  %v3521_v55 = vpop.eup %3520  ;;  %v5595_v49 = vld [vmem:[#allocation2 + $0x18] sm:$0xff]  ;;  %v5598_v50 = vld [vmem:[#allocation2] sm:$0xff]  ;;  %v5602_v52 = vld [vmem:[#allocation2 + $0x10] sm:$0xff] }
 0x244   :  { %v3523_v57 = vpop.eup %3522  ;;  %v1054_v61 = vadd.f32 1.0, %v3521_v55  ;;  %8769 = vst [vmem:[#allocation15_spill] sm:$0xff] %v5598_v50  ;;  %8770 = vst [vmem:[#allocation16_spill] sm:$0xff] %v5602_v52  ;;  %v5611_v55 = vld [vmem:[#allocation5 + $0x1f8] sm:$0xff] }
 0x245   :  { %1131 = vmatprep.mubr.f32.mxu0 %v896_v53  ;;  %1202 = vmatprep.mubr.f32.mxu1 %v896_v53  ;;  %v5608_v53 = vld [vmem:[#allocation5 + $0x1e8] sm:$0xff]  ;;  %8772 = vst [vmem:[#allocation18_spill] sm:$0xff] %v5611_v55 }
 0x246   :  { %3528 = vrcp.f32 %v1054_v61  ;;  %8771 = vst [vmem:[#allocation17_spill] sm:$0xff] %v5608_v53  ;;  %v5626_v61 = vld [vmem:[#allocation5 + $0x1c0] sm:$0xff] }
 0x247   :  { %8777 = vst [vmem:[#allocation23_spill] sm:$0xff] %v5626_v61 }
 0x24e   :  { %v3525_v58 = vpop.eup %3524 }
 0x24f   :  { %v1063_v59 = vmul.f32 %v3525_v58, %v3523_v57  ;;  %v5614_v57 = vld [vmem:[#allocation5 + $0x1e0] sm:$0xff]  ;;  %v5617_v58 = vld [vmem:[#allocation5 + $0x1f0] sm:$0xff] }
 0x250   :  { %v3527_v60 = vpop.eup %3526  ;;  %8773 = vst [vmem:[#allocation19_spill] sm:$0xff] %v5614_v57  ;;  %8774 = vst [vmem:[#allocation20_spill] sm:$0xff] %v5617_v58 }
 0x251   :  { %v1062_v62 = vmul.f32 %v3527_v60, %v5173_v63  ;;  %v5472_v63 = vld [vmem:[#allocation2 + $0x148] sm:$0xff]  ;;  %v5623_v60 = vld [vmem:[#allocation5 + $0x1d8] sm:$0xff] }
 0x252   :  { %8776 = vst [vmem:[#allocation22_spill] sm:$0xff] %v5623_v60 }
 0x253   :  { %v5447_v1 = vadd.f32 %v1063_v59, %v1062_v62  ;;  %v3529_v2 = vpop.eup %3528  ;;  %v5620_v59 = vld [vmem:[#allocation5 + $0x1c8] sm:$0xff]  ;;  %v5629_v62 = vld [vmem:[#allocation5 + $0x1d0] sm:$0xff] }
 0x254   :  { %8775 = vst [vmem:[#allocation21_spill] sm:$0xff] %v5620_v59  ;;  %8778 = vst [vmem:[#allocation24_spill] sm:$0xff] %v5629_v62 }
 0x255   :  { %3530 = vtanh.f32 %v5447_v1 }
 0x262   :  { %v3531_v3 = vpop.eup %3530 }
 0x263   :  { %v5450_v4 = vmul.f32 %v3531_v3, %v3529_v2  ;;  %v5632_v2 = vld [vmem:[#allocation5 + $0x1a8] sm:$0xff]  ;;  %v5635_v3 = vld [vmem:[#allocation5 + $0x1b8] sm:$0xff] }
 0x264   :  { %8779 = vst [vmem:[#allocation25_spill] sm:$0xff] %v5632_v2  ;;  %8780 = vst [vmem:[#allocation26_spill] sm:$0xff] %v5635_v3 }
 0x265   :  { %1132 = vmatmul.mubr.f32.vlgmr.msra.gmra.mxu0 %v5450_v4  ;;  %1203 = vmatmul.mubr.f32.vlgmr.msra.gmra.mxu1 %v5450_v4 }
 0x266   :  { %1234 = vmatpush1.msra.mxu0 %v5180_v11  ;;  %1305 = vmatpush1.msra.mxu1 %v5183_v26  ;;  %v5475_v11 = vld [vmem:[#allocation2 + $0x158] sm:$0xff]  ;;  %v5478_v26 = vld [vmem:[#allocation2 + $0x140] sm:$0xff] }
 0x267   :  { %1235 = vmatprep.subr.mxu0 %v5186_v19  ;;  %1306 = vmatprep.subr.mxu1 %v5189_v18  ;;  %v5481_v19 = vld [vmem:[#allocation2 + $0x150] sm:$0xff]  ;;  %v5484_v18 = vld [vmem:[#allocation2 + $0x128] sm:$0xff] }
 0x268   :  { %1236 = vmatpush1.msra.mxu0 %v5192_v0  ;;  %1307 = vmatpush1.msra.mxu1 %v5195_v45  ;;  %v5487_v0 = vld [vmem:[#allocation2 + $0x138] sm:$0xff]  ;;  %v5490_v45 = vld [vmem:[#allocation2 + $0x120] sm:$0xff] }
 0x269   :  { %1237 = vmatprep.subr.mxu0 %v5198_v31  ;;  %1308 = vmatprep.subr.mxu1 %v5201_v54  ;;  %v5493_v31 = vld [vmem:[#allocation2 + $0x130] sm:$0xff]  ;;  %v5496_v54 = vld [vmem:[#allocation2 + $0x108] sm:$0xff] }
 0x26a   :  { %1238 = vmatpush1.msra.mxu0 %v5204_v25  ;;  %1309 = vmatpush1.msra.mxu1 %v5207_v28  ;;  %v5499_v25 = vld [vmem:[#allocation2 + $0x118] sm:$0xff]  ;;  %v5502_v28 = vld [vmem:[#allocation2 + $0x100] sm:$0xff] }
 0x26b   :  { %1239 = vmatprep.subr.mxu0 %v5210_v17  ;;  %1310 = vmatprep.subr.mxu1 %v5213_v23  ;;  %v5505_v17 = vld [vmem:[#allocation2 + $0x110] sm:$0xff]  ;;  %v5508_v23 = vld [vmem:[#allocation2 + $0xe8] sm:$0xff] }
 0x26c   :  { %1240 = vmatpush1.msra.mxu0 %v5216_v27  ;;  %1311 = vmatpush1.msra.mxu1 %v5219_v22  ;;  %v5511_v27 = vld [vmem:[#allocation2 + $0xf8] sm:$0xff]  ;;  %v5514_v22 = vld [vmem:[#allocation2 + $0xe0] sm:$0xff] }
 0x26d   :  { %1241 = vmatprep.subr.mxu0 %v5222_v29  ;;  %1312 = vmatprep.subr.mxu1 %v5225_v30  ;;  %v5517_v29 = vld [vmem:[#allocation2 + $0xf0] sm:$0xff]  ;;  %v5520_v30 = vld [vmem:[#allocation2 + $0xc8] sm:$0xff] }
 0x26e   :  { %1242 = vmatpush1.msra.mxu0 %v5228_v9  ;;  %1313 = vmatpush1.msra.mxu1 %v5231_v21  ;;  %v5523_v9 = vld [vmem:[#allocation2 + $0xd8] sm:$0xff]  ;;  %v5526_v21 = vld [vmem:[#allocation2 + $0xc0] sm:$0xff] }
 0x26f   :  { %1243 = vmatprep.subr.mxu0 %v5472_v63  ;;  %1314 = vmatprep.subr.mxu1 %v5475_v11 }
 0x270   :  { %1244 = vmatpush1.msra.mxu0 %v5478_v26  ;;  %1315 = vmatpush1.msra.mxu1 %v5481_v19 }
 0x271   :  { %1245 = vmatprep.subr.mxu0 %v5484_v18  ;;  %1316 = vmatprep.subr.mxu1 %v5487_v0 }
 0x272   :  { %1246 = vmatpush1.msra.mxu0 %v5490_v45  ;;  %1317 = vmatpush1.msra.mxu1 %v5493_v31 }
 0x273   :  { %1247 = vmatprep.subr.mxu0 %v5496_v54  ;;  %1318 = vmatprep.subr.mxu1 %v5499_v25 }
 0x274   :  { %1248 = vmatpush1.msra.mxu0 %v5502_v28  ;;  %1319 = vmatpush1.msra.mxu1 %v5505_v17 }
 0x275   :  { %1249 = vmatprep.subr.mxu0 %v5508_v23  ;;  %1320 = vmatprep.subr.mxu1 %v5511_v27 }
 0x276   :  { %1250 = vmatpush1.msra.mxu0 %v5514_v22  ;;  %1321 = vmatpush1.msra.mxu1 %v5517_v29 }
 0x277   :  { %1251 = vmatprep.subr.mxu0 %v5520_v30  ;;  %1322 = vmatprep.subr.mxu1 %v5523_v9 }
 0x278   :  { %1252 = vmatpush1.msra.mxu0 %v5526_v21  ;;  %1323 = vmatpush1.msra.mxu1 %v5529_v5 }
 0x279   :  { %1253 = vmatprep.subr.mxu0 %v5532_v6  ;;  %1324 = vmatprep.subr.mxu1 %v5535_v36 }
 0x27a   :  { %1254 = vmatpush1.msra.mxu0 %v5538_v7  ;;  %1325 = vmatpush1.msra.mxu1 %v5541_v8 }
 0x27b   :  { %1255 = vmatprep.subr.mxu0 %v5544_v12  ;;  %1326 = vmatprep.subr.mxu1 %v5547_v13 }
 0x27c   :  { %1256 = vmatpush1.msra.mxu0 %v5550_v14  ;;  %1327 = vmatpush1.msra.mxu1 %v5553_v15 }
 0x27d   :  { %1257 = vmatprep.subr.mxu0 %v5556_v16  ;;  %1328 = vmatprep.subr.mxu1 %v5559_v20 }
 0x27e   :  { %1258 = vmatpush1.msra.mxu0 %v5562_v24  ;;  %1329 = vmatpush1.msra.mxu1 %v5565_v32 }
 0x27f   :  { %1259 = vmatprep.subr.mxu0 %v5568_v33  ;;  %1330 = vmatprep.subr.mxu1 %v5571_v38 }
 0x280   :  { %1260 = vmatpush1.msra.mxu0 %v5574_v39  ;;  %1331 = vmatpush1.msra.mxu1 %v5577_v41 }
 0x281   :  { %1261 = vmatprep.subr.mxu0 %v5580_v43  ;;  %1332 = vmatprep.subr.mxu1 %v5583_v44 }
 0x282   :  { %1262 = vmatpush1.msra.mxu0 %v5586_v46  ;;  %1333 = vmatpush1.msra.mxu1 %v5589_v47 }
 0x283   :  { %1263 = vmatprep.subr.mxu0 %v5592_v48  ;;  %1334 = vmatprep.subr.mxu1 %v5595_v49 }
 0x284   :  { %1264 = vmatpush1.msra.mxu0 %v5598_v50  ;;  %1297 = vmatprep.mubr.f32.mxu0 %v8627_v34 }
 0x285   :  { %1335 = vmatpush1.msra.mxu1 %v5602_v52  ;;  %1368 = vmatprep.mubr.f32.mxu1 %v8627_v34 }
 0x286   :  { %1298 = vmatmul.mubr.f32.vlgmr.msra.gmra.mxu0 %v5450_v4  ;;  %1369 = vmatmul.mubr.f32.vlgmr.msra.gmra.mxu1 %v5450_v4  ;;  %v5638_v4 = vld [vmem:[#allocation5 + $0x1a0] sm:$0xff] }
 0x287   :  { %1403 = vmatprep.subr.mxu0 %v5608_v53  ;;  %1474 = vmatprep.subr.mxu1 %v5611_v55  ;;  %8781 = vst [vmem:[#allocation27_spill] sm:$0xff] %v5638_v4 }
 0x288   :  { %1404 = vmatpush1.msra.mxu0 %v5614_v57  ;;  %1475 = vmatpush1.msra.mxu1 %v5617_v58 }
 0x289   :  { %1405 = vmatprep.subr.mxu0 %v5620_v59  ;;  %1476 = vmatprep.subr.mxu1 %v5623_v60  ;;  %v5641_v60 = vld [vmem:[#allocation5 + $0x1b0] sm:$0xff] }
 0x28a   :  { %1406 = vmatpush1.msra.mxu0 %v5626_v61  ;;  %1477 = vmatpush1.msra.mxu1 %v5629_v62  ;;  %8782 = vst [vmem:[#allocation28_spill] sm:$0xff] %v5641_v60  ;;  %v5644_v61 = vld [vmem:[#allocation5 + $0x188] sm:$0xff]  ;;  %v5647_v62 = vld [vmem:[#allocation5 + $0x198] sm:$0xff] }
 0x28b   :  { %1407 = vmatprep.subr.mxu0 %v5632_v2  ;;  %1478 = vmatprep.subr.mxu1 %v5635_v3  ;;  %8783 = vst [vmem:[#allocation29_spill] sm:$0xff] %v5644_v61  ;;  %8784 = vst [vmem:[#allocation30_spill] sm:$0xff] %v5647_v62  ;;  %v5650_v2 = vld [vmem:[#allocation5 + $0x180] sm:$0xff]  ;;  %v5653_v3 = vld [vmem:[#allocation5 + $0x190] sm:$0xff] }
 0x28c   :  { %1408 = vmatpush1.msra.mxu0 %v5638_v4  ;;  %1479 = vmatpush1.msra.mxu1 %v5641_v60  ;;  %8785 = vst [vmem:[#allocation31_spill] sm:$0xff] %v5650_v2  ;;  %8786 = vst [vmem:[#allocation32_spill] sm:$0xff] %v5653_v3  ;;  %v5656_v4 = vld [vmem:[#allocation5 + $0x168] sm:$0xff]  ;;  %v5659_v60 = vld [vmem:[#allocation5 + $0x178] sm:$0xff] }
 0x28d   :  { %1409 = vmatprep.subr.mxu0 %v5644_v61  ;;  %1480 = vmatprep.subr.mxu1 %v5647_v62  ;;  %8787 = vst [vmem:[#allocation33_spill] sm:$0xff] %v5656_v4  ;;  %8788 = vst [vmem:[#allocation34_spill] sm:$0xff] %v5659_v60  ;;  %v5662_v61 = vld [vmem:[#allocation5 + $0x160] sm:$0xff]  ;;  %v5665_v62 = vld [vmem:[#allocation5 + $0x170] sm:$0xff] }
 0x28e   :  { %1410 = vmatpush1.msra.mxu0 %v5650_v2  ;;  %1481 = vmatpush1.msra.mxu1 %v5653_v3  ;;  %8789 = vst [vmem:[#allocation35_spill] sm:$0xff] %v5662_v61  ;;  %8790 = vst [vmem:[#allocation36_spill] sm:$0xff] %v5665_v62  ;;  %v5668_v2 = vld [vmem:[#allocation5 + $0x148] sm:$0xff]  ;;  %v5671_v3 = vld [vmem:[#allocation5 + $0x158] sm:$0xff] }
 0x28f   :  { %1411 = vmatprep.subr.mxu0 %v5656_v4  ;;  %1482 = vmatprep.subr.mxu1 %v5659_v60  ;;  %8791 = vst [vmem:[#allocation37_spill] sm:$0xff] %v5668_v2  ;;  %8792 = vst [vmem:[#allocation38_spill] sm:$0xff] %v5671_v3  ;;  %v5674_v4 = vld [vmem:[#allocation5 + $0x140] sm:$0xff]  ;;  %v5677_v60 = vld [vmem:[#allocation5 + $0x150] sm:$0xff] }
 0x290   :  { %1412 = vmatpush1.msra.mxu0 %v5662_v61  ;;  %1483 = vmatpush1.msra.mxu1 %v5665_v62  ;;  %8793 = vst [vmem:[#allocation39_spill] sm:$0xff] %v5674_v4  ;;  %8794 = vst [vmem:[#allocation40_spill] sm:$0xff] %v5677_v60  ;;  %v5680_v61 = vld [vmem:[#allocation5 + $0x128] sm:$0xff]  ;;  %v5683_v62 = vld [vmem:[#allocation5 + $0x138] sm:$0xff] }
 0x291   :  { %1413 = vmatprep.subr.mxu0 %v5668_v2  ;;  %1484 = vmatprep.subr.mxu1 %v5671_v3  ;;  %8795 = vst [vmem:[#allocation41_spill] sm:$0xff] %v5680_v61  ;;  %8796 = vst [vmem:[#allocation42_spill] sm:$0xff] %v5683_v62  ;;  %v5686_v2 = vld [vmem:[#allocation5 + $0x120] sm:$0xff]  ;;  %v5689_v3 = vld [vmem:[#allocation5 + $0x130] sm:$0xff] }
 0x292   :  { %1414 = vmatpush1.msra.mxu0 %v5674_v4  ;;  %1485 = vmatpush1.msra.mxu1 %v5677_v60  ;;  %8797 = vst [vmem:[#allocation43_spill] sm:$0xff] %v5686_v2  ;;  %8798 = vst [vmem:[#allocation44_spill] sm:$0xff] %v5689_v3  ;;  %v5692_v4 = vld [vmem:[#allocation5 + $0x108] sm:$0xff]  ;;  %v5695_v60 = vld [vmem:[#allocation5 + $0x118] sm:$0xff] }
 0x293   :  { %1415 = vmatprep.subr.mxu0 %v5680_v61  ;;  %1486 = vmatprep.subr.mxu1 %v5683_v62  ;;  %8799 = vst [vmem:[#allocation45_spill] sm:$0xff] %v5692_v4  ;;  %8800 = vst [vmem:[#allocation46_spill] sm:$0xff] %v5695_v60  ;;  %v5698_v61 = vld [vmem:[#allocation5 + $0x100] sm:$0xff]  ;;  %v5701_v62 = vld [vmem:[#allocation5 + $0x110] sm:$0xff] }
 0x294   :  { %1416 = vmatpush1.msra.mxu0 %v5686_v2  ;;  %1487 = vmatpush1.msra.mxu1 %v5689_v3  ;;  %8801 = vst [vmem:[#allocation47_spill] sm:$0xff] %v5698_v61  ;;  %8802 = vst [vmem:[#allocation48_spill] sm:$0xff] %v5701_v62  ;;  %v5704_v2 = vld [vmem:[#allocation5 + $0xe8] sm:$0xff]  ;;  %v5707_v3 = vld [vmem:[#allocation5 + $0xf8] sm:$0xff] }
 0x295   :  { %1417 = vmatprep.subr.mxu0 %v5692_v4  ;;  %1488 = vmatprep.subr.mxu1 %v5695_v60  ;;  %8803 = vst [vmem:[#allocation49_spill] sm:$0xff] %v5704_v2  ;;  %8804 = vst [vmem:[#allocation50_spill] sm:$0xff] %v5707_v3  ;;  %v5710_v4 = vld [vmem:[#allocation5 + $0xe0] sm:$0xff]  ;;  %v5713_v60 = vld [vmem:[#allocation5 + $0xf0] sm:$0xff] }
 0x296   :  { %1418 = vmatpush1.msra.mxu0 %v5698_v61  ;;  %1489 = vmatpush1.msra.mxu1 %v5701_v62  ;;  %8805 = vst [vmem:[#allocation51_spill] sm:$0xff] %v5710_v4  ;;  %8806 = vst [vmem:[#allocation52_spill] sm:$0xff] %v5713_v60  ;;  %v5716_v61 = vld [vmem:[#allocation5 + $0xc8] sm:$0xff]  ;;  %v5719_v62 = vld [vmem:[#allocation5 + $0xd8] sm:$0xff] }
 0x297   :  { %1419 = vmatprep.subr.mxu0 %v5704_v2  ;;  %1490 = vmatprep.subr.mxu1 %v5707_v3  ;;  %8807 = vst [vmem:[#allocation53_spill] sm:$0xff] %v5716_v61  ;;  %8808 = vst [vmem:[#allocation54_spill] sm:$0xff] %v5719_v62  ;;  %v5722_v2 = vld [vmem:[#allocation5 + $0xc0] sm:$0xff]  ;;  %v5725_v3 = vld [vmem:[#allocation5 + $0xd0] sm:$0xff] }
 0x298   :  { %1420 = vmatpush1.msra.mxu0 %v5710_v4  ;;  %1491 = vmatpush1.msra.mxu1 %v5713_v60  ;;  %8809 = vst [vmem:[#allocation55_spill] sm:$0xff] %v5722_v2  ;;  %8810 = vst [vmem:[#allocation56_spill] sm:$0xff] %v5725_v3  ;;  %v5728_v4 = vld [vmem:[#allocation5 + $0xa8] sm:$0xff]  ;;  %v5731_v60 = vld [vmem:[#allocation5 + $0xb8] sm:$0xff] }
 0x299   :  { %1421 = vmatprep.subr.mxu0 %v5716_v61  ;;  %1492 = vmatprep.subr.mxu1 %v5719_v62  ;;  %8811 = vst [vmem:[#allocation57_spill] sm:$0xff] %v5728_v4  ;;  %8812 = vst [vmem:[#allocation58_spill] sm:$0xff] %v5731_v60  ;;  %v5734_v61 = vld [vmem:[#allocation5 + $0xa0] sm:$0xff]  ;;  %v5737_v62 = vld [vmem:[#allocation5 + $0xb0] sm:$0xff] }
 0x29a   :  { %1422 = vmatpush1.msra.mxu0 %v5722_v2  ;;  %1493 = vmatpush1.msra.mxu1 %v5725_v3  ;;  %8813 = vst [vmem:[#allocation59_spill] sm:$0xff] %v5734_v61  ;;  %8814 = vst [vmem:[#allocation60_spill] sm:$0xff] %v5737_v62  ;;  %v5740_v2 = vld [vmem:[#allocation5 + $0x88] sm:$0xff]  ;;  %v5743_v3 = vld [vmem:[#allocation5 + $0x98] sm:$0xff] }
 0x29b   :  { %1423 = vmatprep.subr.mxu0 %v5728_v4  ;;  %1494 = vmatprep.subr.mxu1 %v5731_v60  ;;  %8815 = vst [vmem:[#allocation61_spill] sm:$0xff] %v5740_v2  ;;  %8816 = vst [vmem:[#allocation62_spill] sm:$0xff] %v5743_v3  ;;  %v5746_v4 = vld [vmem:[#allocation5 + $0x80] sm:$0xff]  ;;  %v5749_v60 = vld [vmem:[#allocation5 + $0x90] sm:$0xff] }
 0x29c   :  { %1424 = vmatpush1.msra.mxu0 %v5734_v61  ;;  %1495 = vmatpush1.msra.mxu1 %v5737_v62  ;;  %8817 = vst [vmem:[#allocation63_spill] sm:$0xff] %v5746_v4  ;;  %8818 = vst [vmem:[#allocation64_spill] sm:$0xff] %v5749_v60  ;;  %v5752_v61 = vld [vmem:[#allocation5 + $0x68] sm:$0xff]  ;;  %v5755_v62 = vld [vmem:[#allocation5 + $0x78] sm:$0xff] }
 0x29d   :  { %1425 = vmatprep.subr.mxu0 %v5740_v2  ;;  %1496 = vmatprep.subr.mxu1 %v5743_v3  ;;  %8819 = vst [vmem:[#allocation65_spill] sm:$0xff] %v5752_v61  ;;  %8820 = vst [vmem:[#allocation66_spill] sm:$0xff] %v5755_v62  ;;  %v5758_v2 = vld [vmem:[#allocation5 + $0x60] sm:$0xff]  ;;  %v5761_v3 = vld [vmem:[#allocation5 + $0x70] sm:$0xff] }
 0x29e   :  { %1426 = vmatpush1.msra.mxu0 %v5746_v4  ;;  %1497 = vmatpush1.msra.mxu1 %v5749_v60  ;;  %8821 = vst [vmem:[#allocation67_spill] sm:$0xff] %v5758_v2  ;;  %8822 = vst [vmem:[#allocation68_spill] sm:$0xff] %v5761_v3  ;;  %v5764_v4 = vld [vmem:[#allocation5 + $0x48] sm:$0xff]  ;;  %v5767_v60 = vld [vmem:[#allocation5 + $0x58] sm:$0xff] }
 0x29f   :  { %1427 = vmatprep.subr.mxu0 %v5752_v61  ;;  %1498 = vmatprep.subr.mxu1 %v5755_v62  ;;  %8823 = vst [vmem:[#allocation69_spill] sm:$0xff] %v5764_v4  ;;  %8824 = vst [vmem:[#allocation70_spill] sm:$0xff] %v5767_v60  ;;  %v5770_v61 = vld [vmem:[#allocation5 + $0x40] sm:$0xff]  ;;  %v5773_v62 = vld [vmem:[#allocation5 + $0x50] sm:$0xff] }
 0x2a0   :  { %1428 = vmatpush1.msra.mxu0 %v5758_v2  ;;  %1499 = vmatpush1.msra.mxu1 %v5761_v3  ;;  %8825 = vst [vmem:[#allocation71_spill] sm:$0xff] %v5770_v61  ;;  %8826 = vst [vmem:[#allocation72_spill] sm:$0xff] %v5773_v62  ;;  %v5776_v2 = vld [vmem:[#allocation5 + $0x28] sm:$0xff]  ;;  %v5779_v3 = vld [vmem:[#allocation5 + $0x38] sm:$0xff] }
 0x2a1   :  { %1429 = vmatprep.subr.mxu0 %v5764_v4  ;;  %1500 = vmatprep.subr.mxu1 %v5767_v60  ;;  %8827 = vst [vmem:[#allocation73_spill] sm:$0xff] %v5776_v2  ;;  %8828 = vst [vmem:[#allocation74_spill] sm:$0xff] %v5779_v3  ;;  %v5782_v4 = vld [vmem:[#allocation5 + $0x20] sm:$0xff]  ;;  %v5785_v60 = vld [vmem:[#allocation5 + $0x30] sm:$0xff] }
 0x2a2   :  { %1430 = vmatpush1.msra.mxu0 %v5770_v61  ;;  %1501 = vmatpush1.msra.mxu1 %v5773_v62  ;;  %8829 = vst [vmem:[#allocation75_spill] sm:$0xff] %v5782_v4  ;;  %8830 = vst [vmem:[#allocation76_spill] sm:$0xff] %v5785_v60  ;;  %v5788_v61 = vld [vmem:[#allocation5 + $0x8] sm:$0xff]  ;;  %v5791_v62 = vld [vmem:[#allocation5 + $0x18] sm:$0xff] }
 0x2a3   :  { %1431 = vmatprep.subr.mxu0 %v5776_v2  ;;  %1502 = vmatprep.subr.mxu1 %v5779_v3  ;;  %8831 = vst [vmem:[#allocation77_spill] sm:$0xff] %v5788_v61  ;;  %8832 = vst [vmem:[#allocation78_spill] sm:$0xff] %v5791_v62  ;;  %v5794_v2 = vld [vmem:[#allocation5] sm:$0xff]  ;;  %v5797_v3 = vld [vmem:[#allocation5 + $0x10] sm:$0xff] }
 0x2a4   :  { %1432 = vmatpush1.msra.mxu0 %v5782_v4  ;;  %1503 = vmatpush1.msra.mxu1 %v5785_v60  ;;  %8833 = vst [vmem:[#allocation79_spill] sm:$0xff] %v5794_v2  ;;  %8834 = vst [vmem:[#allocation80_spill] sm:$0xff] %v5797_v3  ;;  %v5800_v4 = vld [vmem:[#allocation5 + $0x3e8] sm:$0xff]  ;;  %v5803_v60 = vld [vmem:[#allocation5 + $0x3f8] sm:$0xff] }
 0x2a5   :  { %1433 = vmatprep.subr.mxu0 %v5788_v61  ;;  %1504 = vmatprep.subr.mxu1 %v5791_v62  ;;  %8835 = vst [vmem:[#allocation81_spill] sm:$0xff] %v5800_v4  ;;  %8836 = vst [vmem:[#allocation82_spill] sm:$0xff] %v5803_v60  ;;  %v5806_v61 = vld [vmem:[#allocation5 + $0x3e0] sm:$0xff]  ;;  %v5809_v62 = vld [vmem:[#allocation5 + $0x3f0] sm:$0xff] }
 0x2a6   :  { %1434 = vmatpush1.msra.mxu0 %v5794_v2  ;;  %1505 = vmatpush1.msra.mxu1 %v5797_v3  ;;  %8837 = vst [vmem:[#allocation83_spill] sm:$0xff] %v5806_v61  ;;  %8838 = vst [vmem:[#allocation84_spill] sm:$0xff] %v5809_v62  ;;  %v5812_v2 = vld [vmem:[#allocation5 + $0x3c8] sm:$0xff]  ;;  %v5815_v3 = vld [vmem:[#allocation5 + $0x3d8] sm:$0xff] }
 0x2a7   :  { %1435 = vmatprep.subr.mxu0 %v5800_v4  ;;  %1506 = vmatprep.subr.mxu1 %v5803_v60  ;;  %8839 = vst [vmem:[#allocation85_spill] sm:$0xff] %v5812_v2  ;;  %8840 = vst [vmem:[#allocation86_spill] sm:$0xff] %v5815_v3  ;;  %v5818_v4 = vld [vmem:[#allocation5 + $0x3c0] sm:$0xff]  ;;  %v5821_v60 = vld [vmem:[#allocation5 + $0x3d0] sm:$0xff] }
 0x2a8   :  { %1436 = vmatpush2.msra.mxu0 %v5806_v61  ;;  %1507 = vmatpush2.msra.mxu1 %v5809_v62  ;;  %8841 = vst [vmem:[#allocation87_spill] sm:$0xff] %v5818_v4  ;;  %8842 = vst [vmem:[#allocation88_spill] sm:$0xff] %v5821_v60  ;;  %v5824_v61 = vld [vmem:[#allocation5 + $0x3a8] sm:$0xff]  ;;  %v5827_v62 = vld [vmem:[#allocation5 + $0x3b8] sm:$0xff] }
 0x2a9   :  { %1437 = vmatprep.subr.mxu0 %v5812_v2  ;;  %1508 = vmatprep.subr.mxu1 %v5815_v3  ;;  %8843 = vst [vmem:[#allocation89_spill] sm:$0xff] %v5824_v61  ;;  %8844 = vst [vmem:[#allocation90_spill] sm:$0xff] %v5827_v62  ;;  %v5830_v2 = vld [vmem:[#allocation5 + $0x3a0] sm:$0xff]  ;;  %v5833_v3 = vld [vmem:[#allocation5 + $0x3b0] sm:$0xff] }
 0x2aa   :  { %1438 = vmatpush2.msra.mxu0 %v5818_v4  ;;  %1509 = vmatpush2.msra.mxu1 %v5821_v60  ;;  %8845 = vst [vmem:[#allocation91_spill] sm:$0xff] %v5830_v2  ;;  %8846 = vst [vmem:[#allocation92_spill] sm:$0xff] %v5833_v3  ;;  %v5836_v4 = vld [vmem:[#allocation5 + $0x388] sm:$0xff]  ;;  %v5839_v60 = vld [vmem:[#allocation5 + $0x398] sm:$0xff] }
 0x2ab   :  { %1439 = vmatprep.subr.mxu0 %v5824_v61  ;;  %1510 = vmatprep.subr.mxu1 %v5827_v62  ;;  %8847 = vst [vmem:[#allocation93_spill] sm:$0xff] %v5836_v4  ;;  %8848 = vst [vmem:[#allocation94_spill] sm:$0xff] %v5839_v60  ;;  %v5842_v61 = vld [vmem:[#allocation5 + $0x380] sm:$0xff]  ;;  %v5845_v62 = vld [vmem:[#allocation5 + $0x390] sm:$0xff] }
 0x2ac   :  { %1440 = vmatpush2.msra.mxu0 %v5830_v2  ;;  %1511 = vmatpush2.msra.mxu1 %v5833_v3  ;;  %8849 = vst [vmem:[#allocation95_spill] sm:$0xff] %v5842_v61  ;;  %8850 = vst [vmem:[#allocation96_spill] sm:$0xff] %v5845_v62  ;;  %v5848_v2 = vld [vmem:[#allocation5 + $0x368] sm:$0xff]  ;;  %v5851_v3 = vld [vmem:[#allocation5 + $0x378] sm:$0xff] }
 0x2ad   :  { %1441 = vmatprep.subr.mxu0 %v5836_v4  ;;  %1512 = vmatprep.subr.mxu1 %v5839_v60  ;;  %8851 = vst [vmem:[#allocation97_spill] sm:$0xff] %v5848_v2  ;;  %8852 = vst [vmem:[#allocation98_spill] sm:$0xff] %v5851_v3  ;;  %v5854_v4 = vld [vmem:[#allocation5 + $0x360] sm:$0xff]  ;;  %v5857_v60 = vld [vmem:[#allocation5 + $0x370] sm:$0xff] }
 0x2ae   :  { %1442 = vmatpush2.msra.mxu0 %v5842_v61  ;;  %1513 = vmatpush2.msra.mxu1 %v5845_v62  ;;  %8853 = vst [vmem:[#allocation99_spill] sm:$0xff] %v5854_v4  ;;  %8854 = vst [vmem:[#allocation100_spill] sm:$0xff] %v5857_v60  ;;  %v5860_v61 = vld [vmem:[#allocation5 + $0x348] sm:$0xff]  ;;  %v5863_v62 = vld [vmem:[#allocation5 + $0x358] sm:$0xff] }
 0x2af   :  { %1443 = vmatprep.subr.mxu0 %v5848_v2  ;;  %1514 = vmatprep.subr.mxu1 %v5851_v3  ;;  %8855 = vst [vmem:[#allocation101_spill] sm:$0xff] %v5860_v61  ;;  %8856 = vst [vmem:[#allocation102_spill] sm:$0xff] %v5863_v62  ;;  %v5866_v2 = vld [vmem:[#allocation5 + $0x340] sm:$0xff]  ;;  %v5869_v3 = vld [vmem:[#allocation5 + $0x350] sm:$0xff] }
 0x2b0   :  { %1444 = vmatpush2.msra.mxu0 %v5854_v4  ;;  %1515 = vmatpush2.msra.mxu1 %v5857_v60  ;;  %8857 = vst [vmem:[#allocation103_spill] sm:$0xff] %v5866_v2  ;;  %8858 = vst [vmem:[#allocation104_spill] sm:$0xff] %v5869_v3  ;;  %v5872_v4 = vld [vmem:[#allocation5 + $0x328] sm:$0xff]  ;;  %v5875_v60 = vld [vmem:[#allocation5 + $0x338] sm:$0xff] }
 0x2b1   :  { %1445 = vmatprep.subr.mxu0 %v5860_v61  ;;  %1516 = vmatprep.subr.mxu1 %v5863_v62  ;;  %8859 = vst [vmem:[#allocation105_spill] sm:$0xff] %v5872_v4  ;;  %8860 = vst [vmem:[#allocation106_spill] sm:$0xff] %v5875_v60  ;;  %v5878_v61 = vld [vmem:[#allocation5 + $0x320] sm:$0xff]  ;;  %v5881_v62 = vld [vmem:[#allocation5 + $0x330] sm:$0xff] }
 0x2b2   :  { %1446 = vmatpush2.msra.mxu0 %v5866_v2  ;;  %1517 = vmatpush2.msra.mxu1 %v5869_v3  ;;  %8861 = vst [vmem:[#allocation107_spill] sm:$0xff] %v5878_v61  ;;  %8862 = vst [vmem:[#allocation108_spill] sm:$0xff] %v5881_v62  ;;  %v5884_v2 = vld [vmem:[#allocation5 + $0x308] sm:$0xff]  ;;  %v5887_v3 = vld [vmem:[#allocation5 + $0x318] sm:$0xff] }
 0x2b3   :  { %1447 = vmatprep.subr.mxu0 %v5872_v4  ;;  %1518 = vmatprep.subr.mxu1 %v5875_v60  ;;  %8863 = vst [vmem:[#allocation109_spill] sm:$0xff] %v5884_v2  ;;  %8864 = vst [vmem:[#allocation110_spill] sm:$0xff] %v5887_v3  ;;  %v5890_v4 = vld [vmem:[#allocation5 + $0x300] sm:$0xff]  ;;  %v5893_v60 = vld [vmem:[#allocation5 + $0x310] sm:$0xff] }
 0x2b4   :  { %1448 = vmatpush2.msra.mxu0 %v5878_v61  ;;  %1519 = vmatpush2.msra.mxu1 %v5881_v62  ;;  %8865 = vst [vmem:[#allocation111_spill] sm:$0xff] %v5890_v4  ;;  %8866 = vst [vmem:[#allocation112_spill] sm:$0xff] %v5893_v60  ;;  %v5896_v61 = vld [vmem:[#allocation5 + $0x2e8] sm:$0xff]  ;;  %v5899_v62 = vld [vmem:[#allocation5 + $0x2f8] sm:$0xff] }
 0x2b5   :  { %1449 = vmatprep.subr.mxu0 %v5884_v2  ;;  %1520 = vmatprep.subr.mxu1 %v5887_v3  ;;  %8867 = vst [vmem:[#allocation113_spill] sm:$0xff] %v5896_v61  ;;  %8868 = vst [vmem:[#allocation114_spill] sm:$0xff] %v5899_v62  ;;  %v5902_v2 = vld [vmem:[#allocation5 + $0x2e0] sm:$0xff]  ;;  %v5905_v3 = vld [vmem:[#allocation5 + $0x2f0] sm:$0xff] }
 0x2b6   :  { %1450 = vmatpush2.msra.mxu0 %v5890_v4  ;;  %1521 = vmatpush2.msra.mxu1 %v5893_v60  ;;  %8869 = vst [vmem:[#allocation115_spill] sm:$0xff] %v5902_v2  ;;  %8870 = vst [vmem:[#allocation116_spill] sm:$0xff] %v5905_v3  ;;  %v5908_v4 = vld [vmem:[#allocation5 + $0x2c8] sm:$0xff]  ;;  %v5911_v60 = vld [vmem:[#allocation5 + $0x2d8] sm:$0xff] }
 0x2b7   :  { %1451 = vmatprep.subr.mxu0 %v5896_v61  ;;  %1522 = vmatprep.subr.mxu1 %v5899_v62  ;;  %8871 = vst [vmem:[#allocation117_spill] sm:$0xff] %v5908_v4  ;;  %8872 = vst [vmem:[#allocation118_spill] sm:$0xff] %v5911_v60  ;;  %v5914_v61 = vld [vmem:[#allocation5 + $0x2c0] sm:$0xff]  ;;  %v5917_v62 = vld [vmem:[#allocation5 + $0x2d0] sm:$0xff] }
 0x2b8   :  { %1452 = vmatpush2.msra.mxu0 %v5902_v2  ;;  %1523 = vmatpush2.msra.mxu1 %v5905_v3  ;;  %8873 = vst [vmem:[#allocation119_spill] sm:$0xff] %v5914_v61  ;;  %8874 = vst [vmem:[#allocation120_spill] sm:$0xff] %v5917_v62  ;;  %v5920_v2 = vld [vmem:[#allocation5 + $0x2a8] sm:$0xff]  ;;  %v5923_v3 = vld [vmem:[#allocation5 + $0x2b8] sm:$0xff] }
 0x2b9   :  { %1453 = vmatprep.subr.mxu0 %v5908_v4  ;;  %1524 = vmatprep.subr.mxu1 %v5911_v60  ;;  %8875 = vst [vmem:[#allocation121_spill] sm:$0xff] %v5920_v2  ;;  %8876 = vst [vmem:[#allocation122_spill] sm:$0xff] %v5923_v3  ;;  %v5926_v4 = vld [vmem:[#allocation5 + $0x2a0] sm:$0xff]  ;;  %v5929_v60 = vld [vmem:[#allocation5 + $0x2b0] sm:$0xff] }
 0x2ba   :  { %1454 = vmatpush2.msra.mxu0 %v5914_v61  ;;  %1525 = vmatpush2.msra.mxu1 %v5917_v62  ;;  %8877 = vst [vmem:[#allocation123_spill] sm:$0xff] %v5926_v4  ;;  %8878 = vst [vmem:[#allocation124_spill] sm:$0xff] %v5929_v60  ;;  %v5932_v61 = vld [vmem:[#allocation5 + $0x288] sm:$0xff]  ;;  %v5935_v62 = vld [vmem:[#allocation5 + $0x298] sm:$0xff] }
 0x2bb   :  { %1455 = vmatprep.subr.mxu0 %v5920_v2  ;;  %1526 = vmatprep.subr.mxu1 %v5923_v3  ;;  %8879 = vst [vmem:[#allocation125_spill] sm:$0xff] %v5932_v61  ;;  %8880 = vst [vmem:[#allocation126_spill] sm:$0xff] %v5935_v62  ;;  %v5938_v2 = vld [vmem:[#allocation5 + $0x280] sm:$0xff]  ;;  %v5941_v3 = vld [vmem:[#allocation5 + $0x290] sm:$0xff] }
 0x2bc   :  { %1456 = vmatpush2.msra.mxu0 %v5926_v4  ;;  %1527 = vmatpush2.msra.mxu1 %v5929_v60  ;;  %8881 = vst [vmem:[#allocation127_spill] sm:$0xff] %v5938_v2  ;;  %8882 = vst [vmem:[#allocation128_spill] sm:$0xff] %v5941_v3  ;;  %v5944_v4 = vld [vmem:[#allocation5 + $0x268] sm:$0xff]  ;;  %v5947_v60 = vld [vmem:[#allocation5 + $0x278] sm:$0xff] }
 0x2bd   :  { %1457 = vmatprep.subr.mxu0 %v5932_v61  ;;  %1528 = vmatprep.subr.mxu1 %v5935_v62  ;;  %8883 = vst [vmem:[#allocation129_spill] sm:$0xff] %v5944_v4  ;;  %8884 = vst [vmem:[#allocation130_spill] sm:$0xff] %v5947_v60  ;;  %v5950_v61 = vld [vmem:[#allocation5 + $0x260] sm:$0xff]  ;;  %v5953_v62 = vld [vmem:[#allocation5 + $0x270] sm:$0xff] }
 0x2be   :  { %1458 = vmatpush2.msra.mxu0 %v5938_v2  ;;  %1529 = vmatpush2.msra.mxu1 %v5941_v3  ;;  %8885 = vst [vmem:[#allocation131_spill] sm:$0xff] %v5950_v61  ;;  %8886 = vst [vmem:[#allocation132_spill] sm:$0xff] %v5953_v62  ;;  %v5956_v2 = vld [vmem:[#allocation5 + $0x248] sm:$0xff]  ;;  %v5959_v3 = vld [vmem:[#allocation5 + $0x258] sm:$0xff] }
 0x2bf   :  { %1459 = vmatprep.subr.mxu0 %v5944_v4  ;;  %1530 = vmatprep.subr.mxu1 %v5947_v60  ;;  %8887 = vst [vmem:[#allocation133_spill] sm:$0xff] %v5956_v2  ;;  %8888 = vst [vmem:[#allocation134_spill] sm:$0xff] %v5959_v3  ;;  %v5962_v4 = vld [vmem:[#allocation5 + $0x240] sm:$0xff]  ;;  %v5965_v60 = vld [vmem:[#allocation5 + $0x250] sm:$0xff] }
 0x2c0   :  { %1460 = vmatpush2.msra.mxu0 %v5950_v61  ;;  %1531 = vmatpush2.msra.mxu1 %v5953_v62  ;;  %8889 = vst [vmem:[#allocation135_spill] sm:$0xff] %v5962_v4  ;;  %8890 = vst [vmem:[#allocation136_spill] sm:$0xff] %v5965_v60  ;;  %v5968_v61 = vld [vmem:[#allocation5 + $0x228] sm:$0xff]  ;;  %v5971_v62 = vld [vmem:[#allocation5 + $0x238] sm:$0xff] }
 0x2c1   :  { %1461 = vmatprep.subr.mxu0 %v5956_v2  ;;  %1532 = vmatprep.subr.mxu1 %v5959_v3  ;;  %8891 = vst [vmem:[#allocation137_spill] sm:$0xff] %v5968_v61  ;;  %8892 = vst [vmem:[#allocation138_spill] sm:$0xff] %v5971_v62  ;;  %v5974_v2 = vld [vmem:[#allocation5 + $0x220] sm:$0xff]  ;;  %v5977_v3 = vld [vmem:[#allocation5 + $0x230] sm:$0xff] }
 0x2c2   :  { %1462 = vmatpush2.msra.mxu0 %v5962_v4  ;;  %1533 = vmatpush2.msra.mxu1 %v5965_v60  ;;  %8893 = vst [vmem:[#allocation139_spill] sm:$0xff] %v5974_v2  ;;  %8894 = vst [vmem:[#allocation140_spill] sm:$0xff] %v5977_v3  ;;  %v5980_v4 = vld [vmem:[#allocation5 + $0x208] sm:$0xff]  ;;  %v5983_v60 = vld [vmem:[#allocation5 + $0x218] sm:$0xff] }
 0x2c3   :  { %1463 = vmatprep.subr.mxu0 %v5968_v61  ;;  %1534 = vmatprep.subr.mxu1 %v5971_v62  ;;  %8895 = vst [vmem:[#allocation141_spill] sm:$0xff] %v5980_v4  ;;  %8896 = vst [vmem:[#allocation142_spill] sm:$0xff] %v5983_v60  ;;  %v5986_v61 = vld [vmem:[#allocation5 + $0x200] sm:$0xff]  ;;  %v5989_v62 = vld [vmem:[#allocation5 + $0x210] sm:$0xff] }
 0x2c4   :  { %1464 = vmatpush2.msra.mxu0 %v5974_v2  ;;  %1535 = vmatpush2.msra.mxu1 %v5977_v3  ;;  %8897 = vst [vmem:[#allocation144_spill] sm:$0xff] %v5986_v61  ;;  %8898 = vst [vmem:[#allocation143_spill] sm:$0xff] %v5989_v62 }
 0x2c5   :  { %1465 = vmatprep.subr.mxu0 %v5980_v4  ;;  %1536 = vmatprep.subr.mxu1 %v5983_v60 }
 0x2c6   :  { %1466 = vmatpush2.msra.mxu0 %v5986_v61  ;;  %1537 = vmatpush2.msra.mxu1 %v5989_v62 }
 0x2c7   :  { %1569 = vmatprep.subr.mxu0 %v5410_v35  ;;  %1640 = vmatprep.subr.mxu1 %v5413_v37 }
 0x325   :  { %v1133_v3 = vpop.f32.mrf.mxu0  ;;  %v1204_v57 = vpop.f32.mrf.mxu1 }
 0x326   :  { %v1134_v2 = vadd.f32 %v1133_v3, %v5421_v40  ;;  %v1205_v61 = vadd.f32 %v1204_v57, %v5431_v51 }
 0x327   :  { %v1135_v4 = vpop.f32.mrf.mxu0  ;;  %v1206_v55 = vpop.f32.mrf.mxu1 }
 0x328   :  { %v3385_v59 = vmul.f32 -1.442695, %v1134_v2  ;;  %v1136_v58 = vadd.f32 %v1135_v4, %v5425_v42  ;;  %v3387_v53 = vmul.f32 -1.442695, %v1205_v61  ;;  %v1207_v35 = vadd.f32 %v1206_v55, %v5436_v56  ;;  %v8900_v61 = vld [vmem:[#allocation148_spill] sm:$0xff] }
 0x32a   :  { %3532 = vpow2.f32 %v3385_v59  ;;  %v3386_v60 = vmul.f32 -1.442695, %v1136_v58  ;;  %v8899_v58 = vld [vmem:[#allocation146_spill] sm:$0xff] }
 0x32c   :  { %3534 = vpow2.f32 %v3386_v60 }
 0x32d   :  { %3536 = vpow2.f32 %v3387_v53 }
 0x337   :  { %v3533_v62 = vpop.eup %3532 }
 0x338   :  { %v1218_v52 = vadd.f32 1.0, %v3533_v62 }
 0x339   :  { %v3535_v37 = vpop.eup %3534 }
 0x33a   :  { %3538 = vrcp.f32 %v1218_v52  ;;  %v1219_v3 = vadd.f32 1.0, %v3535_v37  ;;  %v3537_v2 = vpop.eup %3536  ;;  %v8901_v37 = vld [vmem:[#allocation147_spill] sm:$0xff] }
 0x33b   :  { %3540 = vtanh.f32 %v1207_v35  ;;  %v1220_v50 = vadd.f32 1.0, %v3537_v2 }
 0x33c   :  { %3542 = vrcp.f32 %v1219_v3 }
 0x346   :  { %v1299_v4 = vpop.f32.mrf.mxu0  ;;  %v1370_v35 = vpop.f32.mrf.mxu1 }
 0x347   :  { %v3539_v59 = vpop.eup %3538  ;;  %v1375_v60 = vadd.f32 %v1299_v4, %v8899_v58  ;;  %v1377_v3 = vadd.f32 %v1370_v35, %v8901_v37 }
 0x348   :  { %v3541_v42 = vpop.eup %3540  ;;  %v1301_v40 = vpop.f32.mrf.mxu0 }
 0x349   :  { %v3543_v57 = vpop.eup %3542  ;;  %v3388_v51 = vmul.f32 -1.442695, %v1375_v60  ;;  %v1376_v34 = vadd.f32 %v1301_v40, %v8900_v61  ;;  %v1229_v62 = vmul.f32 %v3541_v42, %v3539_v59  ;;  %v1372_v4 = vpop.f32.mrf.mxu1  ;;  %v3390_v58 = vmul.f32 -1.442695, %v1377_v3  ;;  %v8902_v60 = vld [vmem:[#allocation149_spill] sm:$0xff] }
 0x34a   :  { %v1228_v55 = vmul.f32 %v3543_v57, %v5441_v10  ;;  %v1378_v56 = vadd.f32 %v1372_v4, %v8902_v60  ;;  %v6017_v60 = vld [vmem:[#allocation2 + $0x1f0] sm:$0xff] }
 0x34b   :  { %3544 = vpow2.f32 %v3388_v51  ;;  %v3389_v52 = vmul.f32 -1.442695, %v1376_v34 }
 0x34c   :  { %v6001_v53 = vadd.f32 %v1229_v62, %v1228_v55 }
 0x34d   :  { %3546 = vpow2.f32 %v3389_v52 }
 0x34e   :  { %3548 = vrcp.f32 %v1220_v50 }
 0x34f   :  { %3550 = vtanh.f32 %v6001_v53 }
 0x350   :  { %3552 = vpow2.f32 %v3390_v58  ;;  %v6014_v58 = vld [vmem:[#allocation2 + $0x1e0] sm:$0xff] }
 0x351   :  { %3554 = vtanh.f32 %v1378_v56 }
 0x358   :  { %v3545_v40 = vpop.eup %3544 }
 0x359   :  { %v1388_v2 = vadd.f32 1.0, %v3545_v40  ;;  %v6023_v40 = vld [vmem:[#allocation2 + $0x1d8] sm:$0xff] }
 0x35a   :  { %v3547_v10 = vpop.eup %3546 }
 0x35b   :  { %v3549_v42 = vpop.eup %3548  ;;  %3556 = vrcp.f32 %v1388_v2  ;;  %v1389_v34 = vadd.f32 1.0, %v3547_v10  ;;  %v6026_v2 = vld [vmem:[#allocation2 + $0x1c0] sm:$0xff]  ;;  %v6029_v10 = vld [vmem:[#allocation2 + $0x1d0] sm:$0xff] }
 0x35c   :  { %v3551_v51 = vpop.eup %3550 }
 0x35d   :  { %3558 = vrcp.f32 %v1389_v34  ;;  %v1232_v50 = vmul.f32 %v3551_v51, %v3549_v42  ;;  %v3553_v59 = vpop.eup %3552  ;;  %v6032_v42 = vld [vmem:[#allocation2 + $0x1a8] sm:$0xff]  ;;  %v6035_v34 = vld [vmem:[#allocation2 + $0x1b8] sm:$0xff]  ;;  %v6038_v51 = vld [vmem:[#allocation2 + $0x1a0] sm:$0xff] }
 0x35e   :  { %v3555_v57 = vpop.eup %3554  ;;  %v1390_v52 = vadd.f32 1.0, %v3553_v59  ;;  %v6044_v59 = vld [vmem:[#allocation2 + $0x188] sm:$0xff] }
 0x35f   :  { %1467 = vmatprep.mubr.f32.mxu0 %v1232_v50  ;;  %1538 = vmatprep.mubr.f32.mxu1 %v1232_v50  ;;  %v6041_v50 = vld [vmem:[#allocation2 + $0x1b0] sm:$0xff] }
 0x360   :  { %3560 = vrcp.f32 %v1390_v52  ;;  %v6059_v52 = vld [vmem:[#allocation2 + $0x178] sm:$0xff] }
 0x368   :  { %v3557_v61 = vpop.eup %3556 }
 0x369   :  { %v1399_v55 = vmul.f32 %v3557_v61, %v3555_v57  ;;  %v6047_v57 = vld [vmem:[#allocation2 + $0x198] sm:$0xff]  ;;  %v6050_v61 = vld [vmem:[#allocation2 + $0x180] sm:$0xff] }
 0x36a   :  { %v3559_v62 = vpop.eup %3558 }
 0x36b   :  { %v1398_v35 = vmul.f32 %v3559_v62, %v5447_v1  ;;  %v6020_v1 = vld [vmem:[#allocation2 + $0x1c8] sm:$0xff] }
 0x36c   :  { %v6056_v62 = vld [vmem:[#allocation2 + $0x168] sm:$0xff] }
 0x36d   :  { %v6007_v37 = vadd.f32 %v1399_v55, %v1398_v35  ;;  %v3561_v56 = vpop.eup %3560  ;;  %v6053_v55 = vld [vmem:[#allocation2 + $0x190] sm:$0xff]  ;;  %v6062_v35 = vld [vmem:[#allocation2 + $0x160] sm:$0xff] }
 0x36f   :  { %3562 = vtanh.f32 %v6007_v37 }
 0x37c   :  { %v3563_v3 = vpop.eup %3562 }
 0x37d   :  { %v6010_v4 = vmul.f32 %v3563_v3, %v3561_v56  ;;  %v6065_v56 = vld [vmem:[#allocation2 + $0x170] sm:$0xff] }
 0x37e   :  { %v8945_v3 = vld [vmem:[#allocation56_spill] sm:$0xff] }
 0x37f   :  { %1468 = vmatmul.mubr.f32.vlgmr.msra.gmra.mxu0 %v6010_v4  ;;  %1539 = vmatmul.mubr.f32.vlgmr.msra.gmra.mxu1 %v6010_v4 }
 0x380   :  { %1570 = vmatpush1.msra.mxu0 %v6014_v58  ;;  %1641 = vmatpush1.msra.mxu1 %v6017_v60 }
 0x381   :  { %1571 = vmatprep.subr.mxu0 %v6020_v1  ;;  %1642 = vmatprep.subr.mxu1 %v6023_v40 }
 0x382   :  { %1572 = vmatpush1.msra.mxu0 %v6026_v2  ;;  %1643 = vmatpush1.msra.mxu1 %v6029_v10 }
 0x383   :  { %1573 = vmatprep.subr.mxu0 %v6032_v42  ;;  %1644 = vmatprep.subr.mxu1 %v6035_v34 }
 0x384   :  { %1574 = vmatpush1.msra.mxu0 %v6038_v51  ;;  %1645 = vmatpush1.msra.mxu1 %v6041_v50 }
 0x385   :  { %1575 = vmatprep.subr.mxu0 %v6044_v59  ;;  %1646 = vmatprep.subr.mxu1 %v6047_v57 }
 0x386   :  { %1576 = vmatpush1.msra.mxu0 %v6050_v61  ;;  %1647 = vmatpush1.msra.mxu1 %v6053_v55 }
 0x387   :  { %1577 = vmatprep.subr.mxu0 %v6056_v62  ;;  %1648 = vmatprep.subr.mxu1 %v6059_v52 }
 0x388   :  { %1578 = vmatpush1.msra.mxu0 %v6062_v35  ;;  %1649 = vmatpush1.msra.mxu1 %v6065_v56 }
 0x389   :  { %1579 = vmatprep.subr.mxu0 %v5472_v63  ;;  %1650 = vmatprep.subr.mxu1 %v5475_v11  ;;  %v8903_v63 = vld [vmem:[#allocation15_spill] sm:$0xff]  ;;  %v8904_v11 = vmov 0.0  }
 0x38a   :  { %1580 = vmatpush1.msra.mxu0 %v5478_v26  ;;  %1651 = vmatpush1.msra.mxu1 %v5481_v19  ;;  %v8905_v26 = vld [vmem:[#allocation16_spill] sm:$0xff]  ;;  %v8906_v19 = vld [vmem:[#allocation17_spill] sm:$0xff] }
 0x38b   :  { %1581 = vmatprep.subr.mxu0 %v5484_v18  ;;  %1652 = vmatprep.subr.mxu1 %v5487_v0  ;;  %v8907_v18 = vld [vmem:[#allocation18_spill] sm:$0xff]  ;;  %v8908_v0 = vld [vmem:[#allocation19_spill] sm:$0xff] }
 0x38c   :  { %1582 = vmatpush1.msra.mxu0 %v5490_v45  ;;  %1653 = vmatpush1.msra.mxu1 %v5493_v31  ;;  %v8909_v45 = vld [vmem:[#allocation20_spill] sm:$0xff]  ;;  %v8910_v31 = vld [vmem:[#allocation21_spill] sm:$0xff] }
 0x38d   :  { %1583 = vmatprep.subr.mxu0 %v5496_v54  ;;  %1654 = vmatprep.subr.mxu1 %v5499_v25  ;;  %v8911_v54 = vld [vmem:[#allocation22_spill] sm:$0xff]  ;;  %v8912_v25 = vld [vmem:[#allocation23_spill] sm:$0xff] }
 0x38e   :  { %1584 = vmatpush1.msra.mxu0 %v5502_v28  ;;  %1655 = vmatpush1.msra.mxu1 %v5505_v17  ;;  %v8913_v28 = vld [vmem:[#allocation24_spill] sm:$0xff]  ;;  %v8914_v17 = vld [vmem:[#allocation25_spill] sm:$0xff] }
 0x38f   :  { %1585 = vmatprep.subr.mxu0 %v5508_v23  ;;  %1656 = vmatprep.subr.mxu1 %v5511_v27  ;;  %v8915_v23 = vld [vmem:[#allocation26_spill] sm:$0xff]  ;;  %v8916_v27 = vld [vmem:[#allocation27_spill] sm:$0xff] }
 0x390   :  { %1586 = vmatpush1.msra.mxu0 %v5514_v22  ;;  %1657 = vmatpush1.msra.mxu1 %v5517_v29  ;;  %v8917_v22 = vld [vmem:[#allocation28_spill] sm:$0xff]  ;;  %v8918_v29 = vld [vmem:[#allocation29_spill] sm:$0xff] }
 0x391   :  { %1587 = vmatprep.subr.mxu0 %v5520_v30  ;;  %1658 = vmatprep.subr.mxu1 %v5523_v9  ;;  %v8919_v30 = vld [vmem:[#allocation30_spill] sm:$0xff]  ;;  %v8920_v9 = vld [vmem:[#allocation31_spill] sm:$0xff] }
 0x392   :  { %1588 = vmatpush1.msra.mxu0 %v5526_v21  ;;  %1659 = vmatpush1.msra.mxu1 %v5529_v5  ;;  %v8921_v21 = vld [vmem:[#allocation32_spill] sm:$0xff]  ;;  %v8922_v5 = vld [vmem:[#allocation33_spill] sm:$0xff] }
 0x393   :  { %1589 = vmatprep.subr.mxu0 %v5532_v6  ;;  %1660 = vmatprep.subr.mxu1 %v5535_v36  ;;  %v8923_v6 = vld [vmem:[#allocation34_spill] sm:$0xff]  ;;  %v8924_v36 = vld [vmem:[#allocation35_spill] sm:$0xff] }
 0x394   :  { %1590 = vmatpush1.msra.mxu0 %v5538_v7  ;;  %1661 = vmatpush1.msra.mxu1 %v5541_v8  ;;  %v8925_v7 = vld [vmem:[#allocation36_spill] sm:$0xff]  ;;  %v8926_v8 = vld [vmem:[#allocation37_spill] sm:$0xff] }
 0x395   :  { %1591 = vmatprep.subr.mxu0 %v5544_v12  ;;  %1662 = vmatprep.subr.mxu1 %v5547_v13  ;;  %v8927_v12 = vld [vmem:[#allocation38_spill] sm:$0xff]  ;;  %v8928_v13 = vld [vmem:[#allocation39_spill] sm:$0xff] }
 0x396   :  { %1592 = vmatpush1.msra.mxu0 %v5550_v14  ;;  %1663 = vmatpush1.msra.mxu1 %v5553_v15  ;;  %v8929_v14 = vld [vmem:[#allocation40_spill] sm:$0xff]  ;;  %v8930_v15 = vld [vmem:[#allocation41_spill] sm:$0xff] }
 0x397   :  { %1593 = vmatprep.subr.mxu0 %v5556_v16  ;;  %1664 = vmatprep.subr.mxu1 %v5559_v20  ;;  %v8931_v16 = vld [vmem:[#allocation42_spill] sm:$0xff]  ;;  %v8932_v20 = vld [vmem:[#allocation43_spill] sm:$0xff] }
 0x398   :  { %1594 = vmatpush1.msra.mxu0 %v5562_v24  ;;  %1665 = vmatpush1.msra.mxu1 %v5565_v32  ;;  %v8933_v24 = vld [vmem:[#allocation44_spill] sm:$0xff]  ;;  %v8934_v32 = vld [vmem:[#allocation45_spill] sm:$0xff] }
 0x399   :  { %1595 = vmatprep.subr.mxu0 %v5568_v33  ;;  %1666 = vmatprep.subr.mxu1 %v5571_v38  ;;  %v8935_v33 = vld [vmem:[#allocation46_spill] sm:$0xff]  ;;  %v8936_v38 = vld [vmem:[#allocation47_spill] sm:$0xff] }
 0x39a   :  { %1596 = vmatpush1.msra.mxu0 %v5574_v39  ;;  %1667 = vmatpush1.msra.mxu1 %v5577_v41  ;;  %v8937_v39 = vld [vmem:[#allocation48_spill] sm:$0xff]  ;;  %v8938_v41 = vld [vmem:[#allocation49_spill] sm:$0xff] }
 0x39b   :  { %1597 = vmatprep.subr.mxu0 %v5580_v43  ;;  %1668 = vmatprep.subr.mxu1 %v5583_v44  ;;  %v8939_v43 = vld [vmem:[#allocation50_spill] sm:$0xff]  ;;  %v8940_v44 = vld [vmem:[#allocation51_spill] sm:$0xff] }
 0x39c   :  { %1598 = vmatpush1.msra.mxu0 %v5586_v46  ;;  %1669 = vmatpush1.msra.mxu1 %v5589_v47  ;;  %v8941_v46 = vld [vmem:[#allocation52_spill] sm:$0xff]  ;;  %v8942_v47 = vld [vmem:[#allocation53_spill] sm:$0xff] }
 0x39d   :  { %1599 = vmatprep.subr.mxu0 %v5592_v48  ;;  %1670 = vmatprep.subr.mxu1 %v5595_v49  ;;  %v8943_v48 = vld [vmem:[#allocation54_spill] sm:$0xff]  ;;  %v8944_v49 = vld [vmem:[#allocation55_spill] sm:$0xff] }
 0x39e   :  { %1600 = vmatpush1.msra.mxu0 %v8903_v63  ;;  %1633 = vmatprep.mubr.f32.mxu0 %v8904_v11  ;;  %v8947_v63 = vld [vmem:[#allocation58_spill] sm:$0xff] }
 0x39f   :  { %1671 = vmatpush1.msra.mxu1 %v8905_v26  ;;  %1704 = vmatprep.mubr.f32.mxu1 %v8904_v11  ;;  %v8948_v26 = vld [vmem:[#allocation59_spill] sm:$0xff] }
 0x3a0   :  { %1634 = vmatmul.mubr.f32.vlgmr.msra.gmra.mxu0 %v6010_v4  ;;  %1705 = vmatmul.mubr.f32.vlgmr.msra.gmra.mxu1 %v6010_v4  ;;  %v8946_v4 = vld [vmem:[#allocation57_spill] sm:$0xff] }
 0x3a1   :  { %1739 = vmatprep.subr.mxu0 %v8906_v19  ;;  %1810 = vmatprep.subr.mxu1 %v8907_v18  ;;  %v8949_v19 = vld [vmem:[#allocation60_spill] sm:$0xff]  ;;  %v8950_v18 = vld [vmem:[#allocation61_spill] sm:$0xff] }
 0x3a2   :  { %1740 = vmatpush1.msra.mxu0 %v8908_v0  ;;  %1811 = vmatpush1.msra.mxu1 %v8909_v45  ;;  %v8951_v0 = vld [vmem:[#allocation62_spill] sm:$0xff]  ;;  %v8952_v45 = vld [vmem:[#allocation63_spill] sm:$0xff] }
 0x3a3   :  { %1741 = vmatprep.subr.mxu0 %v8910_v31  ;;  %1812 = vmatprep.subr.mxu1 %v8911_v54  ;;  %v8953_v31 = vld [vmem:[#allocation64_spill] sm:$0xff]  ;;  %v8954_v54 = vld [vmem:[#allocation65_spill] sm:$0xff] }
 0x3a4   :  { %1742 = vmatpush1.msra.mxu0 %v8912_v25  ;;  %1813 = vmatpush1.msra.mxu1 %v8913_v28  ;;  %v8955_v25 = vld [vmem:[#allocation66_spill] sm:$0xff]  ;;  %v8956_v28 = vld [vmem:[#allocation67_spill] sm:$0xff] }
 0x3a5   :  { %1743 = vmatprep.subr.mxu0 %v8914_v17  ;;  %1814 = vmatprep.subr.mxu1 %v8915_v23  ;;  %v8957_v17 = vld [vmem:[#allocation68_spill] sm:$0xff]  ;;  %v8958_v23 = vld [vmem:[#allocation69_spill] sm:$0xff] }
 0x3a6   :  { %1744 = vmatpush1.msra.mxu0 %v8916_v27  ;;  %1815 = vmatpush1.msra.mxu1 %v8917_v22  ;;  %v8959_v27 = vld [vmem:[#allocation70_spill] sm:$0xff]  ;;  %v8960_v22 = vld [vmem:[#allocation71_spill] sm:$0xff] }
 0x3a7   :  { %1745 = vmatprep.subr.mxu0 %v8918_v29  ;;  %1816 = vmatprep.subr.mxu1 %v8919_v30  ;;  %v8961_v29 = vld [vmem:[#allocation72_spill] sm:$0xff]  ;;  %v8962_v30 = vld [vmem:[#allocation73_spill] sm:$0xff] }
 0x3a8   :  { %1746 = vmatpush1.msra.mxu0 %v8920_v9  ;;  %1817 = vmatpush1.msra.mxu1 %v8921_v21  ;;  %v8963_v9 = vld [vmem:[#allocation74_spill] sm:$0xff]  ;;  %v8964_v21 = vld [vmem:[#allocation75_spill] sm:$0xff] }
 0x3a9   :  { %1747 = vmatprep.subr.mxu0 %v8922_v5  ;;  %1818 = vmatprep.subr.mxu1 %v8923_v6  ;;  %v8965_v5 = vld [vmem:[#allocation76_spill] sm:$0xff]  ;;  %v8966_v6 = vld [vmem:[#allocation77_spill] sm:$0xff] }
 0x3aa   :  { %1748 = vmatpush1.msra.mxu0 %v8924_v36  ;;  %1819 = vmatpush1.msra.mxu1 %v8925_v7  ;;  %v8967_v36 = vld [vmem:[#allocation78_spill] sm:$0xff]  ;;  %v8968_v7 = vld [vmem:[#allocation79_spill] sm:$0xff] }
 0x3ab   :  { %1749 = vmatprep.subr.mxu0 %v8926_v8  ;;  %1820 = vmatprep.subr.mxu1 %v8927_v12  ;;  %v8969_v8 = vld [vmem:[#allocation80_spill] sm:$0xff]  ;;  %v8970_v12 = vld [vmem:[#allocation81_spill] sm:$0xff] }
 0x3ac   :  { %1750 = vmatpush1.msra.mxu0 %v8928_v13  ;;  %1821 = vmatpush1.msra.mxu1 %v8929_v14  ;;  %v8971_v13 = vld [vmem:[#allocation82_spill] sm:$0xff]  ;;  %v8972_v14 = vld [vmem:[#allocation83_spill] sm:$0xff] }
 0x3ad   :  { %1751 = vmatprep.subr.mxu0 %v8930_v15  ;;  %1822 = vmatprep.subr.mxu1 %v8931_v16  ;;  %v8973_v15 = vld [vmem:[#allocation84_spill] sm:$0xff]  ;;  %v8974_v16 = vld [vmem:[#allocation85_spill] sm:$0xff] }
 0x3ae   :  { %1752 = vmatpush1.msra.mxu0 %v8932_v20  ;;  %1823 = vmatpush1.msra.mxu1 %v8933_v24  ;;  %v8975_v20 = vld [vmem:[#allocation86_spill] sm:$0xff]  ;;  %v8976_v24 = vld [vmem:[#allocation87_spill] sm:$0xff] }
 0x3af   :  { %1753 = vmatprep.subr.mxu0 %v8934_v32  ;;  %1824 = vmatprep.subr.mxu1 %v8935_v33  ;;  %v8977_v32 = vld [vmem:[#allocation88_spill] sm:$0xff]  ;;  %v8978_v33 = vld [vmem:[#allocation89_spill] sm:$0xff] }
 0x3b0   :  { %1754 = vmatpush1.msra.mxu0 %v8936_v38  ;;  %1825 = vmatpush1.msra.mxu1 %v8937_v39  ;;  %v8979_v38 = vld [vmem:[#allocation90_spill] sm:$0xff]  ;;  %v8980_v39 = vld [vmem:[#allocation91_spill] sm:$0xff] }
 0x3b1   :  { %1755 = vmatprep.subr.mxu0 %v8938_v41  ;;  %1826 = vmatprep.subr.mxu1 %v8939_v43  ;;  %v8981_v41 = vld [vmem:[#allocation92_spill] sm:$0xff]  ;;  %v8982_v43 = vld [vmem:[#allocation93_spill] sm:$0xff] }
 0x3b2   :  { %1756 = vmatpush1.msra.mxu0 %v8940_v44  ;;  %1827 = vmatpush1.msra.mxu1 %v8941_v46  ;;  %v8983_v44 = vld [vmem:[#allocation94_spill] sm:$0xff]  ;;  %v8984_v46 = vld [vmem:[#allocation95_spill] sm:$0xff] }
 0x3b3   :  { %1757 = vmatprep.subr.mxu0 %v8942_v47  ;;  %1828 = vmatprep.subr.mxu1 %v8943_v48  ;;  %v8985_v47 = vld [vmem:[#allocation96_spill] sm:$0xff]  ;;  %v8986_v48 = vld [vmem:[#allocation97_spill] sm:$0xff] }
 0x3b4   :  { %1758 = vmatpush1.msra.mxu0 %v8944_v49  ;;  %1829 = vmatpush1.msra.mxu1 %v8945_v3  ;;  %v8987_v49 = vld [vmem:[#allocation98_spill] sm:$0xff]  ;;  %v8988_v3 = vld [vmem:[#allocation99_spill] sm:$0xff] }
 0x3b5   :  { %1759 = vmatprep.subr.mxu0 %v8946_v4  ;;  %1830 = vmatprep.subr.mxu1 %v8947_v63  ;;  %v8989_v4 = vld [vmem:[#allocation100_spill] sm:$0xff]  ;;  %v8990_v63 = vld [vmem:[#allocation101_spill] sm:$0xff] }
 0x3b6   :  { %1760 = vmatpush1.msra.mxu0 %v8948_v26  ;;  %1831 = vmatpush1.msra.mxu1 %v8949_v19  ;;  %v8991_v26 = vld [vmem:[#allocation102_spill] sm:$0xff]  ;;  %v8992_v19 = vld [vmem:[#allocation103_spill] sm:$0xff] }
 0x3b7   :  { %1761 = vmatprep.subr.mxu0 %v8950_v18  ;;  %1832 = vmatprep.subr.mxu1 %v8951_v0  ;;  %v8993_v18 = vld [vmem:[#allocation104_spill] sm:$0xff]  ;;  %v8994_v0 = vld [vmem:[#allocation105_spill] sm:$0xff] }
 0x3b8   :  { %1762 = vmatpush1.msra.mxu0 %v8952_v45  ;;  %1833 = vmatpush1.msra.mxu1 %v8953_v31  ;;  %v8995_v45 = vld [vmem:[#allocation106_spill] sm:$0xff]  ;;  %v8996_v31 = vld [vmem:[#allocation107_spill] sm:$0xff] }
 0x3b9   :  { %1763 = vmatprep.subr.mxu0 %v8954_v54  ;;  %1834 = vmatprep.subr.mxu1 %v8955_v25  ;;  %v8997_v54 = vld [vmem:[#allocation108_spill] sm:$0xff]  ;;  %v8998_v25 = vld [vmem:[#allocation109_spill] sm:$0xff] }
 0x3ba   :  { %1764 = vmatpush1.msra.mxu0 %v8956_v28  ;;  %1835 = vmatpush1.msra.mxu1 %v8957_v17  ;;  %v8999_v28 = vld [vmem:[#allocation110_spill] sm:$0xff]  ;;  %v9000_v17 = vld [vmem:[#allocation111_spill] sm:$0xff] }
 0x3bb   :  { %1765 = vmatprep.subr.mxu0 %v8958_v23  ;;  %1836 = vmatprep.subr.mxu1 %v8959_v27  ;;  %v9001_v23 = vld [vmem:[#allocation112_spill] sm:$0xff]  ;;  %v9002_v27 = vld [vmem:[#allocation113_spill] sm:$0xff] }
 0x3bc   :  { %1766 = vmatpush1.msra.mxu0 %v8960_v22  ;;  %1837 = vmatpush1.msra.mxu1 %v8961_v29  ;;  %v9003_v22 = vld [vmem:[#allocation114_spill] sm:$0xff]  ;;  %v9004_v29 = vld [vmem:[#allocation115_spill] sm:$0xff] }
 0x3bd   :  { %1767 = vmatprep.subr.mxu0 %v8962_v30  ;;  %1838 = vmatprep.subr.mxu1 %v8963_v9  ;;  %v9005_v30 = vld [vmem:[#allocation116_spill] sm:$0xff]  ;;  %v9006_v9 = vld [vmem:[#allocation117_spill] sm:$0xff] }
 0x3be   :  { %1768 = vmatpush1.msra.mxu0 %v8964_v21  ;;  %1839 = vmatpush1.msra.mxu1 %v8965_v5  ;;  %v9007_v21 = vld [vmem:[#allocation118_spill] sm:$0xff]  ;;  %v9008_v5 = vld [vmem:[#allocation119_spill] sm:$0xff] }
 0x3bf   :  { %1769 = vmatprep.subr.mxu0 %v8966_v6  ;;  %1840 = vmatprep.subr.mxu1 %v8967_v36  ;;  %v9009_v6 = vld [vmem:[#allocation120_spill] sm:$0xff]  ;;  %v9010_v36 = vld [vmem:[#allocation121_spill] sm:$0xff] }
 0x3c0   :  { %1770 = vmatpush1.msra.mxu0 %v8968_v7  ;;  %1841 = vmatpush1.msra.mxu1 %v8969_v8  ;;  %v9011_v7 = vld [vmem:[#allocation122_spill] sm:$0xff]  ;;  %v9012_v8 = vld [vmem:[#allocation123_spill] sm:$0xff] }
 0x3c1   :  { %1771 = vmatprep.subr.mxu0 %v8970_v12  ;;  %1842 = vmatprep.subr.mxu1 %v8971_v13  ;;  %v9013_v12 = vld [vmem:[#allocation124_spill] sm:$0xff]  ;;  %v9014_v13 = vld [vmem:[#allocation125_spill] sm:$0xff] }
 0x3c2   :  { %1772 = vmatpush2.msra.mxu0 %v8972_v14  ;;  %1843 = vmatpush2.msra.mxu1 %v8973_v15  ;;  %v9015_v14 = vld [vmem:[#allocation126_spill] sm:$0xff]  ;;  %v9016_v15 = vld [vmem:[#allocation127_spill] sm:$0xff] }
 0x3c3   :  { %1773 = vmatprep.subr.mxu0 %v8974_v16  ;;  %1844 = vmatprep.subr.mxu1 %v8975_v20  ;;  %v9017_v16 = vld [vmem:[#allocation128_spill] sm:$0xff]  ;;  %v9018_v20 = vld [vmem:[#allocation129_spill] sm:$0xff] }
 0x3c4   :  { %1774 = vmatpush2.msra.mxu0 %v8976_v24  ;;  %1845 = vmatpush2.msra.mxu1 %v8977_v32  ;;  %v9019_v24 = vld [vmem:[#allocation130_spill] sm:$0xff]  ;;  %v9020_v32 = vld [vmem:[#allocation131_spill] sm:$0xff] }
 0x3c5   :  { %1775 = vmatprep.subr.mxu0 %v8978_v33  ;;  %1846 = vmatprep.subr.mxu1 %v8979_v38  ;;  %v9021_v33 = vld [vmem:[#allocation132_spill] sm:$0xff]  ;;  %v9022_v38 = vld [vmem:[#allocation133_spill] sm:$0xff] }
 0x3c6   :  { %1776 = vmatpush2.msra.mxu0 %v8980_v39  ;;  %1847 = vmatpush2.msra.mxu1 %v8981_v41  ;;  %v9023_v39 = vld [vmem:[#allocation134_spill] sm:$0xff]  ;;  %v9024_v41 = vld [vmem:[#allocation135_spill] sm:$0xff] }
 0x3c7   :  { %1777 = vmatprep.subr.mxu0 %v8982_v43  ;;  %1848 = vmatprep.subr.mxu1 %v8983_v44  ;;  %v9025_v43 = vld [vmem:[#allocation136_spill] sm:$0xff]  ;;  %v9026_v44 = vld [vmem:[#allocation137_spill] sm:$0xff] }
 0x3c8   :  { %1778 = vmatpush2.msra.mxu0 %v8984_v46  ;;  %1849 = vmatpush2.msra.mxu1 %v8985_v47  ;;  %v9027_v46 = vld [vmem:[#allocation138_spill] sm:$0xff]  ;;  %v9028_v47 = vld [vmem:[#allocation139_spill] sm:$0xff] }
 0x3c9   :  { %1779 = vmatprep.subr.mxu0 %v8986_v48  ;;  %1850 = vmatprep.subr.mxu1 %v8987_v49  ;;  %v9029_v48 = vld [vmem:[#allocation140_spill] sm:$0xff]  ;;  %v9030_v49 = vld [vmem:[#allocation141_spill] sm:$0xff] }
 0x3ca   :  { %1780 = vmatpush2.msra.mxu0 %v8988_v3  ;;  %1851 = vmatpush2.msra.mxu1 %v8989_v4  ;;  %v9031_v3 = vld [vmem:[#allocation142_spill] sm:$0xff]  ;;  %v9032_v4 = vld [vmem:[#allocation144_spill] sm:$0xff] }
 0x3cb   :  { %1781 = vmatprep.subr.mxu0 %v8990_v63  ;;  %1852 = vmatprep.subr.mxu1 %v8991_v26  ;;  %v9033_v63 = vld [vmem:[#allocation143_spill] sm:$0xff] }
 0x3cc   :  { %1782 = vmatpush2.msra.mxu0 %v8992_v19  ;;  %1853 = vmatpush2.msra.mxu1 %v8993_v18  ;;  %v6244_v26 = vld [vmem:[#allocation2 + $0x1e8] sm:$0xff]  ;;  %v6247_v19 = vld [vmem:[#allocation2 + $0x1f8] sm:$0xff] }
 0x3cd   :  { %1783 = vmatprep.subr.mxu0 %v8994_v0  ;;  %1854 = vmatprep.subr.mxu1 %v8995_v45  ;;  %v9034_v0 = vld [vmem:[#allocation11_spill] sm:$0xff] }
 0x3ce   :  { %1784 = vmatpush2.msra.mxu0 %v8996_v31  ;;  %1855 = vmatpush2.msra.mxu1 %v8997_v54 }
 0x3cf   :  { %1785 = vmatprep.subr.mxu0 %v8998_v25  ;;  %1856 = vmatprep.subr.mxu1 %v8999_v28  ;;  %v9035_v25 = vld [vmem:[#allocation12_spill] sm:$0xff] }
 0x3d0   :  { %1786 = vmatpush2.msra.mxu0 %v9000_v17  ;;  %1857 = vmatpush2.msra.mxu1 %v9001_v23 }
 0x3d1   :  { %1787 = vmatprep.subr.mxu0 %v9002_v27  ;;  %1858 = vmatprep.subr.mxu1 %v9003_v22  ;;  %v9036_v27 = vld [vmem:[#allocation13_spill] sm:$0xff] }
 0x3d2   :  { %1788 = vmatpush2.msra.mxu0 %v9004_v29  ;;  %1859 = vmatpush2.msra.mxu1 %v9005_v30 }
 0x3d3   :  { %1789 = vmatprep.subr.mxu0 %v9006_v9  ;;  %1860 = vmatprep.subr.mxu1 %v9007_v21  ;;  %v9037_v21 = vld [vmem:[#allocation14_spill] sm:$0xff] }
 0x3d4   :  { %1790 = vmatpush2.msra.mxu0 %v9008_v5  ;;  %1861 = vmatpush2.msra.mxu1 %v9009_v6 }
 0x3d5   :  { %1791 = vmatprep.subr.mxu0 %v9010_v36  ;;  %1862 = vmatprep.subr.mxu1 %v9011_v7 }
 0x3d6   :  { %1792 = vmatpush2.msra.mxu0 %v9012_v8  ;;  %1863 = vmatpush2.msra.mxu1 %v9013_v12 }
 0x3d7   :  { %1793 = vmatprep.subr.mxu0 %v9014_v13  ;;  %1864 = vmatprep.subr.mxu1 %v9015_v14  ;;  %v9038_v14 = vld [vmem:[#allocation150_spill] sm:$0xff] }
 0x3d8   :  { %1794 = vmatpush2.msra.mxu0 %v9016_v15  ;;  %1865 = vmatpush2.msra.mxu1 %v9017_v16 }
 0x3d9   :  { %1795 = vmatprep.subr.mxu0 %v9018_v20  ;;  %1866 = vmatprep.subr.mxu1 %v9019_v24 }
 0x3da   :  { %1796 = vmatpush2.msra.mxu0 %v9020_v32  ;;  %1867 = vmatpush2.msra.mxu1 %v9021_v33  ;;  %v9039_v33 = vld [vmem:[#allocation152_spill] sm:$0xff] }
 0x3db   :  { %1797 = vmatprep.subr.mxu0 %v9022_v38  ;;  %1868 = vmatprep.subr.mxu1 %v9023_v39 }
 0x3dc   :  { %1798 = vmatpush2.msra.mxu0 %v9024_v41  ;;  %1869 = vmatpush2.msra.mxu1 %v9025_v43 }
 0x3dd   :  { %1799 = vmatprep.subr.mxu0 %v9026_v44  ;;  %1870 = vmatprep.subr.mxu1 %v9027_v46 }
 0x3de   :  { %1800 = vmatpush2.msra.mxu0 %v9028_v47  ;;  %1871 = vmatpush2.msra.mxu1 %v9029_v48  ;;  %v9040_v48 = vld [vmem:[#allocation151_spill] sm:$0xff] }
 0x3df   :  { %1801 = vmatprep.subr.mxu0 %v9030_v49  ;;  %1872 = vmatprep.subr.mxu1 %v9031_v3 }
 0x3e0   :  { %1802 = vmatpush2.msra.mxu0 %v9032_v4  ;;  %1873 = vmatpush2.msra.mxu1 %v9033_v63  ;;  %v9041_v63 = vld [vmem:[#allocation153_spill] sm:$0xff] }
 0x3e1   :  { %1905 = vmatprep.subr.mxu0 %v6244_v26  ;;  %1976 = vmatprep.subr.mxu1 %v6247_v19 }
 0x43f   :  { %v1469_v18 = vpop.f32.mrf.mxu0  ;;  %v1540_v23 = vpop.f32.mrf.mxu1 }
 0x440   :  { %v1470_v45 = vadd.f32 %v1469_v18, %v9034_v0  ;;  %v1541_v22 = vadd.f32 %v1540_v23, %v9036_v27 }
 0x441   :  { %v1471_v31 = vpop.f32.mrf.mxu0  ;;  %v1542_v29 = vpop.f32.mrf.mxu1 }
 0x442   :  { %v3391_v54 = vmul.f32 -1.442695, %v1470_v45  ;;  %v1472_v28 = vadd.f32 %v1471_v31, %v9035_v25  ;;  %v3393_v30 = vmul.f32 -1.442695, %v1541_v22  ;;  %v1543_v5 = vadd.f32 %v1542_v29, %v9037_v21 }
 0x444   :  { %3564 = vpow2.f32 %v3391_v54  ;;  %v3392_v17 = vmul.f32 -1.442695, %v1472_v28 }
 0x446   :  { %3566 = vpow2.f32 %v3392_v17 }
 0x447   :  { %3568 = vpow2.f32 %v3393_v30 }
 0x451   :  { %v3565_v9 = vpop.eup %3564 }
 0x452   :  { %v1554_v6 = vadd.f32 1.0, %v3565_v9 }
 0x453   :  { %v3567_v36 = vpop.eup %3566 }
 0x454   :  { %3570 = vrcp.f32 %v1554_v6  ;;  %v1555_v7 = vadd.f32 1.0, %v3567_v36  ;;  %v3569_v8 = vpop.eup %3568 }
 0x455   :  { %3572 = vtanh.f32 %v1543_v5  ;;  %v1556_v39 = vadd.f32 1.0, %v3569_v8 }
 0x456   :  { %3574 = vrcp.f32 %v1555_v7 }
 0x460   :  { %v1635_v12 = vpop.f32.mrf.mxu0  ;;  %v1706_v47 = vpop.f32.mrf.mxu1 }
 0x461   :  { %v3571_v13 = vpop.eup %3570  ;;  %v1711_v15 = vadd.f32 %v1635_v12, %v9038_v14  ;;  %v1713_v49 = vadd.f32 %v1706_v47, %v9040_v48  ;;  %v6345_v14 = vld [vmem:[#allocation2 + $0xd0] sm:$0xff]  ;;  %v6384_v48 = vld [vmem:[#allocation2 + $0x48] sm:$0xff] }
 0x462   :  { %v3573_v16 = vpop.eup %3572  ;;  %v1637_v20 = vpop.f32.mrf.mxu0  ;;  %v6381_v47 = vld [vmem:[#allocation2 + $0x70] sm:$0xff] }
 0x463   :  { %v3575_v24 = vpop.eup %3574  ;;  %v3394_v32 = vmul.f32 -1.442695, %v1711_v15  ;;  %v1712_v38 = vadd.f32 %v1637_v20, %v9039_v33  ;;  %v1565_v43 = vmul.f32 %v3573_v16, %v3571_v13  ;;  %v1708_v3 = vpop.f32.mrf.mxu1  ;;  %v3396_v4 = vmul.f32 -1.442695, %v1713_v49  ;;  %v6348_v15 = vld [vmem:[#allocation2 + $0xa8] sm:$0xff]  ;;  %v6351_v16 = vld [vmem:[#allocation2 + $0xb8] sm:$0xff] }
 0x464   :  { %v1564_v41 = vmul.f32 %v3575_v24, %v6001_v53  ;;  %v1714_v18 = vadd.f32 %v1708_v3, %v9041_v63  ;;  %v6354_v20 = vld [vmem:[#allocation2 + $0xa0] sm:$0xff]  ;;  %v6357_v24 = vld [vmem:[#allocation2 + $0xb0] sm:$0xff]  ;;  %v6363_v33 = vld [vmem:[#allocation2 + $0x98] sm:$0xff] }
 0x465   :  { %3576 = vpow2.f32 %v3394_v32  ;;  %v3395_v44 = vmul.f32 -1.442695, %v1712_v38  ;;  %v6360_v32 = vld [vmem:[#allocation2 + $0x88] sm:$0xff]  ;;  %v6366_v38 = vld [vmem:[#allocation2 + $0x80] sm:$0xff]  ;;  %v6387_v49 = vld [vmem:[#allocation2 + $0x58] sm:$0xff] }
 0x466   :  { %v6257_v46 = vadd.f32 %v1565_v43, %v1564_v41  ;;  %v6372_v41 = vld [vmem:[#allocation2 + $0x68] sm:$0xff]  ;;  %v6375_v43 = vld [vmem:[#allocation2 + $0x78] sm:$0xff]  ;;  %v6390_v3 = vld [vmem:[#allocation2 + $0x40] sm:$0xff] }
 0x467   :  { %3578 = vpow2.f32 %v3395_v44  ;;  %v6378_v44 = vld [vmem:[#allocation2 + $0x60] sm:$0xff]  ;;  %v6396_v63 = vld [vmem:[#allocation2 + $0x28] sm:$0xff] }
 0x468   :  { %3580 = vrcp.f32 %v1556_v39  ;;  %v6369_v39 = vld [vmem:[#allocation2 + $0x90] sm:$0xff] }
 0x469   :  { %3582 = vtanh.f32 %v6257_v46 }
 0x46a   :  { %3584 = vpow2.f32 %v3396_v4  ;;  %v6393_v4 = vld [vmem:[#allocation2 + $0x50] sm:$0xff] }
 0x46b   :  { %3586 = vtanh.f32 %v1714_v18  ;;  %v6399_v18 = vld [vmem:[#allocation2 + $0x38] sm:$0xff] }
 0x472   :  { %v3577_v45 = vpop.eup %3576 }
 0x473   :  { %v1724_v31 = vadd.f32 1.0, %v3577_v45  ;;  %v6402_v45 = vld [vmem:[#allocation2 + $0x20] sm:$0xff] }
 0x474   :  { %v3579_v53 = vpop.eup %3578 }
 0x475   :  { %v3581_v54 = vpop.eup %3580  ;;  %3588 = vrcp.f32 %v1724_v31  ;;  %v1725_v28 = vadd.f32 1.0, %v3579_v53  ;;  %v6405_v31 = vld [vmem:[#allocation2 + $0x30] sm:$0xff]  ;;  %v6408_v53 = vld [vmem:[#allocation2 + $0x8] sm:$0xff] }
 0x476   :  { %v3583_v17 = vpop.eup %3582 }
 0x477   :  { %3590 = vrcp.f32 %v1725_v28  ;;  %v1568_v23 = vmul.f32 %v3583_v17, %v3581_v54  ;;  %v3585_v22 = vpop.eup %3584  ;;  %v6411_v54 = vld [vmem:[#allocation2 + $0x18] sm:$0xff]  ;;  %v6414_v28 = vld [vmem:[#allocation2] sm:$0xff]  ;;  %v6418_v17 = vld [vmem:[#allocation2 + $0x10] sm:$0xff] }
 0x478   :  { %v3587_v29 = vpop.eup %3586  ;;  %v1726_v6 = vadd.f32 1.0, %v3585_v22  ;;  %9042 = vst [vmem:[#allocation145_spill] sm:$0xff] %v6414_v28  ;;  %9043 = vst [vmem:[#allocation146_spill] sm:$0xff] %v6418_v17  ;;  %v6427_v22 = vld [vmem:[#allocation5 + $0x1f8] sm:$0xff] }
 0x479   :  { %1803 = vmatprep.mubr.f32.mxu0 %v1568_v23  ;;  %1874 = vmatprep.mubr.f32.mxu1 %v1568_v23  ;;  %v6424_v23 = vld [vmem:[#allocation5 + $0x1e8] sm:$0xff]  ;;  %9045 = vst [vmem:[#allocation147_spill] sm:$0xff] %v6427_v22 }
 0x47a   :  { %3592 = vrcp.f32 %v1726_v6  ;;  %9044 = vst [vmem:[#allocation148_spill] sm:$0xff] %v6424_v23  ;;  %v6442_v6 = vld [vmem:[#allocation5 + $0x1c0] sm:$0xff] }
 0x47b   :  { %9050 = vst [vmem:[#allocation18_spill] sm:$0xff] %v6442_v6 }
 0x482   :  { %v3589_v30 = vpop.eup %3588 }
 0x483   :  { %v1735_v9 = vmul.f32 %v3589_v30, %v3587_v29  ;;  %v6430_v29 = vld [vmem:[#allocation5 + $0x1e0] sm:$0xff]  ;;  %v6433_v30 = vld [vmem:[#allocation5 + $0x1f0] sm:$0xff] }
 0x484   :  { %v3591_v5 = vpop.eup %3590  ;;  %9046 = vst [vmem:[#allocation149_spill] sm:$0xff] %v6430_v29  ;;  %9047 = vst [vmem:[#allocation15_spill] sm:$0xff] %v6433_v30 }
 0x485   :  { %v1734_v36 = vmul.f32 %v3591_v5, %v6007_v37  ;;  %v6288_v37 = vld [vmem:[#allocation2 + $0x148] sm:$0xff]  ;;  %v6439_v5 = vld [vmem:[#allocation5 + $0x1d8] sm:$0xff] }
 0x486   :  { %9049 = vst [vmem:[#allocation17_spill] sm:$0xff] %v6439_v5 }
 0x487   :  { %v6263_v7 = vadd.f32 %v1735_v9, %v1734_v36  ;;  %v3593_v8 = vpop.eup %3592  ;;  %v6436_v9 = vld [vmem:[#allocation5 + $0x1c8] sm:$0xff]  ;;  %v6445_v36 = vld [vmem:[#allocation5 + $0x1d0] sm:$0xff] }
 0x488   :  { %9048 = vst [vmem:[#allocation16_spill] sm:$0xff] %v6436_v9  ;;  %9051 = vst [vmem:[#allocation19_spill] sm:$0xff] %v6445_v36 }
 0x489   :  { %3594 = vtanh.f32 %v6263_v7 }
 0x496   :  { %v3595_v12 = vpop.eup %3594 }
 0x497   :  { %v6266_v13 = vmul.f32 %v3595_v12, %v3593_v8  ;;  %v6448_v8 = vld [vmem:[#allocation5 + $0x1a8] sm:$0xff]  ;;  %v6451_v12 = vld [vmem:[#allocation5 + $0x1b8] sm:$0xff] }
 0x498   :  { %9052 = vst [vmem:[#allocation20_spill] sm:$0xff] %v6448_v8  ;;  %9053 = vst [vmem:[#allocation21_spill] sm:$0xff] %v6451_v12 }
 0x499   :  { %1804 = vmatmul.mubr.f32.vlgmr.msra.gmra.mxu0 %v6266_v13  ;;  %1875 = vmatmul.mubr.f32.vlgmr.msra.gmra.mxu1 %v6266_v13 }
 0x49a   :  { %1906 = vmatpush1.msra.mxu0 %v6014_v58  ;;  %1977 = vmatpush1.msra.mxu1 %v6017_v60  ;;  %v6291_v58 = vld [vmem:[#allocation2 + $0x158] sm:$0xff]  ;;  %v6294_v60 = vld [vmem:[#allocation2 + $0x140] sm:$0xff] }
 0x49b   :  { %1907 = vmatprep.subr.mxu0 %v6020_v1  ;;  %1978 = vmatprep.subr.mxu1 %v6023_v40  ;;  %v6297_v1 = vld [vmem:[#allocation2 + $0x150] sm:$0xff]  ;;  %v6300_v40 = vld [vmem:[#allocation2 + $0x128] sm:$0xff] }
 0x49c   :  { %1908 = vmatpush1.msra.mxu0 %v6026_v2  ;;  %1979 = vmatpush1.msra.mxu1 %v6029_v10  ;;  %v6303_v2 = vld [vmem:[#allocation2 + $0x138] sm:$0xff]  ;;  %v6306_v10 = vld [vmem:[#allocation2 + $0x120] sm:$0xff] }
 0x49d   :  { %1909 = vmatprep.subr.mxu0 %v6032_v42  ;;  %1980 = vmatprep.subr.mxu1 %v6035_v34  ;;  %v6309_v42 = vld [vmem:[#allocation2 + $0x130] sm:$0xff]  ;;  %v6312_v34 = vld [vmem:[#allocation2 + $0x108] sm:$0xff] }
 0x49e   :  { %1910 = vmatpush1.msra.mxu0 %v6038_v51  ;;  %1981 = vmatpush1.msra.mxu1 %v6041_v50  ;;  %v6315_v51 = vld [vmem:[#allocation2 + $0x118] sm:$0xff]  ;;  %v6318_v50 = vld [vmem:[#allocation2 + $0x100] sm:$0xff] }
 0x49f   :  { %1911 = vmatprep.subr.mxu0 %v6044_v59  ;;  %1982 = vmatprep.subr.mxu1 %v6047_v57  ;;  %v6321_v59 = vld [vmem:[#allocation2 + $0x110] sm:$0xff]  ;;  %v6324_v57 = vld [vmem:[#allocation2 + $0xe8] sm:$0xff] }
 0x4a0   :  { %1912 = vmatpush1.msra.mxu0 %v6050_v61  ;;  %1983 = vmatpush1.msra.mxu1 %v6053_v55  ;;  %v6327_v61 = vld [vmem:[#allocation2 + $0xf8] sm:$0xff]  ;;  %v6330_v55 = vld [vmem:[#allocation2 + $0xe0] sm:$0xff] }
 0x4a1   :  { %1913 = vmatprep.subr.mxu0 %v6056_v62  ;;  %1984 = vmatprep.subr.mxu1 %v6059_v52  ;;  %v6333_v62 = vld [vmem:[#allocation2 + $0xf0] sm:$0xff]  ;;  %v6336_v52 = vld [vmem:[#allocation2 + $0xc8] sm:$0xff] }
 0x4a2   :  { %1914 = vmatpush1.msra.mxu0 %v6062_v35  ;;  %1985 = vmatpush1.msra.mxu1 %v6065_v56  ;;  %v6339_v35 = vld [vmem:[#allocation2 + $0xd8] sm:$0xff]  ;;  %v6342_v56 = vld [vmem:[#allocation2 + $0xc0] sm:$0xff] }
 0x4a3   :  { %1915 = vmatprep.subr.mxu0 %v6288_v37  ;;  %1986 = vmatprep.subr.mxu1 %v6291_v58 }
 0x4a4   :  { %1916 = vmatpush1.msra.mxu0 %v6294_v60  ;;  %1987 = vmatpush1.msra.mxu1 %v6297_v1 }
 0x4a5   :  { %1917 = vmatprep.subr.mxu0 %v6300_v40  ;;  %1988 = vmatprep.subr.mxu1 %v6303_v2 }
 0x4a6   :  { %1918 = vmatpush1.msra.mxu0 %v6306_v10  ;;  %1989 = vmatpush1.msra.mxu1 %v6309_v42 }
 0x4a7   :  { %1919 = vmatprep.subr.mxu0 %v6312_v34  ;;  %1990 = vmatprep.subr.mxu1 %v6315_v51 }
 0x4a8   :  { %1920 = vmatpush1.msra.mxu0 %v6318_v50  ;;  %1991 = vmatpush1.msra.mxu1 %v6321_v59 }
 0x4a9   :  { %1921 = vmatprep.subr.mxu0 %v6324_v57  ;;  %1992 = vmatprep.subr.mxu1 %v6327_v61 }
 0x4aa   :  { %1922 = vmatpush1.msra.mxu0 %v6330_v55  ;;  %1993 = vmatpush1.msra.mxu1 %v6333_v62 }
 0x4ab   :  { %1923 = vmatprep.subr.mxu0 %v6336_v52  ;;  %1994 = vmatprep.subr.mxu1 %v6339_v35 }
 0x4ac   :  { %1924 = vmatpush1.msra.mxu0 %v6342_v56  ;;  %1995 = vmatpush1.msra.mxu1 %v6345_v14 }
 0x4ad   :  { %1925 = vmatprep.subr.mxu0 %v6348_v15  ;;  %1996 = vmatprep.subr.mxu1 %v6351_v16 }
 0x4ae   :  { %1926 = vmatpush1.msra.mxu0 %v6354_v20  ;;  %1997 = vmatpush1.msra.mxu1 %v6357_v24 }
 0x4af   :  { %1927 = vmatprep.subr.mxu0 %v6360_v32  ;;  %1998 = vmatprep.subr.mxu1 %v6363_v33 }
 0x4b0   :  { %1928 = vmatpush1.msra.mxu0 %v6366_v38  ;;  %1999 = vmatpush1.msra.mxu1 %v6369_v39 }
 0x4b1   :  { %1929 = vmatprep.subr.mxu0 %v6372_v41  ;;  %2000 = vmatprep.subr.mxu1 %v6375_v43 }
 0x4b2   :  { %1930 = vmatpush1.msra.mxu0 %v6378_v44  ;;  %2001 = vmatpush1.msra.mxu1 %v6381_v47 }
 0x4b3   :  { %1931 = vmatprep.subr.mxu0 %v6384_v48  ;;  %2002 = vmatprep.subr.mxu1 %v6387_v49 }
 0x4b4   :  { %1932 = vmatpush1.msra.mxu0 %v6390_v3  ;;  %2003 = vmatpush1.msra.mxu1 %v6393_v4 }
 0x4b5   :  { %1933 = vmatprep.subr.mxu0 %v6396_v63  ;;  %2004 = vmatprep.subr.mxu1 %v6399_v18 }
 0x4b6   :  { %1934 = vmatpush1.msra.mxu0 %v6402_v45  ;;  %2005 = vmatpush1.msra.mxu1 %v6405_v31 }
 0x4b7   :  { %1935 = vmatprep.subr.mxu0 %v6408_v53  ;;  %2006 = vmatprep.subr.mxu1 %v6411_v54 }
 0x4b8   :  { %1936 = vmatpush1.msra.mxu0 %v6414_v28  ;;  %1969 = vmatprep.mubr.f32.mxu0 %v8904_v11 }
 0x4b9   :  { %2007 = vmatpush1.msra.mxu1 %v6418_v17  ;;  %2040 = vmatprep.mubr.f32.mxu1 %v8904_v11 }
 0x4ba   :  { %1970 = vmatmul.mubr.f32.vlgmr.msra.gmra.mxu0 %v6266_v13  ;;  %2041 = vmatmul.mubr.f32.vlgmr.msra.gmra.mxu1 %v6266_v13  ;;  %v6454_v13 = vld [vmem:[#allocation5 + $0x1a0] sm:$0xff] }
 0x4bb   :  { %2075 = vmatprep.subr.mxu0 %v6424_v23  ;;  %2146 = vmatprep.subr.mxu1 %v6427_v22  ;;  %9054 = vst [vmem:[#allocation22_spill] sm:$0xff] %v6454_v13 }
 0x4bc   :  { %2076 = vmatpush1.msra.mxu0 %v6430_v29  ;;  %2147 = vmatpush1.msra.mxu1 %v6433_v30 }
 0x4bd   :  { %2077 = vmatprep.subr.mxu0 %v6436_v9  ;;  %2148 = vmatprep.subr.mxu1 %v6439_v5  ;;  %v6457_v5 = vld [vmem:[#allocation5 + $0x1b0] sm:$0xff] }
 0x4be   :  { %2078 = vmatpush1.msra.mxu0 %v6442_v6  ;;  %2149 = vmatpush1.msra.mxu1 %v6445_v36  ;;  %9055 = vst [vmem:[#allocation23_spill] sm:$0xff] %v6457_v5  ;;  %v6460_v6 = vld [vmem:[#allocation5 + $0x188] sm:$0xff]  ;;  %v6463_v36 = vld [vmem:[#allocation5 + $0x198] sm:$0xff] }
 0x4bf   :  { %2079 = vmatprep.subr.mxu0 %v6448_v8  ;;  %2150 = vmatprep.subr.mxu1 %v6451_v12  ;;  %9056 = vst [vmem:[#allocation24_spill] sm:$0xff] %v6460_v6  ;;  %9057 = vst [vmem:[#allocation25_spill] sm:$0xff] %v6463_v36  ;;  %v6466_v8 = vld [vmem:[#allocation5 + $0x180] sm:$0xff]  ;;  %v6469_v12 = vld [vmem:[#allocation5 + $0x190] sm:$0xff] }
 0x4c0   :  { %2080 = vmatpush1.msra.mxu0 %v6454_v13  ;;  %2151 = vmatpush1.msra.mxu1 %v6457_v5  ;;  %9058 = vst [vmem:[#allocation26_spill] sm:$0xff] %v6466_v8  ;;  %9059 = vst [vmem:[#allocation27_spill] sm:$0xff] %v6469_v12  ;;  %v6472_v13 = vld [vmem:[#allocation5 + $0x168] sm:$0xff]  ;;  %v6475_v5 = vld [vmem:[#allocation5 + $0x178] sm:$0xff] }
 0x4c1   :  { %2081 = vmatprep.subr.mxu0 %v6460_v6  ;;  %2152 = vmatprep.subr.mxu1 %v6463_v36  ;;  %9060 = vst [vmem:[#allocation28_spill] sm:$0xff] %v6472_v13  ;;  %9061 = vst [vmem:[#allocation29_spill] sm:$0xff] %v6475_v5  ;;  %v6478_v6 = vld [vmem:[#allocation5 + $0x160] sm:$0xff]  ;;  %v6481_v36 = vld [vmem:[#allocation5 + $0x170] sm:$0xff] }
 0x4c2   :  { %2082 = vmatpush1.msra.mxu0 %v6466_v8  ;;  %2153 = vmatpush1.msra.mxu1 %v6469_v12  ;;  %9062 = vst [vmem:[#allocation30_spill] sm:$0xff] %v6478_v6  ;;  %9063 = vst [vmem:[#allocation31_spill] sm:$0xff] %v6481_v36  ;;  %v6484_v8 = vld [vmem:[#allocation5 + $0x148] sm:$0xff]  ;;  %v6487_v12 = vld [vmem:[#allocation5 + $0x158] sm:$0xff] }
 0x4c3   :  { %2083 = vmatprep.subr.mxu0 %v6472_v13  ;;  %2154 = vmatprep.subr.mxu1 %v6475_v5  ;;  %9064 = vst [vmem:[#allocation32_spill] sm:$0xff] %v6484_v8  ;;  %9065 = vst [vmem:[#allocation33_spill] sm:$0xff] %v6487_v12  ;;  %v6490_v13 = vld [vmem:[#allocation5 + $0x140] sm:$0xff]  ;;  %v6493_v5 = vld [vmem:[#allocation5 + $0x150] sm:$0xff] }
 0x4c4   :  { %2084 = vmatpush1.msra.mxu0 %v6478_v6  ;;  %2155 = vmatpush1.msra.mxu1 %v6481_v36  ;;  %9066 = vst [vmem:[#allocation34_spill] sm:$0xff] %v6490_v13  ;;  %9067 = vst [vmem:[#allocation35_spill] sm:$0xff] %v6493_v5  ;;  %v6496_v6 = vld [vmem:[#allocation5 + $0x128] sm:$0xff]  ;;  %v6499_v36 = vld [vmem:[#allocation5 + $0x138] sm:$0xff] }
 0x4c5   :  { %2085 = vmatprep.subr.mxu0 %v6484_v8  ;;  %2156 = vmatprep.subr.mxu1 %v6487_v12  ;;  %9068 = vst [vmem:[#allocation36_spill] sm:$0xff] %v6496_v6  ;;  %9069 = vst [vmem:[#allocation37_spill] sm:$0xff] %v6499_v36  ;;  %v6502_v8 = vld [vmem:[#allocation5 + $0x120] sm:$0xff]  ;;  %v6505_v12 = vld [vmem:[#allocation5 + $0x130] sm:$0xff] }
 0x4c6   :  { %2086 = vmatpush1.msra.mxu0 %v6490_v13  ;;  %2157 = vmatpush1.msra.mxu1 %v6493_v5  ;;  %9070 = vst [vmem:[#allocation38_spill] sm:$0xff] %v6502_v8  ;;  %9071 = vst [vmem:[#allocation39_spill] sm:$0xff] %v6505_v12  ;;  %v6508_v13 = vld [vmem:[#allocation5 + $0x108] sm:$0xff]  ;;  %v6511_v5 = vld [vmem:[#allocation5 + $0x118] sm:$0xff] }
 0x4c7   :  { %2087 = vmatprep.subr.mxu0 %v6496_v6  ;;  %2158 = vmatprep.subr.mxu1 %v6499_v36  ;;  %9072 = vst [vmem:[#allocation40_spill] sm:$0xff] %v6508_v13  ;;  %9073 = vst [vmem:[#allocation41_spill] sm:$0xff] %v6511_v5  ;;  %v6514_v6 = vld [vmem:[#allocation5 + $0x100] sm:$0xff]  ;;  %v6517_v36 = vld [vmem:[#allocation5 + $0x110] sm:$0xff] }
 0x4c8   :  { %2088 = vmatpush1.msra.mxu0 %v6502_v8  ;;  %2159 = vmatpush1.msra.mxu1 %v6505_v12  ;;  %9074 = vst [vmem:[#allocation42_spill] sm:$0xff] %v6514_v6  ;;  %9075 = vst [vmem:[#allocation43_spill] sm:$0xff] %v6517_v36  ;;  %v6520_v8 = vld [vmem:[#allocation5 + $0xe8] sm:$0xff]  ;;  %v6523_v12 = vld [vmem:[#allocation5 + $0xf8] sm:$0xff] }
 0x4c9   :  { %2089 = vmatprep.subr.mxu0 %v6508_v13  ;;  %2160 = vmatprep.subr.mxu1 %v6511_v5  ;;  %9076 = vst [vmem:[#allocation44_spill] sm:$0xff] %v6520_v8  ;;  %9077 = vst [vmem:[#allocation45_spill] sm:$0xff] %v6523_v12  ;;  %v6526_v13 = vld [vmem:[#allocation5 + $0xe0] sm:$0xff]  ;;  %v6529_v5 = vld [vmem:[#allocation5 + $0xf0] sm:$0xff] }
 0x4ca   :  { %2090 = vmatpush1.msra.mxu0 %v6514_v6  ;;  %2161 = vmatpush1.msra.mxu1 %v6517_v36  ;;  %9078 = vst [vmem:[#allocation46_spill] sm:$0xff] %v6526_v13  ;;  %9079 = vst [vmem:[#allocation47_spill] sm:$0xff] %v6529_v5  ;;  %v6532_v6 = vld [vmem:[#allocation5 + $0xc8] sm:$0xff]  ;;  %v6535_v36 = vld [vmem:[#allocation5 + $0xd8] sm:$0xff] }
 0x4cb   :  { %2091 = vmatprep.subr.mxu0 %v6520_v8  ;;  %2162 = vmatprep.subr.mxu1 %v6523_v12  ;;  %9080 = vst [vmem:[#allocation48_spill] sm:$0xff] %v6532_v6  ;;  %9081 = vst [vmem:[#allocation49_spill] sm:$0xff] %v6535_v36  ;;  %v6538_v8 = vld [vmem:[#allocation5 + $0xc0] sm:$0xff]  ;;  %v6541_v12 = vld [vmem:[#allocation5 + $0xd0] sm:$0xff] }
 0x4cc   :  { %2092 = vmatpush1.msra.mxu0 %v6526_v13  ;;  %2163 = vmatpush1.msra.mxu1 %v6529_v5  ;;  %9082 = vst [vmem:[#allocation50_spill] sm:$0xff] %v6538_v8  ;;  %9083 = vst [vmem:[#allocation51_spill] sm:$0xff] %v6541_v12  ;;  %v6544_v13 = vld [vmem:[#allocation5 + $0xa8] sm:$0xff]  ;;  %v6547_v5 = vld [vmem:[#allocation5 + $0xb8] sm:$0xff] }
 0x4cd   :  { %2093 = vmatprep.subr.mxu0 %v6532_v6  ;;  %2164 = vmatprep.subr.mxu1 %v6535_v36  ;;  %9084 = vst [vmem:[#allocation52_spill] sm:$0xff] %v6544_v13  ;;  %9085 = vst [vmem:[#allocation53_spill] sm:$0xff] %v6547_v5  ;;  %v6550_v6 = vld [vmem:[#allocation5 + $0xa0] sm:$0xff]  ;;  %v6553_v36 = vld [vmem:[#allocation5 + $0xb0] sm:$0xff] }
 0x4ce   :  { %2094 = vmatpush1.msra.mxu0 %v6538_v8  ;;  %2165 = vmatpush1.msra.mxu1 %v6541_v12  ;;  %9086 = vst [vmem:[#allocation54_spill] sm:$0xff] %v6550_v6  ;;  %9087 = vst [vmem:[#allocation55_spill] sm:$0xff] %v6553_v36  ;;  %v6556_v8 = vld [vmem:[#allocation5 + $0x88] sm:$0xff]  ;;  %v6559_v12 = vld [vmem:[#allocation5 + $0x98] sm:$0xff] }
 0x4cf   :  { %2095 = vmatprep.subr.mxu0 %v6544_v13  ;;  %2166 = vmatprep.subr.mxu1 %v6547_v5  ;;  %9088 = vst [vmem:[#allocation56_spill] sm:$0xff] %v6556_v8  ;;  %9089 = vst [vmem:[#allocation57_spill] sm:$0xff] %v6559_v12  ;;  %v6562_v13 = vld [vmem:[#allocation5 + $0x80] sm:$0xff]  ;;  %v6565_v5 = vld [vmem:[#allocation5 + $0x90] sm:$0xff] }
 0x4d0   :  { %2096 = vmatpush1.msra.mxu0 %v6550_v6  ;;  %2167 = vmatpush1.msra.mxu1 %v6553_v36  ;;  %9090 = vst [vmem:[#allocation58_spill] sm:$0xff] %v6562_v13  ;;  %9091 = vst [vmem:[#allocation59_spill] sm:$0xff] %v6565_v5  ;;  %v6568_v6 = vld [vmem:[#allocation5 + $0x68] sm:$0xff]  ;;  %v6571_v36 = vld [vmem:[#allocation5 + $0x78] sm:$0xff] }
 0x4d1   :  { %2097 = vmatprep.subr.mxu0 %v6556_v8  ;;  %2168 = vmatprep.subr.mxu1 %v6559_v12  ;;  %9092 = vst [vmem:[#allocation60_spill] sm:$0xff] %v6568_v6  ;;  %9093 = vst [vmem:[#allocation61_spill] sm:$0xff] %v6571_v36  ;;  %v6574_v8 = vld [vmem:[#allocation5 + $0x60] sm:$0xff]  ;;  %v6577_v12 = vld [vmem:[#allocation5 + $0x70] sm:$0xff] }
 0x4d2   :  { %2098 = vmatpush1.msra.mxu0 %v6562_v13  ;;  %2169 = vmatpush1.msra.mxu1 %v6565_v5  ;;  %9094 = vst [vmem:[#allocation62_spill] sm:$0xff] %v6574_v8  ;;  %9095 = vst [vmem:[#allocation63_spill] sm:$0xff] %v6577_v12  ;;  %v6580_v13 = vld [vmem:[#allocation5 + $0x48] sm:$0xff]  ;;  %v6583_v5 = vld [vmem:[#allocation5 + $0x58] sm:$0xff] }
 0x4d3   :  { %2099 = vmatprep.subr.mxu0 %v6568_v6  ;;  %2170 = vmatprep.subr.mxu1 %v6571_v36  ;;  %9096 = vst [vmem:[#allocation64_spill] sm:$0xff] %v6580_v13  ;;  %9097 = vst [vmem:[#allocation65_spill] sm:$0xff] %v6583_v5  ;;  %v6586_v6 = vld [vmem:[#allocation5 + $0x40] sm:$0xff]  ;;  %v6589_v36 = vld [vmem:[#allocation5 + $0x50] sm:$0xff] }
 0x4d4   :  { %2100 = vmatpush1.msra.mxu0 %v6574_v8  ;;  %2171 = vmatpush1.msra.mxu1 %v6577_v12  ;;  %9098 = vst [vmem:[#allocation66_spill] sm:$0xff] %v6586_v6  ;;  %9099 = vst [vmem:[#allocation67_spill] sm:$0xff] %v6589_v36  ;;  %v6592_v8 = vld [vmem:[#allocation5 + $0x28] sm:$0xff]  ;;  %v6595_v12 = vld [vmem:[#allocation5 + $0x38] sm:$0xff] }
 0x4d5   :  { %2101 = vmatprep.subr.mxu0 %v6580_v13  ;;  %2172 = vmatprep.subr.mxu1 %v6583_v5  ;;  %9100 = vst [vmem:[#allocation68_spill] sm:$0xff] %v6592_v8  ;;  %9101 = vst [vmem:[#allocation69_spill] sm:$0xff] %v6595_v12  ;;  %v6598_v13 = vld [vmem:[#allocation5 + $0x20] sm:$0xff]  ;;  %v6601_v5 = vld [vmem:[#allocation5 + $0x30] sm:$0xff] }
 0x4d6   :  { %2102 = vmatpush1.msra.mxu0 %v6586_v6  ;;  %2173 = vmatpush1.msra.mxu1 %v6589_v36  ;;  %9102 = vst [vmem:[#allocation70_spill] sm:$0xff] %v6598_v13  ;;  %9103 = vst [vmem:[#allocation71_spill] sm:$0xff] %v6601_v5  ;;  %v6604_v6 = vld [vmem:[#allocation5 + $0x8] sm:$0xff]  ;;  %v6607_v36 = vld [vmem:[#allocation5 + $0x18] sm:$0xff] }
 0x4d7   :  { %2103 = vmatprep.subr.mxu0 %v6592_v8  ;;  %2174 = vmatprep.subr.mxu1 %v6595_v12  ;;  %9104 = vst [vmem:[#allocation72_spill] sm:$0xff] %v6604_v6  ;;  %9105 = vst [vmem:[#allocation73_spill] sm:$0xff] %v6607_v36  ;;  %v6610_v8 = vld [vmem:[#allocation5] sm:$0xff]  ;;  %v6613_v12 = vld [vmem:[#allocation5 + $0x10] sm:$0xff] }
 0x4d8   :  { %2104 = vmatpush1.msra.mxu0 %v6598_v13  ;;  %2175 = vmatpush1.msra.mxu1 %v6601_v5  ;;  %9106 = vst [vmem:[#allocation74_spill] sm:$0xff] %v6610_v8  ;;  %9107 = vst [vmem:[#allocation75_spill] sm:$0xff] %v6613_v12  ;;  %v6616_v13 = vld [vmem:[#allocation5 + $0x3e8] sm:$0xff]  ;;  %v6619_v5 = vld [vmem:[#allocation5 + $0x3f8] sm:$0xff] }
 0x4d9   :  { %2105 = vmatprep.subr.mxu0 %v6604_v6  ;;  %2176 = vmatprep.subr.mxu1 %v6607_v36  ;;  %9108 = vst [vmem:[#allocation76_spill] sm:$0xff] %v6616_v13  ;;  %9109 = vst [vmem:[#allocation77_spill] sm:$0xff] %v6619_v5  ;;  %v6622_v6 = vld [vmem:[#allocation5 + $0x3e0] sm:$0xff]  ;;  %v6625_v36 = vld [vmem:[#allocation5 + $0x3f0] sm:$0xff] }
 0x4da   :  { %2106 = vmatpush1.msra.mxu0 %v6610_v8  ;;  %2177 = vmatpush1.msra.mxu1 %v6613_v12  ;;  %9110 = vst [vmem:[#allocation78_spill] sm:$0xff] %v6622_v6  ;;  %9111 = vst [vmem:[#allocation79_spill] sm:$0xff] %v6625_v36  ;;  %v6628_v8 = vld [vmem:[#allocation5 + $0x3c8] sm:$0xff]  ;;  %v6631_v12 = vld [vmem:[#allocation5 + $0x3d8] sm:$0xff] }
 0x4db   :  { %2107 = vmatprep.subr.mxu0 %v6616_v13  ;;  %2178 = vmatprep.subr.mxu1 %v6619_v5  ;;  %9112 = vst [vmem:[#allocation80_spill] sm:$0xff] %v6628_v8  ;;  %9113 = vst [vmem:[#allocation81_spill] sm:$0xff] %v6631_v12  ;;  %v6634_v13 = vld [vmem:[#allocation5 + $0x3c0] sm:$0xff]  ;;  %v6637_v5 = vld [vmem:[#allocation5 + $0x3d0] sm:$0xff] }
 0x4dc   :  { %2108 = vmatpush2.msra.mxu0 %v6622_v6  ;;  %2179 = vmatpush2.msra.mxu1 %v6625_v36  ;;  %9114 = vst [vmem:[#allocation82_spill] sm:$0xff] %v6634_v13  ;;  %9115 = vst [vmem:[#allocation83_spill] sm:$0xff] %v6637_v5  ;;  %v6640_v6 = vld [vmem:[#allocation5 + $0x3a8] sm:$0xff]  ;;  %v6643_v36 = vld [vmem:[#allocation5 + $0x3b8] sm:$0xff] }
 0x4dd   :  { %2109 = vmatprep.subr.mxu0 %v6628_v8  ;;  %2180 = vmatprep.subr.mxu1 %v6631_v12  ;;  %9116 = vst [vmem:[#allocation84_spill] sm:$0xff] %v6640_v6  ;;  %9117 = vst [vmem:[#allocation85_spill] sm:$0xff] %v6643_v36  ;;  %v6646_v8 = vld [vmem:[#allocation5 + $0x3a0] sm:$0xff]  ;;  %v6649_v12 = vld [vmem:[#allocation5 + $0x3b0] sm:$0xff] }
 0x4de   :  { %2110 = vmatpush2.msra.mxu0 %v6634_v13  ;;  %2181 = vmatpush2.msra.mxu1 %v6637_v5  ;;  %9118 = vst [vmem:[#allocation86_spill] sm:$0xff] %v6646_v8  ;;  %9119 = vst [vmem:[#allocation87_spill] sm:$0xff] %v6649_v12  ;;  %v6652_v13 = vld [vmem:[#allocation5 + $0x388] sm:$0xff]  ;;  %v6655_v5 = vld [vmem:[#allocation5 + $0x398] sm:$0xff] }
 0x4df   :  { %2111 = vmatprep.subr.mxu0 %v6640_v6  ;;  %2182 = vmatprep.subr.mxu1 %v6643_v36  ;;  %9120 = vst [vmem:[#allocation88_spill] sm:$0xff] %v6652_v13  ;;  %9121 = vst [vmem:[#allocation89_spill] sm:$0xff] %v6655_v5  ;;  %v6658_v6 = vld [vmem:[#allocation5 + $0x380] sm:$0xff]  ;;  %v6661_v36 = vld [vmem:[#allocation5 + $0x390] sm:$0xff] }
 0x4e0   :  { %2112 = vmatpush2.msra.mxu0 %v6646_v8  ;;  %2183 = vmatpush2.msra.mxu1 %v6649_v12  ;;  %9122 = vst [vmem:[#allocation90_spill] sm:$0xff] %v6658_v6  ;;  %9123 = vst [vmem:[#allocation91_spill] sm:$0xff] %v6661_v36  ;;  %v6664_v8 = vld [vmem:[#allocation5 + $0x368] sm:$0xff]  ;;  %v6667_v12 = vld [vmem:[#allocation5 + $0x378] sm:$0xff] }
 0x4e1   :  { %2113 = vmatprep.subr.mxu0 %v6652_v13  ;;  %2184 = vmatprep.subr.mxu1 %v6655_v5  ;;  %9124 = vst [vmem:[#allocation92_spill] sm:$0xff] %v6664_v8  ;;  %9125 = vst [vmem:[#allocation93_spill] sm:$0xff] %v6667_v12  ;;  %v6670_v13 = vld [vmem:[#allocation5 + $0x360] sm:$0xff]  ;;  %v6673_v5 = vld [vmem:[#allocation5 + $0x370] sm:$0xff] }
 0x4e2   :  { %2114 = vmatpush2.msra.mxu0 %v6658_v6  ;;  %2185 = vmatpush2.msra.mxu1 %v6661_v36  ;;  %9126 = vst [vmem:[#allocation94_spill] sm:$0xff] %v6670_v13  ;;  %9127 = vst [vmem:[#allocation95_spill] sm:$0xff] %v6673_v5  ;;  %v6676_v6 = vld [vmem:[#allocation5 + $0x348] sm:$0xff]  ;;  %v6679_v36 = vld [vmem:[#allocation5 + $0x358] sm:$0xff] }
 0x4e3   :  { %2115 = vmatprep.subr.mxu0 %v6664_v8  ;;  %2186 = vmatprep.subr.mxu1 %v6667_v12  ;;  %9128 = vst [vmem:[#allocation96_spill] sm:$0xff] %v6676_v6  ;;  %9129 = vst [vmem:[#allocation97_spill] sm:$0xff] %v6679_v36  ;;  %v6682_v8 = vld [vmem:[#allocation5 + $0x340] sm:$0xff]  ;;  %v6685_v12 = vld [vmem:[#allocation5 + $0x350] sm:$0xff] }
 0x4e4   :  { %2116 = vmatpush2.msra.mxu0 %v6670_v13  ;;  %2187 = vmatpush2.msra.mxu1 %v6673_v5  ;;  %9130 = vst [vmem:[#allocation98_spill] sm:$0xff] %v6682_v8  ;;  %9131 = vst [vmem:[#allocation99_spill] sm:$0xff] %v6685_v12  ;;  %v6688_v13 = vld [vmem:[#allocation5 + $0x328] sm:$0xff]  ;;  %v6691_v5 = vld [vmem:[#allocation5 + $0x338] sm:$0xff] }
 0x4e5   :  { %2117 = vmatprep.subr.mxu0 %v6676_v6  ;;  %2188 = vmatprep.subr.mxu1 %v6679_v36  ;;  %9132 = vst [vmem:[#allocation100_spill] sm:$0xff] %v6688_v13  ;;  %9133 = vst [vmem:[#allocation101_spill] sm:$0xff] %v6691_v5  ;;  %v6694_v6 = vld [vmem:[#allocation5 + $0x320] sm:$0xff]  ;;  %v6697_v36 = vld [vmem:[#allocation5 + $0x330] sm:$0xff] }
 0x4e6   :  { %2118 = vmatpush2.msra.mxu0 %v6682_v8  ;;  %2189 = vmatpush2.msra.mxu1 %v6685_v12  ;;  %9134 = vst [vmem:[#allocation102_spill] sm:$0xff] %v6694_v6  ;;  %9135 = vst [vmem:[#allocation103_spill] sm:$0xff] %v6697_v36  ;;  %v6700_v8 = vld [vmem:[#allocation5 + $0x308] sm:$0xff]  ;;  %v6703_v12 = vld [vmem:[#allocation5 + $0x318] sm:$0xff] }
 0x4e7   :  { %2119 = vmatprep.subr.mxu0 %v6688_v13  ;;  %2190 = vmatprep.subr.mxu1 %v6691_v5  ;;  %9136 = vst [vmem:[#allocation104_spill] sm:$0xff] %v6700_v8  ;;  %9137 = vst [vmem:[#allocation105_spill] sm:$0xff] %v6703_v12  ;;  %v6706_v13 = vld [vmem:[#allocation5 + $0x300] sm:$0xff]  ;;  %v6709_v5 = vld [vmem:[#allocation5 + $0x310] sm:$0xff] }
 0x4e8   :  { %2120 = vmatpush2.msra.mxu0 %v6694_v6  ;;  %2191 = vmatpush2.msra.mxu1 %v6697_v36  ;;  %9138 = vst [vmem:[#allocation106_spill] sm:$0xff] %v6706_v13  ;;  %9139 = vst [vmem:[#allocation107_spill] sm:$0xff] %v6709_v5  ;;  %v6712_v6 = vld [vmem:[#allocation5 + $0x2e8] sm:$0xff]  ;;  %v6715_v36 = vld [vmem:[#allocation5 + $0x2f8] sm:$0xff] }
 0x4e9   :  { %2121 = vmatprep.subr.mxu0 %v6700_v8  ;;  %2192 = vmatprep.subr.mxu1 %v6703_v12  ;;  %9140 = vst [vmem:[#allocation108_spill] sm:$0xff] %v6712_v6  ;;  %9141 = vst [vmem:[#allocation109_spill] sm:$0xff] %v6715_v36  ;;  %v6718_v8 = vld [vmem:[#allocation5 + $0x2e0] sm:$0xff]  ;;  %v6721_v12 = vld [vmem:[#allocation5 + $0x2f0] sm:$0xff] }
 0x4ea   :  { %2122 = vmatpush2.msra.mxu0 %v6706_v13  ;;  %2193 = vmatpush2.msra.mxu1 %v6709_v5  ;;  %9142 = vst [vmem:[#allocation110_spill] sm:$0xff] %v6718_v8  ;;  %9143 = vst [vmem:[#allocation111_spill] sm:$0xff] %v6721_v12  ;;  %v6724_v13 = vld [vmem:[#allocation5 + $0x2c8] sm:$0xff]  ;;  %v6727_v5 = vld [vmem:[#allocation5 + $0x2d8] sm:$0xff] }
 0x4eb   :  { %2123 = vmatprep.subr.mxu0 %v6712_v6  ;;  %2194 = vmatprep.subr.mxu1 %v6715_v36  ;;  %9144 = vst [vmem:[#allocation112_spill] sm:$0xff] %v6724_v13  ;;  %9145 = vst [vmem:[#allocation113_spill] sm:$0xff] %v6727_v5  ;;  %v6730_v6 = vld [vmem:[#allocation5 + $0x2c0] sm:$0xff]  ;;  %v6733_v36 = vld [vmem:[#allocation5 + $0x2d0] sm:$0xff] }
 0x4ec   :  { %2124 = vmatpush2.msra.mxu0 %v6718_v8  ;;  %2195 = vmatpush2.msra.mxu1 %v6721_v12  ;;  %9146 = vst [vmem:[#allocation114_spill] sm:$0xff] %v6730_v6  ;;  %9147 = vst [vmem:[#allocation115_spill] sm:$0xff] %v6733_v36  ;;  %v6736_v8 = vld [vmem:[#allocation5 + $0x2a8] sm:$0xff]  ;;  %v6739_v12 = vld [vmem:[#allocation5 + $0x2b8] sm:$0xff] }
 0x4ed   :  { %2125 = vmatprep.subr.mxu0 %v6724_v13  ;;  %2196 = vmatprep.subr.mxu1 %v6727_v5  ;;  %9148 = vst [vmem:[#allocation116_spill] sm:$0xff] %v6736_v8  ;;  %9149 = vst [vmem:[#allocation117_spill] sm:$0xff] %v6739_v12  ;;  %v6742_v13 = vld [vmem:[#allocation5 + $0x2a0] sm:$0xff]  ;;  %v6745_v5 = vld [vmem:[#allocation5 + $0x2b0] sm:$0xff] }
 0x4ee   :  { %2126 = vmatpush2.msra.mxu0 %v6730_v6  ;;  %2197 = vmatpush2.msra.mxu1 %v6733_v36  ;;  %9150 = vst [vmem:[#allocation118_spill] sm:$0xff] %v6742_v13  ;;  %9151 = vst [vmem:[#allocation119_spill] sm:$0xff] %v6745_v5  ;;  %v6748_v6 = vld [vmem:[#allocation5 + $0x288] sm:$0xff]  ;;  %v6751_v36 = vld [vmem:[#allocation5 + $0x298] sm:$0xff] }
 0x4ef   :  { %2127 = vmatprep.subr.mxu0 %v6736_v8  ;;  %2198 = vmatprep.subr.mxu1 %v6739_v12  ;;  %9152 = vst [vmem:[#allocation120_spill] sm:$0xff] %v6748_v6  ;;  %9153 = vst [vmem:[#allocation121_spill] sm:$0xff] %v6751_v36  ;;  %v6754_v8 = vld [vmem:[#allocation5 + $0x280] sm:$0xff]  ;;  %v6757_v12 = vld [vmem:[#allocation5 + $0x290] sm:$0xff] }
 0x4f0   :  { %2128 = vmatpush2.msra.mxu0 %v6742_v13  ;;  %2199 = vmatpush2.msra.mxu1 %v6745_v5  ;;  %9154 = vst [vmem:[#allocation122_spill] sm:$0xff] %v6754_v8  ;;  %9155 = vst [vmem:[#allocation123_spill] sm:$0xff] %v6757_v12  ;;  %v6760_v13 = vld [vmem:[#allocation5 + $0x268] sm:$0xff]  ;;  %v6763_v5 = vld [vmem:[#allocation5 + $0x278] sm:$0xff] }
 0x4f1   :  { %2129 = vmatprep.subr.mxu0 %v6748_v6  ;;  %2200 = vmatprep.subr.mxu1 %v6751_v36  ;;  %9156 = vst [vmem:[#allocation124_spill] sm:$0xff] %v6760_v13  ;;  %9157 = vst [vmem:[#allocation125_spill] sm:$0xff] %v6763_v5  ;;  %v6766_v6 = vld [vmem:[#allocation5 + $0x260] sm:$0xff]  ;;  %v6769_v36 = vld [vmem:[#allocation5 + $0x270] sm:$0xff] }
 0x4f2   :  { %2130 = vmatpush2.msra.mxu0 %v6754_v8  ;;  %2201 = vmatpush2.msra.mxu1 %v6757_v12  ;;  %9158 = vst [vmem:[#allocation126_spill] sm:$0xff] %v6766_v6  ;;  %9159 = vst [vmem:[#allocation127_spill] sm:$0xff] %v6769_v36  ;;  %v6772_v8 = vld [vmem:[#allocation5 + $0x248] sm:$0xff]  ;;  %v6775_v12 = vld [vmem:[#allocation5 + $0x258] sm:$0xff] }
 0x4f3   :  { %2131 = vmatprep.subr.mxu0 %v6760_v13  ;;  %2202 = vmatprep.subr.mxu1 %v6763_v5  ;;  %9160 = vst [vmem:[#allocation128_spill] sm:$0xff] %v6772_v8  ;;  %9161 = vst [vmem:[#allocation129_spill] sm:$0xff] %v6775_v12  ;;  %v6778_v13 = vld [vmem:[#allocation5 + $0x240] sm:$0xff]  ;;  %v6781_v5 = vld [vmem:[#allocation5 + $0x250] sm:$0xff] }
 0x4f4   :  { %2132 = vmatpush2.msra.mxu0 %v6766_v6  ;;  %2203 = vmatpush2.msra.mxu1 %v6769_v36  ;;  %9162 = vst [vmem:[#allocation130_spill] sm:$0xff] %v6778_v13  ;;  %9163 = vst [vmem:[#allocation131_spill] sm:$0xff] %v6781_v5  ;;  %v6784_v6 = vld [vmem:[#allocation5 + $0x228] sm:$0xff]  ;;  %v6787_v36 = vld [vmem:[#allocation5 + $0x238] sm:$0xff] }
 0x4f5   :  { %2133 = vmatprep.subr.mxu0 %v6772_v8  ;;  %2204 = vmatprep.subr.mxu1 %v6775_v12  ;;  %9164 = vst [vmem:[#allocation132_spill] sm:$0xff] %v6784_v6  ;;  %9165 = vst [vmem:[#allocation133_spill] sm:$0xff] %v6787_v36  ;;  %v6790_v8 = vld [vmem:[#allocation5 + $0x220] sm:$0xff]  ;;  %v6793_v12 = vld [vmem:[#allocation5 + $0x230] sm:$0xff] }
 0x4f6   :  { %2134 = vmatpush2.msra.mxu0 %v6778_v13  ;;  %2205 = vmatpush2.msra.mxu1 %v6781_v5  ;;  %9166 = vst [vmem:[#allocation134_spill] sm:$0xff] %v6790_v8  ;;  %9167 = vst [vmem:[#allocation135_spill] sm:$0xff] %v6793_v12  ;;  %v6796_v13 = vld [vmem:[#allocation5 + $0x208] sm:$0xff]  ;;  %v6799_v5 = vld [vmem:[#allocation5 + $0x218] sm:$0xff] }
 0x4f7   :  { %2135 = vmatprep.subr.mxu0 %v6784_v6  ;;  %2206 = vmatprep.subr.mxu1 %v6787_v36  ;;  %9168 = vst [vmem:[#allocation136_spill] sm:$0xff] %v6796_v13  ;;  %9169 = vst [vmem:[#allocation137_spill] sm:$0xff] %v6799_v5  ;;  %v6802_v6 = vld [vmem:[#allocation5 + $0x200] sm:$0xff]  ;;  %v6805_v36 = vld [vmem:[#allocation5 + $0x210] sm:$0xff] }
 0x4f8   :  { %2136 = vmatpush2.msra.mxu0 %v6790_v8  ;;  %2207 = vmatpush2.msra.mxu1 %v6793_v12  ;;  %9170 = vst [vmem:[#allocation138_spill] sm:$0xff] %v6802_v6  ;;  %9171 = vst [vmem:[#allocation139_spill] sm:$0xff] %v6805_v36 }
 0x4f9   :  { %2137 = vmatprep.subr.mxu0 %v6796_v13  ;;  %2208 = vmatprep.subr.mxu1 %v6799_v5 }
 0x4fa   :  { %2138 = vmatpush2.msra.mxu0 %v6802_v6  ;;  %2209 = vmatpush2.msra.mxu1 %v6805_v36 }
 0x4fb   :  { %2241 = vmatprep.subr.mxu0 %v6244_v26  ;;  %2312 = vmatprep.subr.mxu1 %v6247_v19 }
 0x559   :  { %v1805_v12 = vpop.f32.mrf.mxu0  ;;  %v1876_v29 = vpop.f32.mrf.mxu1 }
 0x55a   :  { %v1806_v8 = vadd.f32 %v1805_v12, %v9034_v0  ;;  %v1877_v6 = vadd.f32 %v1876_v29, %v9036_v27 }
 0x55b   :  { %v1807_v13 = vpop.f32.mrf.mxu0  ;;  %v1878_v22 = vpop.f32.mrf.mxu1 }
 0x55c   :  { %v3397_v9 = vmul.f32 -1.442695, %v1806_v8  ;;  %v1808_v30 = vadd.f32 %v1807_v13, %v9035_v25  ;;  %v3399_v23 = vmul.f32 -1.442695, %v1877_v6  ;;  %v1879_v26 = vadd.f32 %v1878_v22, %v9037_v21  ;;  %v9173_v6 = vld [vmem:[#allocation156_spill] sm:$0xff] }
 0x55e   :  { %3596 = vpow2.f32 %v3397_v9  ;;  %v3398_v5 = vmul.f32 -1.442695, %v1808_v30  ;;  %v9172_v30 = vld [vmem:[#allocation154_spill] sm:$0xff] }
 0x560   :  { %3598 = vpow2.f32 %v3398_v5 }
 0x561   :  { %3600 = vpow2.f32 %v3399_v23 }
 0x56b   :  { %v3597_v36 = vpop.eup %3596 }
 0x56c   :  { %v1890_v17 = vadd.f32 1.0, %v3597_v36 }
 0x56d   :  { %v3599_v19 = vpop.eup %3598 }
 0x56e   :  { %3602 = vrcp.f32 %v1890_v17  ;;  %v1891_v12 = vadd.f32 1.0, %v3599_v19  ;;  %v3601_v8 = vpop.eup %3600  ;;  %v9174_v19 = vld [vmem:[#allocation155_spill] sm:$0xff] }
 0x56f   :  { %3604 = vtanh.f32 %v1879_v26  ;;  %v1892_v28 = vadd.f32 1.0, %v3601_v8 }
 0x570   :  { %3606 = vrcp.f32 %v1891_v12 }
 0x57a   :  { %v1971_v13 = vpop.f32.mrf.mxu0  ;;  %v2042_v26 = vpop.f32.mrf.mxu1 }
 0x57b   :  { %v3603_v9 = vpop.eup %3602  ;;  %v2047_v5 = vadd.f32 %v1971_v13, %v9172_v30  ;;  %v2049_v12 = vadd.f32 %v2042_v26, %v9174_v19 }
 0x57c   :  { %v3605_v25 = vpop.eup %3604  ;;  %v1973_v0 = vpop.f32.mrf.mxu0 }
 0x57d   :  { %v3607_v29 = vpop.eup %3606  ;;  %v3400_v27 = vmul.f32 -1.442695, %v2047_v5  ;;  %v2048_v11 = vadd.f32 %v1973_v0, %v9173_v6  ;;  %v1901_v36 = vmul.f32 %v3605_v25, %v3603_v9  ;;  %v2044_v13 = vpop.f32.mrf.mxu1  ;;  %v3402_v30 = vmul.f32 -1.442695, %v2049_v12  ;;  %v9175_v5 = vld [vmem:[#allocation157_spill] sm:$0xff] }
 0x57e   :  { %v1900_v22 = vmul.f32 %v3607_v29, %v6257_v46  ;;  %v2050_v21 = vadd.f32 %v2044_v13, %v9175_v5  ;;  %v6833_v5 = vld [vmem:[#allocation2 + $0x1f0] sm:$0xff] }
 0x57f   :  { %3608 = vpow2.f32 %v3400_v27  ;;  %v3401_v17 = vmul.f32 -1.442695, %v2048_v11 }
 0x580   :  { %v6817_v23 = vadd.f32 %v1901_v36, %v1900_v22 }
 0x581   :  { %3610 = vpow2.f32 %v3401_v17 }
 0x582   :  { %3612 = vrcp.f32 %v1892_v28 }
 0x583   :  { %3614 = vtanh.f32 %v6817_v23 }
 0x584   :  { %3616 = vpow2.f32 %v3402_v30  ;;  %v6830_v30 = vld [vmem:[#allocation2 + $0x1e0] sm:$0xff] }
 0x585   :  { %3618 = vtanh.f32 %v2050_v21 }
 0x58c   :  { %v3609_v0 = vpop.eup %3608 }
 0x58d   :  { %v2060_v8 = vadd.f32 1.0, %v3609_v0  ;;  %v6839_v0 = vld [vmem:[#allocation2 + $0x1d8] sm:$0xff] }
 0x58e   :  { %v3611_v46 = vpop.eup %3610 }
 0x58f   :  { %v3613_v25 = vpop.eup %3612  ;;  %3620 = vrcp.f32 %v2060_v8  ;;  %v2061_v11 = vadd.f32 1.0, %v3611_v46  ;;  %v6842_v8 = vld [vmem:[#allocation2 + $0x1c0] sm:$0xff]  ;;  %v6845_v46 = vld [vmem:[#allocation2 + $0x1d0] sm:$0xff] }
 0x590   :  { %v3615_v27 = vpop.eup %3614 }
 0x591   :  { %3622 = vrcp.f32 %v2061_v11  ;;  %v1904_v28 = vmul.f32 %v3615_v27, %v3613_v25  ;;  %v3617_v9 = vpop.eup %3616  ;;  %v6848_v25 = vld [vmem:[#allocation2 + $0x1a8] sm:$0xff]  ;;  %v6851_v11 = vld [vmem:[#allocation2 + $0x1b8] sm:$0xff]  ;;  %v6854_v27 = vld [vmem:[#allocation2 + $0x1a0] sm:$0xff] }
 0x592   :  { %v3619_v29 = vpop.eup %3618  ;;  %v2062_v17 = vadd.f32 1.0, %v3617_v9  ;;  %v6860_v9 = vld [vmem:[#allocation2 + $0x188] sm:$0xff] }
 0x593   :  { %2139 = vmatprep.mubr.f32.mxu0 %v1904_v28  ;;  %2210 = vmatprep.mubr.f32.mxu1 %v1904_v28  ;;  %v6857_v28 = vld [vmem:[#allocation2 + $0x1b0] sm:$0xff] }
 0x594   :  { %3624 = vrcp.f32 %v2062_v17  ;;  %v6875_v17 = vld [vmem:[#allocation2 + $0x178] sm:$0xff] }
 0x59c   :  { %v3621_v6 = vpop.eup %3620 }
 0x59d   :  { %v2071_v22 = vmul.f32 %v3621_v6, %v3619_v29  ;;  %v6863_v29 = vld [vmem:[#allocation2 + $0x198] sm:$0xff]  ;;  %v6866_v6 = vld [vmem:[#allocation2 + $0x180] sm:$0xff] }
 0x59e   :  { %v3623_v36 = vpop.eup %3622 }
 0x59f   :  { %v2070_v26 = vmul.f32 %v3623_v36, %v6263_v7  ;;  %v6836_v7 = vld [vmem:[#allocation2 + $0x1c8] sm:$0xff] }
 0x5a0   :  { %v6872_v36 = vld [vmem:[#allocation2 + $0x168] sm:$0xff] }
 0x5a1   :  { %v6823_v19 = vadd.f32 %v2071_v22, %v2070_v26  ;;  %v3625_v21 = vpop.eup %3624  ;;  %v6869_v22 = vld [vmem:[#allocation2 + $0x190] sm:$0xff]  ;;  %v6878_v26 = vld [vmem:[#allocation2 + $0x160] sm:$0xff] }
 0x5a3   :  { %3626 = vtanh.f32 %v6823_v19 }
 0x5b0   :  { %v3627_v12 = vpop.eup %3626 }
 0x5b1   :  { %v6826_v13 = vmul.f32 %v3627_v12, %v3625_v21  ;;  %v6881_v21 = vld [vmem:[#allocation2 + $0x170] sm:$0xff]  ;;  %v9218_v12 = vld [vmem:[#allocation51_spill] sm:$0xff] }
 0x5b3   :  { %2140 = vmatmul.mubr.f32.vlgmr.msra.gmra.mxu0 %v6826_v13  ;;  %2211 = vmatmul.mubr.f32.vlgmr.msra.gmra.mxu1 %v6826_v13 }
 0x5b4   :  { %2242 = vmatpush1.msra.mxu0 %v6830_v30  ;;  %2313 = vmatpush1.msra.mxu1 %v6833_v5 }
 0x5b5   :  { %2243 = vmatprep.subr.mxu0 %v6836_v7  ;;  %2314 = vmatprep.subr.mxu1 %v6839_v0 }
 0x5b6   :  { %2244 = vmatpush1.msra.mxu0 %v6842_v8  ;;  %2315 = vmatpush1.msra.mxu1 %v6845_v46 }
 0x5b7   :  { %2245 = vmatprep.subr.mxu0 %v6848_v25  ;;  %2316 = vmatprep.subr.mxu1 %v6851_v11 }
 0x5b8   :  { %2246 = vmatpush1.msra.mxu0 %v6854_v27  ;;  %2317 = vmatpush1.msra.mxu1 %v6857_v28 }
 0x5b9   :  { %2247 = vmatprep.subr.mxu0 %v6860_v9  ;;  %2318 = vmatprep.subr.mxu1 %v6863_v29 }
 0x5ba   :  { %2248 = vmatpush1.msra.mxu0 %v6866_v6  ;;  %2319 = vmatpush1.msra.mxu1 %v6869_v22 }
 0x5bb   :  { %2249 = vmatprep.subr.mxu0 %v6872_v36  ;;  %2320 = vmatprep.subr.mxu1 %v6875_v17 }
 0x5bc   :  { %2250 = vmatpush1.msra.mxu0 %v6878_v26  ;;  %2321 = vmatpush1.msra.mxu1 %v6881_v21 }
 0x5bd   :  { %2251 = vmatprep.subr.mxu0 %v6288_v37  ;;  %2322 = vmatprep.subr.mxu1 %v6291_v58  ;;  %v9176_v37 = vld [vmem:[#allocation145_spill] sm:$0xff]  ;;  %v9177_v58 = vmov 0.0  }
 0x5be   :  { %2252 = vmatpush1.msra.mxu0 %v6294_v60  ;;  %2323 = vmatpush1.msra.mxu1 %v6297_v1  ;;  %v9178_v60 = vld [vmem:[#allocation146_spill] sm:$0xff]  ;;  %v9179_v1 = vld [vmem:[#allocation148_spill] sm:$0xff] }
 0x5bf   :  { %2253 = vmatprep.subr.mxu0 %v6300_v40  ;;  %2324 = vmatprep.subr.mxu1 %v6303_v2  ;;  %v9180_v40 = vld [vmem:[#allocation147_spill] sm:$0xff]  ;;  %v9181_v2 = vld [vmem:[#allocation149_spill] sm:$0xff] }
 0x5c0   :  { %2254 = vmatpush1.msra.mxu0 %v6306_v10  ;;  %2325 = vmatpush1.msra.mxu1 %v6309_v42  ;;  %v9182_v10 = vld [vmem:[#allocation15_spill] sm:$0xff]  ;;  %v9183_v42 = vld [vmem:[#allocation16_spill] sm:$0xff] }
 0x5c1   :  { %2255 = vmatprep.subr.mxu0 %v6312_v34  ;;  %2326 = vmatprep.subr.mxu1 %v6315_v51  ;;  %v9184_v34 = vld [vmem:[#allocation17_spill] sm:$0xff]  ;;  %v9185_v51 = vld [vmem:[#allocation18_spill] sm:$0xff] }
 0x5c2   :  { %2256 = vmatpush1.msra.mxu0 %v6318_v50  ;;  %2327 = vmatpush1.msra.mxu1 %v6321_v59  ;;  %v9186_v50 = vld [vmem:[#allocation19_spill] sm:$0xff]  ;;  %v9187_v59 = vld [vmem:[#allocation20_spill] sm:$0xff] }
 0x5c3   :  { %2257 = vmatprep.subr.mxu0 %v6324_v57  ;;  %2328 = vmatprep.subr.mxu1 %v6327_v61  ;;  %v9188_v57 = vld [vmem:[#allocation21_spill] sm:$0xff]  ;;  %v9189_v61 = vld [vmem:[#allocation22_spill] sm:$0xff] }
 0x5c4   :  { %2258 = vmatpush1.msra.mxu0 %v6330_v55  ;;  %2329 = vmatpush1.msra.mxu1 %v6333_v62  ;;  %v9190_v55 = vld [vmem:[#allocation23_spill] sm:$0xff]  ;;  %v9191_v62 = vld [vmem:[#allocation24_spill] sm:$0xff] }
 0x5c5   :  { %2259 = vmatprep.subr.mxu0 %v6336_v52  ;;  %2330 = vmatprep.subr.mxu1 %v6339_v35  ;;  %v9192_v52 = vld [vmem:[#allocation25_spill] sm:$0xff]  ;;  %v9193_v35 = vld [vmem:[#allocation26_spill] sm:$0xff] }
 0x5c6   :  { %2260 = vmatpush1.msra.mxu0 %v6342_v56  ;;  %2331 = vmatpush1.msra.mxu1 %v6345_v14  ;;  %v9194_v56 = vld [vmem:[#allocation27_spill] sm:$0xff]  ;;  %v9195_v14 = vld [vmem:[#allocation28_spill] sm:$0xff] }
 0x5c7   :  { %2261 = vmatprep.subr.mxu0 %v6348_v15  ;;  %2332 = vmatprep.subr.mxu1 %v6351_v16  ;;  %v9196_v15 = vld [vmem:[#allocation29_spill] sm:$0xff]  ;;  %v9197_v16 = vld [vmem:[#allocation30_spill] sm:$0xff] }
 0x5c8   :  { %2262 = vmatpush1.msra.mxu0 %v6354_v20  ;;  %2333 = vmatpush1.msra.mxu1 %v6357_v24  ;;  %v9198_v20 = vld [vmem:[#allocation31_spill] sm:$0xff]  ;;  %v9199_v24 = vld [vmem:[#allocation32_spill] sm:$0xff] }
 0x5c9   :  { %2263 = vmatprep.subr.mxu0 %v6360_v32  ;;  %2334 = vmatprep.subr.mxu1 %v6363_v33  ;;  %v9200_v32 = vld [vmem:[#allocation33_spill] sm:$0xff]  ;;  %v9201_v33 = vld [vmem:[#allocation34_spill] sm:$0xff] }
 0x5ca   :  { %2264 = vmatpush1.msra.mxu0 %v6366_v38  ;;  %2335 = vmatpush1.msra.mxu1 %v6369_v39  ;;  %v9202_v38 = vld [vmem:[#allocation35_spill] sm:$0xff]  ;;  %v9203_v39 = vld [vmem:[#allocation36_spill] sm:$0xff] }
 0x5cb   :  { %2265 = vmatprep.subr.mxu0 %v6372_v41  ;;  %2336 = vmatprep.subr.mxu1 %v6375_v43  ;;  %v9204_v41 = vld [vmem:[#allocation37_spill] sm:$0xff]  ;;  %v9205_v43 = vld [vmem:[#allocation38_spill] sm:$0xff] }
 0x5cc   :  { %2266 = vmatpush1.msra.mxu0 %v6378_v44  ;;  %2337 = vmatpush1.msra.mxu1 %v6381_v47  ;;  %v9206_v44 = vld [vmem:[#allocation39_spill] sm:$0xff]  ;;  %v9207_v47 = vld [vmem:[#allocation40_spill] sm:$0xff] }
 0x5cd   :  { %2267 = vmatprep.subr.mxu0 %v6384_v48  ;;  %2338 = vmatprep.subr.mxu1 %v6387_v49  ;;  %v9208_v48 = vld [vmem:[#allocation41_spill] sm:$0xff]  ;;  %v9209_v49 = vld [vmem:[#allocation42_spill] sm:$0xff] }
 0x5ce   :  { %2268 = vmatpush1.msra.mxu0 %v6390_v3  ;;  %2339 = vmatpush1.msra.mxu1 %v6393_v4  ;;  %v9210_v3 = vld [vmem:[#allocation43_spill] sm:$0xff]  ;;  %v9211_v4 = vld [vmem:[#allocation44_spill] sm:$0xff] }
 0x5cf   :  { %2269 = vmatprep.subr.mxu0 %v6396_v63  ;;  %2340 = vmatprep.subr.mxu1 %v6399_v18  ;;  %v9212_v63 = vld [vmem:[#allocation45_spill] sm:$0xff]  ;;  %v9213_v18 = vld [vmem:[#allocation46_spill] sm:$0xff] }
 0x5d0   :  { %2270 = vmatpush1.msra.mxu0 %v6402_v45  ;;  %2341 = vmatpush1.msra.mxu1 %v6405_v31  ;;  %v9214_v45 = vld [vmem:[#allocation47_spill] sm:$0xff]  ;;  %v9215_v31 = vld [vmem:[#allocation48_spill] sm:$0xff] }
 0x5d1   :  { %2271 = vmatprep.subr.mxu0 %v6408_v53  ;;  %2342 = vmatprep.subr.mxu1 %v6411_v54  ;;  %v9216_v53 = vld [vmem:[#allocation49_spill] sm:$0xff]  ;;  %v9217_v54 = vld [vmem:[#allocation50_spill] sm:$0xff] }
 0x5d2   :  { %2272 = vmatpush1.msra.mxu0 %v9176_v37  ;;  %2305 = vmatprep.mubr.f32.mxu0 %v9177_v58  ;;  %v9220_v37 = vld [vmem:[#allocation53_spill] sm:$0xff] }
 0x5d3   :  { %2343 = vmatpush1.msra.mxu1 %v9178_v60  ;;  %2376 = vmatprep.mubr.f32.mxu1 %v9177_v58  ;;  %v9221_v60 = vld [vmem:[#allocation54_spill] sm:$0xff] }
 0x5d4   :  { %2306 = vmatmul.mubr.f32.vlgmr.msra.gmra.mxu0 %v6826_v13  ;;  %2377 = vmatmul.mubr.f32.vlgmr.msra.gmra.mxu1 %v6826_v13  ;;  %v9219_v13 = vld [vmem:[#allocation52_spill] sm:$0xff] }
 0x5d5   :  { %2411 = vmatprep.subr.mxu0 %v9179_v1  ;;  %2482 = vmatprep.subr.mxu1 %v9180_v40  ;;  %v9222_v1 = vld [vmem:[#allocation55_spill] sm:$0xff]  ;;  %v9223_v40 = vld [vmem:[#allocation56_spill] sm:$0xff] }
 0x5d6   :  { %2412 = vmatpush1.msra.mxu0 %v9181_v2  ;;  %2483 = vmatpush1.msra.mxu1 %v9182_v10  ;;  %v9224_v2 = vld [vmem:[#allocation57_spill] sm:$0xff]  ;;  %v9225_v10 = vld [vmem:[#allocation58_spill] sm:$0xff] }
 0x5d7   :  { %2413 = vmatprep.subr.mxu0 %v9183_v42  ;;  %2484 = vmatprep.subr.mxu1 %v9184_v34  ;;  %v9226_v42 = vld [vmem:[#allocation59_spill] sm:$0xff]  ;;  %v9227_v34 = vld [vmem:[#allocation60_spill] sm:$0xff] }
 0x5d8   :  { %2414 = vmatpush1.msra.mxu0 %v9185_v51  ;;  %2485 = vmatpush1.msra.mxu1 %v9186_v50  ;;  %v9228_v51 = vld [vmem:[#allocation61_spill] sm:$0xff]  ;;  %v9229_v50 = vld [vmem:[#allocation62_spill] sm:$0xff] }
 0x5d9   :  { %2415 = vmatprep.subr.mxu0 %v9187_v59  ;;  %2486 = vmatprep.subr.mxu1 %v9188_v57  ;;  %v9230_v59 = vld [vmem:[#allocation63_spill] sm:$0xff]  ;;  %v9231_v57 = vld [vmem:[#allocation64_spill] sm:$0xff] }
 0x5da   :  { %2416 = vmatpush1.msra.mxu0 %v9189_v61  ;;  %2487 = vmatpush1.msra.mxu1 %v9190_v55  ;;  %v9232_v61 = vld [vmem:[#allocation65_spill] sm:$0xff]  ;;  %v9233_v55 = vld [vmem:[#allocation66_spill] sm:$0xff] }
 0x5db   :  { %2417 = vmatprep.subr.mxu0 %v9191_v62  ;;  %2488 = vmatprep.subr.mxu1 %v9192_v52  ;;  %v9234_v62 = vld [vmem:[#allocation67_spill] sm:$0xff]  ;;  %v9235_v52 = vld [vmem:[#allocation68_spill] sm:$0xff] }
 0x5dc   :  { %2418 = vmatpush1.msra.mxu0 %v9193_v35  ;;  %2489 = vmatpush1.msra.mxu1 %v9194_v56  ;;  %v9236_v35 = vld [vmem:[#allocation69_spill] sm:$0xff]  ;;  %v9237_v56 = vld [vmem:[#allocation70_spill] sm:$0xff] }
 0x5dd   :  { %2419 = vmatprep.subr.mxu0 %v9195_v14  ;;  %2490 = vmatprep.subr.mxu1 %v9196_v15  ;;  %v9238_v14 = vld [vmem:[#allocation71_spill] sm:$0xff]  ;;  %v9239_v15 = vld [vmem:[#allocation72_spill] sm:$0xff] }
 0x5de   :  { %2420 = vmatpush1.msra.mxu0 %v9197_v16  ;;  %2491 = vmatpush1.msra.mxu1 %v9198_v20  ;;  %v9240_v16 = vld [vmem:[#allocation73_spill] sm:$0xff]  ;;  %v9241_v20 = vld [vmem:[#allocation74_spill] sm:$0xff] }
 0x5df   :  { %2421 = vmatprep.subr.mxu0 %v9199_v24  ;;  %2492 = vmatprep.subr.mxu1 %v9200_v32  ;;  %v9242_v24 = vld [vmem:[#allocation75_spill] sm:$0xff]  ;;  %v9243_v32 = vld [vmem:[#allocation76_spill] sm:$0xff] }
 0x5e0   :  { %2422 = vmatpush1.msra.mxu0 %v9201_v33  ;;  %2493 = vmatpush1.msra.mxu1 %v9202_v38  ;;  %v9244_v33 = vld [vmem:[#allocation77_spill] sm:$0xff]  ;;  %v9245_v38 = vld [vmem:[#allocation78_spill] sm:$0xff] }
 0x5e1   :  { %2423 = vmatprep.subr.mxu0 %v9203_v39  ;;  %2494 = vmatprep.subr.mxu1 %v9204_v41  ;;  %v9246_v39 = vld [vmem:[#allocation79_spill] sm:$0xff]  ;;  %v9247_v41 = vld [vmem:[#allocation80_spill] sm:$0xff] }
 0x5e2   :  { %2424 = vmatpush1.msra.mxu0 %v9205_v43  ;;  %2495 = vmatpush1.msra.mxu1 %v9206_v44  ;;  %v9248_v43 = vld [vmem:[#allocation81_spill] sm:$0xff]  ;;  %v9249_v44 = vld [vmem:[#allocation82_spill] sm:$0xff] }
 0x5e3   :  { %2425 = vmatprep.subr.mxu0 %v9207_v47  ;;  %2496 = vmatprep.subr.mxu1 %v9208_v48  ;;  %v9250_v47 = vld [vmem:[#allocation83_spill] sm:$0xff]  ;;  %v9251_v48 = vld [vmem:[#allocation84_spill] sm:$0xff] }
 0x5e4   :  { %2426 = vmatpush1.msra.mxu0 %v9209_v49  ;;  %2497 = vmatpush1.msra.mxu1 %v9210_v3  ;;  %v9252_v49 = vld [vmem:[#allocation85_spill] sm:$0xff]  ;;  %v9253_v3 = vld [vmem:[#allocation86_spill] sm:$0xff] }
 0x5e5   :  { %2427 = vmatprep.subr.mxu0 %v9211_v4  ;;  %2498 = vmatprep.subr.mxu1 %v9212_v63  ;;  %v9254_v4 = vld [vmem:[#allocation87_spill] sm:$0xff]  ;;  %v9255_v63 = vld [vmem:[#allocation88_spill] sm:$0xff] }
 0x5e6   :  { %2428 = vmatpush1.msra.mxu0 %v9213_v18  ;;  %2499 = vmatpush1.msra.mxu1 %v9214_v45  ;;  %v9256_v18 = vld [vmem:[#allocation89_spill] sm:$0xff]  ;;  %v9257_v45 = vld [vmem:[#allocation90_spill] sm:$0xff] }
 0x5e7   :  { %2429 = vmatprep.subr.mxu0 %v9215_v31  ;;  %2500 = vmatprep.subr.mxu1 %v9216_v53  ;;  %v9258_v31 = vld [vmem:[#allocation91_spill] sm:$0xff]  ;;  %v9259_v53 = vld [vmem:[#allocation92_spill] sm:$0xff] }
 0x5e8   :  { %2430 = vmatpush1.msra.mxu0 %v9217_v54  ;;  %2501 = vmatpush1.msra.mxu1 %v9218_v12  ;;  %v9260_v54 = vld [vmem:[#allocation93_spill] sm:$0xff]  ;;  %v9261_v12 = vld [vmem:[#allocation94_spill] sm:$0xff] }
 0x5e9   :  { %2431 = vmatprep.subr.mxu0 %v9219_v13  ;;  %2502 = vmatprep.subr.mxu1 %v9220_v37  ;;  %v9262_v13 = vld [vmem:[#allocation95_spill] sm:$0xff]  ;;  %v9263_v37 = vld [vmem:[#allocation96_spill] sm:$0xff] }
 0x5ea   :  { %2432 = vmatpush1.msra.mxu0 %v9221_v60  ;;  %2503 = vmatpush1.msra.mxu1 %v9222_v1  ;;  %v9264_v60 = vld [vmem:[#allocation97_spill] sm:$0xff]  ;;  %v9265_v1 = vld [vmem:[#allocation98_spill] sm:$0xff] }
 0x5eb   :  { %2433 = vmatprep.subr.mxu0 %v9223_v40  ;;  %2504 = vmatprep.subr.mxu1 %v9224_v2  ;;  %v9266_v40 = vld [vmem:[#allocation99_spill] sm:$0xff]  ;;  %v9267_v2 = vld [vmem:[#allocation100_spill] sm:$0xff] }
 0x5ec   :  { %2434 = vmatpush1.msra.mxu0 %v9225_v10  ;;  %2505 = vmatpush1.msra.mxu1 %v9226_v42  ;;  %v9268_v10 = vld [vmem:[#allocation101_spill] sm:$0xff]  ;;  %v9269_v42 = vld [vmem:[#allocation102_spill] sm:$0xff] }
 0x5ed   :  { %2435 = vmatprep.subr.mxu0 %v9227_v34  ;;  %2506 = vmatprep.subr.mxu1 %v9228_v51  ;;  %v9270_v34 = vld [vmem:[#allocation103_spill] sm:$0xff]  ;;  %v9271_v51 = vld [vmem:[#allocation104_spill] sm:$0xff] }
 0x5ee   :  { %2436 = vmatpush1.msra.mxu0 %v9229_v50  ;;  %2507 = vmatpush1.msra.mxu1 %v9230_v59  ;;  %v9272_v50 = vld [vmem:[#allocation105_spill] sm:$0xff]  ;;  %v9273_v59 = vld [vmem:[#allocation106_spill] sm:$0xff] }
 0x5ef   :  { %2437 = vmatprep.subr.mxu0 %v9231_v57  ;;  %2508 = vmatprep.subr.mxu1 %v9232_v61  ;;  %v9274_v57 = vld [vmem:[#allocation107_spill] sm:$0xff]  ;;  %v9275_v61 = vld [vmem:[#allocation108_spill] sm:$0xff] }
 0x5f0   :  { %2438 = vmatpush1.msra.mxu0 %v9233_v55  ;;  %2509 = vmatpush1.msra.mxu1 %v9234_v62  ;;  %v9276_v55 = vld [vmem:[#allocation109_spill] sm:$0xff]  ;;  %v9277_v62 = vld [vmem:[#allocation110_spill] sm:$0xff] }
 0x5f1   :  { %2439 = vmatprep.subr.mxu0 %v9235_v52  ;;  %2510 = vmatprep.subr.mxu1 %v9236_v35  ;;  %v9278_v52 = vld [vmem:[#allocation111_spill] sm:$0xff]  ;;  %v9279_v35 = vld [vmem:[#allocation112_spill] sm:$0xff] }
 0x5f2   :  { %2440 = vmatpush1.msra.mxu0 %v9237_v56  ;;  %2511 = vmatpush1.msra.mxu1 %v9238_v14  ;;  %v9280_v56 = vld [vmem:[#allocation113_spill] sm:$0xff]  ;;  %v9281_v14 = vld [vmem:[#allocation114_spill] sm:$0xff] }
 0x5f3   :  { %2441 = vmatprep.subr.mxu0 %v9239_v15  ;;  %2512 = vmatprep.subr.mxu1 %v9240_v16  ;;  %v9282_v15 = vld [vmem:[#allocation115_spill] sm:$0xff]  ;;  %v9283_v16 = vld [vmem:[#allocation116_spill] sm:$0xff] }
 0x5f4   :  { %2442 = vmatpush1.msra.mxu0 %v9241_v20  ;;  %2513 = vmatpush1.msra.mxu1 %v9242_v24  ;;  %v9284_v20 = vld [vmem:[#allocation117_spill] sm:$0xff]  ;;  %v9285_v24 = vld [vmem:[#allocation118_spill] sm:$0xff] }
 0x5f5   :  { %2443 = vmatprep.subr.mxu0 %v9243_v32  ;;  %2514 = vmatprep.subr.mxu1 %v9244_v33  ;;  %v9286_v32 = vld [vmem:[#allocation119_spill] sm:$0xff]  ;;  %v9287_v33 = vld [vmem:[#allocation120_spill] sm:$0xff] }
 0x5f6   :  { %2444 = vmatpush2.msra.mxu0 %v9245_v38  ;;  %2515 = vmatpush2.msra.mxu1 %v9246_v39  ;;  %v9288_v38 = vld [vmem:[#allocation121_spill] sm:$0xff]  ;;  %v9289_v39 = vld [vmem:[#allocation122_spill] sm:$0xff] }
 0x5f7   :  { %2445 = vmatprep.subr.mxu0 %v9247_v41  ;;  %2516 = vmatprep.subr.mxu1 %v9248_v43  ;;  %v9290_v41 = vld [vmem:[#allocation123_spill] sm:$0xff]  ;;  %v9291_v43 = vld [vmem:[#allocation124_spill] sm:$0xff] }
 0x5f8   :  { %2446 = vmatpush2.msra.mxu0 %v9249_v44  ;;  %2517 = vmatpush2.msra.mxu1 %v9250_v47  ;;  %v9292_v44 = vld [vmem:[#allocation125_spill] sm:$0xff]  ;;  %v9293_v47 = vld [vmem:[#allocation126_spill] sm:$0xff] }
 0x5f9   :  { %2447 = vmatprep.subr.mxu0 %v9251_v48  ;;  %2518 = vmatprep.subr.mxu1 %v9252_v49  ;;  %v9294_v48 = vld [vmem:[#allocation127_spill] sm:$0xff]  ;;  %v9295_v49 = vld [vmem:[#allocation128_spill] sm:$0xff] }
 0x5fa   :  { %2448 = vmatpush2.msra.mxu0 %v9253_v3  ;;  %2519 = vmatpush2.msra.mxu1 %v9254_v4  ;;  %v9296_v3 = vld [vmem:[#allocation129_spill] sm:$0xff]  ;;  %v9297_v4 = vld [vmem:[#allocation130_spill] sm:$0xff] }
 0x5fb   :  { %2449 = vmatprep.subr.mxu0 %v9255_v63  ;;  %2520 = vmatprep.subr.mxu1 %v9256_v18  ;;  %v9298_v63 = vld [vmem:[#allocation131_spill] sm:$0xff]  ;;  %v9299_v18 = vld [vmem:[#allocation132_spill] sm:$0xff] }
 0x5fc   :  { %2450 = vmatpush2.msra.mxu0 %v9257_v45  ;;  %2521 = vmatpush2.msra.mxu1 %v9258_v31  ;;  %v9300_v45 = vld [vmem:[#allocation133_spill] sm:$0xff]  ;;  %v9301_v31 = vld [vmem:[#allocation134_spill] sm:$0xff] }
 0x5fd   :  { %2451 = vmatprep.subr.mxu0 %v9259_v53  ;;  %2522 = vmatprep.subr.mxu1 %v9260_v54  ;;  %v9302_v53 = vld [vmem:[#allocation135_spill] sm:$0xff]  ;;  %v9303_v54 = vld [vmem:[#allocation136_spill] sm:$0xff] }
 0x5fe   :  { %2452 = vmatpush2.msra.mxu0 %v9261_v12  ;;  %2523 = vmatpush2.msra.mxu1 %v9262_v13  ;;  %v9304_v12 = vld [vmem:[#allocation137_spill] sm:$0xff]  ;;  %v9305_v13 = vld [vmem:[#allocation138_spill] sm:$0xff] }
 0x5ff   :  { %2453 = vmatprep.subr.mxu0 %v9263_v37  ;;  %2524 = vmatprep.subr.mxu1 %v9264_v60  ;;  %v9306_v37 = vld [vmem:[#allocation139_spill] sm:$0xff] }
 0x600   :  { %2454 = vmatpush2.msra.mxu0 %v9265_v1  ;;  %2525 = vmatpush2.msra.mxu1 %v9266_v40  ;;  %v7060_v60 = vld [vmem:[#allocation2 + $0x1e8] sm:$0xff]  ;;  %v7063_v1 = vld [vmem:[#allocation2 + $0x1f8] sm:$0xff] }
 0x601   :  { %2455 = vmatprep.subr.mxu0 %v9267_v2  ;;  %2526 = vmatprep.subr.mxu1 %v9268_v10  ;;  %v9307_v2 = vld [vmem:[#allocation11_spill] sm:$0xff] }
 0x602   :  { %2456 = vmatpush2.msra.mxu0 %v9269_v42  ;;  %2527 = vmatpush2.msra.mxu1 %v9270_v34 }
 0x603   :  { %2457 = vmatprep.subr.mxu0 %v9271_v51  ;;  %2528 = vmatprep.subr.mxu1 %v9272_v50  ;;  %v9308_v51 = vld [vmem:[#allocation12_spill] sm:$0xff] }
 0x604   :  { %2458 = vmatpush2.msra.mxu0 %v9273_v59  ;;  %2529 = vmatpush2.msra.mxu1 %v9274_v57 }
 0x605   :  { %2459 = vmatprep.subr.mxu0 %v9275_v61  ;;  %2530 = vmatprep.subr.mxu1 %v9276_v55  ;;  %v9309_v61 = vld [vmem:[#allocation13_spill] sm:$0xff] }
 0x606   :  { %2460 = vmatpush2.msra.mxu0 %v9277_v62  ;;  %2531 = vmatpush2.msra.mxu1 %v9278_v52 }
 0x607   :  { %2461 = vmatprep.subr.mxu0 %v9279_v35  ;;  %2532 = vmatprep.subr.mxu1 %v9280_v56  ;;  %v9310_v56 = vld [vmem:[#allocation14_spill] sm:$0xff] }
 0x608   :  { %2462 = vmatpush2.msra.mxu0 %v9281_v14  ;;  %2533 = vmatpush2.msra.mxu1 %v9282_v15 }
 0x609   :  { %2463 = vmatprep.subr.mxu0 %v9283_v16  ;;  %2534 = vmatprep.subr.mxu1 %v9284_v20 }
 0x60a   :  { %2464 = vmatpush2.msra.mxu0 %v9285_v24  ;;  %2535 = vmatpush2.msra.mxu1 %v9286_v32 }
 0x60b   :  { %2465 = vmatprep.subr.mxu0 %v9287_v33  ;;  %2536 = vmatprep.subr.mxu1 %v9288_v38  ;;  %v9311_v38 = vld [vmem:[#allocation158_spill] sm:$0xff] }
 0x60c   :  { %2466 = vmatpush2.msra.mxu0 %v9289_v39  ;;  %2537 = vmatpush2.msra.mxu1 %v9290_v41 }
 0x60d   :  { %2467 = vmatprep.subr.mxu0 %v9291_v43  ;;  %2538 = vmatprep.subr.mxu1 %v9292_v44 }
 0x60e   :  { %2468 = vmatpush2.msra.mxu0 %v9293_v47  ;;  %2539 = vmatpush2.msra.mxu1 %v9294_v48  ;;  %v9312_v48 = vld [vmem:[#allocation160_spill] sm:$0xff] }
 0x60f   :  { %2469 = vmatprep.subr.mxu0 %v9295_v49  ;;  %2540 = vmatprep.subr.mxu1 %v9296_v3 }
 0x610   :  { %2470 = vmatpush2.msra.mxu0 %v9297_v4  ;;  %2541 = vmatpush2.msra.mxu1 %v9298_v63 }
 0x611   :  { %2471 = vmatprep.subr.mxu0 %v9299_v18  ;;  %2542 = vmatprep.subr.mxu1 %v9300_v45 }
 0x612   :  { %2472 = vmatpush2.msra.mxu0 %v9301_v31  ;;  %2543 = vmatpush2.msra.mxu1 %v9302_v53  ;;  %v9313_v53 = vld [vmem:[#allocation159_spill] sm:$0xff] }
 0x613   :  { %2473 = vmatprep.subr.mxu0 %v9303_v54  ;;  %2544 = vmatprep.subr.mxu1 %v9304_v12 }
 0x614   :  { %2474 = vmatpush2.msra.mxu0 %v9305_v13  ;;  %2545 = vmatpush2.msra.mxu1 %v9306_v37  ;;  %v9314_v37 = vld [vmem:[#allocation161_spill] sm:$0xff] }
 0x615   :  { %2577 = vmatprep.subr.mxu0 %v7060_v60  ;;  %2648 = vmatprep.subr.mxu1 %v7063_v1 }
 0x673   :  { %v2141_v40 = vpop.f32.mrf.mxu0  ;;  %v2212_v57 = vpop.f32.mrf.mxu1 }
 0x674   :  { %v2142_v10 = vadd.f32 %v2141_v40, %v9307_v2  ;;  %v2213_v55 = vadd.f32 %v2212_v57, %v9309_v61 }
 0x675   :  { %v2143_v42 = vpop.f32.mrf.mxu0  ;;  %v2214_v62 = vpop.f32.mrf.mxu1 }
 0x676   :  { %v3403_v34 = vmul.f32 -1.442695, %v2142_v10  ;;  %v2144_v50 = vadd.f32 %v2143_v42, %v9308_v51  ;;  %v3405_v52 = vmul.f32 -1.442695, %v2213_v55  ;;  %v2215_v14 = vadd.f32 %v2214_v62, %v9310_v56 }
 0x678   :  { %3628 = vpow2.f32 %v3403_v34  ;;  %v3404_v59 = vmul.f32 -1.442695, %v2144_v50 }
 0x67a   :  { %3630 = vpow2.f32 %v3404_v59 }
 0x67b   :  { %3632 = vpow2.f32 %v3405_v52 }
 0x685   :  { %v3629_v35 = vpop.eup %3628 }
 0x686   :  { %v2226_v15 = vadd.f32 1.0, %v3629_v35 }
 0x687   :  { %v3631_v16 = vpop.eup %3630 }
 0x688   :  { %3634 = vrcp.f32 %v2226_v15  ;;  %v2227_v20 = vadd.f32 1.0, %v3631_v16  ;;  %v3633_v24 = vpop.eup %3632 }
 0x689   :  { %3636 = vtanh.f32 %v2215_v14  ;;  %v2228_v3 = vadd.f32 1.0, %v3633_v24 }
 0x68a   :  { %3638 = vrcp.f32 %v2227_v20 }
 0x694   :  { %v2307_v32 = vpop.f32.mrf.mxu0  ;;  %v2378_v31 = vpop.f32.mrf.mxu1 }
 0x695   :  { %v3635_v33 = vpop.eup %3634  ;;  %v2383_v39 = vadd.f32 %v2307_v32, %v9311_v38  ;;  %v2385_v54 = vadd.f32 %v2378_v31, %v9313_v53  ;;  %v7161_v38 = vld [vmem:[#allocation2 + $0xd0] sm:$0xff]  ;;  %v7200_v53 = vld [vmem:[#allocation2 + $0x48] sm:$0xff] }
 0x696   :  { %v3637_v41 = vpop.eup %3636  ;;  %v2309_v43 = vpop.f32.mrf.mxu0  ;;  %v7197_v31 = vld [vmem:[#allocation2 + $0x70] sm:$0xff] }
 0x697   :  { %v3639_v44 = vpop.eup %3638  ;;  %v3406_v47 = vmul.f32 -1.442695, %v2383_v39  ;;  %v2384_v49 = vadd.f32 %v2309_v43, %v9312_v48  ;;  %v2237_v63 = vmul.f32 %v3637_v41, %v3635_v33  ;;  %v2380_v12 = vpop.f32.mrf.mxu1  ;;  %v3408_v13 = vmul.f32 -1.442695, %v2385_v54  ;;  %v7164_v39 = vld [vmem:[#allocation2 + $0xa8] sm:$0xff]  ;;  %v7167_v41 = vld [vmem:[#allocation2 + $0xb8] sm:$0xff] }
 0x698   :  { %v2236_v4 = vmul.f32 %v3639_v44, %v6817_v23  ;;  %v2386_v40 = vadd.f32 %v2380_v12, %v9314_v37  ;;  %v7170_v43 = vld [vmem:[#allocation2 + $0xa0] sm:$0xff]  ;;  %v7173_v44 = vld [vmem:[#allocation2 + $0xb0] sm:$0xff]  ;;  %v7179_v48 = vld [vmem:[#allocation2 + $0x98] sm:$0xff] }
 0x699   :  { %3640 = vpow2.f32 %v3406_v47  ;;  %v3407_v18 = vmul.f32 -1.442695, %v2384_v49  ;;  %v7176_v47 = vld [vmem:[#allocation2 + $0x88] sm:$0xff]  ;;  %v7182_v49 = vld [vmem:[#allocation2 + $0x80] sm:$0xff]  ;;  %v7203_v54 = vld [vmem:[#allocation2 + $0x58] sm:$0xff] }
 0x69a   :  { %v7073_v45 = vadd.f32 %v2237_v63, %v2236_v4  ;;  %v7188_v4 = vld [vmem:[#allocation2 + $0x68] sm:$0xff]  ;;  %v7191_v63 = vld [vmem:[#allocation2 + $0x78] sm:$0xff]  ;;  %v7206_v12 = vld [vmem:[#allocation2 + $0x40] sm:$0xff] }
 0x69b   :  { %3642 = vpow2.f32 %v3407_v18  ;;  %v7194_v18 = vld [vmem:[#allocation2 + $0x60] sm:$0xff]  ;;  %v7212_v37 = vld [vmem:[#allocation2 + $0x28] sm:$0xff] }
 0x69c   :  { %3644 = vrcp.f32 %v2228_v3  ;;  %v7185_v3 = vld [vmem:[#allocation2 + $0x90] sm:$0xff] }
 0x69d   :  { %3646 = vtanh.f32 %v7073_v45 }
 0x69e   :  { %3648 = vpow2.f32 %v3408_v13  ;;  %v7209_v13 = vld [vmem:[#allocation2 + $0x50] sm:$0xff] }
 0x69f   :  { %3650 = vtanh.f32 %v2386_v40  ;;  %v7215_v40 = vld [vmem:[#allocation2 + $0x38] sm:$0xff] }
 0x6a6   :  { %v3641_v10 = vpop.eup %3640 }
 0x6a7   :  { %v2396_v42 = vadd.f32 1.0, %v3641_v10  ;;  %v7218_v10 = vld [vmem:[#allocation2 + $0x20] sm:$0xff] }
 0x6a8   :  { %v3643_v23 = vpop.eup %3642 }
 0x6a9   :  { %v3645_v34 = vpop.eup %3644  ;;  %3652 = vrcp.f32 %v2396_v42  ;;  %v2397_v50 = vadd.f32 1.0, %v3643_v23  ;;  %v7221_v42 = vld [vmem:[#allocation2 + $0x30] sm:$0xff]  ;;  %v7224_v23 = vld [vmem:[#allocation2 + $0x8] sm:$0xff] }
 0x6aa   :  { %v3647_v59 = vpop.eup %3646 }
 0x6ab   :  { %3654 = vrcp.f32 %v2397_v50  ;;  %v2240_v57 = vmul.f32 %v3647_v59, %v3645_v34  ;;  %v3649_v55 = vpop.eup %3648  ;;  %v7227_v34 = vld [vmem:[#allocation2 + $0x18] sm:$0xff]  ;;  %v7230_v50 = vld [vmem:[#allocation2] sm:$0xff]  ;;  %v7234_v59 = vld [vmem:[#allocation2 + $0x10] sm:$0xff] }
 0x6ac   :  { %v3651_v62 = vpop.eup %3650  ;;  %v2398_v15 = vadd.f32 1.0, %v3649_v55  ;;  %9315 = vst [vmem:[#allocation140_spill] sm:$0xff] %v7230_v50  ;;  %9316 = vst [vmem:[#allocation141_spill] sm:$0xff] %v7234_v59  ;;  %v7243_v55 = vld [vmem:[#allocation5 + $0x1f8] sm:$0xff] }
 0x6ad   :  { %2475 = vmatprep.mubr.f32.mxu0 %v2240_v57  ;;  %2546 = vmatprep.mubr.f32.mxu1 %v2240_v57  ;;  %v7240_v57 = vld [vmem:[#allocation5 + $0x1e8] sm:$0xff]  ;;  %9318 = vst [vmem:[#allocation144_spill] sm:$0xff] %v7243_v55 }
 0x6ae   :  { %3656 = vrcp.f32 %v2398_v15  ;;  %9317 = vst [vmem:[#allocation142_spill] sm:$0xff] %v7240_v57  ;;  %v7258_v15 = vld [vmem:[#allocation5 + $0x1c0] sm:$0xff] }
 0x6af   :  { %9323 = vst [vmem:[#allocation153_spill] sm:$0xff] %v7258_v15 }
 0x6b6   :  { %v3653_v52 = vpop.eup %3652 }
 0x6b7   :  { %v2407_v35 = vmul.f32 %v3653_v52, %v3651_v62  ;;  %v7246_v62 = vld [vmem:[#allocation5 + $0x1e0] sm:$0xff]  ;;  %v7249_v52 = vld [vmem:[#allocation5 + $0x1f0] sm:$0xff] }
 0x6b8   :  { %v3655_v14 = vpop.eup %3654  ;;  %9319 = vst [vmem:[#allocation143_spill] sm:$0xff] %v7246_v62  ;;  %9320 = vst [vmem:[#allocation150_spill] sm:$0xff] %v7249_v52 }
 0x6b9   :  { %v2406_v16 = vmul.f32 %v3655_v14, %v6823_v19  ;;  %v7104_v19 = vld [vmem:[#allocation2 + $0x148] sm:$0xff]  ;;  %v7255_v14 = vld [vmem:[#allocation5 + $0x1d8] sm:$0xff] }
 0x6ba   :  { %9322 = vst [vmem:[#allocation151_spill] sm:$0xff] %v7255_v14 }
 0x6bb   :  { %v7079_v20 = vadd.f32 %v2407_v35, %v2406_v16  ;;  %v3657_v24 = vpop.eup %3656  ;;  %v7252_v35 = vld [vmem:[#allocation5 + $0x1c8] sm:$0xff]  ;;  %v7261_v16 = vld [vmem:[#allocation5 + $0x1d0] sm:$0xff] }
 0x6bc   :  { %9321 = vst [vmem:[#allocation152_spill] sm:$0xff] %v7252_v35  ;;  %9324 = vst [vmem:[#allocation154_spill] sm:$0xff] %v7261_v16 }
 0x6bd   :  { %3658 = vtanh.f32 %v7079_v20 }
 0x6ca   :  { %v3659_v32 = vpop.eup %3658 }
 0x6cb   :  { %v7082_v33 = vmul.f32 %v3659_v32, %v3657_v24  ;;  %v7264_v24 = vld [vmem:[#allocation5 + $0x1a8] sm:$0xff]  ;;  %v7267_v32 = vld [vmem:[#allocation5 + $0x1b8] sm:$0xff] }
 0x6cc   :  { %9325 = vst [vmem:[#allocation156_spill] sm:$0xff] %v7264_v24  ;;  %9326 = vst [vmem:[#allocation155_spill] sm:$0xff] %v7267_v32 }
 0x6cd   :  { %2476 = vmatmul.mubr.f32.vlgmr.msra.gmra.mxu0 %v7082_v33  ;;  %2547 = vmatmul.mubr.f32.vlgmr.msra.gmra.mxu1 %v7082_v33 }
 0x6ce   :  { %2578 = vmatpush1.msra.mxu0 %v6830_v30  ;;  %2649 = vmatpush1.msra.mxu1 %v6833_v5  ;;  %v7107_v30 = vld [vmem:[#allocation2 + $0x158] sm:$0xff]  ;;  %v7110_v5 = vld [vmem:[#allocation2 + $0x140] sm:$0xff] }
 0x6cf   :  { %2579 = vmatprep.subr.mxu0 %v6836_v7  ;;  %2650 = vmatprep.subr.mxu1 %v6839_v0  ;;  %v7113_v7 = vld [vmem:[#allocation2 + $0x150] sm:$0xff]  ;;  %v7116_v0 = vld [vmem:[#allocation2 + $0x128] sm:$0xff] }
 0x6d0   :  { %2580 = vmatpush1.msra.mxu0 %v6842_v8  ;;  %2651 = vmatpush1.msra.mxu1 %v6845_v46  ;;  %v7119_v8 = vld [vmem:[#allocation2 + $0x138] sm:$0xff]  ;;  %v7122_v46 = vld [vmem:[#allocation2 + $0x120] sm:$0xff] }
 0x6d1   :  { %2581 = vmatprep.subr.mxu0 %v6848_v25  ;;  %2652 = vmatprep.subr.mxu1 %v6851_v11  ;;  %v7125_v25 = vld [vmem:[#allocation2 + $0x130] sm:$0xff]  ;;  %v7128_v11 = vld [vmem:[#allocation2 + $0x108] sm:$0xff] }
 0x6d2   :  { %2582 = vmatpush1.msra.mxu0 %v6854_v27  ;;  %2653 = vmatpush1.msra.mxu1 %v6857_v28  ;;  %v7131_v27 = vld [vmem:[#allocation2 + $0x118] sm:$0xff]  ;;  %v7134_v28 = vld [vmem:[#allocation2 + $0x100] sm:$0xff] }
 0x6d3   :  { %2583 = vmatprep.subr.mxu0 %v6860_v9  ;;  %2654 = vmatprep.subr.mxu1 %v6863_v29  ;;  %v7137_v9 = vld [vmem:[#allocation2 + $0x110] sm:$0xff]  ;;  %v7140_v29 = vld [vmem:[#allocation2 + $0xe8] sm:$0xff] }
 0x6d4   :  { %2584 = vmatpush1.msra.mxu0 %v6866_v6  ;;  %2655 = vmatpush1.msra.mxu1 %v6869_v22  ;;  %v7143_v6 = vld [vmem:[#allocation2 + $0xf8] sm:$0xff]  ;;  %v7146_v22 = vld [vmem:[#allocation2 + $0xe0] sm:$0xff] }
 0x6d5   :  { %2585 = vmatprep.subr.mxu0 %v6872_v36  ;;  %2656 = vmatprep.subr.mxu1 %v6875_v17  ;;  %v7149_v36 = vld [vmem:[#allocation2 + $0xf0] sm:$0xff]  ;;  %v7152_v17 = vld [vmem:[#allocation2 + $0xc8] sm:$0xff] }
 0x6d6   :  { %2586 = vmatpush1.msra.mxu0 %v6878_v26  ;;  %2657 = vmatpush1.msra.mxu1 %v6881_v21  ;;  %v7155_v26 = vld [vmem:[#allocation2 + $0xd8] sm:$0xff]  ;;  %v7158_v21 = vld [vmem:[#allocation2 + $0xc0] sm:$0xff] }
 0x6d7   :  { %2587 = vmatprep.subr.mxu0 %v7104_v19  ;;  %2658 = vmatprep.subr.mxu1 %v7107_v30 }
 0x6d8   :  { %2588 = vmatpush1.msra.mxu0 %v7110_v5  ;;  %2659 = vmatpush1.msra.mxu1 %v7113_v7 }
 0x6d9   :  { %2589 = vmatprep.subr.mxu0 %v7116_v0  ;;  %2660 = vmatprep.subr.mxu1 %v7119_v8 }
 0x6da   :  { %2590 = vmatpush1.msra.mxu0 %v7122_v46  ;;  %2661 = vmatpush1.msra.mxu1 %v7125_v25 }
 0x6db   :  { %2591 = vmatprep.subr.mxu0 %v7128_v11  ;;  %2662 = vmatprep.subr.mxu1 %v7131_v27 }
 0x6dc   :  { %2592 = vmatpush1.msra.mxu0 %v7134_v28  ;;  %2663 = vmatpush1.msra.mxu1 %v7137_v9 }
 0x6dd   :  { %2593 = vmatprep.subr.mxu0 %v7140_v29  ;;  %2664 = vmatprep.subr.mxu1 %v7143_v6 }
 0x6de   :  { %2594 = vmatpush1.msra.mxu0 %v7146_v22  ;;  %2665 = vmatpush1.msra.mxu1 %v7149_v36 }
 0x6df   :  { %2595 = vmatprep.subr.mxu0 %v7152_v17  ;;  %2666 = vmatprep.subr.mxu1 %v7155_v26 }
 0x6e0   :  { %2596 = vmatpush1.msra.mxu0 %v7158_v21  ;;  %2667 = vmatpush1.msra.mxu1 %v7161_v38 }
 0x6e1   :  { %2597 = vmatprep.subr.mxu0 %v7164_v39  ;;  %2668 = vmatprep.subr.mxu1 %v7167_v41 }
 0x6e2   :  { %2598 = vmatpush1.msra.mxu0 %v7170_v43  ;;  %2669 = vmatpush1.msra.mxu1 %v7173_v44 }
 0x6e3   :  { %2599 = vmatprep.subr.mxu0 %v7176_v47  ;;  %2670 = vmatprep.subr.mxu1 %v7179_v48 }
 0x6e4   :  { %2600 = vmatpush1.msra.mxu0 %v7182_v49  ;;  %2671 = vmatpush1.msra.mxu1 %v7185_v3 }
 0x6e5   :  { %2601 = vmatprep.subr.mxu0 %v7188_v4  ;;  %2672 = vmatprep.subr.mxu1 %v7191_v63 }
 0x6e6   :  { %2602 = vmatpush1.msra.mxu0 %v7194_v18  ;;  %2673 = vmatpush1.msra.mxu1 %v7197_v31 }
 0x6e7   :  { %2603 = vmatprep.subr.mxu0 %v7200_v53  ;;  %2674 = vmatprep.subr.mxu1 %v7203_v54 }
 0x6e8   :  { %2604 = vmatpush1.msra.mxu0 %v7206_v12  ;;  %2675 = vmatpush1.msra.mxu1 %v7209_v13 }
 0x6e9   :  { %2605 = vmatprep.subr.mxu0 %v7212_v37  ;;  %2676 = vmatprep.subr.mxu1 %v7215_v40 }
 0x6ea   :  { %2606 = vmatpush1.msra.mxu0 %v7218_v10  ;;  %2677 = vmatpush1.msra.mxu1 %v7221_v42 }
 0x6eb   :  { %2607 = vmatprep.subr.mxu0 %v7224_v23  ;;  %2678 = vmatprep.subr.mxu1 %v7227_v34 }
 0x6ec   :  { %2608 = vmatpush1.msra.mxu0 %v7230_v50  ;;  %2641 = vmatprep.mubr.f32.mxu0 %v9177_v58 }
 0x6ed   :  { %2679 = vmatpush1.msra.mxu1 %v7234_v59  ;;  %2712 = vmatprep.mubr.f32.mxu1 %v9177_v58 }
 0x6ee   :  { %2642 = vmatmul.mubr.f32.vlgmr.msra.gmra.mxu0 %v7082_v33  ;;  %2713 = vmatmul.mubr.f32.vlgmr.msra.gmra.mxu1 %v7082_v33  ;;  %v7270_v33 = vld [vmem:[#allocation5 + $0x1a0] sm:$0xff] }
 0x6ef   :  { %2747 = vmatprep.subr.mxu0 %v7240_v57  ;;  %2818 = vmatprep.subr.mxu1 %v7243_v55  ;;  %9327 = vst [vmem:[#allocation157_spill] sm:$0xff] %v7270_v33 }
 0x6f0   :  { %2748 = vmatpush1.msra.mxu0 %v7246_v62  ;;  %2819 = vmatpush1.msra.mxu1 %v7249_v52 }
 0x6f1   :  { %2749 = vmatprep.subr.mxu0 %v7252_v35  ;;  %2820 = vmatprep.subr.mxu1 %v7255_v14  ;;  %v7273_v14 = vld [vmem:[#allocation5 + $0x1b0] sm:$0xff] }
 0x6f2   :  { %2750 = vmatpush1.msra.mxu0 %v7258_v15  ;;  %2821 = vmatpush1.msra.mxu1 %v7261_v16  ;;  %9328 = vst [vmem:[#allocation145_spill] sm:$0xff] %v7273_v14  ;;  %v7276_v15 = vld [vmem:[#allocation5 + $0x188] sm:$0xff]  ;;  %v7279_v16 = vld [vmem:[#allocation5 + $0x198] sm:$0xff] }
 0x6f3   :  { %2751 = vmatprep.subr.mxu0 %v7264_v24  ;;  %2822 = vmatprep.subr.mxu1 %v7267_v32  ;;  %9329 = vst [vmem:[#allocation146_spill] sm:$0xff] %v7276_v15  ;;  %9330 = vst [vmem:[#allocation148_spill] sm:$0xff] %v7279_v16  ;;  %v7282_v24 = vld [vmem:[#allocation5 + $0x180] sm:$0xff]  ;;  %v7285_v32 = vld [vmem:[#allocation5 + $0x190] sm:$0xff] }
 0x6f4   :  { %2752 = vmatpush1.msra.mxu0 %v7270_v33  ;;  %2823 = vmatpush1.msra.mxu1 %v7273_v14  ;;  %9331 = vst [vmem:[#allocation147_spill] sm:$0xff] %v7282_v24  ;;  %9332 = vst [vmem:[#allocation149_spill] sm:$0xff] %v7285_v32  ;;  %v7288_v33 = vld [vmem:[#allocation5 + $0x168] sm:$0xff]  ;;  %v7291_v14 = vld [vmem:[#allocation5 + $0x178] sm:$0xff] }
 0x6f5   :  { %2753 = vmatprep.subr.mxu0 %v7276_v15  ;;  %2824 = vmatprep.subr.mxu1 %v7279_v16  ;;  %9333 = vst [vmem:[#allocation15_spill] sm:$0xff] %v7288_v33  ;;  %9334 = vst [vmem:[#allocation16_spill] sm:$0xff] %v7291_v14  ;;  %v7294_v15 = vld [vmem:[#allocation5 + $0x160] sm:$0xff]  ;;  %v7297_v16 = vld [vmem:[#allocation5 + $0x170] sm:$0xff] }
 0x6f6   :  { %2754 = vmatpush1.msra.mxu0 %v7282_v24  ;;  %2825 = vmatpush1.msra.mxu1 %v7285_v32  ;;  %9335 = vst [vmem:[#allocation17_spill] sm:$0xff] %v7294_v15  ;;  %9336 = vst [vmem:[#allocation18_spill] sm:$0xff] %v7297_v16  ;;  %v7300_v24 = vld [vmem:[#allocation5 + $0x148] sm:$0xff]  ;;  %v7303_v32 = vld [vmem:[#allocation5 + $0x158] sm:$0xff] }
 0x6f7   :  { %2755 = vmatprep.subr.mxu0 %v7288_v33  ;;  %2826 = vmatprep.subr.mxu1 %v7291_v14  ;;  %9337 = vst [vmem:[#allocation19_spill] sm:$0xff] %v7300_v24  ;;  %9338 = vst [vmem:[#allocation20_spill] sm:$0xff] %v7303_v32  ;;  %v7306_v33 = vld [vmem:[#allocation5 + $0x140] sm:$0xff]  ;;  %v7309_v14 = vld [vmem:[#allocation5 + $0x150] sm:$0xff] }
 0x6f8   :  { %2756 = vmatpush1.msra.mxu0 %v7294_v15  ;;  %2827 = vmatpush1.msra.mxu1 %v7297_v16  ;;  %9339 = vst [vmem:[#allocation21_spill] sm:$0xff] %v7306_v33  ;;  %9340 = vst [vmem:[#allocation22_spill] sm:$0xff] %v7309_v14  ;;  %v7312_v15 = vld [vmem:[#allocation5 + $0x128] sm:$0xff]  ;;  %v7315_v16 = vld [vmem:[#allocation5 + $0x138] sm:$0xff] }
 0x6f9   :  { %2757 = vmatprep.subr.mxu0 %v7300_v24  ;;  %2828 = vmatprep.subr.mxu1 %v7303_v32  ;;  %9341 = vst [vmem:[#allocation23_spill] sm:$0xff] %v7312_v15  ;;  %9342 = vst [vmem:[#allocation24_spill] sm:$0xff] %v7315_v16  ;;  %v7318_v24 = vld [vmem:[#allocation5 + $0x120] sm:$0xff]  ;;  %v7321_v32 = vld [vmem:[#allocation5 + $0x130] sm:$0xff] }
 0x6fa   :  { %2758 = vmatpush1.msra.mxu0 %v7306_v33  ;;  %2829 = vmatpush1.msra.mxu1 %v7309_v14  ;;  %9343 = vst [vmem:[#allocation25_spill] sm:$0xff] %v7318_v24  ;;  %9344 = vst [vmem:[#allocation26_spill] sm:$0xff] %v7321_v32  ;;  %v7324_v33 = vld [vmem:[#allocation5 + $0x108] sm:$0xff]  ;;  %v7327_v14 = vld [vmem:[#allocation5 + $0x118] sm:$0xff] }
 0x6fb   :  { %2759 = vmatprep.subr.mxu0 %v7312_v15  ;;  %2830 = vmatprep.subr.mxu1 %v7315_v16  ;;  %9345 = vst [vmem:[#allocation27_spill] sm:$0xff] %v7324_v33  ;;  %9346 = vst [vmem:[#allocation28_spill] sm:$0xff] %v7327_v14  ;;  %v7330_v15 = vld [vmem:[#allocation5 + $0x100] sm:$0xff]  ;;  %v7333_v16 = vld [vmem:[#allocation5 + $0x110] sm:$0xff] }
 0x6fc   :  { %2760 = vmatpush1.msra.mxu0 %v7318_v24  ;;  %2831 = vmatpush1.msra.mxu1 %v7321_v32  ;;  %9347 = vst [vmem:[#allocation29_spill] sm:$0xff] %v7330_v15  ;;  %9348 = vst [vmem:[#allocation30_spill] sm:$0xff] %v7333_v16  ;;  %v7336_v24 = vld [vmem:[#allocation5 + $0xe8] sm:$0xff]  ;;  %v7339_v32 = vld [vmem:[#allocation5 + $0xf8] sm:$0xff] }
 0x6fd   :  { %2761 = vmatprep.subr.mxu0 %v7324_v33  ;;  %2832 = vmatprep.subr.mxu1 %v7327_v14  ;;  %9349 = vst [vmem:[#allocation31_spill] sm:$0xff] %v7336_v24  ;;  %9350 = vst [vmem:[#allocation32_spill] sm:$0xff] %v7339_v32  ;;  %v7342_v33 = vld [vmem:[#allocation5 + $0xe0] sm:$0xff]  ;;  %v7345_v14 = vld [vmem:[#allocation5 + $0xf0] sm:$0xff] }
 0x6fe   :  { %2762 = vmatpush1.msra.mxu0 %v7330_v15  ;;  %2833 = vmatpush1.msra.mxu1 %v7333_v16  ;;  %9351 = vst [vmem:[#allocation33_spill] sm:$0xff] %v7342_v33  ;;  %9352 = vst [vmem:[#allocation34_spill] sm:$0xff] %v7345_v14  ;;  %v7348_v15 = vld [vmem:[#allocation5 + $0xc8] sm:$0xff]  ;;  %v7351_v16 = vld [vmem:[#allocation5 + $0xd8] sm:$0xff] }
 0x6ff   :  { %2763 = vmatprep.subr.mxu0 %v7336_v24  ;;  %2834 = vmatprep.subr.mxu1 %v7339_v32  ;;  %9353 = vst [vmem:[#allocation35_spill] sm:$0xff] %v7348_v15  ;;  %9354 = vst [vmem:[#allocation36_spill] sm:$0xff] %v7351_v16  ;;  %v7354_v24 = vld [vmem:[#allocation5 + $0xc0] sm:$0xff]  ;;  %v7357_v32 = vld [vmem:[#allocation5 + $0xd0] sm:$0xff] }
 0x700   :  { %2764 = vmatpush1.msra.mxu0 %v7342_v33  ;;  %2835 = vmatpush1.msra.mxu1 %v7345_v14  ;;  %9355 = vst [vmem:[#allocation37_spill] sm:$0xff] %v7354_v24  ;;  %9356 = vst [vmem:[#allocation38_spill] sm:$0xff] %v7357_v32  ;;  %v7360_v33 = vld [vmem:[#allocation5 + $0xa8] sm:$0xff]  ;;  %v7363_v14 = vld [vmem:[#allocation5 + $0xb8] sm:$0xff] }
 0x701   :  { %2765 = vmatprep.subr.mxu0 %v7348_v15  ;;  %2836 = vmatprep.subr.mxu1 %v7351_v16  ;;  %9357 = vst [vmem:[#allocation39_spill] sm:$0xff] %v7360_v33  ;;  %9358 = vst [vmem:[#allocation40_spill] sm:$0xff] %v7363_v14  ;;  %v7366_v15 = vld [vmem:[#allocation5 + $0xa0] sm:$0xff]  ;;  %v7369_v16 = vld [vmem:[#allocation5 + $0xb0] sm:$0xff] }
 0x702   :  { %2766 = vmatpush1.msra.mxu0 %v7354_v24  ;;  %2837 = vmatpush1.msra.mxu1 %v7357_v32  ;;  %9359 = vst [vmem:[#allocation41_spill] sm:$0xff] %v7366_v15  ;;  %9360 = vst [vmem:[#allocation42_spill] sm:$0xff] %v7369_v16  ;;  %v7372_v24 = vld [vmem:[#allocation5 + $0x88] sm:$0xff]  ;;  %v7375_v32 = vld [vmem:[#allocation5 + $0x98] sm:$0xff] }
 0x703   :  { %2767 = vmatprep.subr.mxu0 %v7360_v33  ;;  %2838 = vmatprep.subr.mxu1 %v7363_v14  ;;  %9361 = vst [vmem:[#allocation43_spill] sm:$0xff] %v7372_v24  ;;  %9362 = vst [vmem:[#allocation44_spill] sm:$0xff] %v7375_v32  ;;  %v7378_v33 = vld [vmem:[#allocation5 + $0x80] sm:$0xff]  ;;  %v7381_v14 = vld [vmem:[#allocation5 + $0x90] sm:$0xff] }
 0x704   :  { %2768 = vmatpush1.msra.mxu0 %v7366_v15  ;;  %2839 = vmatpush1.msra.mxu1 %v7369_v16  ;;  %9363 = vst [vmem:[#allocation45_spill] sm:$0xff] %v7378_v33  ;;  %9364 = vst [vmem:[#allocation46_spill] sm:$0xff] %v7381_v14  ;;  %v7384_v15 = vld [vmem:[#allocation5 + $0x68] sm:$0xff]  ;;  %v7387_v16 = vld [vmem:[#allocation5 + $0x78] sm:$0xff] }
 0x705   :  { %2769 = vmatprep.subr.mxu0 %v7372_v24  ;;  %2840 = vmatprep.subr.mxu1 %v7375_v32  ;;  %9365 = vst [vmem:[#allocation47_spill] sm:$0xff] %v7384_v15  ;;  %9366 = vst [vmem:[#allocation48_spill] sm:$0xff] %v7387_v16  ;;  %v7390_v24 = vld [vmem:[#allocation5 + $0x60] sm:$0xff]  ;;  %v7393_v32 = vld [vmem:[#allocation5 + $0x70] sm:$0xff] }
 0x706   :  { %2770 = vmatpush1.msra.mxu0 %v7378_v33  ;;  %2841 = vmatpush1.msra.mxu1 %v7381_v14  ;;  %9367 = vst [vmem:[#allocation49_spill] sm:$0xff] %v7390_v24  ;;  %9368 = vst [vmem:[#allocation50_spill] sm:$0xff] %v7393_v32  ;;  %v7396_v33 = vld [vmem:[#allocation5 + $0x48] sm:$0xff]  ;;  %v7399_v14 = vld [vmem:[#allocation5 + $0x58] sm:$0xff] }
 0x707   :  { %2771 = vmatprep.subr.mxu0 %v7384_v15  ;;  %2842 = vmatprep.subr.mxu1 %v7387_v16  ;;  %9369 = vst [vmem:[#allocation51_spill] sm:$0xff] %v7396_v33  ;;  %9370 = vst [vmem:[#allocation52_spill] sm:$0xff] %v7399_v14  ;;  %v7402_v15 = vld [vmem:[#allocation5 + $0x40] sm:$0xff]  ;;  %v7405_v16 = vld [vmem:[#allocation5 + $0x50] sm:$0xff] }
 0x708   :  { %2772 = vmatpush1.msra.mxu0 %v7390_v24  ;;  %2843 = vmatpush1.msra.mxu1 %v7393_v32  ;;  %9371 = vst [vmem:[#allocation53_spill] sm:$0xff] %v7402_v15  ;;  %9372 = vst [vmem:[#allocation54_spill] sm:$0xff] %v7405_v16  ;;  %v7408_v24 = vld [vmem:[#allocation5 + $0x28] sm:$0xff]  ;;  %v7411_v32 = vld [vmem:[#allocation5 + $0x38] sm:$0xff] }
 0x709   :  { %2773 = vmatprep.subr.mxu0 %v7396_v33  ;;  %2844 = vmatprep.subr.mxu1 %v7399_v14  ;;  %9373 = vst [vmem:[#allocation55_spill] sm:$0xff] %v7408_v24  ;;  %9374 = vst [vmem:[#allocation56_spill] sm:$0xff] %v7411_v32  ;;  %v7414_v33 = vld [vmem:[#allocation5 + $0x20] sm:$0xff]  ;;  %v7417_v14 = vld [vmem:[#allocation5 + $0x30] sm:$0xff] }
 0x70a   :  { %2774 = vmatpush1.msra.mxu0 %v7402_v15  ;;  %2845 = vmatpush1.msra.mxu1 %v7405_v16  ;;  %9375 = vst [vmem:[#allocation57_spill] sm:$0xff] %v7414_v33  ;;  %9376 = vst [vmem:[#allocation58_spill] sm:$0xff] %v7417_v14  ;;  %v7420_v15 = vld [vmem:[#allocation5 + $0x8] sm:$0xff]  ;;  %v7423_v16 = vld [vmem:[#allocation5 + $0x18] sm:$0xff] }
 0x70b   :  { %2775 = vmatprep.subr.mxu0 %v7408_v24  ;;  %2846 = vmatprep.subr.mxu1 %v7411_v32  ;;  %9377 = vst [vmem:[#allocation59_spill] sm:$0xff] %v7420_v15  ;;  %9378 = vst [vmem:[#allocation60_spill] sm:$0xff] %v7423_v16  ;;  %v7426_v24 = vld [vmem:[#allocation5] sm:$0xff]  ;;  %v7429_v32 = vld [vmem:[#allocation5 + $0x10] sm:$0xff] }
 0x70c   :  { %2776 = vmatpush1.msra.mxu0 %v7414_v33  ;;  %2847 = vmatpush1.msra.mxu1 %v7417_v14  ;;  %9379 = vst [vmem:[#allocation61_spill] sm:$0xff] %v7426_v24  ;;  %9380 = vst [vmem:[#allocation62_spill] sm:$0xff] %v7429_v32  ;;  %v7432_v33 = vld [vmem:[#allocation5 + $0x3e8] sm:$0xff]  ;;  %v7435_v14 = vld [vmem:[#allocation5 + $0x3f8] sm:$0xff] }
 0x70d   :  { %2777 = vmatprep.subr.mxu0 %v7420_v15  ;;  %2848 = vmatprep.subr.mxu1 %v7423_v16  ;;  %9381 = vst [vmem:[#allocation63_spill] sm:$0xff] %v7432_v33  ;;  %9382 = vst [vmem:[#allocation64_spill] sm:$0xff] %v7435_v14  ;;  %v7438_v15 = vld [vmem:[#allocation5 + $0x3e0] sm:$0xff]  ;;  %v7441_v16 = vld [vmem:[#allocation5 + $0x3f0] sm:$0xff] }
 0x70e   :  { %2778 = vmatpush1.msra.mxu0 %v7426_v24  ;;  %2849 = vmatpush1.msra.mxu1 %v7429_v32  ;;  %9383 = vst [vmem:[#allocation65_spill] sm:$0xff] %v7438_v15  ;;  %9384 = vst [vmem:[#allocation66_spill] sm:$0xff] %v7441_v16  ;;  %v7444_v24 = vld [vmem:[#allocation5 + $0x3c8] sm:$0xff]  ;;  %v7447_v32 = vld [vmem:[#allocation5 + $0x3d8] sm:$0xff] }
 0x70f   :  { %2779 = vmatprep.subr.mxu0 %v7432_v33  ;;  %2850 = vmatprep.subr.mxu1 %v7435_v14  ;;  %9385 = vst [vmem:[#allocation67_spill] sm:$0xff] %v7444_v24  ;;  %9386 = vst [vmem:[#allocation68_spill] sm:$0xff] %v7447_v32  ;;  %v7450_v33 = vld [vmem:[#allocation5 + $0x3c0] sm:$0xff]  ;;  %v7453_v14 = vld [vmem:[#allocation5 + $0x3d0] sm:$0xff] }
 0x710   :  { %2780 = vmatpush2.msra.mxu0 %v7438_v15  ;;  %2851 = vmatpush2.msra.mxu1 %v7441_v16  ;;  %9387 = vst [vmem:[#allocation69_spill] sm:$0xff] %v7450_v33  ;;  %9388 = vst [vmem:[#allocation70_spill] sm:$0xff] %v7453_v14  ;;  %v7456_v15 = vld [vmem:[#allocation5 + $0x3a8] sm:$0xff]  ;;  %v7459_v16 = vld [vmem:[#allocation5 + $0x3b8] sm:$0xff] }
 0x711   :  { %2781 = vmatprep.subr.mxu0 %v7444_v24  ;;  %2852 = vmatprep.subr.mxu1 %v7447_v32  ;;  %9389 = vst [vmem:[#allocation71_spill] sm:$0xff] %v7456_v15  ;;  %9390 = vst [vmem:[#allocation72_spill] sm:$0xff] %v7459_v16  ;;  %v7462_v24 = vld [vmem:[#allocation5 + $0x3a0] sm:$0xff]  ;;  %v7465_v32 = vld [vmem:[#allocation5 + $0x3b0] sm:$0xff] }
 0x712   :  { %2782 = vmatpush2.msra.mxu0 %v7450_v33  ;;  %2853 = vmatpush2.msra.mxu1 %v7453_v14  ;;  %9391 = vst [vmem:[#allocation73_spill] sm:$0xff] %v7462_v24  ;;  %9392 = vst [vmem:[#allocation74_spill] sm:$0xff] %v7465_v32  ;;  %v7468_v33 = vld [vmem:[#allocation5 + $0x388] sm:$0xff]  ;;  %v7471_v14 = vld [vmem:[#allocation5 + $0x398] sm:$0xff] }
 0x713   :  { %2783 = vmatprep.subr.mxu0 %v7456_v15  ;;  %2854 = vmatprep.subr.mxu1 %v7459_v16  ;;  %9393 = vst [vmem:[#allocation75_spill] sm:$0xff] %v7468_v33  ;;  %9394 = vst [vmem:[#allocation76_spill] sm:$0xff] %v7471_v14  ;;  %v7474_v15 = vld [vmem:[#allocation5 + $0x380] sm:$0xff]  ;;  %v7477_v16 = vld [vmem:[#allocation5 + $0x390] sm:$0xff] }
 0x714   :  { %2784 = vmatpush2.msra.mxu0 %v7462_v24  ;;  %2855 = vmatpush2.msra.mxu1 %v7465_v32  ;;  %9395 = vst [vmem:[#allocation77_spill] sm:$0xff] %v7474_v15  ;;  %9396 = vst [vmem:[#allocation78_spill] sm:$0xff] %v7477_v16  ;;  %v7480_v24 = vld [vmem:[#allocation5 + $0x368] sm:$0xff]  ;;  %v7483_v32 = vld [vmem:[#allocation5 + $0x378] sm:$0xff] }
 0x715   :  { %2785 = vmatprep.subr.mxu0 %v7468_v33  ;;  %2856 = vmatprep.subr.mxu1 %v7471_v14  ;;  %9397 = vst [vmem:[#allocation79_spill] sm:$0xff] %v7480_v24  ;;  %9398 = vst [vmem:[#allocation80_spill] sm:$0xff] %v7483_v32  ;;  %v7486_v33 = vld [vmem:[#allocation5 + $0x360] sm:$0xff]  ;;  %v7489_v14 = vld [vmem:[#allocation5 + $0x370] sm:$0xff] }
 0x716   :  { %2786 = vmatpush2.msra.mxu0 %v7474_v15  ;;  %2857 = vmatpush2.msra.mxu1 %v7477_v16  ;;  %9399 = vst [vmem:[#allocation81_spill] sm:$0xff] %v7486_v33  ;;  %9400 = vst [vmem:[#allocation82_spill] sm:$0xff] %v7489_v14  ;;  %v7492_v15 = vld [vmem:[#allocation5 + $0x348] sm:$0xff]  ;;  %v7495_v16 = vld [vmem:[#allocation5 + $0x358] sm:$0xff] }
 0x717   :  { %2787 = vmatprep.subr.mxu0 %v7480_v24  ;;  %2858 = vmatprep.subr.mxu1 %v7483_v32  ;;  %9401 = vst [vmem:[#allocation83_spill] sm:$0xff] %v7492_v15  ;;  %9402 = vst [vmem:[#allocation84_spill] sm:$0xff] %v7495_v16  ;;  %v7498_v24 = vld [vmem:[#allocation5 + $0x340] sm:$0xff]  ;;  %v7501_v32 = vld [vmem:[#allocation5 + $0x350] sm:$0xff] }
 0x718   :  { %2788 = vmatpush2.msra.mxu0 %v7486_v33  ;;  %2859 = vmatpush2.msra.mxu1 %v7489_v14  ;;  %9403 = vst [vmem:[#allocation85_spill] sm:$0xff] %v7498_v24  ;;  %9404 = vst [vmem:[#allocation86_spill] sm:$0xff] %v7501_v32  ;;  %v7504_v33 = vld [vmem:[#allocation5 + $0x328] sm:$0xff]  ;;  %v7507_v14 = vld [vmem:[#allocation5 + $0x338] sm:$0xff] }
 0x719   :  { %2789 = vmatprep.subr.mxu0 %v7492_v15  ;;  %2860 = vmatprep.subr.mxu1 %v7495_v16  ;;  %9405 = vst [vmem:[#allocation87_spill] sm:$0xff] %v7504_v33  ;;  %9406 = vst [vmem:[#allocation88_spill] sm:$0xff] %v7507_v14  ;;  %v7510_v15 = vld [vmem:[#allocation5 + $0x320] sm:$0xff]  ;;  %v7513_v16 = vld [vmem:[#allocation5 + $0x330] sm:$0xff] }
 0x71a   :  { %2790 = vmatpush2.msra.mxu0 %v7498_v24  ;;  %2861 = vmatpush2.msra.mxu1 %v7501_v32  ;;  %9407 = vst [vmem:[#allocation89_spill] sm:$0xff] %v7510_v15  ;;  %9408 = vst [vmem:[#allocation90_spill] sm:$0xff] %v7513_v16  ;;  %v7516_v24 = vld [vmem:[#allocation5 + $0x308] sm:$0xff]  ;;  %v7519_v32 = vld [vmem:[#allocation5 + $0x318] sm:$0xff] }
 0x71b   :  { %2791 = vmatprep.subr.mxu0 %v7504_v33  ;;  %2862 = vmatprep.subr.mxu1 %v7507_v14  ;;  %9409 = vst [vmem:[#allocation91_spill] sm:$0xff] %v7516_v24  ;;  %9410 = vst [vmem:[#allocation92_spill] sm:$0xff] %v7519_v32  ;;  %v7522_v33 = vld [vmem:[#allocation5 + $0x300] sm:$0xff]  ;;  %v7525_v14 = vld [vmem:[#allocation5 + $0x310] sm:$0xff] }
 0x71c   :  { %2792 = vmatpush2.msra.mxu0 %v7510_v15  ;;  %2863 = vmatpush2.msra.mxu1 %v7513_v16  ;;  %9411 = vst [vmem:[#allocation93_spill] sm:$0xff] %v7522_v33  ;;  %9412 = vst [vmem:[#allocation94_spill] sm:$0xff] %v7525_v14  ;;  %v7528_v15 = vld [vmem:[#allocation5 + $0x2e8] sm:$0xff]  ;;  %v7531_v16 = vld [vmem:[#allocation5 + $0x2f8] sm:$0xff] }
 0x71d   :  { %2793 = vmatprep.subr.mxu0 %v7516_v24  ;;  %2864 = vmatprep.subr.mxu1 %v7519_v32  ;;  %9413 = vst [vmem:[#allocation95_spill] sm:$0xff] %v7528_v15  ;;  %9414 = vst [vmem:[#allocation96_spill] sm:$0xff] %v7531_v16  ;;  %v7534_v24 = vld [vmem:[#allocation5 + $0x2e0] sm:$0xff]  ;;  %v7537_v32 = vld [vmem:[#allocation5 + $0x2f0] sm:$0xff] }
 0x71e   :  { %2794 = vmatpush2.msra.mxu0 %v7522_v33  ;;  %2865 = vmatpush2.msra.mxu1 %v7525_v14  ;;  %9415 = vst [vmem:[#allocation97_spill] sm:$0xff] %v7534_v24  ;;  %9416 = vst [vmem:[#allocation98_spill] sm:$0xff] %v7537_v32  ;;  %v7540_v33 = vld [vmem:[#allocation5 + $0x2c8] sm:$0xff]  ;;  %v7543_v14 = vld [vmem:[#allocation5 + $0x2d8] sm:$0xff] }
 0x71f   :  { %2795 = vmatprep.subr.mxu0 %v7528_v15  ;;  %2866 = vmatprep.subr.mxu1 %v7531_v16  ;;  %9417 = vst [vmem:[#allocation99_spill] sm:$0xff] %v7540_v33  ;;  %9418 = vst [vmem:[#allocation100_spill] sm:$0xff] %v7543_v14  ;;  %v7546_v15 = vld [vmem:[#allocation5 + $0x2c0] sm:$0xff]  ;;  %v7549_v16 = vld [vmem:[#allocation5 + $0x2d0] sm:$0xff] }
 0x720   :  { %2796 = vmatpush2.msra.mxu0 %v7534_v24  ;;  %2867 = vmatpush2.msra.mxu1 %v7537_v32  ;;  %9419 = vst [vmem:[#allocation101_spill] sm:$0xff] %v7546_v15  ;;  %9420 = vst [vmem:[#allocation102_spill] sm:$0xff] %v7549_v16  ;;  %v7552_v24 = vld [vmem:[#allocation5 + $0x2a8] sm:$0xff]  ;;  %v7555_v32 = vld [vmem:[#allocation5 + $0x2b8] sm:$0xff] }
 0x721   :  { %2797 = vmatprep.subr.mxu0 %v7540_v33  ;;  %2868 = vmatprep.subr.mxu1 %v7543_v14  ;;  %9421 = vst [vmem:[#allocation103_spill] sm:$0xff] %v7552_v24  ;;  %9422 = vst [vmem:[#allocation104_spill] sm:$0xff] %v7555_v32  ;;  %v7558_v33 = vld [vmem:[#allocation5 + $0x2a0] sm:$0xff]  ;;  %v7561_v14 = vld [vmem:[#allocation5 + $0x2b0] sm:$0xff] }
 0x722   :  { %2798 = vmatpush2.msra.mxu0 %v7546_v15  ;;  %2869 = vmatpush2.msra.mxu1 %v7549_v16  ;;  %9423 = vst [vmem:[#allocation105_spill] sm:$0xff] %v7558_v33  ;;  %9424 = vst [vmem:[#allocation106_spill] sm:$0xff] %v7561_v14  ;;  %v7564_v15 = vld [vmem:[#allocation5 + $0x288] sm:$0xff]  ;;  %v7567_v16 = vld [vmem:[#allocation5 + $0x298] sm:$0xff] }
 0x723   :  { %2799 = vmatprep.subr.mxu0 %v7552_v24  ;;  %2870 = vmatprep.subr.mxu1 %v7555_v32  ;;  %9425 = vst [vmem:[#allocation107_spill] sm:$0xff] %v7564_v15  ;;  %9426 = vst [vmem:[#allocation108_spill] sm:$0xff] %v7567_v16  ;;  %v7570_v24 = vld [vmem:[#allocation5 + $0x280] sm:$0xff]  ;;  %v7573_v32 = vld [vmem:[#allocation5 + $0x290] sm:$0xff] }
 0x724   :  { %2800 = vmatpush2.msra.mxu0 %v7558_v33  ;;  %2871 = vmatpush2.msra.mxu1 %v7561_v14  ;;  %9427 = vst [vmem:[#allocation109_spill] sm:$0xff] %v7570_v24  ;;  %9428 = vst [vmem:[#allocation110_spill] sm:$0xff] %v7573_v32  ;;  %v7576_v33 = vld [vmem:[#allocation5 + $0x268] sm:$0xff]  ;;  %v7579_v14 = vld [vmem:[#allocation5 + $0x278] sm:$0xff] }
 0x725   :  { %2801 = vmatprep.subr.mxu0 %v7564_v15  ;;  %2872 = vmatprep.subr.mxu1 %v7567_v16  ;;  %9429 = vst [vmem:[#allocation111_spill] sm:$0xff] %v7576_v33  ;;  %9430 = vst [vmem:[#allocation112_spill] sm:$0xff] %v7579_v14  ;;  %v7582_v15 = vld [vmem:[#allocation5 + $0x260] sm:$0xff]  ;;  %v7585_v16 = vld [vmem:[#allocation5 + $0x270] sm:$0xff] }
 0x726   :  { %2802 = vmatpush2.msra.mxu0 %v7570_v24  ;;  %2873 = vmatpush2.msra.mxu1 %v7573_v32  ;;  %9431 = vst [vmem:[#allocation113_spill] sm:$0xff] %v7582_v15  ;;  %9432 = vst [vmem:[#allocation114_spill] sm:$0xff] %v7585_v16  ;;  %v7588_v24 = vld [vmem:[#allocation5 + $0x248] sm:$0xff]  ;;  %v7591_v32 = vld [vmem:[#allocation5 + $0x258] sm:$0xff] }
 0x727   :  { %2803 = vmatprep.subr.mxu0 %v7576_v33  ;;  %2874 = vmatprep.subr.mxu1 %v7579_v14  ;;  %9433 = vst [vmem:[#allocation115_spill] sm:$0xff] %v7588_v24  ;;  %9434 = vst [vmem:[#allocation116_spill] sm:$0xff] %v7591_v32  ;;  %v7594_v33 = vld [vmem:[#allocation5 + $0x240] sm:$0xff]  ;;  %v7597_v14 = vld [vmem:[#allocation5 + $0x250] sm:$0xff] }
 0x728   :  { %2804 = vmatpush2.msra.mxu0 %v7582_v15  ;;  %2875 = vmatpush2.msra.mxu1 %v7585_v16  ;;  %9435 = vst [vmem:[#allocation117_spill] sm:$0xff] %v7594_v33  ;;  %9436 = vst [vmem:[#allocation118_spill] sm:$0xff] %v7597_v14  ;;  %v7600_v15 = vld [vmem:[#allocation5 + $0x228] sm:$0xff]  ;;  %v7603_v16 = vld [vmem:[#allocation5 + $0x238] sm:$0xff] }
 0x729   :  { %2805 = vmatprep.subr.mxu0 %v7588_v24  ;;  %2876 = vmatprep.subr.mxu1 %v7591_v32  ;;  %9437 = vst [vmem:[#allocation119_spill] sm:$0xff] %v7600_v15  ;;  %9438 = vst [vmem:[#allocation120_spill] sm:$0xff] %v7603_v16  ;;  %v7606_v24 = vld [vmem:[#allocation5 + $0x220] sm:$0xff]  ;;  %v7609_v32 = vld [vmem:[#allocation5 + $0x230] sm:$0xff] }
 0x72a   :  { %2806 = vmatpush2.msra.mxu0 %v7594_v33  ;;  %2877 = vmatpush2.msra.mxu1 %v7597_v14  ;;  %9439 = vst [vmem:[#allocation121_spill] sm:$0xff] %v7606_v24  ;;  %9440 = vst [vmem:[#allocation122_spill] sm:$0xff] %v7609_v32  ;;  %v7612_v33 = vld [vmem:[#allocation5 + $0x208] sm:$0xff]  ;;  %v7615_v14 = vld [vmem:[#allocation5 + $0x218] sm:$0xff] }
 0x72b   :  { %2807 = vmatprep.subr.mxu0 %v7600_v15  ;;  %2878 = vmatprep.subr.mxu1 %v7603_v16  ;;  %9441 = vst [vmem:[#allocation123_spill] sm:$0xff] %v7612_v33  ;;  %9442 = vst [vmem:[#allocation124_spill] sm:$0xff] %v7615_v14  ;;  %v7618_v15 = vld [vmem:[#allocation5 + $0x200] sm:$0xff]  ;;  %v7621_v16 = vld [vmem:[#allocation5 + $0x210] sm:$0xff] }
 0x72c   :  { %2808 = vmatpush2.msra.mxu0 %v7606_v24  ;;  %2879 = vmatpush2.msra.mxu1 %v7609_v32  ;;  %9443 = vst [vmem:[#allocation125_spill] sm:$0xff] %v7618_v15  ;;  %9444 = vst [vmem:[#allocation126_spill] sm:$0xff] %v7621_v16 }
 0x72d   :  { %2809 = vmatprep.subr.mxu0 %v7612_v33  ;;  %2880 = vmatprep.subr.mxu1 %v7615_v14 }
 0x72e   :  { %2810 = vmatpush2.msra.mxu0 %v7618_v15  ;;  %2881 = vmatpush2.msra.mxu1 %v7621_v16 }
 0x72f   :  { %2913 = vmatprep.subr.mxu0 %v7060_v60  ;;  %2984 = vmatprep.subr.mxu1 %v7063_v1 }
 0x78d   :  { %v2477_v32 = vpop.f32.mrf.mxu0  ;;  %v2548_v62 = vpop.f32.mrf.mxu1 }
 0x78e   :  { %v2478_v24 = vadd.f32 %v2477_v32, %v9307_v2  ;;  %v2549_v15 = vadd.f32 %v2548_v62, %v9309_v61 }
 0x78f   :  { %v2479_v33 = vpop.f32.mrf.mxu0  ;;  %v2550_v55 = vpop.f32.mrf.mxu1 }
 0x790   :  { %v3409_v35 = vmul.f32 -1.442695, %v2478_v24  ;;  %v2480_v52 = vadd.f32 %v2479_v33, %v9308_v51  ;;  %v3411_v57 = vmul.f32 -1.442695, %v2549_v15  ;;  %v2551_v60 = vadd.f32 %v2550_v55, %v9310_v56  ;;  %v9446_v15 = vld [vmem:[#allocation164_spill] sm:$0xff] }
 0x792   :  { %3660 = vpow2.f32 %v3409_v35  ;;  %v3410_v14 = vmul.f32 -1.442695, %v2480_v52  ;;  %v9445_v52 = vld [vmem:[#allocation162_spill] sm:$0xff] }
 0x794   :  { %3662 = vpow2.f32 %v3410_v14 }
 0x795   :  { %3664 = vpow2.f32 %v3411_v57 }
 0x79f   :  { %v3661_v16 = vpop.eup %3660 }
 0x7a0   :  { %v2562_v59 = vadd.f32 1.0, %v3661_v16 }
 0x7a1   :  { %v3663_v1 = vpop.eup %3662 }
 0x7a2   :  { %3666 = vrcp.f32 %v2562_v59  ;;  %v2563_v32 = vadd.f32 1.0, %v3663_v1  ;;  %v3665_v24 = vpop.eup %3664  ;;  %v9447_v1 = vld [vmem:[#allocation163_spill] sm:$0xff] }
 0x7a3   :  { %3668 = vtanh.f32 %v2551_v60  ;;  %v2564_v50 = vadd.f32 1.0, %v3665_v24 }
 0x7a4   :  { %3670 = vrcp.f32 %v2563_v32 }
 0x7ae   :  { %v2643_v33 = vpop.f32.mrf.mxu0  ;;  %v2714_v60 = vpop.f32.mrf.mxu1 }
 0x7af   :  { %v3667_v35 = vpop.eup %3666  ;;  %v2719_v14 = vadd.f32 %v2643_v33, %v9445_v52  ;;  %v2721_v32 = vadd.f32 %v2714_v60, %v9447_v1 }
 0x7b0   :  { %v3669_v51 = vpop.eup %3668  ;;  %v2645_v2 = vpop.f32.mrf.mxu0 }
 0x7b1   :  { %v3671_v62 = vpop.eup %3670  ;;  %v3412_v61 = vmul.f32 -1.442695, %v2719_v14  ;;  %v2720_v58 = vadd.f32 %v2645_v2, %v9446_v15  ;;  %v2573_v16 = vmul.f32 %v3669_v51, %v3667_v35  ;;  %v2716_v33 = vpop.f32.mrf.mxu1  ;;  %v3414_v52 = vmul.f32 -1.442695, %v2721_v32  ;;  %v9448_v14 = vld [vmem:[#allocation165_spill] sm:$0xff] }
 0x7b2   :  { %v2572_v55 = vmul.f32 %v3671_v62, %v7073_v45  ;;  %v2722_v56 = vadd.f32 %v2716_v33, %v9448_v14  ;;  %v4317_v14 = vld [vmem:[#allocation2 + $0x1f0] sm:$0xff] }
 0x7b3   :  { %3672 = vpow2.f32 %v3412_v61  ;;  %v3413_v59 = vmul.f32 -1.442695, %v2720_v58 }
 0x7b4   :  { %v7633_v57 = vadd.f32 %v2573_v16, %v2572_v55 }
 0x7b5   :  { %3674 = vpow2.f32 %v3413_v59 }
 0x7b6   :  { %3676 = vrcp.f32 %v2564_v50 }
 0x7b7   :  { %3678 = vtanh.f32 %v7633_v57 }
 0x7b8   :  { %3680 = vpow2.f32 %v3414_v52  ;;  %v4316_v52 = vld [vmem:[#allocation2 + $0x1e0] sm:$0xff] }
 0x7b9   :  { %3682 = vtanh.f32 %v2722_v56 }
 0x7c0   :  { %v3673_v2 = vpop.eup %3672 }
 0x7c1   :  { %v2732_v24 = vadd.f32 1.0, %v3673_v2  ;;  %v4318_v2 = vld [vmem:[#allocation2 + $0x1c8] sm:$0xff] }
 0x7c2   :  { %v3675_v45 = vpop.eup %3674 }
 0x7c3   :  { %v3677_v51 = vpop.eup %3676  ;;  %3684 = vrcp.f32 %v2732_v24  ;;  %v2733_v58 = vadd.f32 1.0, %v3675_v45  ;;  %v4320_v24 = vld [vmem:[#allocation2 + $0x1c0] sm:$0xff]  ;;  %v4321_v45 = vld [vmem:[#allocation2 + $0x1d0] sm:$0xff] }
 0x7c4   :  { %v3679_v61 = vpop.eup %3678 }
 0x7c5   :  { %3686 = vrcp.f32 %v2733_v58  ;;  %v2576_v50 = vmul.f32 %v3679_v61, %v3677_v51  ;;  %v3681_v35 = vpop.eup %3680  ;;  %v4322_v51 = vld [vmem:[#allocation2 + $0x1a8] sm:$0xff]  ;;  %v4323_v58 = vld [vmem:[#allocation2 + $0x1b8] sm:$0xff]  ;;  %v4324_v61 = vld [vmem:[#allocation2 + $0x1a0] sm:$0xff] }
 0x7c6   :  { %v3683_v62 = vpop.eup %3682  ;;  %v2734_v59 = vadd.f32 1.0, %v3681_v35  ;;  %v4326_v35 = vld [vmem:[#allocation2 + $0x188] sm:$0xff] }
 0x7c7   :  { %2811 = vmatprep.mubr.f32.mxu0 %v2576_v50  ;;  %2882 = vmatprep.mubr.f32.mxu1 %v2576_v50  ;;  %v4325_v50 = vld [vmem:[#allocation2 + $0x1b0] sm:$0xff] }
 0x7c8   :  { %3688 = vrcp.f32 %v2734_v59  ;;  %v4331_v59 = vld [vmem:[#allocation2 + $0x178] sm:$0xff] }
 0x7d0   :  { %v3685_v15 = vpop.eup %3684 }
 0x7d1   :  { %v2743_v55 = vmul.f32 %v3685_v15, %v3683_v62  ;;  %v4327_v62 = vld [vmem:[#allocation2 + $0x198] sm:$0xff]  ;;  %v4328_v15 = vld [vmem:[#allocation2 + $0x180] sm:$0xff] }
 0x7d2   :  { %v3687_v16 = vpop.eup %3686 }
 0x7d3   :  { %v2742_v60 = vmul.f32 %v3687_v16, %v7079_v20  ;;  %v4319_v20 = vld [vmem:[#allocation2 + $0x1d8] sm:$0xff]  ;;  %v4330_v16 = vld [vmem:[#allocation2 + $0x168] sm:$0xff] }
 0x7d5   :  { %v7639_v1 = vadd.f32 %v2743_v55, %v2742_v60  ;;  %v3689_v56 = vpop.eup %3688  ;;  %v4329_v55 = vld [vmem:[#allocation2 + $0x190] sm:$0xff]  ;;  %v4332_v60 = vld [vmem:[#allocation2 + $0x160] sm:$0xff] }
 0x7d7   :  { %3690 = vtanh.f32 %v7639_v1 }
 0x7e4   :  { %v3691_v32 = vpop.eup %3690 }
 0x7e5   :  { %v7642_v33 = vmul.f32 %v3691_v32, %v3689_v56  ;;  %v4333_v56 = vld [vmem:[#allocation2 + $0x170] sm:$0xff]  ;;  %v9491_v32 = vld [vmem:[#allocation38_spill] sm:$0xff] }
 0x7e7   :  { %2812 = vmatmul.mubr.f32.vlgmr.msra.gmra.mxu0 %v7642_v33  ;;  %2883 = vmatmul.mubr.f32.vlgmr.msra.gmra.mxu1 %v7642_v33 }
 0x7e8   :  { %2914 = vmatpush1.msra.mxu0 %v4316_v52  ;;  %2985 = vmatpush1.msra.mxu1 %v4317_v14  ;;  %v9493_v52 = vld [vmem:[#allocation40_spill] sm:$0xff]  ;;  %v9494_v14 = vld [vmem:[#allocation41_spill] sm:$0xff] }
 0x7e9   :  { %2915 = vmatprep.subr.mxu0 %v4318_v2  ;;  %2986 = vmatprep.subr.mxu1 %v4319_v20  ;;  %v9495_v2 = vld [vmem:[#allocation42_spill] sm:$0xff]  ;;  %v9496_v20 = vld [vmem:[#allocation43_spill] sm:$0xff] }
 0x7ea   :  { %2916 = vmatpush1.msra.mxu0 %v4320_v24  ;;  %2987 = vmatpush1.msra.mxu1 %v4321_v45  ;;  %v9497_v24 = vld [vmem:[#allocation44_spill] sm:$0xff]  ;;  %v9498_v45 = vld [vmem:[#allocation45_spill] sm:$0xff] }
 0x7eb   :  { %2917 = vmatprep.subr.mxu0 %v4322_v51  ;;  %2988 = vmatprep.subr.mxu1 %v4323_v58  ;;  %v9499_v51 = vld [vmem:[#allocation46_spill] sm:$0xff]  ;;  %v9500_v58 = vld [vmem:[#allocation47_spill] sm:$0xff] }
 0x7ec   :  { %2918 = vmatpush1.msra.mxu0 %v4324_v61  ;;  %2989 = vmatpush1.msra.mxu1 %v4325_v50  ;;  %v9501_v61 = vld [vmem:[#allocation48_spill] sm:$0xff]  ;;  %v9502_v50 = vld [vmem:[#allocation49_spill] sm:$0xff] }
 0x7ed   :  { %2919 = vmatprep.subr.mxu0 %v4326_v35  ;;  %2990 = vmatprep.subr.mxu1 %v4327_v62  ;;  %v9503_v35 = vld [vmem:[#allocation50_spill] sm:$0xff]  ;;  %v9504_v62 = vld [vmem:[#allocation51_spill] sm:$0xff] }
 0x7ee   :  { %2920 = vmatpush1.msra.mxu0 %v4328_v15  ;;  %2991 = vmatpush1.msra.mxu1 %v4329_v55  ;;  %v9505_v15 = vld [vmem:[#allocation52_spill] sm:$0xff]  ;;  %v9506_v55 = vld [vmem:[#allocation53_spill] sm:$0xff] }
 0x7ef   :  { %2921 = vmatprep.subr.mxu0 %v4330_v16  ;;  %2992 = vmatprep.subr.mxu1 %v4331_v59  ;;  %v9507_v16 = vld [vmem:[#allocation54_spill] sm:$0xff]  ;;  %v9508_v59 = vld [vmem:[#allocation55_spill] sm:$0xff] }
 0x7f0   :  { %2922 = vmatpush1.msra.mxu0 %v4332_v60  ;;  %2993 = vmatpush1.msra.mxu1 %v4333_v56  ;;  %v9509_v60 = vld [vmem:[#allocation56_spill] sm:$0xff]  ;;  %v9510_v56 = vld [vmem:[#allocation57_spill] sm:$0xff] }
 0x7f1   :  { %2923 = vmatprep.subr.mxu0 %v7104_v19  ;;  %2994 = vmatprep.subr.mxu1 %v7107_v30  ;;  %v9449_v19 = vld [vmem:[#allocation140_spill] sm:$0xff]  ;;  %v9450_v30 = vmov 0.0  }
 0x7f2   :  { %2924 = vmatpush1.msra.mxu0 %v7110_v5  ;;  %2995 = vmatpush1.msra.mxu1 %v7113_v7  ;;  %v9451_v5 = vld [vmem:[#allocation141_spill] sm:$0xff]  ;;  %v9452_v7 = vld [vmem:[#allocation142_spill] sm:$0xff] }
 0x7f3   :  { %2925 = vmatprep.subr.mxu0 %v7116_v0  ;;  %2996 = vmatprep.subr.mxu1 %v7119_v8  ;;  %v9453_v0 = vld [vmem:[#allocation144_spill] sm:$0xff]  ;;  %v9454_v8 = vld [vmem:[#allocation143_spill] sm:$0xff] }
 0x7f4   :  { %2926 = vmatpush1.msra.mxu0 %v7122_v46  ;;  %2997 = vmatpush1.msra.mxu1 %v7125_v25  ;;  %v9455_v46 = vld [vmem:[#allocation150_spill] sm:$0xff]  ;;  %v9456_v25 = vld [vmem:[#allocation152_spill] sm:$0xff] }
 0x7f5   :  { %2927 = vmatprep.subr.mxu0 %v7128_v11  ;;  %2998 = vmatprep.subr.mxu1 %v7131_v27  ;;  %v9457_v11 = vld [vmem:[#allocation151_spill] sm:$0xff]  ;;  %v9458_v27 = vld [vmem:[#allocation153_spill] sm:$0xff] }
 0x7f6   :  { %2928 = vmatpush1.msra.mxu0 %v7134_v28  ;;  %2999 = vmatpush1.msra.mxu1 %v7137_v9  ;;  %v9459_v28 = vld [vmem:[#allocation154_spill] sm:$0xff]  ;;  %v9460_v9 = vld [vmem:[#allocation156_spill] sm:$0xff] }
 0x7f7   :  { %2929 = vmatprep.subr.mxu0 %v7140_v29  ;;  %3000 = vmatprep.subr.mxu1 %v7143_v6  ;;  %v9461_v29 = vld [vmem:[#allocation155_spill] sm:$0xff]  ;;  %v9462_v6 = vld [vmem:[#allocation157_spill] sm:$0xff] }
 0x7f8   :  { %2930 = vmatpush1.msra.mxu0 %v7146_v22  ;;  %3001 = vmatpush1.msra.mxu1 %v7149_v36  ;;  %v9463_v22 = vld [vmem:[#allocation145_spill] sm:$0xff]  ;;  %v9464_v36 = vld [vmem:[#allocation146_spill] sm:$0xff] }
 0x7f9   :  { %2931 = vmatprep.subr.mxu0 %v7152_v17  ;;  %3002 = vmatprep.subr.mxu1 %v7155_v26  ;;  %v9465_v17 = vld [vmem:[#allocation148_spill] sm:$0xff]  ;;  %v9466_v26 = vld [vmem:[#allocation147_spill] sm:$0xff] }
 0x7fa   :  { %2932 = vmatpush1.msra.mxu0 %v7158_v21  ;;  %3003 = vmatpush1.msra.mxu1 %v7161_v38  ;;  %v9467_v21 = vld [vmem:[#allocation149_spill] sm:$0xff]  ;;  %v9468_v38 = vld [vmem:[#allocation15_spill] sm:$0xff] }
 0x7fb   :  { %2933 = vmatprep.subr.mxu0 %v7164_v39  ;;  %3004 = vmatprep.subr.mxu1 %v7167_v41  ;;  %v9469_v39 = vld [vmem:[#allocation16_spill] sm:$0xff]  ;;  %v9470_v41 = vld [vmem:[#allocation17_spill] sm:$0xff] }
 0x7fc   :  { %2934 = vmatpush1.msra.mxu0 %v7170_v43  ;;  %3005 = vmatpush1.msra.mxu1 %v7173_v44  ;;  %v9471_v43 = vld [vmem:[#allocation18_spill] sm:$0xff]  ;;  %v9472_v44 = vld [vmem:[#allocation19_spill] sm:$0xff] }
 0x7fd   :  { %2935 = vmatprep.subr.mxu0 %v7176_v47  ;;  %3006 = vmatprep.subr.mxu1 %v7179_v48  ;;  %v9473_v47 = vld [vmem:[#allocation20_spill] sm:$0xff]  ;;  %v9474_v48 = vld [vmem:[#allocation21_spill] sm:$0xff] }
 0x7fe   :  { %2936 = vmatpush1.msra.mxu0 %v7182_v49  ;;  %3007 = vmatpush1.msra.mxu1 %v7185_v3  ;;  %v9475_v49 = vld [vmem:[#allocation22_spill] sm:$0xff]  ;;  %v9476_v3 = vld [vmem:[#allocation23_spill] sm:$0xff] }
 0x7ff   :  { %2937 = vmatprep.subr.mxu0 %v7188_v4  ;;  %3008 = vmatprep.subr.mxu1 %v7191_v63  ;;  %v9477_v4 = vld [vmem:[#allocation24_spill] sm:$0xff]  ;;  %v9478_v63 = vld [vmem:[#allocation25_spill] sm:$0xff] }
 0x800   :  { %2938 = vmatpush1.msra.mxu0 %v7194_v18  ;;  %3009 = vmatpush1.msra.mxu1 %v7197_v31  ;;  %v9479_v18 = vld [vmem:[#allocation26_spill] sm:$0xff]  ;;  %v9480_v31 = vld [vmem:[#allocation27_spill] sm:$0xff] }
 0x801   :  { %2939 = vmatprep.subr.mxu0 %v7200_v53  ;;  %3010 = vmatprep.subr.mxu1 %v7203_v54  ;;  %v9481_v53 = vld [vmem:[#allocation28_spill] sm:$0xff]  ;;  %v9482_v54 = vld [vmem:[#allocation29_spill] sm:$0xff] }
 0x802   :  { %2940 = vmatpush1.msra.mxu0 %v7206_v12  ;;  %3011 = vmatpush1.msra.mxu1 %v7209_v13  ;;  %v9483_v12 = vld [vmem:[#allocation30_spill] sm:$0xff]  ;;  %v9484_v13 = vld [vmem:[#allocation31_spill] sm:$0xff] }
 0x803   :  { %2941 = vmatprep.subr.mxu0 %v7212_v37  ;;  %3012 = vmatprep.subr.mxu1 %v7215_v40  ;;  %v9485_v37 = vld [vmem:[#allocation32_spill] sm:$0xff]  ;;  %v9486_v40 = vld [vmem:[#allocation33_spill] sm:$0xff] }
 0x804   :  { %2942 = vmatpush1.msra.mxu0 %v7218_v10  ;;  %3013 = vmatpush1.msra.mxu1 %v7221_v42  ;;  %v9487_v10 = vld [vmem:[#allocation34_spill] sm:$0xff]  ;;  %v9488_v42 = vld [vmem:[#allocation35_spill] sm:$0xff] }
 0x805   :  { %2943 = vmatprep.subr.mxu0 %v7224_v23  ;;  %3014 = vmatprep.subr.mxu1 %v7227_v34  ;;  %v9489_v23 = vld [vmem:[#allocation36_spill] sm:$0xff]  ;;  %v9490_v34 = vld [vmem:[#allocation37_spill] sm:$0xff] }
 0x806   :  { %2944 = vmatpush1.msra.mxu0 %v9449_v19  ;;  %2977 = vmatprep.mubr.f32.mxu0 %v9450_v30  ;;  %v9511_v19 = vld [vmem:[#allocation58_spill] sm:$0xff] }
 0x807   :  { %3015 = vmatpush1.msra.mxu1 %v9451_v5  ;;  %3048 = vmatprep.mubr.f32.mxu1 %v9450_v30  ;;  %v9512_v5 = vld [vmem:[#allocation59_spill] sm:$0xff] }
 0x808   :  { %2978 = vmatmul.mubr.f32.vlgmr.msra.gmra.mxu0 %v7642_v33  ;;  %3049 = vmatmul.mubr.f32.vlgmr.msra.gmra.mxu1 %v7642_v33  ;;  %v9492_v33 = vld [vmem:[#allocation39_spill] sm:$0xff] }
 0x809   :  { %3083 = vmatprep.subr.mxu0 %v9452_v7  ;;  %3154 = vmatprep.subr.mxu1 %v9453_v0  ;;  %v9513_v7 = vld [vmem:[#allocation60_spill] sm:$0xff]  ;;  %v9514_v0 = vld [vmem:[#allocation61_spill] sm:$0xff] }
 0x80a   :  { %3084 = vmatpush1.msra.mxu0 %v9454_v8  ;;  %3155 = vmatpush1.msra.mxu1 %v9455_v46  ;;  %v9515_v8 = vld [vmem:[#allocation62_spill] sm:$0xff]  ;;  %v9516_v46 = vld [vmem:[#allocation63_spill] sm:$0xff] }
 0x80b   :  { %3085 = vmatprep.subr.mxu0 %v9456_v25  ;;  %3156 = vmatprep.subr.mxu1 %v9457_v11  ;;  %v9517_v25 = vld [vmem:[#allocation64_spill] sm:$0xff]  ;;  %v9518_v11 = vld [vmem:[#allocation65_spill] sm:$0xff] }
 0x80c   :  { %3086 = vmatpush1.msra.mxu0 %v9458_v27  ;;  %3157 = vmatpush1.msra.mxu1 %v9459_v28  ;;  %v9519_v27 = vld [vmem:[#allocation66_spill] sm:$0xff]  ;;  %v9520_v28 = vld [vmem:[#allocation67_spill] sm:$0xff] }
 0x80d   :  { %3087 = vmatprep.subr.mxu0 %v9460_v9  ;;  %3158 = vmatprep.subr.mxu1 %v9461_v29  ;;  %v9521_v9 = vld [vmem:[#allocation68_spill] sm:$0xff]  ;;  %v9522_v29 = vld [vmem:[#allocation69_spill] sm:$0xff] }
 0x80e   :  { %3088 = vmatpush1.msra.mxu0 %v9462_v6  ;;  %3159 = vmatpush1.msra.mxu1 %v9463_v22  ;;  %v9523_v6 = vld [vmem:[#allocation70_spill] sm:$0xff]  ;;  %v9524_v22 = vld [vmem:[#allocation71_spill] sm:$0xff] }
 0x80f   :  { %3089 = vmatprep.subr.mxu0 %v9464_v36  ;;  %3160 = vmatprep.subr.mxu1 %v9465_v17  ;;  %v9525_v36 = vld [vmem:[#allocation72_spill] sm:$0xff]  ;;  %v9526_v17 = vld [vmem:[#allocation73_spill] sm:$0xff] }
 0x810   :  { %3090 = vmatpush1.msra.mxu0 %v9466_v26  ;;  %3161 = vmatpush1.msra.mxu1 %v9467_v21  ;;  %v9527_v26 = vld [vmem:[#allocation74_spill] sm:$0xff]  ;;  %v9528_v21 = vld [vmem:[#allocation75_spill] sm:$0xff] }
 0x811   :  { %3091 = vmatprep.subr.mxu0 %v9468_v38  ;;  %3162 = vmatprep.subr.mxu1 %v9469_v39  ;;  %v9529_v38 = vld [vmem:[#allocation76_spill] sm:$0xff]  ;;  %v9530_v39 = vld [vmem:[#allocation77_spill] sm:$0xff] }
 0x812   :  { %3092 = vmatpush1.msra.mxu0 %v9470_v41  ;;  %3163 = vmatpush1.msra.mxu1 %v9471_v43  ;;  %v9531_v41 = vld [vmem:[#allocation78_spill] sm:$0xff]  ;;  %v9532_v43 = vld [vmem:[#allocation79_spill] sm:$0xff] }
 0x813   :  { %3093 = vmatprep.subr.mxu0 %v9472_v44  ;;  %3164 = vmatprep.subr.mxu1 %v9473_v47  ;;  %v9533_v44 = vld [vmem:[#allocation80_spill] sm:$0xff]  ;;  %v9534_v47 = vld [vmem:[#allocation81_spill] sm:$0xff] }
 0x814   :  { %3094 = vmatpush1.msra.mxu0 %v9474_v48  ;;  %3165 = vmatpush1.msra.mxu1 %v9475_v49  ;;  %v9535_v48 = vld [vmem:[#allocation82_spill] sm:$0xff]  ;;  %v9536_v49 = vld [vmem:[#allocation83_spill] sm:$0xff] }
 0x815   :  { %3095 = vmatprep.subr.mxu0 %v9476_v3  ;;  %3166 = vmatprep.subr.mxu1 %v9477_v4  ;;  %v9537_v3 = vld [vmem:[#allocation84_spill] sm:$0xff]  ;;  %v9538_v4 = vld [vmem:[#allocation85_spill] sm:$0xff] }
 0x816   :  { %3096 = vmatpush1.msra.mxu0 %v9478_v63  ;;  %3167 = vmatpush1.msra.mxu1 %v9479_v18  ;;  %v9539_v63 = vld [vmem:[#allocation86_spill] sm:$0xff]  ;;  %v9540_v18 = vld [vmem:[#allocation87_spill] sm:$0xff] }
 0x817   :  { %3097 = vmatprep.subr.mxu0 %v9480_v31  ;;  %3168 = vmatprep.subr.mxu1 %v9481_v53  ;;  %v9541_v31 = vld [vmem:[#allocation88_spill] sm:$0xff]  ;;  %v9542_v53 = vld [vmem:[#allocation89_spill] sm:$0xff] }
 0x818   :  { %3098 = vmatpush1.msra.mxu0 %v9482_v54  ;;  %3169 = vmatpush1.msra.mxu1 %v9483_v12  ;;  %v9543_v54 = vld [vmem:[#allocation90_spill] sm:$0xff]  ;;  %v9544_v12 = vld [vmem:[#allocation91_spill] sm:$0xff] }
 0x819   :  { %3099 = vmatprep.subr.mxu0 %v9484_v13  ;;  %3170 = vmatprep.subr.mxu1 %v9485_v37  ;;  %v9545_v13 = vld [vmem:[#allocation92_spill] sm:$0xff]  ;;  %v9546_v37 = vld [vmem:[#allocation93_spill] sm:$0xff] }
 0x81a   :  { %3100 = vmatpush1.msra.mxu0 %v9486_v40  ;;  %3171 = vmatpush1.msra.mxu1 %v9487_v10  ;;  %v9547_v40 = vld [vmem:[#allocation94_spill] sm:$0xff]  ;;  %v9548_v10 = vld [vmem:[#allocation95_spill] sm:$0xff] }
 0x81b   :  { %3101 = vmatprep.subr.mxu0 %v9488_v42  ;;  %3172 = vmatprep.subr.mxu1 %v9489_v23  ;;  %v9549_v42 = vld [vmem:[#allocation96_spill] sm:$0xff]  ;;  %v9550_v23 = vld [vmem:[#allocation97_spill] sm:$0xff] }
 0x81c   :  { %3102 = vmatpush1.msra.mxu0 %v9490_v34  ;;  %3173 = vmatpush1.msra.mxu1 %v9491_v32  ;;  %v9551_v34 = vld [vmem:[#allocation98_spill] sm:$0xff]  ;;  %v9552_v32 = vld [vmem:[#allocation99_spill] sm:$0xff] }
 0x81d   :  { %3103 = vmatprep.subr.mxu0 %v9492_v33  ;;  %3174 = vmatprep.subr.mxu1 %v9493_v52  ;;  %v9553_v33 = vld [vmem:[#allocation100_spill] sm:$0xff]  ;;  %v9554_v52 = vld [vmem:[#allocation101_spill] sm:$0xff] }
 0x81e   :  { %3104 = vmatpush1.msra.mxu0 %v9494_v14  ;;  %3175 = vmatpush1.msra.mxu1 %v9495_v2  ;;  %v9555_v14 = vld [vmem:[#allocation102_spill] sm:$0xff]  ;;  %v9556_v2 = vld [vmem:[#allocation103_spill] sm:$0xff] }
 0x81f   :  { %3105 = vmatprep.subr.mxu0 %v9496_v20  ;;  %3176 = vmatprep.subr.mxu1 %v9497_v24  ;;  %v9557_v20 = vld [vmem:[#allocation104_spill] sm:$0xff]  ;;  %v9558_v24 = vld [vmem:[#allocation105_spill] sm:$0xff] }
 0x820   :  { %3106 = vmatpush1.msra.mxu0 %v9498_v45  ;;  %3177 = vmatpush1.msra.mxu1 %v9499_v51  ;;  %v9559_v45 = vld [vmem:[#allocation106_spill] sm:$0xff]  ;;  %v9560_v51 = vld [vmem:[#allocation107_spill] sm:$0xff] }
 0x821   :  { %3107 = vmatprep.subr.mxu0 %v9500_v58  ;;  %3178 = vmatprep.subr.mxu1 %v9501_v61  ;;  %v9561_v58 = vld [vmem:[#allocation108_spill] sm:$0xff]  ;;  %v9562_v61 = vld [vmem:[#allocation109_spill] sm:$0xff] }
 0x822   :  { %3108 = vmatpush1.msra.mxu0 %v9502_v50  ;;  %3179 = vmatpush1.msra.mxu1 %v9503_v35  ;;  %v9563_v50 = vld [vmem:[#allocation110_spill] sm:$0xff]  ;;  %v9564_v35 = vld [vmem:[#allocation111_spill] sm:$0xff] }
 0x823   :  { %3109 = vmatprep.subr.mxu0 %v9504_v62  ;;  %3180 = vmatprep.subr.mxu1 %v9505_v15  ;;  %v9565_v62 = vld [vmem:[#allocation112_spill] sm:$0xff]  ;;  %v9566_v15 = vld [vmem:[#allocation113_spill] sm:$0xff] }
 0x824   :  { %3110 = vmatpush1.msra.mxu0 %v9506_v55  ;;  %3181 = vmatpush1.msra.mxu1 %v9507_v16  ;;  %v9567_v55 = vld [vmem:[#allocation114_spill] sm:$0xff]  ;;  %v9568_v16 = vld [vmem:[#allocation115_spill] sm:$0xff] }
 0x825   :  { %3111 = vmatprep.subr.mxu0 %v9508_v59  ;;  %3182 = vmatprep.subr.mxu1 %v9509_v60  ;;  %v9569_v59 = vld [vmem:[#allocation116_spill] sm:$0xff]  ;;  %v9570_v60 = vld [vmem:[#allocation117_spill] sm:$0xff] }
 0x826   :  { %3112 = vmatpush1.msra.mxu0 %v9510_v56  ;;  %3183 = vmatpush1.msra.mxu1 %v9511_v19  ;;  %v9571_v56 = vld [vmem:[#allocation118_spill] sm:$0xff]  ;;  %v9572_v19 = vld [vmem:[#allocation119_spill] sm:$0xff] }
 0x827   :  { %3113 = vmatprep.subr.mxu0 %v9512_v5  ;;  %3184 = vmatprep.subr.mxu1 %v9513_v7  ;;  %v9573_v5 = vld [vmem:[#allocation120_spill] sm:$0xff]  ;;  %v9574_v7 = vld [vmem:[#allocation121_spill] sm:$0xff] }
 0x828   :  { %3114 = vmatpush1.msra.mxu0 %v9514_v0  ;;  %3185 = vmatpush1.msra.mxu1 %v9515_v8  ;;  %v9575_v0 = vld [vmem:[#allocation122_spill] sm:$0xff]  ;;  %v9576_v8 = vld [vmem:[#allocation123_spill] sm:$0xff] }
 0x829   :  { %3115 = vmatprep.subr.mxu0 %v9516_v46  ;;  %3186 = vmatprep.subr.mxu1 %v9517_v25  ;;  %v9577_v46 = vld [vmem:[#allocation124_spill] sm:$0xff]  ;;  %v9578_v25 = vld [vmem:[#allocation125_spill] sm:$0xff] }
 0x82a   :  { %3116 = vmatpush2.msra.mxu0 %v9518_v11  ;;  %3187 = vmatpush2.msra.mxu1 %v9519_v27  ;;  %v9579_v11 = vld [vmem:[#allocation126_spill] sm:$0xff] }
 0x82b   :  { %3117 = vmatprep.subr.mxu0 %v9520_v28  ;;  %3188 = vmatprep.subr.mxu1 %v9521_v9  ;;  %v9580_v28 = vld [vmem:[#allocation11_spill] sm:$0xff] }
 0x82c   :  { %3118 = vmatpush2.msra.mxu0 %v9522_v29  ;;  %3189 = vmatpush2.msra.mxu1 %v9523_v6 }
 0x82d   :  { %3119 = vmatprep.subr.mxu0 %v9524_v22  ;;  %3190 = vmatprep.subr.mxu1 %v9525_v36  ;;  %v9581_v22 = vld [vmem:[#allocation12_spill] sm:$0xff] }
 0x82e   :  { %3120 = vmatpush2.msra.mxu0 %v9526_v17  ;;  %3191 = vmatpush2.msra.mxu1 %v9527_v26 }
 0x82f   :  { %3121 = vmatprep.subr.mxu0 %v9528_v21  ;;  %3192 = vmatprep.subr.mxu1 %v9529_v38  ;;  %v9582_v21 = vld [vmem:[#allocation13_spill] sm:$0xff] }
 0x830   :  { %3122 = vmatpush2.msra.mxu0 %v9530_v39  ;;  %3193 = vmatpush2.msra.mxu1 %v9531_v41 }
 0x831   :  { %3123 = vmatprep.subr.mxu0 %v9532_v43  ;;  %3194 = vmatprep.subr.mxu1 %v9533_v44  ;;  %v9583_v44 = vld [vmem:[#allocation14_spill] sm:$0xff] }
 0x832   :  { %3124 = vmatpush2.msra.mxu0 %v9534_v47  ;;  %3195 = vmatpush2.msra.mxu1 %v9535_v48 }
 0x833   :  { %3125 = vmatprep.subr.mxu0 %v9536_v49  ;;  %3196 = vmatprep.subr.mxu1 %v9537_v3 }
 0x834   :  { %3126 = vmatpush2.msra.mxu0 %v9538_v4  ;;  %3197 = vmatpush2.msra.mxu1 %v9539_v63 }
 0x835   :  { %3127 = vmatprep.subr.mxu0 %v9540_v18  ;;  %3198 = vmatprep.subr.mxu1 %v9541_v31  ;;  %v9584_v31 = vld [vmem:[#allocation166_spill] sm:$0xff] }
 0x836   :  { %3128 = vmatpush2.msra.mxu0 %v9542_v53  ;;  %3199 = vmatpush2.msra.mxu1 %v9543_v54 }
 0x837   :  { %3129 = vmatprep.subr.mxu0 %v9544_v12  ;;  %3200 = vmatprep.subr.mxu1 %v9545_v13 }
 0x838   :  { %3130 = vmatpush2.msra.mxu0 %v9546_v37  ;;  %3201 = vmatpush2.msra.mxu1 %v9547_v40  ;;  %v9585_v40 = vld [vmem:[#allocation168_spill] sm:$0xff] }
 0x839   :  { %3131 = vmatprep.subr.mxu0 %v9548_v10  ;;  %3202 = vmatprep.subr.mxu1 %v9549_v42 }
 0x83a   :  { %3132 = vmatpush2.msra.mxu0 %v9550_v23  ;;  %3203 = vmatpush2.msra.mxu1 %v9551_v34 }
 0x83b   :  { %3133 = vmatprep.subr.mxu0 %v9552_v32  ;;  %3204 = vmatprep.subr.mxu1 %v9553_v33 }
 0x83c   :  { %3134 = vmatpush2.msra.mxu0 %v9554_v52  ;;  %3205 = vmatpush2.msra.mxu1 %v9555_v14  ;;  %v9586_v14 = vld [vmem:[#allocation167_spill] sm:$0xff] }
 0x83d   :  { %3135 = vmatprep.subr.mxu0 %v9556_v2  ;;  %3206 = vmatprep.subr.mxu1 %v9557_v20 }
 0x83e   :  { %3136 = vmatpush2.msra.mxu0 %v9558_v24  ;;  %3207 = vmatpush2.msra.mxu1 %v9559_v45  ;;  %v9587_v45 = vld [vmem:[#allocation169_spill] sm:$0xff] }
 0x83f   :  { %3137 = vmatprep.subr.mxu0 %v9560_v51  ;;  %3208 = vmatprep.subr.mxu1 %v9561_v58 }
 0x840   :  { %3138 = vmatpush2.msra.mxu0 %v9562_v61  ;;  %3209 = vmatpush2.msra.mxu1 %v9563_v50 }
 0x841   :  { %3139 = vmatprep.subr.mxu0 %v9564_v35  ;;  %3210 = vmatprep.subr.mxu1 %v9565_v62 }
 0x842   :  { %3140 = vmatpush2.msra.mxu0 %v9566_v15  ;;  %3211 = vmatpush2.msra.mxu1 %v9567_v55 }
 0x843   :  { %3141 = vmatprep.subr.mxu0 %v9568_v16  ;;  %3212 = vmatprep.subr.mxu1 %v9569_v59 }
 0x844   :  { %3142 = vmatpush2.msra.mxu0 %v9570_v60  ;;  %3213 = vmatpush2.msra.mxu1 %v9571_v56 }
 0x845   :  { %3143 = vmatprep.subr.mxu0 %v9572_v19  ;;  %3214 = vmatprep.subr.mxu1 %v9573_v5 }
 0x846   :  { %3144 = vmatpush2.msra.mxu0 %v9574_v7  ;;  %3215 = vmatpush2.msra.mxu1 %v9575_v0 }
 0x847   :  { %3145 = vmatprep.subr.mxu0 %v9576_v8  ;;  %3216 = vmatprep.subr.mxu1 %v9577_v46 }
 0x848   :  { %3146 = vmatpush2.msra.mxu0 %v9578_v25  ;;  %3217 = vmatpush2.msra.mxu1 %v9579_v11  ;;  %v3264_v25 = vld [vmem:[%s7917_s6 + $0x78] sm:$0xff]  ;;  %v3263_v11 = vld [vmem:[%s7917_s6 + $0x70] sm:$0xff] }
 0x849   :  { %3442 = vmatprep.subr.mxu0 %v9450_v30 }
 0x8a7   :  { %v2813_v27 = vpop.f32.mrf.mxu0  ;;  %v2884_v26 = vpop.f32.mrf.mxu1 }
 0x8a8   :  { %v2814_v9 = vadd.f32 %v2813_v27, %v9580_v28  ;;  %v2885_v38 = vadd.f32 %v2884_v26, %v9582_v21  ;;  %v3261_v27 = vld [vmem:[%s7917_s6 + $0x60] sm:$0xff]  ;;  %v3255_v26 = vld [vmem:[%s7917_s6 + $0x30] sm:$0xff] }
 0x8a9   :  { %v2815_v29 = vpop.f32.mrf.mxu0  ;;  %v2886_v39 = vpop.f32.mrf.mxu1 }
 0x8aa   :  { %v3415_v6 = vmul.f32 -1.442695, %v2814_v9  ;;  %v2816_v36 = vadd.f32 %v2815_v29, %v9581_v22  ;;  %v3417_v41 = vmul.f32 -1.442695, %v2885_v38  ;;  %v2887_v47 = vadd.f32 %v2886_v39, %v9583_v44  ;;  %v3260_v9 = vld [vmem:[%s7917_s6 + $0x58] sm:$0xff]  ;;  %v3259_v29 = vld [vmem:[%s7917_s6 + $0x50] sm:$0xff] }
 0x8ab   :  { %v3254_v38 = vld [vmem:[%s7917_s6 + $0x28] sm:$0xff]  ;;  %v3253_v39 = vld [vmem:[%s7917_s6 + $0x20] sm:$0xff] }
 0x8ac   :  { %3692 = vpow2.f32 %v3415_v6  ;;  %v3416_v17 = vmul.f32 -1.442695, %v2816_v36  ;;  %v3258_v6 = vld [vmem:[%s7917_s6 + $0x48] sm:$0xff]  ;;  %v3257_v36 = vld [vmem:[%s7917_s6 + $0x40] sm:$0xff] }
 0x8ae   :  { %3694 = vpow2.f32 %v3416_v17  ;;  %v3256_v17 = vld [vmem:[%s7917_s6 + $0x38] sm:$0xff] }
 0x8af   :  { %3696 = vpow2.f32 %v3417_v41  ;;  %v3252_v41 = vld [vmem:[%s7917_s6 + $0x18] sm:$0xff] }
 0x8b9   :  { %v3693_v43 = vpop.eup %3692 }
 0x8ba   :  { %v2898_v48 = vadd.f32 1.0, %v3693_v43  ;;  %v3251_v43 = vld [vmem:[%s7917_s6 + $0x10] sm:$0xff] }
 0x8bb   :  { %v3695_v49 = vpop.eup %3694 }
 0x8bc   :  { %3698 = vrcp.f32 %v2898_v48  ;;  %v2899_v3 = vadd.f32 1.0, %v3695_v49  ;;  %v3697_v4 = vpop.eup %3696  ;;  %v3249_v48 = vld [vmem:[%s7917_s6] sm:$0xff] }
 0x8bd   :  { %3700 = vtanh.f32 %v2887_v47  ;;  %v2900_v42 = vadd.f32 1.0, %v3697_v4  ;;  %v3250_v47 = vld [vmem:[%s7917_s6 + $0x8] sm:$0xff] }
 0x8be   :  { %3702 = vrcp.f32 %v2899_v3 }
 0x8c8   :  { %v2979_v63 = vpop.f32.mrf.mxu0  ;;  %v3050_v52 = vpop.f32.mrf.mxu1 }
 0x8c9   :  { %v3699_v18 = vpop.eup %3698  ;;  %v3055_v53 = vadd.f32 %v2979_v63, %v9584_v31  ;;  %v3057_v2 = vadd.f32 %v3050_v52, %v9586_v14 }
 0x8ca   :  { %v3701_v54 = vpop.eup %3700  ;;  %v2981_v12 = vpop.f32.mrf.mxu0 }
 0x8cb   :  { %v3703_v13 = vpop.eup %3702  ;;  %v3418_v37 = vmul.f32 -1.442695, %v3055_v53  ;;  %v3056_v10 = vadd.f32 %v2981_v12, %v9585_v40  ;;  %v2909_v34 = vmul.f32 %v3701_v54, %v3699_v18  ;;  %v3052_v20 = vpop.f32.mrf.mxu1  ;;  %v3420_v24 = vmul.f32 -1.442695, %v3057_v2 }
 0x8cc   :  { %v2908_v23 = vmul.f32 %v3703_v13, %v7633_v57  ;;  %v3058_v51 = vadd.f32 %v3052_v20, %v9587_v45 }
 0x8cd   :  { %3704 = vpow2.f32 %v3418_v37  ;;  %v3419_v32 = vmul.f32 -1.442695, %v3056_v10 }
 0x8ce   :  { %v7830_v33 = vadd.f32 %v2909_v34, %v2908_v23 }
 0x8cf   :  { %3706 = vpow2.f32 %v3419_v32 }
 0x8d0   :  { %3708 = vrcp.f32 %v2900_v42 }
 0x8d1   :  { %3710 = vtanh.f32 %v7830_v33 }
 0x8d2   :  { %3712 = vpow2.f32 %v3420_v24  ;;  %v3424_v24 = vld [vmem:[%s7918_s7] ss:$0 sm:$0xff] }
 0x8d3   :  { %3714 = vtanh.f32 %v3058_v51 }
 0x8da   :  { %v3705_v58 = vpop.eup %3704 }
 0x8db   :  { %v3068_v61 = vadd.f32 1.0, %v3705_v58 }
 0x8dc   :  { %v3707_v57 = vpop.eup %3706 }
 0x8dd   :  { %v3709_v50 = vpop.eup %3708  ;;  %3716 = vrcp.f32 %v3068_v61  ;;  %v3069_v35 = vadd.f32 1.0, %v3707_v57 }
 0x8de   :  { %v3711_v62 = vpop.eup %3710 }
 0x8df   :  { %3718 = vrcp.f32 %v3069_v35  ;;  %v2912_v15 = vmul.f32 %v3711_v62, %v3709_v50  ;;  %v3713_v55 = vpop.eup %3712 }
 0x8e0   :  { %v3715_v16 = vpop.eup %3714  ;;  %v3070_v19 = vadd.f32 1.0, %v3713_v55 }
 0x8e1   :  { %3147 = vmatprep.mubr.f32.mxu0 %v2912_v15  ;;  %3218 = vmatprep.mubr.f32.mxu1 %v2912_v15 }
 0x8e2   :  { %3720 = vrcp.f32 %v3070_v19 }
 0x8ea   :  { %v3717_v59 = vpop.eup %3716 }
 0x8eb   :  { %v3079_v60 = vmul.f32 %v3717_v59, %v3715_v16 }
 0x8ec   :  { %v3719_v56 = vpop.eup %3718 }
 0x8ed   :  { %v3078_v5 = vmul.f32 %v3719_v56, %v7639_v1  ;;  %v3262_v1 = vld [vmem:[%s7917_s6 + $0x68] sm:$0xff] }
 0x8ef   :  { %v3080_v7 = vadd.f32 %v3079_v60, %v3078_v5  ;;  %v3721_v0 = vpop.eup %3720 }
 0x8f1   :  { %3722 = vtanh.f32 %v3080_v7 }
 0x8fe   :  { %v3723_v8 = vpop.eup %3722 }
 0x8ff   :  { %v3082_v46 = vmul.f32 %v3723_v8, %v3721_v0 }
 0x901   :  { %3148 = vmatmul.mubr.f32.vlgmr.msra.gmra.mxu0 %v3082_v46  ;;  %3219 = vmatmul.mubr.f32.vlgmr.msra.gmra.mxu1 %v3082_v46 }
 0x902   :  { %3443 = vmatpush3.msra.mxu0 %v3264_v25  ;;  %3474 = vmatprep.mubr.msk.f32.mxu0 %vm4405_vm1, %v9450_v30 }
 0x903   :  { %3444 = vmatprep.subr.mxu0 %v9450_v30 }
 0x904   :  { %3445 = vmatpush3.msra.mxu0 %v3263_v11 }
 0x905   :  { %3446 = vmatprep.subr.mxu0 %v9450_v30 }
 0x906   :  { %3447 = vmatpush3.msra.mxu0 %v3262_v1 }
 0x907   :  { %3448 = vmatprep.subr.mxu0 %v9450_v30 }
 0x908   :  { %3449 = vmatpush3.msra.mxu0 %v3261_v27 }
 0x909   :  { %3450 = vmatprep.subr.mxu0 %v9450_v30 }
 0x90a   :  { %3451 = vmatpush3.msra.mxu0 %v3260_v9 }
 0x90b   :  { %3452 = vmatprep.subr.mxu0 %v9450_v30 }
 0x90c   :  { %3453 = vmatpush3.msra.mxu0 %v3259_v29 }
 0x90d   :  { %3454 = vmatprep.subr.mxu0 %v9450_v30 }
 0x90e   :  { %3455 = vmatpush3.msra.mxu0 %v3258_v6 }
 0x90f   :  { %3456 = vmatprep.subr.mxu0 %v9450_v30 }
 0x910   :  { %3457 = vmatpush3.msra.mxu0 %v3257_v36 }
 0x911   :  { %3458 = vmatprep.subr.mxu0 %v9450_v30 }
 0x912   :  { %3459 = vmatpush3.msra.mxu0 %v3256_v17 }
 0x913   :  { %3460 = vmatprep.subr.mxu0 %v9450_v30 }
 0x914   :  { %3461 = vmatpush3.msra.mxu0 %v3255_v26 }
 0x915   :  { %3462 = vmatprep.subr.mxu0 %v9450_v30 }
 0x916   :  { %3463 = vmatpush3.msra.mxu0 %v3254_v38 }
 0x917   :  { %3464 = vmatprep.subr.mxu0 %v9450_v30 }
 0x918   :  { %3465 = vmatpush3.msra.mxu0 %v3253_v39 }
 0x919   :  { %3466 = vmatprep.subr.mxu0 %v9450_v30 }
 0x91a   :  { %3467 = vmatpush3.msra.mxu0 %v3252_v41 }
 0x91b   :  { %3468 = vmatprep.subr.mxu0 %v9450_v30 }
 0x91c   :  { %3469 = vmatpush3.msra.mxu0 %v3251_v43 }
 0x91d   :  { %3470 = vmatprep.subr.mxu0 %v9450_v30 }
 0x91e   :  { %3471 = vmatpush3.msra.mxu0 %v3250_v47 }
 0x91f   :  { %3472 = vmatprep.subr.mxu0 %v9450_v30 }
 0x920   :  { %3473 = vmatpush3.msra.mxu0 %v3249_v48 }
 0x9c1   :  { %v3149_v49 = vpop.f32.mrf.mxu0  ;;  %v3220_v53 = vpop.f32.mrf.mxu1 }
 0x9c2   :  { %v3150_v3 = vadd.f32 %v3149_v49, %v9580_v28  ;;  %v3221_v54 = vadd.f32 %v3220_v53, %v9582_v21 }
 0x9c3   :  { %v3151_v4 = vpop.f32.mrf.mxu0  ;;  %v3222_v12 = vpop.f32.mrf.mxu1 }
 0x9c4   :  { %v3421_v63 = vmul.f32 -1.442695, %v3150_v3  ;;  %v3152_v18 = vadd.f32 %v3151_v4, %v9581_v22  ;;  %v3423_v13 = vmul.f32 -1.442695, %v3221_v54  ;;  %v3223_v40 = vadd.f32 %v3222_v12, %v9583_v44 }
 0x9c6   :  { %3724 = vpow2.f32 %v3421_v63  ;;  %v3422_v31 = vmul.f32 -1.442695, %v3152_v18 }
 0x9c8   :  { %3726 = vpow2.f32 %v3422_v31 }
 0x9c9   :  { %3728 = vpow2.f32 %v3423_v13 }
 0x9d3   :  { %v3725_v37 = vpop.eup %3724 }
 0x9d4   :  { %v3234_v30 = vadd.f32 1.0, %v3725_v37 }
 0x9d5   :  { %v3727_v10 = vpop.eup %3726 }
 0x9d6   :  { %3730 = vrcp.f32 %v3234_v30  ;;  %v3235_v28 = vadd.f32 1.0, %v3727_v10  ;;  %v3729_v42 = vpop.eup %3728 }
 0x9d7   :  { %3732 = vtanh.f32 %v3223_v40  ;;  %v3236_v32 = vadd.f32 1.0, %v3729_v42 }
 0x9d8   :  { %3734 = vrcp.f32 %v3235_v28 }
 0x9d9   :  { %3736 = vrcp.f32 %v3236_v32 }
 0x9e3   :  { %v3731_v22 = vpop.eup %3730 }
 0x9e4   :  { %v3733_v23 = vpop.eup %3732 }
 0x9e5   :  { %v3735_v34 = vpop.eup %3734  ;;  %v3245_v21 = vmul.f32 %v3733_v23, %v3731_v22 }
 0x9e6   :  { %v3244_v52 = vmul.f32 %v3735_v34, %v7830_v33  ;;  %v3737_v2 = vpop.eup %3736 }
 0x9e8   :  { %v3246_v14 = vadd.f32 %v3245_v21, %v3244_v52 }
 0x9ea   :  { %3738 = vtanh.f32 %v3246_v14 }
 0x9f7   :  { %v3739_v44 = vpop.eup %3738 }
 0x9f8   :  { %v3248_v20 = vmul.f32 %v3739_v44, %v3737_v2 }
 0x9fa   :  { %3475 = vmatmul.mubr.f32.vlgmr.msra.gmra.mxu0 %v3248_v20 }
 0xaba   :  { %v3338_v45 = vpop.f32.mrf.mxu0 }
 0xabb   :  { %v3339_v51 = vadd.f32 %v3424_v24, %v3338_v45 }
 0xabc   :  { %v3476_v58 = vpop.f32.mrf.mxu0 }
 0xabd   :  { %3343 = vst.msk [vmem:[#allocation7] sm:$0xff] %vm3342_vm2, %v3339_v51 }
 0xabe   :  { %4385 = shalt.err (!%p4382_p0)
}
 0xabf   :  { %3353 = dma.vmem_to_hbm [thread:$0]  %s3351_s29, 128, %s7919_s8, [#allocation4]  }
 0xac0   :  { %4398 = dma.done.wait [#allocation4], 128  }
 0xac1   :  { %4399 = vsyncadd [#allocation4], 4294967168 }
 0xac2   :  { %3357 = vsyncpa [#allocation3], 1 }
 0xac3   :  { %3358 = vsyncpa [#allocation6], 1 }
 0xac4   :  { %3359 = vsyncpa [#allocation4], 1 }

</bundles_post_ra>
